<compile_context>
chip_gen: v7x
topology: tpu7x:2x2x1
jax: 0.10.0
libtpu: 0.0.40
codegen_flags: <defaults>
</compile_context>

<pallas_src>
import functools

import jax
import jax.numpy as jnp
from jax import lax
from jax.experimental import pallas as pl
from jax.experimental.pallas import tpu as pltpu

BALANCE = 0.5          # balance_value of Seg3dLossless
EPS = 1e-4             # tolerance for the 0 < valid < 1 boundary test
TD = 8                 # D-rows per query tile (lane-dense (TD, hw_pad) blocks)
NFEAT = 4              # number of tanh features of the synthetic query_func
LANE = 128             # lane width; query slabs are padded to a multiple of this


def _round_up(x, m):
    return ((x + m - 1) // m) * m


# ----------------------------------------------------------------------------
# Pallas kernels
# ----------------------------------------------------------------------------
def refine_kernel(occ_ref, a_w_ref, a_h_ref, band_w_ref, band_h_ref, prev_ref,
                  occ_up_ref, is_b_ref):
    """Upsample (trilinear, align_corners=True) + boundary + 3x3x3 smooth > 0."""
    di, hi, wi = occ_ref.shape
    do, ho, wo = prev_ref.shape

    x = occ_ref[...]
    b = (x > BALANCE).astype(jnp.float32)
    # batch occupancy + binary chain through one pair of batched matmuls
    xb = jnp.concatenate([x, b], axis=0)                              # (2di, hi, wi)

    a_w = jnp.broadcast_to(a_w_ref[...][None], (2 * di, wo, wi))
    a_h = jnp.broadcast_to(a_h_ref[...][None], (2 * di, ho, hi))
    # separable interpolation: W then H (small MXU batched matmuls, no kron)
    t = jnp.einsum('bqd,bkd->bqk', xb, a_w,
                   preferred_element_type=jnp.float32)                # (2di, hi, wo)
    t = jnp.einsum('bqk,bkd->bqd', a_h, t,
                   preferred_element_type=jnp.float32)                # (2di, ho, wo)

    def up_d(v):
        # exact 2x+1 align_corners=True doubling along the leading (D) axis:
        #   out[2i] = v[i], out[2i+1] = 0.5*(v[i] + v[i+1]),
        # realised with a constant op count (pairwise means + plane interleave).
        mids = 0.5 * (v[:-1] + v[1:])                                 # (di-1, ho, wo)
        mids = jnp.concatenate([mids, v[-1:]], axis=0)                # pad -> (di, ...)
        inter = jnp.stack([v, mids], axis=1).reshape(2 * di, ho, wo)  # leading reshape
        return inter[:do]                                             # (do, ho, wo)

    occ_up = up_d(t[:di])
    valid = up_d(t[di:])

    # is_boundary = (0 < valid < 1), with a small epsilon for fp safety
    ind = jnp.logical_and(valid > EPS, valid < 1.0 - EPS).astype(jnp.float32)

    # SmoothConv3D(kernel=3) > 0  ==  separable 3x3x3 box-sum > 0
    bw = jnp.broadcast_to(band_w_ref[...][None], (do, wo, wo))
    bh = jnp.broadcast_to(band_h_ref[...][None], (do, ho, ho))
    s = jnp.einsum('bqd,bkd->bqk', ind, bw,
                   preferred_element_type=jnp.float32)                # W band-sum
    s = jnp.einsum('bqk,bkd->bqd', bh, s,
                   preferred_element_type=jnp.float32)                # H band-sum
    zplane = jnp.zeros((1, ho, wo), jnp.float32)
    s = (s
         + jnp.concatenate([zplane, s[:-1]], axis=0)                  # D band-sum
         + jnp.concatenate([s[1:], zplane], axis=0))

    # exclude voxels that were already evaluated at previous levels
    is_b = jnp.logical_and(s > 0.5, prev_ref[...] < 0.5).astype(jnp.float32)

    occ_up_ref[...] = occ_up
    is_b_ref[...] = is_b


def query_merge_kernel(cnt_ref, qp_ref, xy_ref, occ_up_ref, is_b_ref, out_ref):
    """Synthetic query_func at boundary voxels, fused with the scatter/merge.

    Blocks are lane-dense (TD, hw_pad) slabs (hw_pad a multiple of 128 -> unmasked
    stores); z coordinates are generated in-kernel. Tiles without boundary voxels
    skip all query compute (pl.when gate).
    """
    i = pl.program_id(0)
    td, hw = out_ref.shape

    @pl.when(cnt_ref[i] == 0)
    def _():
        out_ref[...] = occ_up_ref[...]

    @pl.when(cnt_ref[i] > 0)
    def _():
        xs = xy_ref[0:1, :]                                           # level-grid x
        ys = xy_ref[1:2, :]                                           # level-grid y
        zs = (lax.broadcasted_iota(jnp.int32, (td, hw), 0)
              + i * td).astype(jnp.float32)                           # level-grid z
        # batch_eval affine (align_corners=False), stride folded into the scale
        px = xs * qp_ref[0, 0] + qp_ref[0, 3]
        py = ys * qp_ref[0, 1] + qp_ref[0, 4]
        pz = zs * qp_ref[0, 2] + qp_ref[0, 5]
        r2 = px * px + py * py + pz * pz
        logit = qp_ref[5, 0] * (qp_ref[5, 1] - r2)
        for k in range(NFEAT):
            f = (qp_ref[1 + k, 0] * px + qp_ref[1 + k, 1] * py
                 + qp_ref[1 + k, 2] * pz + qp_ref[1 + k, 3])
            logit = logit + qp_ref[1 + k, 4] * jnp.tanh(f)
        logit = jnp.maximum(logit, -60.0)     # keep exp finite at far padded coords
        occ = pl.reciprocal(1.0 + jnp.exp(-logit), approx=True)       # sigmoid (EUP)
        out_ref[...] = jnp.where(is_b_ref[...] > 0.5, occ, occ_up_ref[...])


# ----------------------------------------------------------------------------
# Wrappers
# ----------------------------------------------------------------------------
def _interp_matrix(n_out, n_in):
    """Linear interpolation matrix, align_corners=True."""
    o = jnp.arange(n_out, dtype=jnp.float32)[:, None]
    i = jnp.arange(n_in, dtype=jnp.float32)[None, :]
    src = o * (n_in - 1) / max(n_out - 1, 1)
    return jnp.maximum(0.0, 1.0 - jnp.abs(src - i))


def _band_matrix(n):
    idx = jnp.arange(n)
    return (jnp.abs(idx[:, None] - idx[None, :]) <= 1).astype(jnp.float32)


def _refine_level(occ3, prev3):
    di, hi, wi = occ3.shape
    do, ho, wo = prev3.shape
    a_w = _interp_matrix(wo, wi)
    a_h = _interp_matrix(ho, hi)
    band_w = _band_matrix(wo)
    band_h = _band_matrix(ho)
    return pl.pallas_call(
        refine_kernel,
        out_shape=(jax.ShapeDtypeStruct((do, ho, wo), jnp.float32),
                   jax.ShapeDtypeStruct((do, ho, wo), jnp.float32)),
    )(occ3, a_w, a_h, band_w, band_h, prev3)


def _query_merge(qp, occ_up2, is_b2, wo):
    """occ_up2/is_b2: (D_pad, hw_pad) slabs; D_pad % TD == 0, hw_pad % 128 == 0."""
    dp, hwp = occ_up2.shape
    n_tiles = dp // TD
    cnts = (is_b2.reshape(n_tiles, TD * hwp).sum(axis=1) > 0.0).astype(jnp.int32)
    idx = jnp.arange(hwp, dtype=jnp.int32)
    xy = jnp.stack([(idx % wo).astype(jnp.float32),
                    (idx // wo).astype(jnp.float32)], axis=0)         # (2, hwp)
    return pl.pallas_call(
        query_merge_kernel,
        out_shape=jax.ShapeDtypeStruct((dp, hwp), jnp.float32),
        grid=(n_tiles,),
        in_specs=[
            pl.BlockSpec(memory_space=pltpu.MemorySpace.SMEM),        # per-tile counts
            pl.BlockSpec(memory_space=pltpu.MemorySpace.SMEM),        # query params
            pl.BlockSpec((2, hwp), lambda i: (0, 0)),                 # xy index planes
            pl.BlockSpec((TD, hwp), lambda i: (i, 0)),                # interpolated occ
            pl.BlockSpec((TD, hwp), lambda i: (i, 0)),                # boundary mask
        ],
        out_specs=pl.BlockSpec((TD, hwp), lambda i: (i, 0)),
        compiler_params=pltpu.CompilerParams(
            dimension_semantics=("parallel",)),
    )(cnts, qp, xy, occ_up2, is_b2)


def seg3d_lossless_forward(qp_base, b_min, b_max, resolutions):
    """Equivalent of Seg3dLossless._forward (faster=False, use_shadow=False)."""
    final = int(resolutions[-1])
    # exact 2x+1 ladder (the module's intended use); needed by the D-axis upsample
    for a, c in zip(resolutions[:-1], resolutions[1:]):
        assert c == 2 * a - 1 and a % 2 == 1, "resolutions must be an odd 2x+1 ladder"

    rng = b_max - b_min
    evaluated = jnp.zeros((final, final, final), dtype=bool)   # `calculated` buffer
    occ3 = None
    for li, res in enumerate(resolutions):
        res = int(res)
        stride = (final - 1) // (res - 1)
        # batch_eval normalisation (align_corners=False):
        #   p = (idx*stride)/final + 0.5/final, then * (b_max-b_min) + b_min
        scale = rng * (float(stride) / float(final))
        offset = b_min + 0.5 * rng / float(final)
        qp = qp_base.at[0, 0:3].set(scale).at[0, 3:6].set(offset)

        dp = _round_up(res, TD)
        hw = res * res
        hwp = _round_up(hw, LANE)
        if li == 0:
            occ_up2 = jnp.zeros((dp, hwp), jnp.float32)
            is_b2 = jnp.zeros((dp, hwp), jnp.float32).at[:res, :hw].set(1.0)
            out2 = _query_merge(qp, occ_up2, is_b2, res)
            occ3 = out2[:res, :hw].reshape(res, res, res)
            evaluated = evaluated.at[::stride, ::stride, ::stride].set(True)
        else:
            prev_b = evaluated[::stride, ::stride, ::stride]
            occ_up3, is_b3 = _refine_level(occ3, prev_b.astype(jnp.float32))
            occ_up2 = jnp.pad(occ_up3.reshape(res, hw),
                              ((0, dp - res), (0, hwp - hw)))
            is_b2 = jnp.pad(is_b3.reshape(res, hw),
                            ((0, dp - res), (0, hwp - hw)))
            out2 = _query_merge(qp, occ_up2, is_b2, res)
            occ3 = out2[:res, :hw].reshape(res, res, res)
            evaluated = evaluated.at[::stride, ::stride, ::stride].set(
                jnp.logical_or(prev_b, is_b3 > 0.5))
            # TODO(synk): conflict-resolution while-loop of the reference is not
            # reproduced (dynamic nonzero/unique/scatter shapes).
    return occ3.reshape(1, 1, final, final, final)


# ----------------------------------------------------------------------------
if __name__ == "__main__":
    resolutions = (5, 9, 17)          # odd 2x+1 ladder, matches the module asserts
    final = resolutions[-1]
    b_min = jnp.array([-1.0, -1.0, -1.0], jnp.float32)
    b_max = jnp.array([1.0, 1.0, 1.0], jnp.float32)

    # deterministic synthetic query_func parameters packed into one SMEM table:
    #   row 0      : per-level coordinate affine (filled inside forward)
    #   rows 1..4  : tanh features (fx, fy, fz, phase, amplitude)
    #   row 5      : (sphere sharpness A, squared radius R2)
    key = jax.random.PRNGKey(0)
    k1, k2, k3 = jax.random.split(key, 3)
    feat = jnp.concatenate(
        [1.5 * jax.random.normal(k1, (NFEAT, 3)),
         jax.random.uniform(k2, (NFEAT, 1), minval=-1.0, maxval=1.0),
         0.3 * jax.random.normal(k3, (NFEAT, 1))], axis=1)            # (NFEAT, 5)
    qp_base = jnp.zeros((8, 8), jnp.float32)
    qp_base = qp_base.at[1:1 + NFEAT, 0:5].set(feat)
    qp_base = qp_base.at[5, 0].set(8.0).at[5, 1].set(0.45)

    fwd = jax.jit(functools.partial(seg3d_lossless_forward,
                                    resolutions=resolutions))
    occ = jax.block_until_ready(fwd(qp_base, b_min, b_max))

    assert occ.shape == (1, 1, final, final, final)
    assert bool(jnp.all(jnp.isfinite(occ)))
    assert bool(jnp.any(occ > BALANCE)) and bool(jnp.any(occ < BALANCE))
    print("KERNEL_OK")
</pallas_src>

<mosaic_0001>
module attributes {stable_mosaic.version = 11 : i64} {
  func.func @query_merge_kernel(%arg0: i32, %arg1: memref<1xi32, #tpu.memory_space<smem>>, %arg2: memref<8x8xf32, #tpu.memory_space<smem>>, %arg3: memref<2x128xf32, #tpu.memory_space<vmem>>, %arg4: memref<8x128xf32, #tpu.memory_space<vmem>>, %arg5: memref<8x128xf32, #tpu.memory_space<vmem>>, %arg6: memref<8x128xf32, #tpu.memory_space<vmem>>) attributes {dimension_semantics = [#tpu.dimension_semantics<parallel>], iteration_bounds = array<i64: 1>, scalar_prefetch = 0 : i64, scratch_operands = 0 : i64, tpu.core_type = #tpu.core_type<tc>, window_params = [{transform_indices = @transform_0, window_bounds = array<i64: 1>}, {transform_indices = @transform_1, window_bounds = array<i64: 8, 8>}, {pipeline_mode = #tpu.pipeline_mode<synchronous>, transform_indices = @transform_2, window_bounds = array<i64: 2, 128>}, {transform_indices = @transform_3, window_bounds = array<i64: 8, 128>}, {transform_indices = @transform_4, window_bounds = array<i64: 8, 128>}, {transform_indices = @transform_5, window_bounds = array<i64: 8, 128>}]} {
    %0 = arith.index_cast %arg0 : i32 to index
    %1 = memref.load %arg1[%0] : memref<1xi32, #tpu.memory_space<smem>>
    %c0_i32 = arith.constant 0 : i32
    %2 = arith.cmpi eq, %1, %c0_i32 : i32
    %3 = arith.extui %2 : i1 to i32
    %c0_i32_0 = arith.constant 0 : i32
    %4 = arith.cmpi ne, %3, %c0_i32_0 : i32
    scf.if %4 {
      %c0 = arith.constant 0 : index
      %c0_3 = arith.constant 0 : index
      %10 = vector.load %arg4[%c0, %c0_3] : memref<8x128xf32, #tpu.memory_space<vmem>>, vector<8x128xf32>
      %c0_4 = arith.constant 0 : index
      %c0_5 = arith.constant 0 : index
      %11 = vector.load %arg6[%c0_4, %c0_5] : memref<8x128xf32, #tpu.memory_space<vmem>>, vector<8x128xf32>
      tpu.vector_store %arg6[%c0_4, %c0_5], %10 {strides = array<i32>} : memref<8x128xf32, #tpu.memory_space<vmem>>, vector<8x128xf32>,
    } else {
    }
    %5 = arith.index_cast %arg0 : i32 to index
    %6 = memref.load %arg1[%5] : memref<1xi32, #tpu.memory_space<smem>>
    %c0_i32_1 = arith.constant 0 : i32
    %7 = arith.cmpi sgt, %6, %c0_i32_1 : i32
    %8 = arith.extui %7 : i1 to i32
    %c0_i32_2 = arith.constant 0 : i32
    %9 = arith.cmpi ne, %8, %c0_i32_2 : i32
    scf.if %9 {
      %c0 = arith.constant 0 : index
      %c0_3 = arith.constant 0 : index
      %10 = vector.load %arg3[%c0, %c0_3] : memref<2x128xf32, #tpu.memory_space<vmem>>, vector<1x128xf32>
      %c1 = arith.constant 1 : index
      %c0_4 = arith.constant 0 : index
      %11 = vector.load %arg3[%c1, %c0_4] : memref<2x128xf32, #tpu.memory_space<vmem>>, vector<1x128xf32>
      %12 = tpu.iota {dimensions = array<i32: 0>} : vector<8x128xi32>
      %c8_i32 = arith.constant 8 : i32
      %13 = arith.muli %arg0, %c8_i32 : i32
      %14 = vector.broadcast %13 : i32 to vector<8x128xi32>
      %15 = arith.addi %12, %14 : vector<8x128xi32>
      %16 = arith.sitofp %15 : vector<8x128xi32> to vector<8x128xf32>
      %c0_5 = arith.constant 0 : index
      %c0_6 = arith.constant 0 : index
      %17 = memref.load %arg2[%c0_5, %c0_6] : memref<8x8xf32, #tpu.memory_space<smem>>
      %18 = vector.broadcast %17 : f32 to vector<1x128xf32>
      %19 = arith.mulf %10, %18 : vector<1x128xf32>
      %c0_7 = arith.constant 0 : index
      %c3 = arith.constant 3 : index
      %20 = memref.load %arg2[%c0_7, %c3] : memref<8x8xf32, #tpu.memory_space<smem>>
      %21 = vector.broadcast %20 : f32 to vector<1x128xf32>
      %22 = arith.addf %19, %21 : vector<1x128xf32>
      %c0_8 = arith.constant 0 : index
      %c1_9 = arith.constant 1 : index
      %23 = memref.load %arg2[%c0_8, %c1_9] : memref<8x8xf32, #tpu.memory_space<smem>>
      %24 = vector.broadcast %23 : f32 to vector<1x128xf32>
      %25 = arith.mulf %11, %24 : vector<1x128xf32>
      %c0_10 = arith.constant 0 : index
      %c4 = arith.constant 4 : index
      %26 = memref.load %arg2[%c0_10, %c4] : memref<8x8xf32, #tpu.memory_space<smem>>
      %27 = vector.broadcast %26 : f32 to vector<1x128xf32>
      %28 = arith.addf %25, %27 : vector<1x128xf32>
      %c0_11 = arith.constant 0 : index
      %c2 = arith.constant 2 : index
      %29 = memref.load %arg2[%c0_11, %c2] : memref<8x8xf32, #tpu.memory_space<smem>>
      %30 = vector.broadcast %29 : f32 to vector<8x128xf32>
      %31 = arith.mulf %16, %30 : vector<8x128xf32>
      %c0_12 = arith.constant 0 : index
      %c5 = arith.constant 5 : index
      %32 = memref.load %arg2[%c0_12, %c5] : memref<8x8xf32, #tpu.memory_space<smem>>
      %33 = vector.broadcast %32 : f32 to vector<8x128xf32>
      %34 = arith.addf %31, %33 : vector<8x128xf32>
      %35 = arith.mulf %22, %22 : vector<1x128xf32>
      %36 = arith.mulf %28, %28 : vector<1x128xf32>
      %37 = arith.addf %35, %36 : vector<1x128xf32>
      %38 = arith.mulf %34, %34 : vector<8x128xf32>
      %39 = vector.broadcast %37 : vector<1x128xf32> to vector<8x128xf32>
      %40 = arith.addf %39, %38 : vector<8x128xf32>
      %c5_13 = arith.constant 5 : index
      %c0_14 = arith.constant 0 : index
      %41 = memref.load %arg2[%c5_13, %c0_14] : memref<8x8xf32, #tpu.memory_space<smem>>
      %c5_15 = arith.constant 5 : index
      %c1_16 = arith.constant 1 : index
      %42 = memref.load %arg2[%c5_15, %c1_16] : memref<8x8xf32, #tpu.memory_space<smem>>
      %43 = vector.broadcast %42 : f32 to vector<8x128xf32>
      %44 = arith.subf %43, %40 : vector<8x128xf32>
      %45 = vector.broadcast %41 : f32 to vector<8x128xf32>
      %46 = arith.mulf %45, %44 : vector<8x128xf32>
      %c1_17 = arith.constant 1 : index
      %c0_18 = arith.constant 0 : index
      %47 = memref.load %arg2[%c1_17, %c0_18] : memref<8x8xf32, #tpu.memory_space<smem>>
      %48 = vector.broadcast %47 : f32 to vector<1x128xf32>
      %49 = arith.mulf %48, %22 : vector<1x128xf32>
      %c1_19 = arith.constant 1 : index
      %c1_20 = arith.constant 1 : index
      %50 = memref.load %arg2[%c1_19, %c1_20] : memref<8x8xf32, #tpu.memory_space<smem>>
      %51 = vector.broadcast %50 : f32 to vector<1x128xf32>
      %52 = arith.mulf %51, %28 : vector<1x128xf32>
      %53 = arith.addf %49, %52 : vector<1x128xf32>
      %c1_21 = arith.constant 1 : index
      %c2_22 = arith.constant 2 : index
      %54 = memref.load %arg2[%c1_21, %c2_22] : memref<8x8xf32, #tpu.memory_space<smem>>
      %55 = vector.broadcast %54 : f32 to vector<8x128xf32>
      %56 = arith.mulf %55, %34 : vector<8x128xf32>
      %57 = vector.broadcast %53 : vector<1x128xf32> to vector<8x128xf32>
      %58 = arith.addf %57, %56 : vector<8x128xf32>
      %c1_23 = arith.constant 1 : index
      %c3_24 = arith.constant 3 : index
      %59 = memref.load %arg2[%c1_23, %c3_24] : memref<8x8xf32, #tpu.memory_space<smem>>
      %60 = vector.broadcast %59 : f32 to vector<8x128xf32>
      %61 = arith.addf %58, %60 : vector<8x128xf32>
      %c1_25 = arith.constant 1 : index
      %c4_26 = arith.constant 4 : index
      %62 = memref.load %arg2[%c1_25, %c4_26] : memref<8x8xf32, #tpu.memory_space<smem>>
      %63 = math.tanh %61 : vector<8x128xf32>
      %64 = vector.broadcast %62 : f32 to vector<8x128xf32>
      %65 = arith.mulf %64, %63 : vector<8x128xf32>
      %66 = arith.addf %46, %65 : vector<8x128xf32>
      %c2_27 = arith.constant 2 : index
      %c0_28 = arith.constant 0 : index
      %67 = memref.load %arg2[%c2_27, %c0_28] : memref<8x8xf32, #tpu.memory_space<smem>>
      %68 = vector.broadcast %67 : f32 to vector<1x128xf32>
      %69 = arith.mulf %68, %22 : vector<1x128xf32>
      %c2_29 = arith.constant 2 : index
      %c1_30 = arith.constant 1 : index
      %70 = memref.load %arg2[%c2_29, %c1_30] : memref<8x8xf32, #tpu.memory_space<smem>>
      %71 = vector.broadcast %70 : f32 to vector<1x128xf32>
      %72 = arith.mulf %71, %28 : vector<1x128xf32>
      %73 = arith.addf %69, %72 : vector<1x128xf32>
      %c2_31 = arith.constant 2 : index
      %c2_32 = arith.constant 2 : index
      %74 = memref.load %arg2[%c2_31, %c2_32] : memref<8x8xf32, #tpu.memory_space<smem>>
      %75 = vector.broadcast %74 : f32 to vector<8x128xf32>
      %76 = arith.mulf %75, %34 : vector<8x128xf32>
      %77 = vector.broadcast %73 : vector<1x128xf32> to vector<8x128xf32>
      %78 = arith.addf %77, %76 : vector<8x128xf32>
      %c2_33 = arith.constant 2 : index
      %c3_34 = arith.constant 3 : index
      %79 = memref.load %arg2[%c2_33, %c3_34] : memref<8x8xf32, #tpu.memory_space<smem>>
      %80 = vector.broadcast %79 : f32 to vector<8x128xf32>
      %81 = arith.addf %78, %80 : vector<8x128xf32>
      %c2_35 = arith.constant 2 : index
      %c4_36 = arith.constant 4 : index
      %82 = memref.load %arg2[%c2_35, %c4_36] : memref<8x8xf32, #tpu.memory_space<smem>>
      %83 = math.tanh %81 : vector<8x128xf32>
      %84 = vector.broadcast %82 : f32 to vector<8x128xf32>
      %85 = arith.mulf %84, %83 : vector<8x128xf32>
      %86 = arith.addf %66, %85 : vector<8x128xf32>
      %c3_37 = arith.constant 3 : index
      %c0_38 = arith.constant 0 : index
      %87 = memref.load %arg2[%c3_37, %c0_38] : memref<8x8xf32, #tpu.memory_space<smem>>
      %88 = vector.broadcast %87 : f32 to vector<1x128xf32>
      %89 = arith.mulf %88, %22 : vector<1x128xf32>
      %c3_39 = arith.constant 3 : index
      %c1_40 = arith.constant 1 : index
      %90 = memref.load %arg2[%c3_39, %c1_40] : memref<8x8xf32, #tpu.memory_space<smem>>
      %91 = vector.broadcast %90 : f32 to vector<1x128xf32>
      %92 = arith.mulf %91, %28 : vector<1x128xf32>
      %93 = arith.addf %89, %92 : vector<1x128xf32>
      %c3_41 = arith.constant 3 : index
      %c2_42 = arith.constant 2 : index
      %94 = memref.load %arg2[%c3_41, %c2_42] : memref<8x8xf32, #tpu.memory_space<smem>>
      %95 = vector.broadcast %94 : f32 to vector<8x128xf32>
      %96 = arith.mulf %95, %34 : vector<8x128xf32>
      %97 = vector.broadcast %93 : vector<1x128xf32> to vector<8x128xf32>
      %98 = arith.addf %97, %96 : vector<8x128xf32>
      %c3_43 = arith.constant 3 : index
      %c3_44 = arith.constant 3 : index
      %99 = memref.load %arg2[%c3_43, %c3_44] : memref<8x8xf32, #tpu.memory_space<smem>>
      %100 = vector.broadcast %99 : f32 to vector<8x128xf32>
      %101 = arith.addf %98, %100 : vector<8x128xf32>
      %c3_45 = arith.constant 3 : index
      %c4_46 = arith.constant 4 : index
      %102 = memref.load %arg2[%c3_45, %c4_46] : memref<8x8xf32, #tpu.memory_space<smem>>
      %103 = math.tanh %101 : vector<8x128xf32>
      %104 = vector.broadcast %102 : f32 to vector<8x128xf32>
      %105 = arith.mulf %104, %103 : vector<8x128xf32>
      %106 = arith.addf %86, %105 : vector<8x128xf32>
      %c4_47 = arith.constant 4 : index
      %c0_48 = arith.constant 0 : index
      %107 = memref.load %arg2[%c4_47, %c0_48] : memref<8x8xf32, #tpu.memory_space<smem>>
      %108 = vector.broadcast %107 : f32 to vector<1x128xf32>
      %109 = arith.mulf %108, %22 : vector<1x128xf32>
      %c4_49 = arith.constant 4 : index
      %c1_50 = arith.constant 1 : index
      %110 = memref.load %arg2[%c4_49, %c1_50] : memref<8x8xf32, #tpu.memory_space<smem>>
      %111 = vector.broadcast %110 : f32 to vector<1x128xf32>
      %112 = arith.mulf %111, %28 : vector<1x128xf32>
      %113 = arith.addf %109, %112 : vector<1x128xf32>
      %c4_51 = arith.constant 4 : index
      %c2_52 = arith.constant 2 : index
      %114 = memref.load %arg2[%c4_51, %c2_52] : memref<8x8xf32, #tpu.memory_space<smem>>
      %115 = vector.broadcast %114 : f32 to vector<8x128xf32>
      %116 = arith.mulf %115, %34 : vector<8x128xf32>
      %117 = vector.broadcast %113 : vector<1x128xf32> to vector<8x128xf32>
      %118 = arith.addf %117, %116 : vector<8x128xf32>
      %c4_53 = arith.constant 4 : index
      %c3_54 = arith.constant 3 : index
      %119 = memref.load %arg2[%c4_53, %c3_54] : memref<8x8xf32, #tpu.memory_space<smem>>
      %120 = vector.broadcast %119 : f32 to vector<8x128xf32>
      %121 = arith.addf %118, %120 : vector<8x128xf32>
      %c4_55 = arith.constant 4 : index
      %c4_56 = arith.constant 4 : index
      %122 = memref.load %arg2[%c4_55, %c4_56] : memref<8x8xf32, #tpu.memory_space<smem>>
      %123 = math.tanh %121 : vector<8x128xf32>
      %124 = vector.broadcast %122 : f32 to vector<8x128xf32>
      %125 = arith.mulf %124, %123 : vector<8x128xf32>
      %126 = arith.addf %106, %125 : vector<8x128xf32>
      %cst = arith.constant -6.000000e+01 : f32
      %127 = vector.broadcast %cst : f32 to vector<8x128xf32>
      %128 = arith.maximumf %126, %127 : vector<8x128xf32>
      %cst_57 = arith.constant 0.000000e+00 : f32
      %129 = vector.broadcast %cst_57 : f32 to vector<8x128xf32>
      %130 = arith.subf %129, %128 : vector<8x128xf32>
      %131 = math.exp %130 : vector<8x128xf32>
      %cst_58 = arith.constant 1.000000e+00 : f32
      %132 = vector.broadcast %cst_58 : f32 to vector<8x128xf32>
      %133 = arith.addf %132, %131 : vector<8x128xf32>
      %134 = tpu.reciprocal %133 {approx = true} : vector<8x128xf32> -> vector<8x128xf32>
      %c0_59 = arith.constant 0 : index
      %c0_60 = arith.constant 0 : index
      %135 = vector.load %arg5[%c0_59, %c0_60] : memref<8x128xf32, #tpu.memory_space<vmem>>, vector<8x128xf32>
      %cst_61 = arith.constant 5.000000e-01 : f32
      %136 = vector.broadcast %cst_61 : f32 to vector<8x128xf32>
      %137 = arith.cmpf ogt, %135, %136 : vector<8x128xf32>
      %c0_62 = arith.constant 0 : index
      %c0_63 = arith.constant 0 : index
      %138 = vector.load %arg4[%c0_62, %c0_63] : memref<8x128xf32, #tpu.memory_space<vmem>>, vector<8x128xf32>
      %139 = arith.select %137, %134, %138 : vector<8x128xi1>, vector<8x128xf32>
      %c0_64 = arith.constant 0 : index
      %c0_65 = arith.constant 0 : index
      %140 = vector.load %arg6[%c0_64, %c0_65] : memref<8x128xf32, #tpu.memory_space<vmem>>, vector<8x128xf32>
      tpu.vector_store %arg6[%c0_64, %c0_65], %139 {strides = array<i32>} : memref<8x128xf32, #tpu.memory_space<vmem>>, vector<8x128xf32>,
    } else {
    }
    return
  }
  func.func @transform_0(%arg0: i32) -> i32 {
    %c0_i32 = arith.constant 0 : i32
    %c0_i32_0 = arith.constant 0 : i32
    return %c0_i32 : i32
  }
  func.func @transform_1(%arg0: i32) -> (i32, i32) {
    %c0_i32 = arith.constant 0 : i32
    %c0_i32_0 = arith.constant 0 : i32
    %c0_i32_1 = arith.constant 0 : i32
    return %c0_i32, %c0_i32_0 : i32, i32
  }
  func.func @transform_2(%arg0: i32) -> (i32, i32) {
    %c0_i32 = arith.constant 0 : i32
    %c0_i32_0 = arith.constant 0 : i32
    %c0_i32_1 = arith.constant 0 : i32
    return %c0_i32, %c0_i32_0 : i32, i32
  }
  func.func @transform_3(%arg0: i32) -> (i32, i32) {
    %c0_i32 = arith.constant 0 : i32
    %c0_i32_0 = arith.constant 0 : i32
    return %arg0, %c0_i32 : i32, i32
  }
  func.func @transform_4(%arg0: i32) -> (i32, i32) {
    %c0_i32 = arith.constant 0 : i32
    %c0_i32_0 = arith.constant 0 : i32
    return %arg0, %c0_i32 : i32, i32
  }
  func.func @transform_5(%arg0: i32) -> (i32, i32) {
    %c0_i32 = arith.constant 0 : i32
    %c0_i32_0 = arith.constant 0 : i32
    return %arg0, %c0_i32 : i32, i32
  }
}

module attributes {stable_mosaic.version = 11 : i64} {
  func.func @refine_kernel(%arg0: memref<5x5x5xf32, #tpu.memory_space<vmem>>, %arg1: memref<9x5xf32, #tpu.memory_space<vmem>>, %arg2: memref<9x5xf32, #tpu.memory_space<vmem>>, %arg3: memref<9x9xf32, #tpu.memory_space<vmem>>, %arg4: memref<9x9xf32, #tpu.memory_space<vmem>>, %arg5: memref<9x9x9xf32, #tpu.memory_space<vmem>>, %arg6: memref<9x9x9xf32, #tpu.memory_space<vmem>>, %arg7: memref<9x9x9xf32, #tpu.memory_space<vmem>>) attributes {dimension_semantics = [], scalar_prefetch = 0 : i64, scratch_operands = 0 : i64, tpu.core_type = #tpu.core_type<tc>} {
    %c0 = arith.constant 0 : index
    %c0_0 = arith.constant 0 : index
    %c0_1 = arith.constant 0 : index
    %0 = vector.load %arg0[%c0, %c0_0, %c0_1] : memref<5x5x5xf32, #tpu.memory_space<vmem>>, vector<5x5x5xf32>
    %cst = arith.constant 5.000000e-01 : f32
    %1 = vector.broadcast %cst : f32 to vector<5x5x5xf32>
    %2 = arith.cmpf ogt, %0, %1 : vector<5x5x5xf32>
    %3 = arith.extui %2 : vector<5x5x5xi1> to vector<5x5x5xi32>
    %4 = arith.sitofp %3 : vector<5x5x5xi32> to vector<5x5x5xf32>
    %5 = tpu.concatenate %0, %4 in 0 : vector<5x5x5xf32>, vector<5x5x5xf32> -> vector<10x5x5xf32>
    %c0_2 = arith.constant 0 : index
    %c0_3 = arith.constant 0 : index
    %6 = vector.load %arg1[%c0_2, %c0_3] : memref<9x5xf32, #tpu.memory_space<vmem>>, vector<9x5xf32>
    %7 = vector.shape_cast %6 : vector<9x5xf32> to vector<1x9x5xf32>
    %8 = vector.shape_cast %7 : vector<1x9x5xf32> to vector<1x9x5xf32>
    %9 = vector.broadcast %8 : vector<1x9x5xf32> to vector<10x9x5xf32>
    %c0_4 = arith.constant 0 : index
    %c0_5 = arith.constant 0 : index
    %10 = vector.load %arg2[%c0_4, %c0_5] : memref<9x5xf32, #tpu.memory_space<vmem>>, vector<9x5xf32>
    %11 = vector.shape_cast %10 : vector<9x5xf32> to vector<1x9x5xf32>
    %12 = vector.shape_cast %11 : vector<1x9x5xf32> to vector<1x9x5xf32>
    %13 = vector.broadcast %12 : vector<1x9x5xf32> to vector<10x9x5xf32>
    "tpu.trace_start"() <{level = 10 : i32, message = "bqd,bkd->bqk"}> : () -> ()
    %cst_6 = arith.constant dense<0.000000e+00> : vector<10x5x9xf32>
    %14 = tpu.matmul %5, %9, %cst_6 {dimension_numbers = #tpu.dot_dimension_numbers<[2], [2], [1], [1], [0, 0, 0, 1, 1, 1], [0], [0]>} : vector<10x5x5xf32>, vector<10x9x5xf32>, vector<10x5x9xf32> -> vector<10x5x9xf32>
    "tpu.trace_stop"() : () -> ()
    "tpu.trace_start"() <{level = 10 : i32, message = "bqk,bkd->bqd"}> : () -> ()
    %cst_7 = arith.constant dense<0.000000e+00> : vector<10x9x9xf32>
    %15 = tpu.matmul %13, %14, %cst_7 {dimension_numbers = #tpu.dot_dimension_numbers<[2], [1], [1], [2], [0, 0, 0, 1, 1, 2], [0], [0]>} : vector<10x9x5xf32>, vector<10x5x9xf32>, vector<10x9x9xf32> -> vector<10x9x9xf32>
    "tpu.trace_stop"() : () -> ()
    %16 = vector.extract_strided_slice %15 {offsets = [0, 0, 0], sizes = [5, 9, 9], strides = [1, 1, 1]} : vector<10x9x9xf32> to vector<5x9x9xf32>
    %17 = vector.extract_strided_slice %16 {offsets = [0, 0, 0], sizes = [4, 9, 9], strides = [1, 1, 1]} : vector<5x9x9xf32> to vector<4x9x9xf32>
    %18 = vector.extract_strided_slice %16 {offsets = [1, 0, 0], sizes = [4, 9, 9], strides = [1, 1, 1]} : vector<5x9x9xf32> to vector<4x9x9xf32>
    %19 = arith.addf %17, %18 : vector<4x9x9xf32>
    %cst_8 = arith.constant 5.000000e-01 : f32
    %20 = vector.broadcast %cst_8 : f32 to vector<4x9x9xf32>
    %21 = arith.mulf %20, %19 : vector<4x9x9xf32>
    %22 = vector.extract_strided_slice %16 {offsets = [4, 0, 0], sizes = [1, 9, 9], strides = [1, 1, 1]} : vector<5x9x9xf32> to vector<1x9x9xf32>
    %23 = tpu.concatenate %21, %22 in 0 : vector<4x9x9xf32>, vector<1x9x9xf32> -> vector<5x9x9xf32>
    %24 = vector.shape_cast %16 : vector<5x9x9xf32> to vector<5x1x9x9xf32>
    %25 = vector.shape_cast %23 : vector<5x9x9xf32> to vector<5x1x9x9xf32>
    %26 = tpu.concatenate %24, %25 in 1 : vector<5x1x9x9xf32>, vector<5x1x9x9xf32> -> vector<5x2x9x9xf32>
    %27 = vector.shape_cast %26 : vector<5x2x9x9xf32> to vector<10x9x9xf32>
    %28 = vector.extract_strided_slice %27 {offsets = [0, 0, 0], sizes = [9, 9, 9], strides = [1, 1, 1]} : vector<10x9x9xf32> to vector<9x9x9xf32>
    %29 = vector.extract_strided_slice %15 {offsets = [5, 0, 0], sizes = [5, 9, 9], strides = [1, 1, 1]} : vector<10x9x9xf32> to vector<5x9x9xf32>
    %30 = vector.extract_strided_slice %29 {offsets = [0, 0, 0], sizes = [4, 9, 9], strides = [1, 1, 1]} : vector<5x9x9xf32> to vector<4x9x9xf32>
    %31 = vector.extract_strided_slice %29 {offsets = [1, 0, 0], sizes = [4, 9, 9], strides = [1, 1, 1]} : vector<5x9x9xf32> to vector<4x9x9xf32>
    %32 = arith.addf %30, %31 : vector<4x9x9xf32>
    %cst_9 = arith.constant 5.000000e-01 : f32
    %33 = vector.broadcast %cst_9 : f32 to vector<4x9x9xf32>
    %34 = arith.mulf %33, %32 : vector<4x9x9xf32>
    %35 = vector.extract_strided_slice %29 {offsets = [4, 0, 0], sizes = [1, 9, 9], strides = [1, 1, 1]} : vector<5x9x9xf32> to vector<1x9x9xf32>
    %36 = tpu.concatenate %34, %35 in 0 : vector<4x9x9xf32>, vector<1x9x9xf32> -> vector<5x9x9xf32>
    %37 = vector.shape_cast %29 : vector<5x9x9xf32> to vector<5x1x9x9xf32>
    %38 = vector.shape_cast %36 : vector<5x9x9xf32> to vector<5x1x9x9xf32>
    %39 = tpu.concatenate %37, %38 in 1 : vector<5x1x9x9xf32>, vector<5x1x9x9xf32> -> vector<5x2x9x9xf32>
    %40 = vector.shape_cast %39 : vector<5x2x9x9xf32> to vector<10x9x9xf32>
    %41 = vector.extract_strided_slice %40 {offsets = [0, 0, 0], sizes = [9, 9, 9], strides = [1, 1, 1]} : vector<10x9x9xf32> to vector<9x9x9xf32>
    %cst_10 = arith.constant 9.99999974E-5 : f32
    %42 = vector.broadcast %cst_10 : f32 to vector<9x9x9xf32>
    %43 = arith.cmpf ogt, %41, %42 : vector<9x9x9xf32>
    %cst_11 = arith.constant 0.999899983 : f32
    %44 = vector.broadcast %cst_11 : f32 to vector<9x9x9xf32>
    %45 = arith.cmpf olt, %41, %44 : vector<9x9x9xf32>
    %46 = arith.andi %43, %45 : vector<9x9x9xi1>
    %47 = arith.extui %46 : vector<9x9x9xi1> to vector<9x9x9xi32>
    %48 = arith.sitofp %47 : vector<9x9x9xi32> to vector<9x9x9xf32>
    %c0_12 = arith.constant 0 : index
    %c0_13 = arith.constant 0 : index
    %49 = vector.load %arg3[%c0_12, %c0_13] : memref<9x9xf32, #tpu.memory_space<vmem>>, vector<9x9xf32>
    %50 = vector.shape_cast %49 : vector<9x9xf32> to vector<1x9x9xf32>
    %51 = vector.shape_cast %50 : vector<1x9x9xf32> to vector<1x9x9xf32>
    %52 = vector.broadcast %51 : vector<1x9x9xf32> to vector<9x9x9xf32>
    %c0_14 = arith.constant 0 : index
    %c0_15 = arith.constant 0 : index
    %53 = vector.load %arg4[%c0_14, %c0_15] : memref<9x9xf32, #tpu.memory_space<vmem>>, vector<9x9xf32>
    %54 = vector.shape_cast %53 : vector<9x9xf32> to vector<1x9x9xf32>
    %55 = vector.shape_cast %54 : vector<1x9x9xf32> to vector<1x9x9xf32>
    %56 = vector.broadcast %55 : vector<1x9x9xf32> to vector<9x9x9xf32>
    "tpu.trace_start"() <{level = 10 : i32, message = "bqd,bkd->bqk"}> : () -> ()
    %cst_16 = arith.constant dense<0.000000e+00> : vector<9x9x9xf32>
    %57 = tpu.matmul %48, %52, %cst_16 {dimension_numbers = #tpu.dot_dimension_numbers<[2], [2], [1], [1], [0, 0, 0, 1, 1, 1], [0], [0]>} : vector<9x9x9xf32>, vector<9x9x9xf32>, vector<9x9x9xf32> -> vector<9x9x9xf32>
    "tpu.trace_stop"() : () -> ()
    "tpu.trace_start"() <{level = 10 : i32, message = "bqk,bkd->bqd"}> : () -> ()
    %cst_17 = arith.constant dense<0.000000e+00> : vector<9x9x9xf32>
    %58 = tpu.matmul %56, %57, %cst_17 {dimension_numbers = #tpu.dot_dimension_numbers<[2], [1], [1], [2], [0, 0, 0, 1, 1, 2], [0], [0]>} : vector<9x9x9xf32>, vector<9x9x9xf32>, vector<9x9x9xf32> -> vector<9x9x9xf32>
    %cst_18 = arith.constant 0.000000e+00 : f32
    "tpu.trace_stop"() : () -> ()
    %59 = vector.broadcast %cst_18 : f32 to vector<1x9x9xf32>
    %60 = vector.extract_strided_slice %58 {offsets = [0, 0, 0], sizes = [8, 9, 9], strides = [1, 1, 1]} : vector<9x9x9xf32> to vector<8x9x9xf32>
    %61 = tpu.concatenate %59, %60 in 0 : vector<1x9x9xf32>, vector<8x9x9xf32> -> vector<9x9x9xf32>
    %62 = arith.addf %58, %61 : vector<9x9x9xf32>
    %63 = vector.extract_strided_slice %58 {offsets = [1, 0, 0], sizes = [8, 9, 9], strides = [1, 1, 1]} : vector<9x9x9xf32> to vector<8x9x9xf32>
    %64 = tpu.concatenate %63, %59 in 0 : vector<8x9x9xf32>, vector<1x9x9xf32> -> vector<9x9x9xf32>
    %65 = arith.addf %62, %64 : vector<9x9x9xf32>
    %cst_19 = arith.constant 5.000000e-01 : f32
    %66 = vector.broadcast %cst_19 : f32 to vector<9x9x9xf32>
    %67 = arith.cmpf ogt, %65, %66 : vector<9x9x9xf32>
    %c0_20 = arith.constant 0 : index
    %c0_21 = arith.constant 0 : index
    %c0_22 = arith.constant 0 : index
    %68 = vector.load %arg5[%c0_20, %c0_21, %c0_22] : memref<9x9x9xf32, #tpu.memory_space<vmem>>, vector<9x9x9xf32>
    %cst_23 = arith.constant 5.000000e-01 : f32
    %69 = vector.broadcast %cst_23 : f32 to vector<9x9x9xf32>
    %70 = arith.cmpf olt, %68, %69 : vector<9x9x9xf32>
    %71 = arith.andi %67, %70 : vector<9x9x9xi1>
    %72 = arith.extui %71 : vector<9x9x9xi1> to vector<9x9x9xi32>
    %73 = arith.sitofp %72 : vector<9x9x9xi32> to vector<9x9x9xf32>
    %c0_24 = arith.constant 0 : index
    %c0_25 = arith.constant 0 : index
    %c0_26 = arith.constant 0 : index
    %74 = vector.load %arg6[%c0_24, %c0_25, %c0_26] : memref<9x9x9xf32, #tpu.memory_space<vmem>>, vector<9x9x9xf32>
    tpu.vector_store %arg6[%c0_24, %c0_25, %c0_26], %28 {strides = array<i32>} : memref<9x9x9xf32, #tpu.memory_space<vmem>>, vector<9x9x9xf32>,
    %c0_27 = arith.constant 0 : index
    %c0_28 = arith.constant 0 : index
    %c0_29 = arith.constant 0 : index
    %75 = vector.load %arg7[%c0_27, %c0_28, %c0_29] : memref<9x9x9xf32, #tpu.memory_space<vmem>>, vector<9x9x9xf32>
    tpu.vector_store %arg7[%c0_27, %c0_28, %c0_29], %73 {strides = array<i32>} : memref<9x9x9xf32, #tpu.memory_space<vmem>>, vector<9x9x9xf32>,
    return
  }
}

module attributes {stable_mosaic.version = 11 : i64} {
  func.func @query_merge_kernel(%arg0: i32, %arg1: memref<2xi32, #tpu.memory_space<smem>>, %arg2: memref<8x8xf32, #tpu.memory_space<smem>>, %arg3: memref<2x128xf32, #tpu.memory_space<vmem>>, %arg4: memref<8x128xf32, #tpu.memory_space<vmem>>, %arg5: memref<8x128xf32, #tpu.memory_space<vmem>>, %arg6: memref<8x128xf32, #tpu.memory_space<vmem>>) attributes {dimension_semantics = [#tpu.dimension_semantics<parallel>], iteration_bounds = array<i64: 2>, scalar_prefetch = 0 : i64, scratch_operands = 0 : i64, tpu.core_type = #tpu.core_type<tc>, window_params = [{transform_indices = @transform_0, window_bounds = array<i64: 2>}, {transform_indices = @transform_1, window_bounds = array<i64: 8, 8>}, {pipeline_mode = #tpu.pipeline_mode<synchronous>, transform_indices = @transform_2, window_bounds = array<i64: 2, 128>}, {transform_indices = @transform_3, window_bounds = array<i64: 8, 128>}, {transform_indices = @transform_4, window_bounds = array<i64: 8, 128>}, {transform_indices = @transform_5, window_bounds = array<i64: 8, 128>}]} {
    %0 = arith.index_cast %arg0 : i32 to index
    %1 = memref.load %arg1[%0] : memref<2xi32, #tpu.memory_space<smem>>
    %c0_i32 = arith.constant 0 : i32
    %2 = arith.cmpi eq, %1, %c0_i32 : i32
    %3 = arith.extui %2 : i1 to i32
    %c0_i32_0 = arith.constant 0 : i32
    %4 = arith.cmpi ne, %3, %c0_i32_0 : i32
    scf.if %4 {
      %c0 = arith.constant 0 : index
      %c0_3 = arith.constant 0 : index
      %10 = vector.load %arg4[%c0, %c0_3] : memref<8x128xf32, #tpu.memory_space<vmem>>, vector<8x128xf32>
      %c0_4 = arith.constant 0 : index
      %c0_5 = arith.constant 0 : index
      %11 = vector.load %arg6[%c0_4, %c0_5] : memref<8x128xf32, #tpu.memory_space<vmem>>, vector<8x128xf32>
      tpu.vector_store %arg6[%c0_4, %c0_5], %10 {strides = array<i32>} : memref<8x128xf32, #tpu.memory_space<vmem>>, vector<8x128xf32>,
    } else {
    }
    %5 = arith.index_cast %arg0 : i32 to index
    %6 = memref.load %arg1[%5] : memref<2xi32, #tpu.memory_space<smem>>
    %c0_i32_1 = arith.constant 0 : i32
    %7 = arith.cmpi sgt, %6, %c0_i32_1 : i32
    %8 = arith.extui %7 : i1 to i32
    %c0_i32_2 = arith.constant 0 : i32
    %9 = arith.cmpi ne, %8, %c0_i32_2 : i32
    scf.if %9 {
      %c0 = arith.constant 0 : index
      %c0_3 = arith.constant 0 : index
      %10 = vector.load %arg3[%c0, %c0_3] : memref<2x128xf32, #tpu.memory_space<vmem>>, vector<1x128xf32>
      %c1 = arith.constant 1 : index
      %c0_4 = arith.constant 0 : index
      %11 = vector.load %arg3[%c1, %c0_4] : memref<2x128xf32, #tpu.memory_space<vmem>>, vector<1x128xf32>
      %12 = tpu.iota {dimensions = array<i32: 0>} : vector<8x128xi32>
      %c8_i32 = arith.constant 8 : i32
      %13 = arith.muli %arg0, %c8_i32 : i32
      %14 = vector.broadcast %13 : i32 to vector<8x128xi32>
      %15 = arith.addi %12, %14 : vector<8x128xi32>
      %16 = arith.sitofp %15 : vector<8x128xi32> to vector<8x128xf32>
      %c0_5 = arith.constant 0 : index
      %c0_6 = arith.constant 0 : index
      %17 = memref.load %arg2[%c0_5, %c0_6] : memref<8x8xf32, #tpu.memory_space<smem>>
      %18 = vector.broadcast %17 : f32 to vector<1x128xf32>
      %19 = arith.mulf %10, %18 : vector<1x128xf32>
      %c0_7 = arith.constant 0 : index
      %c3 = arith.constant 3 : index
      %20 = memref.load %arg2[%c0_7, %c3] : memref<8x8xf32, #tpu.memory_space<smem>>
      %21 = vector.broadcast %20 : f32 to vector<1x128xf32>
      %22 = arith.addf %19, %21 : vector<1x128xf32>
      %c0_8 = arith.constant 0 : index
      %c1_9 = arith.constant 1 : index
      %23 = memref.load %arg2[%c0_8, %c1_9] : memref<8x8xf32, #tpu.memory_space<smem>>
      %24 = vector.broadcast %23 : f32 to vector<1x128xf32>
      %25 = arith.mulf %11, %24 : vector<1x128xf32>
      %c0_10 = arith.constant 0 : index
      %c4 = arith.constant 4 : index
      %26 = memref.load %arg2[%c0_10, %c4] : memref<8x8xf32, #tpu.memory_space<smem>>
      %27 = vector.broadcast %26 : f32 to vector<1x128xf32>
      %28 = arith.addf %25, %27 : vector<1x128xf32>
      %c0_11 = arith.constant 0 : index
      %c2 = arith.constant 2 : index
      %29 = memref.load %arg2[%c0_11, %c2] : memref<8x8xf32, #tpu.memory_space<smem>>
      %30 = vector.broadcast %29 : f32 to vector<8x128xf32>
      %31 = arith.mulf %16, %30 : vector<8x128xf32>
      %c0_12 = arith.constant 0 : index
      %c5 = arith.constant 5 : index
      %32 = memref.load %arg2[%c0_12, %c5] : memref<8x8xf32, #tpu.memory_space<smem>>
      %33 = vector.broadcast %32 : f32 to vector<8x128xf32>
      %34 = arith.addf %31, %33 : vector<8x128xf32>
      %35 = arith.mulf %22, %22 : vector<1x128xf32>
      %36 = arith.mulf %28, %28 : vector<1x128xf32>
      %37 = arith.addf %35, %36 : vector<1x128xf32>
      %38 = arith.mulf %34, %34 : vector<8x128xf32>
      %39 = vector.broadcast %37 : vector<1x128xf32> to vector<8x128xf32>
      %40 = arith.addf %39, %38 : vector<8x128xf32>
      %c5_13 = arith.constant 5 : index
      %c0_14 = arith.constant 0 : index
      %41 = memref.load %arg2[%c5_13, %c0_14] : memref<8x8xf32, #tpu.memory_space<smem>>
      %c5_15 = arith.constant 5 : index
      %c1_16 = arith.constant 1 : index
      %42 = memref.load %arg2[%c5_15, %c1_16] : memref<8x8xf32, #tpu.memory_space<smem>>
      %43 = vector.broadcast %42 : f32 to vector<8x128xf32>
      %44 = arith.subf %43, %40 : vector<8x128xf32>
      %45 = vector.broadcast %41 : f32 to vector<8x128xf32>
      %46 = arith.mulf %45, %44 : vector<8x128xf32>
      %c1_17 = arith.constant 1 : index
      %c0_18 = arith.constant 0 : index
      %47 = memref.load %arg2[%c1_17, %c0_18] : memref<8x8xf32, #tpu.memory_space<smem>>
      %48 = vector.broadcast %47 : f32 to vector<1x128xf32>
      %49 = arith.mulf %48, %22 : vector<1x128xf32>
      %c1_19 = arith.constant 1 : index
      %c1_20 = arith.constant 1 : index
      %50 = memref.load %arg2[%c1_19, %c1_20] : memref<8x8xf32, #tpu.memory_space<smem>>
      %51 = vector.broadcast %50 : f32 to vector<1x128xf32>
      %52 = arith.mulf %51, %28 : vector<1x128xf32>
      %53 = arith.addf %49, %52 : vector<1x128xf32>
      %c1_21 = arith.constant 1 : index
      %c2_22 = arith.constant 2 : index
      %54 = memref.load %arg2[%c1_21, %c2_22] : memref<8x8xf32, #tpu.memory_space<smem>>
      %55 = vector.broadcast %54 : f32 to vector<8x128xf32>
      %56 = arith.mulf %55, %34 : vector<8x128xf32>
      %57 = vector.broadcast %53 : vector<1x128xf32> to vector<8x128xf32>
      %58 = arith.addf %57, %56 : vector<8x128xf32>
      %c1_23 = arith.constant 1 : index
      %c3_24 = arith.constant 3 : index
      %59 = memref.load %arg2[%c1_23, %c3_24] : memref<8x8xf32, #tpu.memory_space<smem>>
      %60 = vector.broadcast %59 : f32 to vector<8x128xf32>
      %61 = arith.addf %58, %60 : vector<8x128xf32>
      %c1_25 = arith.constant 1 : index
      %c4_26 = arith.constant 4 : index
      %62 = memref.load %arg2[%c1_25, %c4_26] : memref<8x8xf32, #tpu.memory_space<smem>>
      %63 = math.tanh %61 : vector<8x128xf32>
      %64 = vector.broadcast %62 : f32 to vector<8x128xf32>
      %65 = arith.mulf %64, %63 : vector<8x128xf32>
      %66 = arith.addf %46, %65 : vector<8x128xf32>
      %c2_27 = arith.constant 2 : index
      %c0_28 = arith.constant 0 : index
      %67 = memref.load %arg2[%c2_27, %c0_28] : memref<8x8xf32, #tpu.memory_space<smem>>
      %68 = vector.broadcast %67 : f32 to vector<1x128xf32>
      %69 = arith.mulf %68, %22 : vector<1x128xf32>
      %c2_29 = arith.constant 2 : index
      %c1_30 = arith.constant 1 : index
      %70 = memref.load %arg2[%c2_29, %c1_30] : memref<8x8xf32, #tpu.memory_space<smem>>
      %71 = vector.broadcast %70 : f32 to vector<1x128xf32>
      %72 = arith.mulf %71, %28 : vector<1x128xf32>
      %73 = arith.addf %69, %72 : vector<1x128xf32>
      %c2_31 = arith.constant 2 : index
      %c2_32 = arith.constant 2 : index
      %74 = memref.load %arg2[%c2_31, %c2_32] : memref<8x8xf32, #tpu.memory_space<smem>>
      %75 = vector.broadcast %74 : f32 to vector<8x128xf32>
      %76 = arith.mulf %75, %34 : vector<8x128xf32>
      %77 = vector.broadcast %73 : vector<1x128xf32> to vector<8x128xf32>
      %78 = arith.addf %77, %76 : vector<8x128xf32>
      %c2_33 = arith.constant 2 : index
      %c3_34 = arith.constant 3 : index
      %79 = memref.load %arg2[%c2_33, %c3_34] : memref<8x8xf32, #tpu.memory_space<smem>>
      %80 = vector.broadcast %79 : f32 to vector<8x128xf32>
      %81 = arith.addf %78, %80 : vector<8x128xf32>
      %c2_35 = arith.constant 2 : index
      %c4_36 = arith.constant 4 : index
      %82 = memref.load %arg2[%c2_35, %c4_36] : memref<8x8xf32, #tpu.memory_space<smem>>
      %83 = math.tanh %81 : vector<8x128xf32>
      %84 = vector.broadcast %82 : f32 to vector<8x128xf32>
      %85 = arith.mulf %84, %83 : vector<8x128xf32>
      %86 = arith.addf %66, %85 : vector<8x128xf32>
      %c3_37 = arith.constant 3 : index
      %c0_38 = arith.constant 0 : index
      %87 = memref.load %arg2[%c3_37, %c0_38] : memref<8x8xf32, #tpu.memory_space<smem>>
      %88 = vector.broadcast %87 : f32 to vector<1x128xf32>
      %89 = arith.mulf %88, %22 : vector<1x128xf32>
      %c3_39 = arith.constant 3 : index
      %c1_40 = arith.constant 1 : index
      %90 = memref.load %arg2[%c3_39, %c1_40] : memref<8x8xf32, #tpu.memory_space<smem>>
      %91 = vector.broadcast %90 : f32 to vector<1x128xf32>
      %92 = arith.mulf %91, %28 : vector<1x128xf32>
      %93 = arith.addf %89, %92 : vector<1x128xf32>
      %c3_41 = arith.constant 3 : index
      %c2_42 = arith.constant 2 : index
      %94 = memref.load %arg2[%c3_41, %c2_42] : memref<8x8xf32, #tpu.memory_space<smem>>
      %95 = vector.broadcast %94 : f32 to vector<8x128xf32>
      %96 = arith.mulf %95, %34 : vector<8x128xf32>
      %97 = vector.broadcast %93 : vector<1x128xf32> to vector<8x128xf32>
      %98 = arith.addf %97, %96 : vector<8x128xf32>
      %c3_43 = arith.constant 3 : index
      %c3_44 = arith.constant 3 : index
      %99 = memref.load %arg2[%c3_43, %c3_44] : memref<8x8xf32, #tpu.memory_space<smem>>
      %100 = vector.broadcast %99 : f32 to vector<8x128xf32>
      %101 = arith.addf %98, %100 : vector<8x128xf32>
      %c3_45 = arith.constant 3 : index
      %c4_46 = arith.constant 4 : index
      %102 = memref.load %arg2[%c3_45, %c4_46] : memref<8x8xf32, #tpu.memory_space<smem>>
      %103 = math.tanh %101 : vector<8x128xf32>
      %104 = vector.broadcast %102 : f32 to vector<8x128xf32>
      %105 = arith.mulf %104, %103 : vector<8x128xf32>
      %106 = arith.addf %86, %105 : vector<8x128xf32>
      %c4_47 = arith.constant 4 : index
      %c0_48 = arith.constant 0 : index
      %107 = memref.load %arg2[%c4_47, %c0_48] : memref<8x8xf32, #tpu.memory_space<smem>>
      %108 = vector.broadcast %107 : f32 to vector<1x128xf32>
      %109 = arith.mulf %108, %22 : vector<1x128xf32>
      %c4_49 = arith.constant 4 : index
      %c1_50 = arith.constant 1 : index
      %110 = memref.load %arg2[%c4_49, %c1_50] : memref<8x8xf32, #tpu.memory_space<smem>>
      %111 = vector.broadcast %110 : f32 to vector<1x128xf32>
      %112 = arith.mulf %111, %28 : vector<1x128xf32>
      %113 = arith.addf %109, %112 : vector<1x128xf32>
      %c4_51 = arith.constant 4 : index
      %c2_52 = arith.constant 2 : index
      %114 = memref.load %arg2[%c4_51, %c2_52] : memref<8x8xf32, #tpu.memory_space<smem>>
      %115 = vector.broadcast %114 : f32 to vector<8x128xf32>
      %116 = arith.mulf %115, %34 : vector<8x128xf32>
      %117 = vector.broadcast %113 : vector<1x128xf32> to vector<8x128xf32>
      %118 = arith.addf %117, %116 : vector<8x128xf32>
      %c4_53 = arith.constant 4 : index
      %c3_54 = arith.constant 3 : index
      %119 = memref.load %arg2[%c4_53, %c3_54] : memref<8x8xf32, #tpu.memory_space<smem>>
      %120 = vector.broadcast %119 : f32 to vector<8x128xf32>
      %121 = arith.addf %118, %120 : vector<8x128xf32>
      %c4_55 = arith.constant 4 : index
      %c4_56 = arith.constant 4 : index
      %122 = memref.load %arg2[%c4_55, %c4_56] : memref<8x8xf32, #tpu.memory_space<smem>>
      %123 = math.tanh %121 : vector<8x128xf32>
      %124 = vector.broadcast %122 : f32 to vector<8x128xf32>
      %125 = arith.mulf %124, %123 : vector<8x128xf32>
      %126 = arith.addf %106, %125 : vector<8x128xf32>
      %cst = arith.constant -6.000000e+01 : f32
      %127 = vector.broadcast %cst : f32 to vector<8x128xf32>
      %128 = arith.maximumf %126, %127 : vector<8x128xf32>
      %cst_57 = arith.constant 0.000000e+00 : f32
      %129 = vector.broadcast %cst_57 : f32 to vector<8x128xf32>
      %130 = arith.subf %129, %128 : vector<8x128xf32>
      %131 = math.exp %130 : vector<8x128xf32>
      %cst_58 = arith.constant 1.000000e+00 : f32
      %132 = vector.broadcast %cst_58 : f32 to vector<8x128xf32>
      %133 = arith.addf %132, %131 : vector<8x128xf32>
      %134 = tpu.reciprocal %133 {approx = true} : vector<8x128xf32> -> vector<8x128xf32>
      %c0_59 = arith.constant 0 : index
      %c0_60 = arith.constant 0 : index
      %135 = vector.load %arg5[%c0_59, %c0_60] : memref<8x128xf32, #tpu.memory_space<vmem>>, vector<8x128xf32>
      %cst_61 = arith.constant 5.000000e-01 : f32
      %136 = vector.broadcast %cst_61 : f32 to vector<8x128xf32>
      %137 = arith.cmpf ogt, %135, %136 : vector<8x128xf32>
      %c0_62 = arith.constant 0 : index
      %c0_63 = arith.constant 0 : index
      %138 = vector.load %arg4[%c0_62, %c0_63] : memref<8x128xf32, #tpu.memory_space<vmem>>, vector<8x128xf32>
      %139 = arith.select %137, %134, %138 : vector<8x128xi1>, vector<8x128xf32>
      %c0_64 = arith.constant 0 : index
      %c0_65 = arith.constant 0 : index
      %140 = vector.load %arg6[%c0_64, %c0_65] : memref<8x128xf32, #tpu.memory_space<vmem>>, vector<8x128xf32>
      tpu.vector_store %arg6[%c0_64, %c0_65], %139 {strides = array<i32>} : memref<8x128xf32, #tpu.memory_space<vmem>>, vector<8x128xf32>,
    } else {
    }
    return
  }
  func.func @transform_0(%arg0: i32) -> i32 {
    %c0_i32 = arith.constant 0 : i32
    %c0_i32_0 = arith.constant 0 : i32
    return %c0_i32 : i32
  }
  func.func @transform_1(%arg0: i32) -> (i32, i32) {
    %c0_i32 = arith.constant 0 : i32
    %c0_i32_0 = arith.constant 0 : i32
    %c0_i32_1 = arith.constant 0 : i32
    return %c0_i32, %c0_i32_0 : i32, i32
  }
  func.func @transform_2(%arg0: i32) -> (i32, i32) {
    %c0_i32 = arith.constant 0 : i32
    %c0_i32_0 = arith.constant 0 : i32
    %c0_i32_1 = arith.constant 0 : i32
    return %c0_i32, %c0_i32_0 : i32, i32
  }
  func.func @transform_3(%arg0: i32) -> (i32, i32) {
    %c0_i32 = arith.constant 0 : i32
    %c0_i32_0 = arith.constant 0 : i32
    return %arg0, %c0_i32 : i32, i32
  }
  func.func @transform_4(%arg0: i32) -> (i32, i32) {
    %c0_i32 = arith.constant 0 : i32
    %c0_i32_0 = arith.constant 0 : i32
    return %arg0, %c0_i32 : i32, i32
  }
  func.func @transform_5(%arg0: i32) -> (i32, i32) {
    %c0_i32 = arith.constant 0 : i32
    %c0_i32_0 = arith.constant 0 : i32
    return %arg0, %c0_i32 : i32, i32
  }
}

module attributes {stable_mosaic.version = 11 : i64} {
  func.func @refine_kernel(%arg0: memref<9x9x9xf32, #tpu.memory_space<vmem>>, %arg1: memref<17x9xf32, #tpu.memory_space<vmem>>, %arg2: memref<17x9xf32, #tpu.memory_space<vmem>>, %arg3: memref<17x17xf32, #tpu.memory_space<vmem>>, %arg4: memref<17x17xf32, #tpu.memory_space<vmem>>, %arg5: memref<17x17x17xf32, #tpu.memory_space<vmem>>, %arg6: memref<17x17x17xf32, #tpu.memory_space<vmem>>, %arg7: memref<17x17x17xf32, #tpu.memory_space<vmem>>) attributes {dimension_semantics = [], scalar_prefetch = 0 : i64, scratch_operands = 0 : i64, tpu.core_type = #tpu.core_type<tc>} {
    %c0 = arith.constant 0 : index
    %c0_0 = arith.constant 0 : index
    %c0_1 = arith.constant 0 : index
    %0 = vector.load %arg0[%c0, %c0_0, %c0_1] : memref<9x9x9xf32, #tpu.memory_space<vmem>>, vector<9x9x9xf32>
    %cst = arith.constant 5.000000e-01 : f32
    %1 = vector.broadcast %cst : f32 to vector<9x9x9xf32>
    %2 = arith.cmpf ogt, %0, %1 : vector<9x9x9xf32>
    %3 = arith.extui %2 : vector<9x9x9xi1> to vector<9x9x9xi32>
    %4 = arith.sitofp %3 : vector<9x9x9xi32> to vector<9x9x9xf32>
    %5 = tpu.concatenate %0, %4 in 0 : vector<9x9x9xf32>, vector<9x9x9xf32> -> vector<18x9x9xf32>
    %c0_2 = arith.constant 0 : index
    %c0_3 = arith.constant 0 : index
    %6 = vector.load %arg1[%c0_2, %c0_3] : memref<17x9xf32, #tpu.memory_space<vmem>>, vector<17x9xf32>
    %7 = vector.shape_cast %6 : vector<17x9xf32> to vector<1x17x9xf32>
    %8 = vector.shape_cast %7 : vector<1x17x9xf32> to vector<1x17x9xf32>
    %9 = vector.broadcast %8 : vector<1x17x9xf32> to vector<18x17x9xf32>
    %c0_4 = arith.constant 0 : index
    %c0_5 = arith.constant 0 : index
    %10 = vector.load %arg2[%c0_4, %c0_5] : memref<17x9xf32, #tpu.memory_space<vmem>>, vector<17x9xf32>
    %11 = vector.shape_cast %10 : vector<17x9xf32> to vector<1x17x9xf32>
    %12 = vector.shape_cast %11 : vector<1x17x9xf32> to vector<1x17x9xf32>
    %13 = vector.broadcast %12 : vector<1x17x9xf32> to vector<18x17x9xf32>
    "tpu.trace_start"() <{level = 10 : i32, message = "bqd,bkd->bqk"}> : () -> ()
    %cst_6 = arith.constant dense<0.000000e+00> : vector<18x9x17xf32>
    %14 = tpu.matmul %5, %9, %cst_6 {dimension_numbers = #tpu.dot_dimension_numbers<[2], [2], [1], [1], [0, 0, 0, 1, 1, 1], [0], [0]>} : vector<18x9x9xf32>, vector<18x17x9xf32>, vector<18x9x17xf32> -> vector<18x9x17xf32>
    "tpu.trace_stop"() : () -> ()
    "tpu.trace_start"() <{level = 10 : i32, message = "bqk,bkd->bqd"}> : () -> ()
    %cst_7 = arith.constant dense<0.000000e+00> : vector<18x17x17xf32>
    %15 = tpu.matmul %13, %14, %cst_7 {dimension_numbers = #tpu.dot_dimension_numbers<[2], [1], [1], [2], [0, 0, 0, 1, 1, 2], [0], [0]>} : vector<18x17x9xf32>, vector<18x9x17xf32>, vector<18x17x17xf32> -> vector<18x17x17xf32>
    "tpu.trace_stop"() : () -> ()
    %16 = vector.extract_strided_slice %15 {offsets = [0, 0, 0], sizes = [9, 17, 17], strides = [1, 1, 1]} : vector<18x17x17xf32> to vector<9x17x17xf32>
    %17 = vector.extract_strided_slice %16 {offsets = [0, 0, 0], sizes = [8, 17, 17], strides = [1, 1, 1]} : vector<9x17x17xf32> to vector<8x17x17xf32>
    %18 = vector.extract_strided_slice %16 {offsets = [1, 0, 0], sizes = [8, 17, 17], strides = [1, 1, 1]} : vector<9x17x17xf32> to vector<8x17x17xf32>
    %19 = arith.addf %17, %18 : vector<8x17x17xf32>
    %cst_8 = arith.constant 5.000000e-01 : f32
    %20 = vector.broadcast %cst_8 : f32 to vector<8x17x17xf32>
    %21 = arith.mulf %20, %19 : vector<8x17x17xf32>
    %22 = vector.extract_strided_slice %16 {offsets = [8, 0, 0], sizes = [1, 17, 17], strides = [1, 1, 1]} : vector<9x17x17xf32> to vector<1x17x17xf32>
    %23 = tpu.concatenate %21, %22 in 0 : vector<8x17x17xf32>, vector<1x17x17xf32> -> vector<9x17x17xf32>
    %24 = vector.shape_cast %16 : vector<9x17x17xf32> to vector<9x1x17x17xf32>
    %25 = vector.shape_cast %23 : vector<9x17x17xf32> to vector<9x1x17x17xf32>
    %26 = tpu.concatenate %24, %25 in 1 : vector<9x1x17x17xf32>, vector<9x1x17x17xf32> -> vector<9x2x17x17xf32>
    %27 = vector.shape_cast %26 : vector<9x2x17x17xf32> to vector<18x17x17xf32>
    %28 = vector.extract_strided_slice %27 {offsets = [0, 0, 0], sizes = [17, 17, 17], strides = [1, 1, 1]} : vector<18x17x17xf32> to vector<17x17x17xf32>
    %29 = vector.extract_strided_slice %15 {offsets = [9, 0, 0], sizes = [9, 17, 17], strides = [1, 1, 1]} : vector<18x17x17xf32> to vector<9x17x17xf32>
    %30 = vector.extract_strided_slice %29 {offsets = [0, 0, 0], sizes = [8, 17, 17], strides = [1, 1, 1]} : vector<9x17x17xf32> to vector<8x17x17xf32>
    %31 = vector.extract_strided_slice %29 {offsets = [1, 0, 0], sizes = [8, 17, 17], strides = [1, 1, 1]} : vector<9x17x17xf32> to vector<8x17x17xf32>
    %32 = arith.addf %30, %31 : vector<8x17x17xf32>
    %cst_9 = arith.constant 5.000000e-01 : f32
    %33 = vector.broadcast %cst_9 : f32 to vector<8x17x17xf32>
    %34 = arith.mulf %33, %32 : vector<8x17x17xf32>
    %35 = vector.extract_strided_slice %29 {offsets = [8, 0, 0], sizes = [1, 17, 17], strides = [1, 1, 1]} : vector<9x17x17xf32> to vector<1x17x17xf32>
    %36 = tpu.concatenate %34, %35 in 0 : vector<8x17x17xf32>, vector<1x17x17xf32> -> vector<9x17x17xf32>
    %37 = vector.shape_cast %29 : vector<9x17x17xf32> to vector<9x1x17x17xf32>
    %38 = vector.shape_cast %36 : vector<9x17x17xf32> to vector<9x1x17x17xf32>
    %39 = tpu.concatenate %37, %38 in 1 : vector<9x1x17x17xf32>, vector<9x1x17x17xf32> -> vector<9x2x17x17xf32>
    %40 = vector.shape_cast %39 : vector<9x2x17x17xf32> to vector<18x17x17xf32>
    %41 = vector.extract_strided_slice %40 {offsets = [0, 0, 0], sizes = [17, 17, 17], strides = [1, 1, 1]} : vector<18x17x17xf32> to vector<17x17x17xf32>
    %cst_10 = arith.constant 9.99999974E-5 : f32
    %42 = vector.broadcast %cst_10 : f32 to vector<17x17x17xf32>
    %43 = arith.cmpf ogt, %41, %42 : vector<17x17x17xf32>
    %cst_11 = arith.constant 0.999899983 : f32
    %44 = vector.broadcast %cst_11 : f32 to vector<17x17x17xf32>
    %45 = arith.cmpf olt, %41, %44 : vector<17x17x17xf32>
    %46 = arith.andi %43, %45 : vector<17x17x17xi1>
    %47 = arith.extui %46 : vector<17x17x17xi1> to vector<17x17x17xi32>
    %48 = arith.sitofp %47 : vector<17x17x17xi32> to vector<17x17x17xf32>
    %c0_12 = arith.constant 0 : index
    %c0_13 = arith.constant 0 : index
    %49 = vector.load %arg3[%c0_12, %c0_13] : memref<17x17xf32, #tpu.memory_space<vmem>>, vector<17x17xf32>
    %50 = vector.shape_cast %49 : vector<17x17xf32> to vector<1x17x17xf32>
    %51 = vector.shape_cast %50 : vector<1x17x17xf32> to vector<1x17x17xf32>
    %52 = vector.broadcast %51 : vector<1x17x17xf32> to vector<17x17x17xf32>
    %c0_14 = arith.constant 0 : index
    %c0_15 = arith.constant 0 : index
    %53 = vector.load %arg4[%c0_14, %c0_15] : memref<17x17xf32, #tpu.memory_space<vmem>>, vector<17x17xf32>
    %54 = vector.shape_cast %53 : vector<17x17xf32> to vector<1x17x17xf32>
    %55 = vector.shape_cast %54 : vector<1x17x17xf32> to vector<1x17x17xf32>
    %56 = vector.broadcast %55 : vector<1x17x17xf32> to vector<17x17x17xf32>
    "tpu.trace_start"() <{level = 10 : i32, message = "bqd,bkd->bqk"}> : () -> ()
    %cst_16 = arith.constant dense<0.000000e+00> : vector<17x17x17xf32>
    %57 = tpu.matmul %48, %52, %cst_16 {dimension_numbers = #tpu.dot_dimension_numbers<[2], [2], [1], [1], [0, 0, 0, 1, 1, 1], [0], [0]>} : vector<17x17x17xf32>, vector<17x17x17xf32>, vector<17x17x17xf32> -> vector<17x17x17xf32>
    "tpu.trace_stop"() : () -> ()
    "tpu.trace_start"() <{level = 10 : i32, message = "bqk,bkd->bqd"}> : () -> ()
    %cst_17 = arith.constant dense<0.000000e+00> : vector<17x17x17xf32>
    %58 = tpu.matmul %56, %57, %cst_17 {dimension_numbers = #tpu.dot_dimension_numbers<[2], [1], [1], [2], [0, 0, 0, 1, 1, 2], [0], [0]>} : vector<17x17x17xf32>, vector<17x17x17xf32>, vector<17x17x17xf32> -> vector<17x17x17xf32>
    %cst_18 = arith.constant 0.000000e+00 : f32
    "tpu.trace_stop"() : () -> ()
    %59 = vector.broadcast %cst_18 : f32 to vector<1x17x17xf32>
    %60 = vector.extract_strided_slice %58 {offsets = [0, 0, 0], sizes = [16, 17, 17], strides = [1, 1, 1]} : vector<17x17x17xf32> to vector<16x17x17xf32>
    %61 = tpu.concatenate %59, %60 in 0 : vector<1x17x17xf32>, vector<16x17x17xf32> -> vector<17x17x17xf32>
    %62 = arith.addf %58, %61 : vector<17x17x17xf32>
    %63 = vector.extract_strided_slice %58 {offsets = [1, 0, 0], sizes = [16, 17, 17], strides = [1, 1, 1]} : vector<17x17x17xf32> to vector<16x17x17xf32>
    %64 = tpu.concatenate %63, %59 in 0 : vector<16x17x17xf32>, vector<1x17x17xf32> -> vector<17x17x17xf32>
    %65 = arith.addf %62, %64 : vector<17x17x17xf32>
    %cst_19 = arith.constant 5.000000e-01 : f32
    %66 = vector.broadcast %cst_19 : f32 to vector<17x17x17xf32>
    %67 = arith.cmpf ogt, %65, %66 : vector<17x17x17xf32>
    %c0_20 = arith.constant 0 : index
    %c0_21 = arith.constant 0 : index
    %c0_22 = arith.constant 0 : index
    %68 = vector.load %arg5[%c0_20, %c0_21, %c0_22] : memref<17x17x17xf32, #tpu.memory_space<vmem>>, vector<17x17x17xf32>
    %cst_23 = arith.constant 5.000000e-01 : f32
    %69 = vector.broadcast %cst_23 : f32 to vector<17x17x17xf32>
    %70 = arith.cmpf olt, %68, %69 : vector<17x17x17xf32>
    %71 = arith.andi %67, %70 : vector<17x17x17xi1>
    %72 = arith.extui %71 : vector<17x17x17xi1> to vector<17x17x17xi32>
    %73 = arith.sitofp %72 : vector<17x17x17xi32> to vector<17x17x17xf32>
    %c0_24 = arith.constant 0 : index
    %c0_25 = arith.constant 0 : index
    %c0_26 = arith.constant 0 : index
    %74 = vector.load %arg6[%c0_24, %c0_25, %c0_26] : memref<17x17x17xf32, #tpu.memory_space<vmem>>, vector<17x17x17xf32>
    tpu.vector_store %arg6[%c0_24, %c0_25, %c0_26], %28 {strides = array<i32>} : memref<17x17x17xf32, #tpu.memory_space<vmem>>, vector<17x17x17xf32>,
    %c0_27 = arith.constant 0 : index
    %c0_28 = arith.constant 0 : index
    %c0_29 = arith.constant 0 : index
    %75 = vector.load %arg7[%c0_27, %c0_28, %c0_29] : memref<17x17x17xf32, #tpu.memory_space<vmem>>, vector<17x17x17xf32>
    tpu.vector_store %arg7[%c0_27, %c0_28, %c0_29], %73 {strides = array<i32>} : memref<17x17x17xf32, #tpu.memory_space<vmem>>, vector<17x17x17xf32>,
    return
  }
}

module attributes {stable_mosaic.version = 11 : i64} {
  func.func @query_merge_kernel(%arg0: i32, %arg1: memref<3xi32, #tpu.memory_space<smem>>, %arg2: memref<8x8xf32, #tpu.memory_space<smem>>, %arg3: memref<2x384xf32, #tpu.memory_space<vmem>>, %arg4: memref<8x384xf32, #tpu.memory_space<vmem>>, %arg5: memref<8x384xf32, #tpu.memory_space<vmem>>, %arg6: memref<8x384xf32, #tpu.memory_space<vmem>>) attributes {dimension_semantics = [#tpu.dimension_semantics<parallel>], iteration_bounds = array<i64: 3>, scalar_prefetch = 0 : i64, scratch_operands = 0 : i64, tpu.core_type = #tpu.core_type<tc>, window_params = [{transform_indices = @transform_0, window_bounds = array<i64: 3>}, {transform_indices = @transform_1, window_bounds = array<i64: 8, 8>}, {pipeline_mode = #tpu.pipeline_mode<synchronous>, transform_indices = @transform_2, window_bounds = array<i64: 2, 384>}, {transform_indices = @transform_3, window_bounds = array<i64: 8, 384>}, {transform_indices = @transform_4, window_bounds = array<i64: 8, 384>}, {transform_indices = @transform_5, window_bounds = array<i64: 8, 384>}]} {
    %0 = arith.index_cast %arg0 : i32 to index
    %1 = memref.load %arg1[%0] : memref<3xi32, #tpu.memory_space<smem>>
    %c0_i32 = arith.constant 0 : i32
    %2 = arith.cmpi eq, %1, %c0_i32 : i32
    %3 = arith.extui %2 : i1 to i32
    %c0_i32_0 = arith.constant 0 : i32
    %4 = arith.cmpi ne, %3, %c0_i32_0 : i32
    scf.if %4 {
      %c0 = arith.constant 0 : index
      %c0_3 = arith.constant 0 : index
      %10 = vector.load %arg4[%c0, %c0_3] : memref<8x384xf32, #tpu.memory_space<vmem>>, vector<8x384xf32>
      %c0_4 = arith.constant 0 : index
      %c0_5 = arith.constant 0 : index
      %11 = vector.load %arg6[%c0_4, %c0_5] : memref<8x384xf32, #tpu.memory_space<vmem>>, vector<8x384xf32>
      tpu.vector_store %arg6[%c0_4, %c0_5], %10 {strides = array<i32>} : memref<8x384xf32, #tpu.memory_space<vmem>>, vector<8x384xf32>,
    } else {
    }
    %5 = arith.index_cast %arg0 : i32 to index
    %6 = memref.load %arg1[%5] : memref<3xi32, #tpu.memory_space<smem>>
    %c0_i32_1 = arith.constant 0 : i32
    %7 = arith.cmpi sgt, %6, %c0_i32_1 : i32
    %8 = arith.extui %7 : i1 to i32
    %c0_i32_2 = arith.constant 0 : i32
    %9 = arith.cmpi ne, %8, %c0_i32_2 : i32
    scf.if %9 {
      %c0 = arith.constant 0 : index
      %c0_3 = arith.constant 0 : index
      %10 = vector.load %arg3[%c0, %c0_3] : memref<2x384xf32, #tpu.memory_space<vmem>>, vector<1x384xf32>
      %c1 = arith.constant 1 : index
      %c0_4 = arith.constant 0 : index
      %11 = vector.load %arg3[%c1, %c0_4] : memref<2x384xf32, #tpu.memory_space<vmem>>, vector<1x384xf32>
      %12 = tpu.iota {dimensions = array<i32: 0>} : vector<8x384xi32>
      %c8_i32 = arith.constant 8 : i32
      %13 = arith.muli %arg0, %c8_i32 : i32
      %14 = vector.broadcast %13 : i32 to vector<8x384xi32>
      %15 = arith.addi %12, %14 : vector<8x384xi32>
      %16 = arith.sitofp %15 : vector<8x384xi32> to vector<8x384xf32>
      %c0_5 = arith.constant 0 : index
      %c0_6 = arith.constant 0 : index
      %17 = memref.load %arg2[%c0_5, %c0_6] : memref<8x8xf32, #tpu.memory_space<smem>>
      %18 = vector.broadcast %17 : f32 to vector<1x384xf32>
      %19 = arith.mulf %10, %18 : vector<1x384xf32>
      %c0_7 = arith.constant 0 : index
      %c3 = arith.constant 3 : index
      %20 = memref.load %arg2[%c0_7, %c3] : memref<8x8xf32, #tpu.memory_space<smem>>
      %21 = vector.broadcast %20 : f32 to vector<1x384xf32>
      %22 = arith.addf %19, %21 : vector<1x384xf32>
      %c0_8 = arith.constant 0 : index
      %c1_9 = arith.constant 1 : index
      %23 = memref.load %arg2[%c0_8, %c1_9] : memref<8x8xf32, #tpu.memory_space<smem>>
      %24 = vector.broadcast %23 : f32 to vector<1x384xf32>
      %25 = arith.mulf %11, %24 : vector<1x384xf32>
      %c0_10 = arith.constant 0 : index
      %c4 = arith.constant 4 : index
      %26 = memref.load %arg2[%c0_10, %c4] : memref<8x8xf32, #tpu.memory_space<smem>>
      %27 = vector.broadcast %26 : f32 to vector<1x384xf32>
      %28 = arith.addf %25, %27 : vector<1x384xf32>
      %c0_11 = arith.constant 0 : index
      %c2 = arith.constant 2 : index
      %29 = memref.load %arg2[%c0_11, %c2] : memref<8x8xf32, #tpu.memory_space<smem>>
      %30 = vector.broadcast %29 : f32 to vector<8x384xf32>
      %31 = arith.mulf %16, %30 : vector<8x384xf32>
      %c0_12 = arith.constant 0 : index
      %c5 = arith.constant 5 : index
      %32 = memref.load %arg2[%c0_12, %c5] : memref<8x8xf32, #tpu.memory_space<smem>>
      %33 = vector.broadcast %32 : f32 to vector<8x384xf32>
      %34 = arith.addf %31, %33 : vector<8x384xf32>
      %35 = arith.mulf %22, %22 : vector<1x384xf32>
      %36 = arith.mulf %28, %28 : vector<1x384xf32>
      %37 = arith.addf %35, %36 : vector<1x384xf32>
      %38 = arith.mulf %34, %34 : vector<8x384xf32>
      %39 = vector.broadcast %37 : vector<1x384xf32> to vector<8x384xf32>
      %40 = arith.addf %39, %38 : vector<8x384xf32>
      %c5_13 = arith.constant 5 : index
      %c0_14 = arith.constant 0 : index
      %41 = memref.load %arg2[%c5_13, %c0_14] : memref<8x8xf32, #tpu.memory_space<smem>>
      %c5_15 = arith.constant 5 : index
      %c1_16 = arith.constant 1 : index
      %42 = memref.load %arg2[%c5_15, %c1_16] : memref<8x8xf32, #tpu.memory_space<smem>>
      %43 = vector.broadcast %42 : f32 to vector<8x384xf32>
      %44 = arith.subf %43, %40 : vector<8x384xf32>
      %45 = vector.broadcast %41 : f32 to vector<8x384xf32>
      %46 = arith.mulf %45, %44 : vector<8x384xf32>
      %c1_17 = arith.constant 1 : index
      %c0_18 = arith.constant 0 : index
      %47 = memref.load %arg2[%c1_17, %c0_18] : memref<8x8xf32, #tpu.memory_space<smem>>
      %48 = vector.broadcast %47 : f32 to vector<1x384xf32>
      %49 = arith.mulf %48, %22 : vector<1x384xf32>
      %c1_19 = arith.constant 1 : index
      %c1_20 = arith.constant 1 : index
      %50 = memref.load %arg2[%c1_19, %c1_20] : memref<8x8xf32, #tpu.memory_space<smem>>
      %51 = vector.broadcast %50 : f32 to vector<1x384xf32>
      %52 = arith.mulf %51, %28 : vector<1x384xf32>
      %53 = arith.addf %49, %52 : vector<1x384xf32>
      %c1_21 = arith.constant 1 : index
      %c2_22 = arith.constant 2 : index
      %54 = memref.load %arg2[%c1_21, %c2_22] : memref<8x8xf32, #tpu.memory_space<smem>>
      %55 = vector.broadcast %54 : f32 to vector<8x384xf32>
      %56 = arith.mulf %55, %34 : vector<8x384xf32>
      %57 = vector.broadcast %53 : vector<1x384xf32> to vector<8x384xf32>
      %58 = arith.addf %57, %56 : vector<8x384xf32>
      %c1_23 = arith.constant 1 : index
      %c3_24 = arith.constant 3 : index
      %59 = memref.load %arg2[%c1_23, %c3_24] : memref<8x8xf32, #tpu.memory_space<smem>>
      %60 = vector.broadcast %59 : f32 to vector<8x384xf32>
      %61 = arith.addf %58, %60 : vector<8x384xf32>
      %c1_25 = arith.constant 1 : index
      %c4_26 = arith.constant 4 : index
      %62 = memref.load %arg2[%c1_25, %c4_26] : memref<8x8xf32, #tpu.memory_space<smem>>
      %63 = math.tanh %61 : vector<8x384xf32>
      %64 = vector.broadcast %62 : f32 to vector<8x384xf32>
      %65 = arith.mulf %64, %63 : vector<8x384xf32>
      %66 = arith.addf %46, %65 : vector<8x384xf32>
      %c2_27 = arith.constant 2 : index
      %c0_28 = arith.constant 0 : index
      %67 = memref.load %arg2[%c2_27, %c0_28] : memref<8x8xf32, #tpu.memory_space<smem>>
      %68 = vector.broadcast %67 : f32 to vector<1x384xf32>
      %69 = arith.mulf %68, %22 : vector<1x384xf32>
      %c2_29 = arith.constant 2 : index
      %c1_30 = arith.constant 1 : index
      %70 = memref.load %arg2[%c2_29, %c1_30] : memref<8x8xf32, #tpu.memory_space<smem>>
      %71 = vector.broadcast %70 : f32 to vector<1x384xf32>
      %72 = arith.mulf %71, %28 : vector<1x384xf32>
      %73 = arith.addf %69, %72 : vector<1x384xf32>
      %c2_31 = arith.constant 2 : index
      %c2_32 = arith.constant 2 : index
      %74 = memref.load %arg2[%c2_31, %c2_32] : memref<8x8xf32, #tpu.memory_space<smem>>
      %75 = vector.broadcast %74 : f32 to vector<8x384xf32>
      %76 = arith.mulf %75, %34 : vector<8x384xf32>
      %77 = vector.broadcast %73 : vector<1x384xf32> to vector<8x384xf32>
      %78 = arith.addf %77, %76 : vector<8x384xf32>
      %c2_33 = arith.constant 2 : index
      %c3_34 = arith.constant 3 : index
      %79 = memref.load %arg2[%c2_33, %c3_34] : memref<8x8xf32, #tpu.memory_space<smem>>
      %80 = vector.broadcast %79 : f32 to vector<8x384xf32>
      %81 = arith.addf %78, %80 : vector<8x384xf32>
      %c2_35 = arith.constant 2 : index
      %c4_36 = arith.constant 4 : index
      %82 = memref.load %arg2[%c2_35, %c4_36] : memref<8x8xf32, #tpu.memory_space<smem>>
      %83 = math.tanh %81 : vector<8x384xf32>
      %84 = vector.broadcast %82 : f32 to vector<8x384xf32>
      %85 = arith.mulf %84, %83 : vector<8x384xf32>
      %86 = arith.addf %66, %85 : vector<8x384xf32>
      %c3_37 = arith.constant 3 : index
      %c0_38 = arith.constant 0 : index
      %87 = memref.load %arg2[%c3_37, %c0_38] : memref<8x8xf32, #tpu.memory_space<smem>>
      %88 = vector.broadcast %87 : f32 to vector<1x384xf32>
      %89 = arith.mulf %88, %22 : vector<1x384xf32>
      %c3_39 = arith.constant 3 : index
      %c1_40 = arith.constant 1 : index
      %90 = memref.load %arg2[%c3_39, %c1_40] : memref<8x8xf32, #tpu.memory_space<smem>>
      %91 = vector.broadcast %90 : f32 to vector<1x384xf32>
      %92 = arith.mulf %91, %28 : vector<1x384xf32>
      %93 = arith.addf %89, %92 : vector<1x384xf32>
      %c3_41 = arith.constant 3 : index
      %c2_42 = arith.constant 2 : index
      %94 = memref.load %arg2[%c3_41, %c2_42] : memref<8x8xf32, #tpu.memory_space<smem>>
      %95 = vector.broadcast %94 : f32 to vector<8x384xf32>
      %96 = arith.mulf %95, %34 : vector<8x384xf32>
      %97 = vector.broadcast %93 : vector<1x384xf32> to vector<8x384xf32>
      %98 = arith.addf %97, %96 : vector<8x384xf32>
      %c3_43 = arith.constant 3 : index
      %c3_44 = arith.constant 3 : index
      %99 = memref.load %arg2[%c3_43, %c3_44] : memref<8x8xf32, #tpu.memory_space<smem>>
      %100 = vector.broadcast %99 : f32 to vector<8x384xf32>
      %101 = arith.addf %98, %100 : vector<8x384xf32>
      %c3_45 = arith.constant 3 : index
      %c4_46 = arith.constant 4 : index
      %102 = memref.load %arg2[%c3_45, %c4_46] : memref<8x8xf32, #tpu.memory_space<smem>>
      %103 = math.tanh %101 : vector<8x384xf32>
      %104 = vector.broadcast %102 : f32 to vector<8x384xf32>
      %105 = arith.mulf %104, %103 : vector<8x384xf32>
      %106 = arith.addf %86, %105 : vector<8x384xf32>
      %c4_47 = arith.constant 4 : index
      %c0_48 = arith.constant 0 : index
      %107 = memref.load %arg2[%c4_47, %c0_48] : memref<8x8xf32, #tpu.memory_space<smem>>
      %108 = vector.broadcast %107 : f32 to vector<1x384xf32>
      %109 = arith.mulf %108, %22 : vector<1x384xf32>
      %c4_49 = arith.constant 4 : index
      %c1_50 = arith.constant 1 : index
      %110 = memref.load %arg2[%c4_49, %c1_50] : memref<8x8xf32, #tpu.memory_space<smem>>
      %111 = vector.broadcast %110 : f32 to vector<1x384xf32>
      %112 = arith.mulf %111, %28 : vector<1x384xf32>
      %113 = arith.addf %109, %112 : vector<1x384xf32>
      %c4_51 = arith.constant 4 : index
      %c2_52 = arith.constant 2 : index
      %114 = memref.load %arg2[%c4_51, %c2_52] : memref<8x8xf32, #tpu.memory_space<smem>>
      %115 = vector.broadcast %114 : f32 to vector<8x384xf32>
      %116 = arith.mulf %115, %34 : vector<8x384xf32>
      %117 = vector.broadcast %113 : vector<1x384xf32> to vector<8x384xf32>
      %118 = arith.addf %117, %116 : vector<8x384xf32>
      %c4_53 = arith.constant 4 : index
      %c3_54 = arith.constant 3 : index
      %119 = memref.load %arg2[%c4_53, %c3_54] : memref<8x8xf32, #tpu.memory_space<smem>>
      %120 = vector.broadcast %119 : f32 to vector<8x384xf32>
      %121 = arith.addf %118, %120 : vector<8x384xf32>
      %c4_55 = arith.constant 4 : index
      %c4_56 = arith.constant 4 : index
      %122 = memref.load %arg2[%c4_55, %c4_56] : memref<8x8xf32, #tpu.memory_space<smem>>
      %123 = math.tanh %121 : vector<8x384xf32>
      %124 = vector.broadcast %122 : f32 to vector<8x384xf32>
      %125 = arith.mulf %124, %123 : vector<8x384xf32>
      %126 = arith.addf %106, %125 : vector<8x384xf32>
      %cst = arith.constant -6.000000e+01 : f32
      %127 = vector.broadcast %cst : f32 to vector<8x384xf32>
      %128 = arith.maximumf %126, %127 : vector<8x384xf32>
      %cst_57 = arith.constant 0.000000e+00 : f32
      %129 = vector.broadcast %cst_57 : f32 to vector<8x384xf32>
      %130 = arith.subf %129, %128 : vector<8x384xf32>
      %131 = math.exp %130 : vector<8x384xf32>
      %cst_58 = arith.constant 1.000000e+00 : f32
      %132 = vector.broadcast %cst_58 : f32 to vector<8x384xf32>
      %133 = arith.addf %132, %131 : vector<8x384xf32>
      %134 = tpu.reciprocal %133 {approx = true} : vector<8x384xf32> -> vector<8x384xf32>
      %c0_59 = arith.constant 0 : index
      %c0_60 = arith.constant 0 : index
      %135 = vector.load %arg5[%c0_59, %c0_60] : memref<8x384xf32, #tpu.memory_space<vmem>>, vector<8x384xf32>
      %cst_61 = arith.constant 5.000000e-01 : f32
      %136 = vector.broadcast %cst_61 : f32 to vector<8x384xf32>
      %137 = arith.cmpf ogt, %135, %136 : vector<8x384xf32>
      %c0_62 = arith.constant 0 : index
      %c0_63 = arith.constant 0 : index
      %138 = vector.load %arg4[%c0_62, %c0_63] : memref<8x384xf32, #tpu.memory_space<vmem>>, vector<8x384xf32>
      %139 = arith.select %137, %134, %138 : vector<8x384xi1>, vector<8x384xf32>
      %c0_64 = arith.constant 0 : index
      %c0_65 = arith.constant 0 : index
      %140 = vector.load %arg6[%c0_64, %c0_65] : memref<8x384xf32, #tpu.memory_space<vmem>>, vector<8x384xf32>
      tpu.vector_store %arg6[%c0_64, %c0_65], %139 {strides = array<i32>} : memref<8x384xf32, #tpu.memory_space<vmem>>, vector<8x384xf32>,
    } else {
    }
    return
  }
  func.func @transform_0(%arg0: i32) -> i32 {
    %c0_i32 = arith.constant 0 : i32
    %c0_i32_0 = arith.constant 0 : i32
    return %c0_i32 : i32
  }
  func.func @transform_1(%arg0: i32) -> (i32, i32) {
    %c0_i32 = arith.constant 0 : i32
    %c0_i32_0 = arith.constant 0 : i32
    %c0_i32_1 = arith.constant 0 : i32
    return %c0_i32, %c0_i32_0 : i32, i32
  }
  func.func @transform_2(%arg0: i32) -> (i32, i32) {
    %c0_i32 = arith.constant 0 : i32
    %c0_i32_0 = arith.constant 0 : i32
    %c0_i32_1 = arith.constant 0 : i32
    return %c0_i32, %c0_i32_0 : i32, i32
  }
  func.func @transform_3(%arg0: i32) -> (i32, i32) {
    %c0_i32 = arith.constant 0 : i32
    %c0_i32_0 = arith.constant 0 : i32
    return %arg0, %c0_i32 : i32, i32
  }
  func.func @transform_4(%arg0: i32) -> (i32, i32) {
    %c0_i32 = arith.constant 0 : i32
    %c0_i32_0 = arith.constant 0 : i32
    return %arg0, %c0_i32 : i32, i32
  }
  func.func @transform_5(%arg0: i32) -> (i32, i32) {
    %c0_i32 = arith.constant 0 : i32
    %c0_i32_0 = arith.constant 0 : i32
    return %arg0, %c0_i32 : i32, i32
  }
}

</mosaic_0001>

<bundles_post_ra>
// kernel: seg3d_lossless_forward.5
= control target key start
LH: loop header
LB: loop body
LE: loop exit
PB: predicated region body
PF: predicated region fallthrough
CT: control target
= control target key end

     0   :  { %s354_s0 = inlined_call_operand.<no memory space> [shape: s32[1], index: 0, kind: input, shape index: {}]   ;;  %s355_s1 = inlined_call_operand.vmem [shape: f32[8,8], index: 1, kind: input, shape index: {}]   ;;  %s356_s2 = inlined_call_operand.vmem [shape: f32[2,128], index: 2, kind: input, shape index: {}]   ;;  %s357_s3 = inlined_call_operand.vmem [shape: f32[8,128], index: 3, kind: input, shape index: {}]   ;;  %s358_s4 = inlined_call_operand.vmem [shape: f32[8,128], index: 4, kind: input, shape index: {}]   ;;  %s359_s5 = inlined_call_operand.vmem [shape: f32[8,128], index: 5, kind: output, shape index: {}]  }
   0x1   :  { %10 = sst [smem:[#allocation2]] %s354_s0 }
   0x2   :  { %11 = vsyncpa [#allocation4], 0  ;;  %s20_s22 = sshll.u32 %s355_s1, 4  ;;  %s21_s22 = int_to_ptr.vmem [resolvable:$true] %s20_s22 }
   0x3   :  { %s237_s23 = scalar_lea.vmem %s21_s22, 128  ;;  %p242_p1 = scmp.lt.s32.totalorder %s21_s22, %s21_s22 }
   0x4   :  { %p238_p0 = scmp.ne.s32.totalorder %s21_s22, %s237_s23  ;;  %p243_p2 = scmp.lt.s32.totalorder %s237_s23, %s237_s23 }
   0x6   :  { %p244_p3 = por %p243_p2, %p242_p1 }
   0x8   :  { %p245_p4 = pnand %p244_p3, %p238_p0 }
   0xa   :  { %248 = shalt.err (!%p245_p4)
}
   0xb   :  { %s251_s24 = smov [#allocation3]  }
   0xc   :  { %23 = dma.vmem_to_smem %s21_s22, 128, %s251_s24, [#allocation4]  }
   0xd   :  { %249 = dma.done.wait [#allocation4], 128  }
   0xe   :  { %250 = vsyncadd [#allocation4], 4294967168 }
   0xf   :  { %33 = sfence }
  0x10   :  { %s34_s25 = sld [smem:[#allocation2]] }
  0x16   :  { %p195_p5 = scmp.ne.s32.totalorder %s34_s25, 0 }
  0x17   :  { %v39_v0 = vld [vmem:[%s357_s3] sm:$0xff] (!%p195_p5) }
  0x18   :  { %38 = sbr.rel (%p195_p5) target bundleno = 31 (0x1f), region = 29  ;;  %40 = vst [vmem:[%s359_s5] sm:$0xff] (!%p195_p5), %v39_v0 }
  0x1f PF:  { %s41_s28 = sld [smem:[#allocation2]] }
  0x25   :  { %p196_p6 = scmp.le.s32.totalorder %s41_s28, 0 }
  0x26   :  { %v48_v1 = vlaneseq (!%p196_p6)  ;;  %s54_s29 = sld [smem:[#allocation3]] (!%p196_p6)  ;;  %s197_s30 = sld [smem:[#allocation3 + $0x3]] (!%p196_p6)  ;;  %v46_v3 = vld [vmem:[%s356_s2] sm:$0x1] (!%p196_p6)  ;;  %v47_v4 = vld [vmem:[%s356_s2 + $0x1] sm:$0x1] (!%p196_p6) }
  0x27   :  { %45 = sbr.rel (%p196_p6) target bundleno = 114 (0x72), region = 33  ;;  %s198_s6 = sld [smem:[#allocation3 + $0x1]] (!%p196_p6) }
  0x28   :  { %v49_v2 = vshrl.u32 (!%p196_p6), %v48_v1, 7  ;;  %s199_s7 = sld [smem:[#allocation3 + $0x4]] (!%p196_p6)  ;;  %s200_s8 = sld [smem:[#allocation3 + $0x2]] (!%p196_p6) }
  0x29   :  { %s201_s9 = sld [smem:[#allocation3 + $0x5]] (!%p196_p6)  ;;  %s204_s12 = sld [smem:[#allocation3 + $0x80]] (!%p196_p6) }
  0x2a   :  { %v53_v5 = vcvt.s32.f32 (!%p196_p6), %v49_v2  ;;  %s205_s15 = sld [smem:[#allocation3 + $0x81]] (!%p196_p6)  ;;  %s300_s16 = sld [smem:[#allocation3 + $0x82]] (!%p196_p6)  ;;  %v78_v23 = vsub.s32 (!%p196_p6), 0, %v49_v2 }
  0x2b   :  { %s209_s17 = sld [smem:[#allocation3 + $0x100]] (!%p196_p6)  ;;  %s302_s18 = sld [smem:[#allocation3 + $0x101]] (!%p196_p6) }
  0x2c   :  { %v55_v6 = vstv (!%p196_p6), %s54_s29  ;;  %v58_v8 = vstv (!%p196_p6), %s197_s30  ;;  %s304_s19 = sld [smem:[#allocation3 + $0x83]] (!%p196_p6)  ;;  %s306_s20 = sld [smem:[#allocation3 + $0x102]] (!%p196_p6) }
  0x2d   :  { %v56_v7 = vmul.f32 (!%p196_p6), %v55_v6, %v46_v3  ;;  %v61_v9 = vstv (!%p196_p6), %s198_s6  ;;  %s308_s2 = sld [smem:[#allocation3 + $0x180]] (!%p196_p6)  ;;  %s310_s21 = sld [smem:[#allocation3 + $0x181]] (!%p196_p6) }
  0x2e   :  { %v62_v10 = vmul.f32 %v61_v9, %v47_v4  ;;  %v64_v11 = vstv %s199_s7  ;;  %v67_v12 = vstv %s200_s8  ;;  %s312_s22 = sld [smem:[#allocation3 + $0x182]]  ;;  %s314_s23 = sld [smem:[#allocation3 + $0x103]] }
  0x2f   :  { %v59_v13 = vadd.f32 %v58_v8, %v56_v7  ;;  %v68_v14 = vmul.f32 %v67_v12, %v53_v5  ;;  %v70_v15 = vstv %s201_s9  ;;  %v88_v17 = vstv %s204_s12  ;;  %s317_s24 = sld [smem:[#allocation3 + $0x200]]  ;;  %s319_s25 = sld [smem:[#allocation3 + $0x201]] }
  0x30   :  { %v65_v16 = vadd.f32 %v64_v11, %v62_v10  ;;  %v91_v21 = vstv %s205_s15  ;;  %v95_v25 = vstv %s300_s16  ;;  %s321_s0 = sld [smem:[#allocation3 + $0x202]]  ;;  %s325_s26 = sld [smem:[#allocation3 + $0x183]] }
  0x31   :  { %v71_v18 = vadd.f32 %v70_v15, %v68_v14  ;;  %v72_v19 = vmul.f32 %v59_v13, %v59_v13  ;;  %v89_v20 = vmul.f32 %v88_v17, %v59_v13  ;;  %v111_v26 = vstv %s209_s17  ;;  %s327_s1 = sld [smem:[#allocation3 + $0x281]]  ;;  %s335_s27 = sld [smem:[#allocation3 + $0x203]] }
  0x32   :  { %v73_v22 = vmul.f32 %v65_v16, %v65_v16  ;;  %v92_v24 = vmul.f32 %v91_v21, %v65_v16  ;;  %v112_v29 = vmul.f32 %v111_v26, %v59_v13  ;;  %v114_v30 = vstv %s302_s18  ;;  %s337_s28 = sld [smem:[#allocation3 + $0x280]]  ;;  %s208_s29 = sld [smem:[#allocation3 + $0x84]] }
  0x33   :  { %v96_v28 = vmul.f32 %v95_v25, %v71_v18  ;;  %v115_v32 = vmul.f32 %v114_v30, %v65_v16  ;;  %v118_v33 = vstv %s306_s20  ;;  %v103_v35 = vstv %s304_s19  ;;  %s213_s30 = sld [smem:[#allocation3 + $0x104]]  ;;  %v185_v30 = vld [vmem:[%s358_s4] sm:$0xff] }
  0x34   :  { %v93_v27 = vadd.f32 %v92_v24, %v89_v20  ;;  %v74_v31 = vadd.f32 %v73_v22, %v72_v19  ;;  %v119_v36 = vmul.f32 %v118_v33, %v71_v18  ;;  %v134_v37 = vstv %s308_s2  ;;  %s218_s6 = sld [smem:[#allocation3 + $0x184]] }
  0x35   :  { %v116_v38 = vadd.f32 %v115_v32, %v112_v29  ;;  %v135_v39 = vmul.f32 %v134_v37, %v59_v13  ;;  %v137_v40 = vstv %s310_s21  ;;  %v141_v41 = vstv %s312_s22  ;;  %s223_s7 = sld [smem:[#allocation3 + $0x204]] }
  0x36   :  { %v100_v34 = vrot.slane %v93_v27, %v78_v23  ;;  %v75_v42 = vmul.f32 %v71_v18, %v71_v18  ;;  %v138_v44 = vmul.f32 %v137_v40, %v65_v16  ;;  %v79_v45 = vrot.slane %v74_v31, %v78_v23  ;;  %v187_v31 = vld [vmem:[%s357_s3] sm:$0xff] }
  0x37   :  { %v123_v46 = vrot.slane %v116_v38, %v78_v23  ;;  %v126_v47 = vstv %s314_s23  ;;  %v157_v48 = vstv %s317_s24  ;;  %v142_v51 = vmul.f32 %v141_v41, %v71_v18 }
  0x38   :  { %v101_v43 = vadd.f32 %v100_v34, %v96_v28  ;;  %v139_v50 = vadd.f32 %v138_v44, %v135_v39  ;;  %v158_v52 = vmul.f32 %v157_v48, %v59_v13  ;;  %v160_v54 = vstv %s319_s25 }
  0x39   :  { %v124_v53 = vadd.f32 %v123_v46, %v119_v36  ;;  %v164_v55 = vstv %s321_s0  ;;  %v161_v57 = vmul.f32 %v160_v54, %v65_v16  ;;  %v80_v58 = vadd.f32 %v79_v45, %v75_v42 }
  0x3a   :  { %v104_v49 = vadd.f32 %v103_v35, %v101_v43  ;;  %v146_v56 = vrot.slane %v139_v50, %v78_v23  ;;  %v149_v60 = vstv %s325_s26  ;;  %v83_v61 = vstv %s327_s1 }
  0x3b   :  { %v127_v59 = vadd.f32 %v126_v47, %v124_v53  ;;  %v162_v63 = vadd.f32 %v161_v57, %v158_v52  ;;  %v165_v0 = vmul.f32 %v164_v55, %v71_v18  ;;  %v84_v3 = vsub.f32 %v83_v61, %v80_v58 }
  0x3c   :  { %225 = vtanh.f32 %v104_v49  ;;  %v147_v62 = vadd.f32 %v146_v56, %v142_v51  ;;  %v172_v4 = vstv %s335_s27  ;;  %v85_v5 = vstv %s337_s28 }
  0x3d   :  { %227 = vtanh.f32 %v127_v59  ;;  %v169_v2 = vrot.slane %v162_v63, %v78_v23  ;;  %v107_v7 = vstv %s208_s29  ;;  %v86_v9 = vmul.f32 %v85_v5, %v84_v3 }
  0x3e   :  { %v150_v1 = vadd.f32 %v149_v60, %v147_v62  ;;  %v130_v12 = vstv %s213_s30  ;;  %v153_v16 = vstv %s218_s6  ;;  %v176_v20 = vstv %s223_s7 }
  0x3f   :  { %v170_v6 = vadd.f32 %v169_v2, %v165_v0  ;;  %vm186_vm0 = vcmp.gt.f32.partialorder %v185_v30, 0.5 }
  0x40   :  { %229 = vtanh.f32 %v150_v1 }
  0x41   :  { %v173_v8 = vadd.f32 %v172_v4, %v170_v6 }
  0x43   :  { %231 = vtanh.f32 %v173_v8 }
  0x46   :  { %v226_v10 = vpop.eup %225 }
  0x47   :  { %v108_v11 = vmul.f32 %v226_v10, %v107_v7  ;;  %v228_v13 = vpop.eup %227 }
  0x48   :  { %v131_v15 = vmul.f32 %v228_v13, %v130_v12 }
  0x49   :  { %v109_v14 = vadd.f32 %v108_v11, %v86_v9 }
  0x4a   :  { %v230_v17 = vpop.eup %229 }
  0x4b   :  { %v132_v18 = vadd.f32 %v131_v15, %v109_v14  ;;  %v154_v19 = vmul.f32 %v230_v17, %v153_v16 }
  0x4d   :  { %v155_v21 = vadd.f32 %v154_v19, %v132_v18  ;;  %v232_v22 = vpop.eup %231 }
  0x4e   :  { %v177_v23 = vmul.f32 %v232_v22, %v176_v20 }
  0x50   :  { %v178_v24 = vadd.f32 %v177_v23, %v155_v21 }
  0x52   :  { %v179_v25 = vmax.f32 %v178_v24, -60.0 }
  0x54   :  { %v180_v26 = vsub.f32 0.0, %v179_v25 }
  0x56   :  { %v181_v27 = vmul.f32 1.442695, %v180_v26 }
  0x58   :  { %233 = vpow2.f32 %v181_v27 }
  0x62   :  { %v234_v28 = vpop.eup %233 }
  0x63   :  { %v183_v29 = vadd.f32 1.0, %v234_v28 }
  0x65   :  { %235 = vrcp.f32 %v183_v29 }
  0x6f   :  { %v236_v32 = vpop.eup %235 }
  0x70   :  { %v188_v33 = vsel %vm186_vm0, %v236_v32, %v187_v31 }
  0x71   :  { %189 = vst [vmem:[%s359_s5] sm:$0xff] %v188_v33 }
  0x72 PF:  { %194 = vsyncpa [#allocation4], 1 }

// kernel: seg3d_lossless_forward.7
= control target key start
LH: loop header
LB: loop body
LE: loop exit
PB: predicated region body
PF: predicated region fallthrough
CT: control target
= control target key end

     0   :  { %10 = vsyncpa [#allocation3], 0  ;;  %s804_s0 = inlined_call_operand.vmem [shape: s32[2], index: 0, kind: input, shape index: {}]   ;;  %s805_s1 = inlined_call_operand.vmem [shape: f32[8,8], index: 1, kind: input, shape index: {}]   ;;  %s806_s2 = inlined_call_operand.vmem [shape: f32[2,128], index: 2, kind: input, shape index: {}]   ;;  %s807_s3 = inlined_call_operand.vmem [shape: f32[16,128], index: 3, kind: input, shape index: {}]   ;;  %s808_s4 = inlined_call_operand.vmem [shape: f32[16,128], index: 4, kind: input, shape index: {}]   ;;  %s809_s5 = inlined_call_operand.vmem [shape: f32[16,128], index: 5, kind: output, shape index: {}]  }
   0x1   :  { %11 = vsyncpa [#allocation5], 0  ;;  %s670_s18 = smov 0  }
   0x2 LB: > { %s676_s19 = sadd.s32 4294967295, %s636_s18   ;;  %p509_p0 = scmp.ge.s32.totalorder %s636_s18, 1  ;;  %s636_s18 = sphi %s670_s18, %s17_s18  }
   0x3   : > { %p163_p1 = scmp.lt.s32.totalorder %s636_s18, 3  ;;  %s176_s22 = sshll.u32 %s804_s0, 4  ;;  %s177_s22 = int_to_ptr.vmem [resolvable:$true] %s176_s22 }
   0x4   : > { %p810_p3 = scmp.eq.s32.totalorder %s676_s19, 0  ;;  %s187_s26 = sshll.u32 %s805_s1, 4  ;;  %s188_s26 = int_to_ptr.vmem [resolvable:$true] %s187_s26 }
   0x5   : > { %p683_p2 = pnand %p509_p0, %p163_p1  ;;  %s592_s28 = scalar_lea.vmem %s177_s22, 16 }
   0x6   : > { %p593_p6 = scmp.ne.s32.totalorder %s177_s22, %s592_s28  ;;  %p600_p10 = scmp.lt.s32.totalorder %s177_s22, %s177_s22 }
   0x7   : > { %s812_s23 = scalar_select %p683_p2, 1, 0 }
   0x8   : > { %p559_p4 = pneg %p683_p2  ;;  %p601_p11 = scmp.lt.s32.totalorder %s592_s28, %s592_s28 }
   0xa   : > { %p695_p5 = pnand %p810_p3, %p559_p4  ;;  %p602_p12 = por %p601_p11, %p600_p10 }
   0xc   : > { %p594_p7 = pneg %p695_p5 }
   0xe   : > { %p595_p8 = pnand %p594_p7, %p593_p6 }
  0x10   : > { %p596_p9 = pneg %p595_p8 }
  0x12   : > { %p603_p13 = pnand %p602_p12, %p596_p9 }
  0x14   : > { %606 = shalt.err (!%p603_p13)
}
  0x15   : > { %s638_s29 = smov [#allocation2]   ;;  %s607_s30 = scalar_lea.vmem %s188_s26, 128 }
  0x16   : > { %562 = dma.vmem_to_smem (!%p695_p5), %s177_s22, 16, %s638_s29, [#allocation3]  }
  0x17   : > { %p608_p0 = scmp.ne.s32.totalorder %s188_s26, %s607_s30  ;;  %p615_p3 = scmp.lt.s32.totalorder %s188_s26, %s188_s26 }
  0x18   : > { %p616_p2 = scmp.lt.s32.totalorder %s607_s30, %s607_s30 }
  0x19   : > { %p610_p1 = pnand %p608_p0, %p594_p7 }
  0x1a   : > { %p617_p6 = por %p616_p2, %p615_p3 }
  0x1b   : > { %p611_p4 = pneg %p610_p1 }
  0x1d   : > { %p618_p8 = pnand %p617_p6, %p611_p4 }
  0x1f   : > { %621 = shalt.err (!%p618_p8)
}
  0x20   : > { %s639_s6 = smov [#allocation4]   ;;  %p814_p9 = scmp.ne.s32.totalorder %s812_s23, 0 }
  0x21   : > { %565 = dma.vmem_to_smem (!%p695_p5), %s188_s26, 128, %s639_s6, [#allocation5]  }
  0x22   : > { %217 = sbr.rel (%p814_p9) target bundleno = 147 (0x93), region = 40  ;;  %p815_p10 = scmp.eq.s32.totalorder (!%p814_p9), %s676_s19, 0 }
  0x29   : > { %627 = dma.done.wait (%p815_p10), [#allocation3], 16   ;;  %p816_p11 = pmov %p815_p10 }
  0x2a   : > { %p817_p7 = pmov %p815_p10 }
  0x2b   : > { %629 = vsyncadd (%p816_p11), [#allocation3], 4294967280 }
  0x2c   : > { %631 = dma.done.wait (%p817_p7), [#allocation5], 128   ;;  %p818_p2 = pmov %p817_p7 }
  0x2e   : > { %633 = vsyncadd (%p818_p2), [#allocation5], 4294967168 }
  0x2f   : > { %227 = sfence }
  0x30   : > { %p252_p3 = scmp.lt.s32.totalorder %s676_s19, 1  ;;  %s264_s7 = sld [smem:[#allocation2 + %s676_s19]] }
  0x32   : > { %s253_s8 = scalar_select %p252_p3, %s676_s19, 1 }
  0x34   : > { %s718_s9 = sshll.u32 %s253_s8, 3 }
  0x35   : > { %s724_s12 = scalar_lea.vmem %s807_s3, %s718_s9  ;;  %s259_s15 = scalar_lea.vmem %s808_s4, %s718_s9 }
  0x36   : > { %s734_s20 = scalar_lea.vmem %s809_s5, %s718_s9  ;;  %p519_p5 = scmp.ne.s32.totalorder %s264_s7, 0 }
  0x37   : > { %v269_v0 = vld [vmem:[%s724_s12] sm:$0xff] (!%p519_p5) }
  0x38   : > { %268 = sbr.rel (%p519_p5) target bundleno = 63 (0x3f), region = 52  ;;  %270 = vst [vmem:[%s734_s20] sm:$0xff] (!%p519_p5), %v269_v0 }
  0x3f PF: > { %s271_s21 = sld [smem:[#allocation2 + %s676_s19]] }
  0x45   : > { %p520_p12 = scmp.le.s32.totalorder %s271_s21, 0 }
  0x46   : > { %v278_v1 = vlaneseq (!%p520_p12)  ;;  %s521_s22 = sshll.u32 (!%p520_p12), %s676_s19, 3  ;;  %s284_s23 = sld [smem:[#allocation4]] (!%p520_p12)  ;;  %v276_v5 = vld [vmem:[%s806_s2] sm:$0x1] (!%p520_p12)  ;;  %v277_v6 = vld [vmem:[%s806_s2 + $0x1] sm:$0x1] (!%p520_p12) }
  0x47   : > { %275 = sbr.rel (%p520_p12) target bundleno = 147 (0x93), region = 56  ;;  %v281_v2 = vstv (!%p520_p12), %s521_s22  ;;  %s522_s24 = sld [smem:[#allocation4 + $0x3]] (!%p520_p12) }
  0x48   : > { %v279_v3 = vshrl.u32 (!%p520_p12), %v278_v1, 7  ;;  %s523_s25 = sld [smem:[#allocation4 + $0x1]] (!%p520_p12)  ;;  %s524_s26 = sld [smem:[#allocation4 + $0x4]] (!%p520_p12) }
  0x49   : > { %s525_s27 = sld [smem:[#allocation4 + $0x2]] (!%p520_p12)  ;;  %s526_s28 = sld [smem:[#allocation4 + $0x5]] (!%p520_p12) }
  0x4a   : > { %v282_v4 = vadd.s32 (!%p520_p12), %v281_v2, %v279_v3  ;;  %s529_s6 = sld [smem:[#allocation4 + $0x80]] (!%p520_p12)  ;;  %s743_s7 = sld [smem:[#allocation4 + $0x81]] (!%p520_p12)  ;;  %v308_v26 = vsub.s32 (!%p520_p12), 0, %v279_v3 }
  0x4b   : > { %s748_s19 = sld [smem:[#allocation4 + $0x82]] (!%p520_p12)  ;;  %s750_s11 = sld [smem:[#allocation4 + $0x100]] (!%p520_p12) }
  0x4c   : > { %v283_v7 = vcvt.s32.f32 (!%p520_p12), %v282_v4  ;;  %v285_v8 = vstv (!%p520_p12), %s284_s23  ;;  %s535_s13 = sld [smem:[#allocation4 + $0x101]] (!%p520_p12)  ;;  %s752_s14 = sld [smem:[#allocation4 + $0x102]] (!%p520_p12) }
  0x4d   : > { %v288_v9 = vstv (!%p520_p12), %s522_s24  ;;  %v286_v10 = vmul.f32 (!%p520_p12), %v285_v8, %v276_v5  ;;  %s754_s16 = sld [smem:[#allocation4 + $0x83]] (!%p520_p12)  ;;  %s756_s17 = sld [smem:[#allocation4 + $0x180]] (!%p520_p12) }
  0x4e   : > { %v291_v11 = vstv %s523_s25  ;;  %v294_v12 = vstv %s524_s26  ;;  %s758_s21 = sld [smem:[#allocation4 + $0x181]]  ;;  %s761_s22 = sld [smem:[#allocation4 + $0x182]] }
  0x4f   : > { %v292_v13 = vmul.f32 %v291_v11, %v277_v6  ;;  %v297_v14 = vstv %s525_s27  ;;  %v300_v15 = vstv %s526_s28  ;;  %v289_v16 = vadd.f32 %v288_v9, %v286_v10  ;;  %s764_s23 = sld [smem:[#allocation4 + $0x103]]  ;;  %s766_s24 = sld [smem:[#allocation4 + $0x200]] }
  0x50   : > { %v298_v17 = vmul.f32 %v297_v14, %v283_v7  ;;  %v318_v19 = vstv %s529_s6  ;;  %v321_v20 = vstv %s743_s7  ;;  %s768_s25 = sld [smem:[#allocation4 + $0x201]]  ;;  %s771_s26 = sld [smem:[#allocation4 + $0x202]] }
  0x51   : > { %v295_v18 = vadd.f32 %v294_v12, %v292_v13  ;;  %v302_v22 = vmul.f32 %v289_v16, %v289_v16  ;;  %v319_v23 = vmul.f32 %v318_v19, %v289_v16  ;;  %v325_v24 = vstv %s748_s19  ;;  %s775_s27 = sld [smem:[#allocation4 + $0x183]]  ;;  %s777_s28 = sld [smem:[#allocation4 + $0x281]] }
  0x52   : > { %v301_v21 = vadd.f32 %v300_v15, %v298_v17  ;;  %v341_v28 = vstv %s750_s11  ;;  %v344_v29 = vstv %s535_s13  ;;  %v348_v35 = vstv %s752_s14  ;;  %s782_s29 = sld [smem:[#allocation4 + $0x203]]  ;;  %s787_s30 = sld [smem:[#allocation4 + $0x280]] }
  0x53   : > { %v303_v25 = vmul.f32 %v295_v18, %v295_v18  ;;  %v322_v27 = vmul.f32 %v321_v20, %v295_v18  ;;  %v342_v32 = vmul.f32 %v341_v28, %v289_v16  ;;  %v345_v33 = vmul.f32 %v344_v29, %v295_v18  ;;  %s533_s6 = sld [smem:[#allocation4 + $0x84]] }
  0x54   : > { %v326_v31 = vmul.f32 %v325_v24, %v301_v21  ;;  %v364_v36 = vstv %s756_s17  ;;  %v349_v39 = vmul.f32 %v348_v35, %v301_v21  ;;  %v333_v40 = vstv %s754_s16  ;;  %s538_s7 = sld [smem:[#allocation4 + $0x104]] }
  0x55   : > { %v323_v30 = vadd.f32 %v322_v27, %v319_v23  ;;  %v304_v34 = vadd.f32 %v303_v25, %v302_v22  ;;  %v346_v38 = vadd.f32 %v345_v33, %v342_v32  ;;  %v365_v41 = vmul.f32 %v364_v36, %v289_v16  ;;  %s543_s8 = sld [smem:[#allocation4 + $0x184]]  ;;  %v415_v32 = vld [vmem:[%s259_s15] sm:$0xff] }
  0x56   : > { %v367_v42 = vstv %s758_s21  ;;  %v371_v43 = vstv %s761_s22  ;;  %v305_v44 = vmul.f32 %v301_v21, %v301_v21  ;;  %v356_v49 = vstv %s764_s23  ;;  %s548_s10 = sld [smem:[#allocation4 + $0x204]]  ;;  %v417_v33 = vld [vmem:[%s724_s12] sm:$0xff] }
  0x57   : > { %v330_v37 = vrot.slane %v323_v30, %v308_v26  ;;  %v353_v46 = vrot.slane %v346_v38, %v308_v26  ;;  %v368_v47 = vmul.f32 %v367_v42, %v295_v18  ;;  %v309_v48 = vrot.slane %v304_v34, %v308_v26 }
  0x58   : > { %v387_v50 = vstv %s766_s24  ;;  %v390_v51 = vstv %s768_s25  ;;  %v372_v55 = vmul.f32 %v371_v43, %v301_v21  ;;  %v394_v58 = vstv %s771_s26 }
  0x59   : > { %v331_v45 = vadd.f32 %v330_v37, %v326_v31  ;;  %v354_v53 = vadd.f32 %v353_v46, %v349_v39  ;;  %v369_v54 = vadd.f32 %v368_v47, %v365_v41  ;;  %v388_v56 = vmul.f32 %v387_v50, %v289_v16 }
  0x5a   : > { %v391_v57 = vmul.f32 %v390_v51, %v295_v18  ;;  %v310_v61 = vadd.f32 %v309_v48, %v305_v44  ;;  %v379_v62 = vstv %s775_s27  ;;  %v395_v0 = vmul.f32 %v394_v58, %v301_v21 }
  0x5b   : > { %v334_v52 = vadd.f32 %v333_v40, %v331_v45  ;;  %v357_v59 = vadd.f32 %v356_v49, %v354_v53  ;;  %v376_v60 = vrot.slane %v369_v54, %v308_v26  ;;  %v313_v1 = vstv %s777_s28 }
  0x5c   : > { %v392_v63 = vadd.f32 %v391_v57, %v388_v56  ;;  %v402_v5 = vstv %s782_s29  ;;  %v314_v6 = vsub.f32 %v313_v1, %v310_v61  ;;  %v315_v8 = vstv %s787_s30 }
  0x5d   : > { %580 = vtanh.f32 %v334_v52  ;;  %v377_v2 = vadd.f32 %v376_v60, %v372_v55  ;;  %v337_v10 = vstv %s533_s6  ;;  %v360_v13 = vstv %s538_s7 }
  0x5e   : > { %582 = vtanh.f32 %v357_v59  ;;  %v399_v3 = vrot.slane %v392_v63, %v308_v26  ;;  %v316_v11 = vmul.f32 %v315_v8, %v314_v6  ;;  %v383_v18 = vstv %s543_s8 }
  0x5f   : > { %v380_v4 = vadd.f32 %v379_v62, %v377_v2  ;;  %v406_v22 = vstv %s548_s10  ;;  %vm416_vm0 = vcmp.gt.f32.partialorder %v415_v32, 0.5 }
  0x60   : > { %v400_v7 = vadd.f32 %v399_v3, %v395_v0 }
  0x61   : > { %584 = vtanh.f32 %v380_v4 }
  0x62   : > { %v403_v9 = vadd.f32 %v402_v5, %v400_v7 }
  0x64   : > { %586 = vtanh.f32 %v403_v9 }
  0x67   : > { %v581_v12 = vpop.eup %580 }
  0x68   : > { %v338_v14 = vmul.f32 %v581_v12, %v337_v10  ;;  %v583_v15 = vpop.eup %582 }
  0x69   : > { %v361_v17 = vmul.f32 %v583_v15, %v360_v13 }
  0x6a   : > { %v339_v16 = vadd.f32 %v338_v14, %v316_v11 }
  0x6b   : > { %v585_v20 = vpop.eup %584 }
  0x6c   : > { %v362_v19 = vadd.f32 %v361_v17, %v339_v16  ;;  %v384_v21 = vmul.f32 %v585_v20, %v383_v18 }
  0x6e   : > { %v587_v23 = vpop.eup %586  ;;  %v385_v24 = vadd.f32 %v384_v21, %v362_v19 }
  0x6f   : > { %v407_v25 = vmul.f32 %v587_v23, %v406_v22 }
  0x71   : > { %v408_v26 = vadd.f32 %v407_v25, %v385_v24 }
  0x73   : > { %v409_v27 = vmax.f32 %v408_v26, -60.0 }
  0x75   : > { %v410_v28 = vsub.f32 0.0, %v409_v27 }
  0x77   : > { %v411_v29 = vmul.f32 1.442695, %v410_v28 }
  0x79   : > { %588 = vpow2.f32 %v411_v29 }
  0x83   : > { %v589_v30 = vpop.eup %588 }
  0x84   : > { %v413_v31 = vadd.f32 1.0, %v589_v30 }
  0x86   : > { %590 = vrcp.f32 %v413_v31 }
  0x90   : > { %v591_v34 = vpop.eup %590 }
  0x91   : > { %v418_v35 = vsel %vm416_vm0, %v591_v34, %v417_v33 }
  0x92   : > { %419 = vst [vmem:[%s734_s20] sm:$0xff] %v418_v35 }
  0x93 PF: > { %s17_s18 = sadd.s32 1, %s636_s18  }
  0x94   : > { %p14_p13 = scmp.ge.s32.totalorder %s17_s18, 4  }
  0x96   :  { %16 = sbr.rel (!%p14_p13) target bundleno = 2 (0x2), region = 90 }
  0x9d   :  { %439 = vsyncpa [#allocation3], 1 }
  0x9e   :  { %441 = vsyncpa [#allocation3 + $0x1], 1 }
  0x9f   :  { %442 = vsyncpa [#allocation5], 1 }

// kernel: seg3d_lossless_forward.6
= control target key start
LH: loop header
LB: loop body
LE: loop exit
PB: predicated region body
PF: predicated region fallthrough
CT: control target
= control target key end

     0   :  { %vm49_vm0 = vcmask 39936   ;;  %v4027_v0 = vmov 0.0|0.0   ;;  %vm4028_vm2 = vmmov 0   ;;  %v4029_v5 = vmov 0.0   ;;  %s4592_s1 = inlined_call_operand.vmem [shape: f32[9,5], index: 1, kind: input, shape index: {}, may-alias: {1,2}]   ;;  %s4593_s0 = inlined_call_operand.vmem [shape: f32[5,5,5], index: 0, kind: input, shape index: {}]   ;;  %s4594_s2 = inlined_call_operand.vmem [shape: f32[9,5], index: 2, kind: input, shape index: {}, may-alias: {1,2}]   ;;  %s4595_s3 = inlined_call_operand.vmem [shape: f32[9,9], index: 3, kind: input, shape index: {}, may-alias: {3,4}]   ;;  %s4596_s6 = inlined_call_operand.vmem [shape: f32[9,9,9], index: 6, kind: output, shape index: {0}]   ;;  %s4597_s4 = inlined_call_operand.vmem [shape: f32[9,9], index: 4, kind: input, shape index: {}, may-alias: {3,4}]   ;;  %s4598_s5 = inlined_call_operand.vmem [shape: f32[9,9,9], index: 5, kind: input, shape index: {}]   ;;  %s4599_s7 = inlined_call_operand.vmem [shape: f32[9,9,9], index: 7, kind: output, shape index: {1}]  }
   0x1   :  { %3875 = vmatprep.subr.bf16.mxu0 %v4027_v0  ;;  %3879 = vmatprep.subr.bf16.mxu1 %v4027_v0  ;;  %v45_v1 = vld [vmem:[%s4592_s1] sm:$0xff]  ;;  %v46_v2 = vld [vmem:[%s4592_s1 + $0x8] sm:$0x1]  ;;  %vm4079_vm1 = vmpackc.low %vm49_vm0, %vm49_vm0  ;;  %vm792_vm8 = vcmask 1044480   ;;  %vm1699_vm9 = vcmask 72704   ;;  %vm4600_vm11 = vcmask 65536  }
   0x2   :  { %v3876_v4 = vpack.c.bf16 %v46_v2, %v45_v1  ;;  %3633 = vmatprep.mubr.msk.f32.mxu0 %vm4028_vm2, %v4029_v5  ;;  %3640 = vmatprep.mubr.msk.f32.mxu1 %vm4028_vm2, %v4029_v5  ;;  %v25_v6 = vld [vmem:[%s4593_s0] sm:$0x1f]  ;;  %v26_v7 = vld [vmem:[%s4593_s0 + $0x8] sm:$0x1f]  ;;  %v27_v8 = vld [vmem:[%s4593_s0 + $0x10] sm:$0x1f] }
   0x3   :  { %v28_v9 = vld [vmem:[%s4593_s0 + $0x18] sm:$0x1f]  ;;  %vm30_vm3 = vcmp.gt.f32.partialorder %v25_v6, 0.5  ;;  %v29_v11 = vld [vmem:[%s4593_s0 + $0x20] sm:$0x1f]  ;;  %vm31_vm4 = vcmp.gt.f32.partialorder %v26_v7, 0.5  ;;  %vm4207_vm10 = vmpackc.low %vm1699_vm9, %vm1699_vm9 }
   0x4   :  { %3878 = vmatpush3.bf16.xpose.msk.msra.mxu0 %vm4079_vm1, %v3876_v4  ;;  %3882 = vmatpush3.bf16.xpose.msk.msra.mxu1 %vm4079_vm1, %v3876_v4  ;;  %v3333_v10 = vsel %vm30_vm3, 1.0, %v4029_v5  ;;  %vm32_vm5 = vcmp.gt.f32.partialorder %v27_v8, 0.5  ;;  %v3334_v12 = vsel %vm31_vm4, 1.0, %v4029_v5  ;;  %vm33_vm6 = vcmp.gt.f32.partialorder %v28_v9, 0.5  ;;  %v47_v16 = vld [vmem:[%s4594_s2] sm:$0xff] }
   0x5   :  { %3883 = vmatprep.subr.bf16.mxu0 %v4027_v0  ;;  %3887 = vmatprep.subr.bf16.mxu1 %v4027_v0  ;;  %v3335_v13 = vsel %vm32_vm5, 1.0, %v4029_v5  ;;  %vm34_vm7 = vcmp.gt.f32.partialorder %v29_v11, 0.5  ;;  %v3336_v14 = vsel %vm33_vm6, 1.0, %v4029_v5  ;;  %v48_v19 = vld [vmem:[%s4594_s2 + $0x8] sm:$0x1]  ;;  %v1695_v38 = vld [vmem:[%s4595_s3] sm:$0xff] }
   0x6   :  { %v3337_v15 = vsel %vm34_vm7, 1.0, %v4029_v5  ;;  %v1696_v39 = vld [vmem:[%s4595_s3 + $0x8] sm:$0x1] }
   0x7   :  { %v4211_v41 = vpack.c.bf16 %v1696_v39, %v1695_v38 }
   0xb   :  { %3634 = vmatmul.mubr.msk.f32.vlgmr.msra.gmra.mrb[0].mxu0 %vm49_vm0, %v25_v6  ;;  %3641 = vmatmul.mubr.msk.f32.vlgmr.msra.gmra.mrb[0].mxu1 %vm49_vm0, %v26_v7 }
   0xc   :  { %3886 = vmatpush3.bf16.xpose.msk.msra.mxu0 %vm4079_vm1, %v3876_v4  ;;  %3890 = vmatpush3.bf16.xpose.msk.msra.mxu1 %vm4079_vm1, %v3876_v4 }
   0xd   :  { %3647 = vmatprep.mubr.msk.f32.mxu0 %vm4028_vm2, %v4029_v5  ;;  %3654 = vmatprep.mubr.msk.f32.mxu1 %vm4028_vm2, %v4029_v5 }
   0xe   :  { %3891 = vmatprep.subr.bf16.mxu0 %v4027_v0  ;;  %3895 = vmatprep.subr.bf16.mxu1 %v4027_v0 }
  0x13   :  { %3648 = vmatmul.mubr.msk.f32.vlgmr.msra.gmra.mrb[2].mxu0 %vm49_vm0, %v27_v8  ;;  %3655 = vmatmul.mubr.msk.f32.vlgmr.msra.gmra.mrb[2].mxu1 %vm49_vm0, %v28_v9 }
  0x14   :  { %3894 = vmatpush3.bf16.xpose.msk.msra.mxu0 %vm4079_vm1, %v3876_v4  ;;  %3898 = vmatpush3.bf16.xpose.msk.msra.mxu1 %vm4079_vm1, %v3876_v4 }
  0x15   :  { %3661 = vmatprep.mubr.msk.f32.mxu0 %vm4028_vm2, %v4029_v5  ;;  %3668 = vmatprep.mubr.msk.f32.mxu1 %vm4028_vm2, %v4029_v5 }
  0x16   :  { %3899 = vmatprep.subr.bf16.mxu0 %v4027_v0  ;;  %3903 = vmatprep.subr.bf16.mxu1 %v4027_v0 }
  0x1b   :  { %3662 = vmatmul.mubr.msk.f32.vlgmr.msra.gmra.mrb[4].mxu0 %vm49_vm0, %v29_v11  ;;  %3669 = vmatmul.mubr.msk.f32.vlgmr.msra.gmra.mrb[4].mxu1 %vm49_vm0, %v3333_v10 }
  0x1c   :  { %3902 = vmatpush3.bf16.xpose.msk.msra.mxu0 %vm4079_vm1, %v3876_v4  ;;  %3906 = vmatpush3.bf16.xpose.msk.msra.mxu1 %vm4079_vm1, %v3876_v4 }
  0x1d   :  { %3675 = vmatprep.mubr.msk.f32.mxu0 %vm4028_vm2, %v4029_v5  ;;  %3682 = vmatprep.mubr.msk.f32.mxu1 %vm4028_vm2, %v4029_v5 }
  0x1e   :  { %3907 = vmatprep.subr.bf16.mxu0 %v4027_v0  ;;  %3911 = vmatprep.subr.bf16.mxu1 %v4027_v0 }
  0x23   :  { %3676 = vmatmul.mubr.msk.f32.vlgmr.msra.gmra.mrb[6].mxu0 %vm49_vm0, %v3334_v12  ;;  %3683 = vmatmul.mubr.msk.f32.vlgmr.msra.gmra.mrb[6].mxu1 %vm49_vm0, %v3335_v13 }
  0x24   :  { %3910 = vmatpush3.bf16.xpose.msk.msra.mxu0 %vm4079_vm1, %v3876_v4  ;;  %3689 = vmatprep.mubr.msk.f32.mxu0 %vm4028_vm2, %v4029_v5 }
  0x25   :  { %3914 = vmatpush3.bf16.xpose.msk.msra.mxu1 %vm4079_vm1, %v3876_v4  ;;  %3696 = vmatprep.mubr.msk.f32.mxu1 %vm4028_vm2, %v4029_v5 }
  0x2b   :  { %3690 = vmatmul.mubr.msk.f32.vlgmr.msra.gmra.mrb[8].mxu0 %vm49_vm0, %v3336_v14 }
  0x2c   :  { %3697 = vmatmul.mubr.msk.f32.vlgmr.msra.gmra.mrb[8].mxu1 %vm49_vm0, %v3337_v15  ;;  %3701 = vmatprep.mubr.msk.f32.mxu0 %vm49_vm0, %v47_v16 }
  0x2d   :  { %3706 = vmatprep.mubr.msk.f32.mxu1 %vm49_vm0, %v47_v16 }
  0xde   :  { %v125_v17 = vpop.f32.mrb[0].mxu0  ;;  %v198_v18 = vpop.f32.mrb[0].mxu1 }
  0xdf   :  { %v3635_v20 = vpop.f32.mrb[1].mxu0  ;;  %3699 = vmatprep.subr.msk.mxu0 %vm792_vm8, %v125_v17  ;;  %v3642_v21 = vpop.f32.mrb[1].mxu1  ;;  %3704 = vmatprep.subr.msk.mxu1 %vm792_vm8, %v198_v18 }
  0xe0   :  { %3700 = vmatpush3.msk.msra.mxu0 %vm792_vm8, %v125_v17  ;;  %3705 = vmatpush3.msk.msra.mxu1 %vm792_vm8, %v198_v18 }
  0xe1   :  { %3702 = vmatmul.mubr.msk.f32.vlgmr.msra.gmra.mrb[10].mxu0 %vm49_vm0, %v48_v19  ;;  %3707 = vmatmul.mubr.msk.f32.vlgmr.msra.gmra.mrb[10].mxu1 %vm49_vm0, %v48_v19 }
  0xe2   :  { %3716 = vmatprep.mubr.msk.f32.mxu1 %vm49_vm0, %v47_v16  ;;  %3711 = vmatprep.mubr.msk.f32.mxu0 %vm49_vm0, %v47_v16 }
  0xe6   :  { %v271_v22 = vpop.f32.mrb[2].mxu0  ;;  %v344_v23 = vpop.f32.mrb[2].mxu1 }
  0xe7   :  { %v3649_v24 = vpop.f32.mrb[3].mxu0  ;;  %3709 = vmatprep.subr.msk.mxu0 %vm792_vm8, %v271_v22  ;;  %3714 = vmatprep.subr.msk.mxu1 %vm792_vm8, %v344_v23  ;;  %v3656_v25 = vpop.f32.mrb[3].mxu1 }
  0xe8   :  { %3710 = vmatpush3.msk.msra.mxu0 %vm792_vm8, %v271_v22  ;;  %3715 = vmatpush3.msk.msra.mxu1 %vm792_vm8, %v344_v23  ;;  %v3198_v22 = vld [vmem:[%s4598_s5] sm:$0xff] }
  0xe9   :  { %3717 = vmatmul.mubr.msk.f32.vlgmr.msra.gmra.mrb[12].mxu1 %vm49_vm0, %v48_v19  ;;  %3712 = vmatmul.mubr.msk.f32.vlgmr.msra.gmra.mrb[12].mxu0 %vm49_vm0, %v48_v19 }
  0xea   :  { %3726 = vmatprep.mubr.msk.f32.mxu1 %vm49_vm0, %v47_v16  ;;  %3721 = vmatprep.mubr.msk.f32.mxu0 %vm49_vm0, %v47_v16 }
  0xee   :  { %v417_v26 = vpop.f32.mrb[4].mxu0  ;;  %v490_v27 = vpop.f32.mrb[4].mxu1 }
  0xef   :  { %v3663_v28 = vpop.f32.mrb[5].mxu0  ;;  %3719 = vmatprep.subr.msk.mxu0 %vm792_vm8, %v417_v26  ;;  %3724 = vmatprep.subr.msk.mxu1 %vm792_vm8, %v490_v27  ;;  %v3670_v29 = vpop.f32.mrb[5].mxu1 }
  0xf0   :  { %3720 = vmatpush3.msk.msra.mxu0 %vm792_vm8, %v417_v26  ;;  %3725 = vmatpush3.msk.msra.mxu1 %vm792_vm8, %v490_v27 }
  0xf1   :  { %3727 = vmatmul.mubr.msk.f32.vlgmr.msra.gmra.mrb[14].mxu1 %vm49_vm0, %v48_v19  ;;  %3722 = vmatmul.mubr.msk.f32.vlgmr.msra.gmra.mrb[14].mxu0 %vm49_vm0, %v48_v19 }
  0xf2   :  { %3731 = vmatprep.mubr.msk.f32.mxu0 %vm49_vm0, %v47_v16  ;;  %3736 = vmatprep.mubr.msk.f32.mxu1 %vm49_vm0, %v47_v16 }
  0xf6   :  { %v563_v30 = vpop.f32.mrb[6].mxu0  ;;  %v636_v31 = vpop.f32.mrb[6].mxu1 }
  0xf7   :  { %v3677_v32 = vpop.f32.mrb[7].mxu0  ;;  %3729 = vmatprep.subr.msk.mxu0 %vm792_vm8, %v563_v30  ;;  %3734 = vmatprep.subr.msk.mxu1 %vm792_vm8, %v636_v31  ;;  %v3684_v33 = vpop.f32.mrb[7].mxu1 }
  0xf8   :  { %3730 = vmatpush3.msk.msra.mxu0 %vm792_vm8, %v563_v30  ;;  %3735 = vmatpush3.msk.msra.mxu1 %vm792_vm8, %v636_v31 }
  0xf9   :  { %3732 = vmatmul.mubr.msk.f32.vlgmr.msra.gmra.mrb[16].mxu0 %vm49_vm0, %v48_v19  ;;  %3737 = vmatmul.mubr.msk.f32.vlgmr.msra.gmra.mrb[16].mxu1 %vm49_vm0, %v48_v19 }
  0xfa   :  { %3741 = vmatprep.mubr.msk.f32.mxu0 %vm49_vm0, %v47_v16  ;;  %3746 = vmatprep.mubr.msk.f32.mxu1 %vm49_vm0, %v47_v16 }
  0xfe   :  { %v709_v34 = vpop.f32.mrb[8].mxu0 }
  0xff   :  { %3739 = vmatprep.subr.msk.mxu0 %vm792_vm8, %v709_v34  ;;  %v3691_v35 = vpop.f32.mrb[9].mxu0  ;;  %v782_v36 = vpop.f32.mrb[8].mxu1 }
 0x100   :  { %3740 = vmatpush3.msk.msra.mxu0 %vm792_vm8, %v709_v34  ;;  %3744 = vmatprep.subr.msk.mxu1 %vm792_vm8, %v782_v36  ;;  %v3698_v37 = vpop.f32.mrb[9].mxu1 }
 0x101   :  { %3742 = vmatmul.mubr.msk.f32.vlgmr.msra.gmra.mrb[18].mxu0 %vm49_vm0, %v48_v19  ;;  %3745 = vmatpush3.msk.msra.mxu1 %vm792_vm8, %v782_v36 }
 0x102   :  { %3747 = vmatmul.mubr.msk.f32.vlgmr.msra.gmra.mrb[18].mxu1 %vm49_vm0, %v48_v19  ;;  %3917 = vmatprep.subr.msk.bf16.mxu0 %vm4207_vm10, %v4211_v41 }
 0x103   :  { %3923 = vmatprep.subr.msk.bf16.mxu1 %vm4207_vm10, %v4211_v41 }
 0x107   :  { %3920 = vmatpush3.bf16.xpose.msk.msra.mxu0 %vm4207_vm10, %v4211_v41 }
 0x108   :  { %3926 = vmatpush3.bf16.xpose.msk.msra.mxu1 %vm4207_vm10, %v4211_v41  ;;  %3929 = vmatprep.subr.msk.bf16.mxu0 %vm4207_vm10, %v4211_v41 }
 0x109   :  { %3935 = vmatprep.subr.msk.bf16.mxu1 %vm4207_vm10, %v4211_v41 }
 0x1b4   :  { %v3708_v42 = vpop.f32.mrb[10].mxu1  ;;  %v3703_v43 = vpop.f32.mrb[10].mxu0 }
 0x1b5   :  { %3294 = vst.msk [vmem:[%s4596_s6 + $0x28] sm:$0x1] %vm4600_vm11, %v3708_v42  ;;  %v1574_v44 = vadd.f32 %v3708_v42, %v3703_v43  ;;  %3290 = vst.msk [vmem:[%s4596_s6 + $0x8] sm:$0x1] %vm4600_vm11, %v3703_v43  ;;  %v940_v45 = vpop.f32.mrb[11].mxu1  ;;  %v862_v46 = vpop.f32.mrb[11].mxu0 }
 0x1b6   :  { %3293 = vst.msk [vmem:[%s4596_s6 + $0x20] sm:$0xff] %vm1699_vm9, %v940_v45  ;;  %v1573_v47 = vadd.f32 %v940_v45, %v862_v46  ;;  %3288 = vst.msk [vmem:[%s4596_s6] sm:$0xff] %vm1699_vm9, %v862_v46 }
 0x1b7   :  { %v1582_v48 = vmul.f32 0.5, %v1574_v44 }
 0x1b8   :  { %v1581_v49 = vmul.f32 0.5, %v1573_v47 }
 0x1b9   :  { %3292 = vst.msk [vmem:[%s4596_s6 + $0x18] sm:$0x1] %vm4600_vm11, %v1582_v48 }
 0x1ba   :  { %3291 = vst.msk [vmem:[%s4596_s6 + $0x10] sm:$0xff] %vm1699_vm9, %v1581_v49 }
 0x1bc   :  { %v3718_v50 = vpop.f32.mrb[12].mxu1  ;;  %v3713_v51 = vpop.f32.mrb[12].mxu0 }
 0x1bd   :  { %3302 = vst.msk [vmem:[%s4596_s6 + $0x68] sm:$0x1] %vm4600_vm11, %v3718_v50  ;;  %v1576_v52 = vadd.f32 %v3713_v51, %v3708_v42  ;;  %v1578_v53 = vadd.f32 %v3718_v50, %v3713_v51  ;;  %3298 = vst.msk [vmem:[%s4596_s6 + $0x48] sm:$0x1] %vm4600_vm11, %v3713_v51  ;;  %v1096_v54 = vpop.f32.mrb[13].mxu1  ;;  %v1018_v55 = vpop.f32.mrb[13].mxu0 }
 0x1be   :  { %3301 = vst.msk [vmem:[%s4596_s6 + $0x60] sm:$0xff] %vm1699_vm9, %v1096_v54  ;;  %v1575_v56 = vadd.f32 %v1018_v55, %v940_v45  ;;  %v1577_v57 = vadd.f32 %v1096_v54, %v1018_v55  ;;  %3297 = vst.msk [vmem:[%s4596_s6 + $0x40] sm:$0xff] %vm1699_vm9, %v1018_v55  ;;  %v1698_v55 = vld [vmem:[%s4597_s4 + $0x8] sm:$0x1] }
 0x1bf   :  { %v1584_v58 = vmul.f32 0.5, %v1576_v52  ;;  %v1586_v59 = vmul.f32 0.5, %v1578_v53  ;;  %v1697_v52 = vld [vmem:[%s4597_s4] sm:$0xff] }
 0x1c0   :  { %v1583_v60 = vmul.f32 0.5, %v1575_v56  ;;  %v1585_v61 = vmul.f32 0.5, %v1577_v57 }
 0x1c1   :  { %3296 = vst.msk [vmem:[%s4596_s6 + $0x38] sm:$0x1] %vm4600_vm11, %v1584_v58  ;;  %3300 = vst.msk [vmem:[%s4596_s6 + $0x58] sm:$0x1] %vm4600_vm11, %v1586_v59 }
 0x1c2   :  { %3295 = vst.msk [vmem:[%s4596_s6 + $0x30] sm:$0xff] %vm1699_vm9, %v1583_v60  ;;  %3299 = vst.msk [vmem:[%s4596_s6 + $0x50] sm:$0xff] %vm1699_vm9, %v1585_v61 }
 0x1c4   :  { %v3728_v62 = vpop.f32.mrb[14].mxu1  ;;  %v3723_v63 = vpop.f32.mrb[14].mxu0 }
 0x1c5   :  { %vm1606_vm12 = vcmp.gt.f32.partialorder %v3728_v62, 0.0001  ;;  %vm1624_vm13 = vcmp.lt.f32.partialorder %v3728_v62, 0.9999  ;;  %v1252_v0 = vpop.f32.mrb[15].mxu1  ;;  %v1580_v1 = vadd.f32 %v3723_v63, %v3718_v50  ;;  %v1174_v2 = vpop.f32.mrb[15].mxu0 }
 0x1c6   :  { %3306 = vst.msk [vmem:[%s4596_s6 + $0x88] sm:$0x1] %vm4600_vm11, %v3723_v63  ;;  %vm1642_vm14 = vmand %vm1606_vm12, %vm1624_vm13  ;;  %vm1605_vm15 = vcmp.gt.f32.partialorder %v1252_v0, 0.0001  ;;  %vm1623_vm0 = vcmp.lt.f32.partialorder %v1252_v0, 0.9999  ;;  %v1579_v3 = vadd.f32 %v1174_v2, %v1096_v54 }
 0x1c7   :  { %3305 = vst.msk [vmem:[%s4596_s6 + $0x80] sm:$0xff] %vm1699_vm9, %v1174_v2  ;;  %v3399_v4 = vsel %vm1642_vm14, 1.0, %v4029_v5  ;;  %v1588_v6 = vmul.f32 0.5, %v1580_v1  ;;  %vm1641_vm1 = vmand %vm1605_vm15, %vm1623_vm0 }
 0x1c8   :  { %v1587_v7 = vmul.f32 0.5, %v1579_v3  ;;  %v3398_v8 = vsel %vm1641_vm1, 1.0, %v4029_v5 }
 0x1c9   :  { %3304 = vst.msk [vmem:[%s4596_s6 + $0x78] sm:$0x1] %vm4600_vm11, %v1588_v6  ;;  %3753 = vmatprep.mubr.msk.f32.mxu0 %vm1699_vm9, %v3398_v8 }
 0x1ca   :  { %3303 = vst.msk [vmem:[%s4596_s6 + $0x70] sm:$0xff] %vm1699_vm9, %v1587_v7  ;;  %3754 = vmatmul.mubr.msk.f32.vlgmr.msra.gmra.mrb[20].mxu0 %vm1699_vm9, %v3399_v4 }
 0x1cb   :  { %3932 = vmatpush3.bf16.xpose.msk.msra.mxu0 %vm4207_vm10, %v4211_v41 }
 0x1cc   :  { %v3733_v9 = vpop.f32.mrb[16].mxu0  ;;  %v3738_v10 = vpop.f32.mrb[16].mxu1  ;;  %3941 = vmatprep.subr.msk.bf16.mxu0 %vm4207_vm10, %v4211_v41 }
 0x1cd   :  { %v1590_v11 = vadd.f32 %v3733_v9, %v3728_v62  ;;  %vm1610_vm2 = vcmp.gt.f32.partialorder %v3733_v9, 0.0001  ;;  %vm1628_vm3 = vcmp.lt.f32.partialorder %v3733_v9, 0.9999  ;;  %v1330_v12 = vpop.f32.mrb[17].mxu0  ;;  %v1592_v13 = vadd.f32 %v3738_v10, %v3733_v9  ;;  %v1408_v14 = vpop.f32.mrb[17].mxu1 }
 0x1ce   :  { %v1589_v15 = vadd.f32 %v1330_v12, %v1252_v0  ;;  %vm1614_vm4 = vcmp.gt.f32.partialorder %v3738_v10, 0.0001  ;;  %vm1632_vm5 = vcmp.lt.f32.partialorder %v3738_v10, 0.9999  ;;  %v1591_v16 = vadd.f32 %v1408_v14, %v1330_v12  ;;  %vm1646_vm6 = vmand %vm1610_vm2, %vm1628_vm3 }
 0x1cf   :  { %v1598_v17 = vmul.f32 0.5, %v1590_v11  ;;  %vm1609_vm7 = vcmp.gt.f32.partialorder %v1330_v12, 0.0001  ;;  %vm1627_vm8 = vcmp.lt.f32.partialorder %v1330_v12, 0.9999  ;;  %v3403_v21 = vsel %vm1646_vm6, 1.0, %v4029_v5  ;;  %vm4316_vm0 = vmand %vm1614_vm4, %vm1632_vm5 }
 0x1d0   :  { %v1597_v18 = vmul.f32 0.5, %v1589_v15  ;;  %v1599_v19 = vmul.f32 0.5, %v1591_v16  ;;  %vm1645_vm12 = vmand %vm1609_vm7, %vm1627_vm8  ;;  %vm1613_vm13 = vcmp.gt.f32.partialorder %v1408_v14, 0.0001  ;;  %v1600_v23 = vmul.f32 0.5, %v1592_v13 }
 0x1d1   :  { %v3402_v20 = vsel %vm1645_vm12, 1.0, %v4029_v5  ;;  %vm1608_vm14 = vcmp.gt.f32.partialorder %v1598_v17, 0.0001  ;;  %vm1626_vm15 = vcmp.lt.f32.partialorder %v1598_v17, 0.9999  ;;  %v3407_v36 = vsel %vm4316_vm0, 1.0, %v4029_v5 }
 0x1d2   :  { %3767 = vmatprep.mubr.msk.f32.mxu0 %vm1699_vm9, %v3402_v20  ;;  %vm1607_vm1 = vcmp.gt.f32.partialorder %v1597_v18, 0.0001  ;;  %vm1625_vm2 = vcmp.lt.f32.partialorder %v1597_v18, 0.9999  ;;  %vm1644_vm3 = vmand %vm1608_vm14, %vm1626_vm15  ;;  %vm1611_vm11 = vcmp.gt.f32.partialorder %v1599_v19, 0.0001 }
 0x1d3   :  { %3768 = vmatmul.mubr.msk.f32.vlgmr.msra.gmra.mrb[22].mxu0 %vm1699_vm9, %v3403_v21  ;;  %vm1643_vm7 = vmand %vm1607_vm1, %vm1625_vm2  ;;  %vm1629_vm8 = vcmp.lt.f32.partialorder %v1599_v19, 0.9999  ;;  %vm1631_vm12 = vcmp.lt.f32.partialorder %v1408_v14, 0.9999  ;;  %v3401_v28 = vsel %vm1644_vm3, 1.0, %v4029_v5 }
 0x1d4   :  { %3944 = vmatpush3.bf16.xpose.msk.msra.mxu0 %vm4207_vm10, %v4211_v41  ;;  %v3743_v24 = vpop.f32.mrb[18].mxu0  ;;  %v3400_v25 = vsel %vm1643_vm7, 1.0, %v4029_v5  ;;  %vm1647_vm4 = vmand %vm1611_vm11, %vm1629_vm8  ;;  %vm1630_vm14 = vcmp.lt.f32.partialorder %v1600_v23, 0.9999  ;;  %v3199_v20 = vld [vmem:[%s4598_s5 + $0x8] sm:$0x1] }
 0x1d5   :  { %v1594_v26 = vadd.f32 %v3743_v24, %v3738_v10  ;;  %3760 = vmatprep.mubr.msk.f32.mxu1 %vm1699_vm9, %v3400_v25  ;;  %v1486_v27 = vpop.f32.mrb[19].mxu0  ;;  %v3404_v29 = vsel %vm1647_vm4, 1.0, %v4029_v5  ;;  %vm1649_vm5 = vmand %vm1613_vm13, %vm1631_vm12  ;;  %3953 = vmatprep.subr.msk.bf16.mxu0 %vm4207_vm10, %v4211_v41  ;;  %v3748_v32 = vpop.f32.mrb[18].mxu1  ;;  %vm1612_vm13 = vcmp.gt.f32.partialorder %v1600_v23, 0.0001 }
 0x1d6   :  { %v1593_v30 = vadd.f32 %v1486_v27, %v1408_v14  ;;  %3761 = vmatmul.mubr.msk.f32.vlgmr.msra.gmra.mrb[20].mxu1 %vm1699_vm9, %v3401_v28  ;;  %v3406_v31 = vsel %vm1649_vm5, 1.0, %v4029_v5  ;;  %vm1617_vm11 = vcmp.gt.f32.partialorder %v1486_v27, 0.0001  ;;  %vm1635_vm6 = vcmp.lt.f32.partialorder %v1486_v27, 0.9999  ;;  %v1564_v34 = vpop.f32.mrb[19].mxu1  ;;  %vm1648_vm3 = vmand %vm1612_vm13, %vm1630_vm14 }
 0x1d7   :  { %3938 = vmatpush3.bf16.xpose.msk.msra.mxu1 %vm4207_vm10, %v4211_v41  ;;  %3774 = vmatprep.mubr.msk.f32.mxu1 %vm1699_vm9, %v3404_v29  ;;  %v1596_v33 = vadd.f32 %v3748_v32, %v3743_v24  ;;  %vm1653_vm15 = vmand %vm1617_vm11, %vm1635_vm6  ;;  %v1595_v37 = vadd.f32 %v1564_v34, %v1486_v27  ;;  %vm1618_vm1 = vcmp.gt.f32.partialorder %v3743_v24, 0.0001  ;;  %vm1636_vm2 = vcmp.lt.f32.partialorder %v3743_v24, 0.9999  ;;  %v3201_v24 = vld [vmem:[%s4598_s5 + $0x18] sm:$0x1] }
 0x1d8   :  { %v1601_v35 = vmul.f32 0.5, %v1593_v30  ;;  %3781 = vmatprep.mubr.msk.f32.mxu0 %vm1699_vm9, %v3406_v31  ;;  %3947 = vmatprep.subr.msk.bf16.mxu1 %vm4207_vm10, %v4211_v41  ;;  %v3410_v38 = vsel %vm1653_vm15, 1.0, %v4029_v5  ;;  %v1602_v39 = vmul.f32 0.5, %v1594_v26  ;;  %vm1621_vm12 = vcmp.gt.f32.partialorder %v1564_v34, 0.0001  ;;  %vm1654_vm0 = vmand %vm1618_vm1, %vm1636_vm2  ;;  %v3200_v28 = vld [vmem:[%s4598_s5 + $0x10] sm:$0xff] }
 0x1d9   :  { %vm1639_vm4 = vcmp.lt.f32.partialorder %v1564_v34, 0.9999  ;;  %v1603_v42 = vmul.f32 0.5, %v1595_v37  ;;  %v3405_v44 = vsel %vm1648_vm3, 1.0, %v4029_v5  ;;  %v3411_v45 = vsel %vm1654_vm0, 1.0, %v4029_v5 }
 0x1da   :  { %vm1615_vm7 = vcmp.gt.f32.partialorder %v1601_v35, 0.0001  ;;  %vm1633_vm8 = vcmp.lt.f32.partialorder %v1601_v35, 0.9999  ;;  %vm1657_vm11 = vmand %vm1621_vm12, %vm1639_vm4  ;;  %vm1616_vm6 = vcmp.gt.f32.partialorder %v1602_v39, 0.0001 }
 0x1db   :  { %3782 = vmatmul.mubr.msk.f32.vlgmr.msra.gmra.mrb[24].mxu0 %vm1699_vm9, %v3407_v36  ;;  %vm1651_vm5 = vmand %vm1615_vm7, %vm1633_vm8  ;;  %vm1634_vm13 = vcmp.lt.f32.partialorder %v1602_v39, 0.9999  ;;  %vm1619_vm14 = vcmp.gt.f32.partialorder %v1603_v42, 0.0001  ;;  %vm1637_vm15 = vcmp.lt.f32.partialorder %v1603_v42, 0.9999 }
 0x1dc   :  { %3956 = vmatpush3.bf16.xpose.msk.msra.mxu0 %vm4207_vm10, %v4211_v41  ;;  %v3408_v43 = vsel %vm1651_vm5, 1.0, %v4029_v5  ;;  %3795 = vmatprep.mubr.msk.f32.mxu0 %vm1699_vm9, %v3410_v38  ;;  %v3414_v46 = vsel %vm1657_vm11, 1.0, %v4029_v5  ;;  %vm1652_vm1 = vmand %vm1616_vm6, %vm1634_vm13  ;;  %v1604_v47 = vmul.f32 0.5, %v1596_v33  ;;  %vm1622_vm3 = vcmp.gt.f32.partialorder %v3748_v32, 0.0001  ;;  %v3202_v39 = vld [vmem:[%s4598_s5 + $0x20] sm:$0xff] }
 0x1dd   :  { %3965 = vmatprep.subr.msk.bf16.mxu0 %vm4207_vm10, %v4211_v41  ;;  %vm1655_vm2 = vmand %vm1619_vm14, %vm1637_vm15  ;;  %vm1640_vm7 = vcmp.lt.f32.partialorder %v3748_v32, 0.9999  ;;  %v3409_v48 = vsel %vm1652_vm1, 1.0, %v4029_v5  ;;  %vm4030_vm0 = vmmov 1   ;;  %vm3217_vm6 = vcmp.lt.f32.partialorder %v3199_v20, 0.5 }
 0x1de   :  { %3775 = vmatmul.mubr.msk.f32.vlgmr.msra.gmra.mrb[22].mxu1 %vm1699_vm9, %v3405_v44  ;;  %v3412_v49 = vsel %vm1655_vm2, 1.0, %v4029_v5  ;;  %vm1620_vm8 = vcmp.gt.f32.partialorder %v1604_v47, 0.0001  ;;  %vm1638_vm12 = vcmp.lt.f32.partialorder %v1604_v47, 0.9999  ;;  %vm1658_vm4 = vmand %vm1622_vm3, %vm1640_vm7  ;;  %vm3216_vm13 = vcmp.lt.f32.partialorder %v3198_v22, 0.5 }
 0x1df   :  { %3950 = vmatpush3.bf16.xpose.msk.msra.mxu1 %vm4207_vm10, %v4211_v41  ;;  %3788 = vmatprep.mubr.msk.f32.mxu1 %vm1699_vm9, %v3408_v43  ;;  %v3415_v50 = vsel %vm1658_vm4, 1.0, %v4029_v5  ;;  %vm1656_vm5 = vmand %vm1620_vm8, %vm1638_vm12  ;;  %vm3219_vm15 = vcmp.lt.f32.partialorder %v3201_v24, 0.5  ;;  %vm3218_vm3 = vcmp.lt.f32.partialorder %v3200_v28, 0.5  ;;  %vm4609_vm12 = vcmask 65536   ;;  %v3203_v36 = vld [vmem:[%s4598_s5 + $0x28] sm:$0x1] }
 0x1e0   :  { %3959 = vmatprep.subr.msk.bf16.mxu1 %vm4207_vm10, %v4211_v41  ;;  %v3413_v51 = vsel %vm1656_vm5, 1.0, %v4029_v5  ;;  %v3205_v44 = vld [vmem:[%s4598_s5 + $0x38] sm:$0x1]  ;;  %v3215_v24 = vld [vmem:[%s4598_s5 + $0x88] sm:$0x1]  ;;  %v3212_v28 = vld [vmem:[%s4598_s5 + $0x70] sm:$0xff] }
 0x1e3   :  { %3796 = vmatmul.mubr.msk.f32.vlgmr.msra.gmra.mrb[26].mxu0 %vm1699_vm9, %v3411_v45 }
 0x1e4   :  { %3968 = vmatpush3.bf16.xpose.msk.msra.mxu0 %vm4207_vm10, %v4211_v41  ;;  %3809 = vmatprep.mubr.msk.f32.mxu0 %vm1699_vm9, %v3414_v46 }
 0x1e6   :  { %3789 = vmatmul.mubr.msk.f32.vlgmr.msra.gmra.mrb[24].mxu1 %vm1699_vm9, %v3409_v48 }
 0x1e7   :  { %3962 = vmatpush3.bf16.xpose.msk.msra.mxu1 %vm4207_vm10, %v4211_v41  ;;  %3802 = vmatprep.mubr.msk.f32.mxu1 %vm1699_vm9, %v3412_v49  ;;  %vm2441_vm10 = vcmask 1040384   ;;  %v3204_v49 = vld [vmem:[%s4598_s5 + $0x30] sm:$0xff] }
 0x1e8   :  { %vm4389_vm11 = vmpackc.low %vm2441_vm10, %vm4030_vm0 }
 0x1e9   :  { %vm4610_vm0 = vmmov %vm4609_vm12 }
 0x1eb   :  { %3810 = vmatmul.mubr.msk.f32.vlgmr.msra.gmra.mrb[28].mxu0 %vm1699_vm9, %v3415_v50 }
 0x1ec   :  { %3830 = vmatprep.mubr.msk.f32.mxu0 %vm1699_vm9, %v1697_v52 }
 0x1ee   :  { %3803 = vmatmul.mubr.msk.f32.vlgmr.msra.gmra.mrb[26].mxu1 %vm1699_vm9, %v3413_v51 }
 0x1ef   :  { %3816 = vmatprep.mubr.msk.f32.mxu1 %vm1699_vm9, %v1697_v52 }
 0x29d   :  { %v3755_v40 = vpop.f32.mrb[20].mxu0 }
 0x29e   :  { %v1778_v41 = vpop.f32.mrb[21].mxu0 }
 0x29f   :  { %v3969_v54 = vpack.c.bf16 %v3755_v40, %v1778_v41 }
 0x2a1   :  { %3971 = vmatprep.subr.msk.bf16.mxu1 %vm4389_vm11, %v3969_v54 }
 0x2a2   :  { %3974 = vmatpush3.bf16.msk.msra.mxu1 %vm4389_vm11, %v3969_v54 }
 0x2a5   :  { %3817 = vmatmul.mubr.msk.f32.vlgmr.msra.gmra.mrb[28].mxu1 %vm1699_vm9, %v1698_v55 }
 0x2a6   :  { %v3769_v56 = vpop.f32.mrb[22].mxu0  ;;  %3823 = vmatprep.mubr.msk.f32.mxu1 %vm1699_vm9, %v1697_v52 }
 0x2a7   :  { %v1940_v57 = vpop.f32.mrb[23].mxu0 }
 0x2a8   :  { %v3981_v58 = vpack.c.bf16 %v3769_v56, %v1940_v57  ;;  %v3207_v56 = vld [vmem:[%s4598_s5 + $0x48] sm:$0x1] }
 0x2a9   :  { %v3762_v59 = vpop.f32.mrb[20].mxu1 }
 0x2aa   :  { %3983 = vmatprep.subr.msk.bf16.mxu0 %vm4389_vm11, %v3981_v58  ;;  %v1859_v60 = vpop.f32.mrb[21].mxu1 }
 0x2ab   :  { %v3975_v61 = vpack.c.bf16 %v3762_v59, %v1859_v60  ;;  %3986 = vmatpush3.bf16.msk.msra.mxu0 %vm4389_vm11, %v3981_v58  ;;  %v3206_v59 = vld [vmem:[%s4598_s5 + $0x40] sm:$0xff] }
 0x2ad   :  { %3977 = vmatprep.subr.msk.bf16.mxu1 %vm4389_vm11, %v3975_v61 }
 0x2ae   :  { %v3783_v62 = vpop.f32.mrb[24].mxu0  ;;  %3980 = vmatpush3.bf16.msk.msra.mxu1 %vm4389_vm11, %v3975_v61  ;;  %3831 = vmatmul.mubr.msk.f32.vlgmr.msra.gmra.mrb[30].mxu0 %vm1699_vm9, %v1698_v55 }
 0x2af   :  { %v2102_v63 = vpop.f32.mrb[25].mxu0  ;;  %3844 = vmatprep.mubr.msk.f32.mxu0 %vm1699_vm9, %v1697_v52 }
 0x2b0   :  { %v3993_v0 = vpack.c.bf16 %v3783_v62, %v2102_v63  ;;  %v3209_v62 = vld [vmem:[%s4598_s5 + $0x58] sm:$0x1] }
 0x2b1   :  { %v3776_v1 = vpop.f32.mrb[22].mxu1  ;;  %3824 = vmatmul.mubr.msk.f32.vlgmr.msra.gmra.mrb[30].mxu1 %vm1699_vm9, %v1698_v55 }
 0x2b2   :  { %3995 = vmatprep.subr.msk.bf16.mxu0 %vm4389_vm11, %v3993_v0  ;;  %v2021_v2 = vpop.f32.mrb[23].mxu1  ;;  %3837 = vmatprep.mubr.msk.f32.mxu1 %vm1699_vm9, %v1697_v52 }
 0x2b3   :  { %v3987_v3 = vpack.c.bf16 %v3776_v1, %v2021_v2  ;;  %3998 = vmatpush3.bf16.msk.msra.mxu0 %vm4389_vm11, %v3993_v0 }
 0x2b5   :  { %3989 = vmatprep.subr.msk.bf16.mxu1 %vm4389_vm11, %v3987_v3 }
 0x2b6   :  { %v3797_v4 = vpop.f32.mrb[26].mxu0  ;;  %3992 = vmatpush3.bf16.msk.msra.mxu1 %vm4389_vm11, %v3987_v3  ;;  %3845 = vmatmul.mubr.msk.f32.vlgmr.msra.gmra.mrb[32].mxu0 %vm1699_vm9, %v1698_v55  ;;  %v3208_v3 = vld [vmem:[%s4598_s5 + $0x50] sm:$0xff] }
 0x2b7   :  { %v2264_v6 = vpop.f32.mrb[27].mxu0  ;;  %3858 = vmatprep.mubr.msk.f32.mxu0 %vm1699_vm9, %v1697_v52 }
 0x2b8   :  { %v4005_v7 = vpack.c.bf16 %v3797_v4, %v2264_v6 }
 0x2b9   :  { %v3790_v8 = vpop.f32.mrb[24].mxu1  ;;  %3838 = vmatmul.mubr.msk.f32.vlgmr.msra.gmra.mrb[32].mxu1 %vm1699_vm9, %v1698_v55 }
 0x2ba   :  { %4007 = vmatprep.subr.msk.bf16.mxu0 %vm4389_vm11, %v4005_v7  ;;  %v2183_v9 = vpop.f32.mrb[25].mxu1  ;;  %3851 = vmatprep.mubr.msk.f32.mxu1 %vm1699_vm9, %v1697_v52 }
 0x2bb   :  { %v3999_v10 = vpack.c.bf16 %v3790_v8, %v2183_v9  ;;  %4010 = vmatpush3.bf16.msk.msra.mxu0 %vm4389_vm11, %v4005_v7 }
 0x2bd   :  { %4001 = vmatprep.subr.msk.bf16.mxu1 %vm4389_vm11, %v3999_v10 }
 0x2be   :  { %v3811_v11 = vpop.f32.mrb[28].mxu0  ;;  %4004 = vmatpush3.bf16.msk.msra.mxu1 %vm4389_vm11, %v3999_v10  ;;  %3859 = vmatmul.mubr.msk.f32.vlgmr.msra.gmra.mrb[34].mxu0 %vm1699_vm9, %v1698_v55 }
 0x2bf   :  { %v2426_v12 = vpop.f32.mrb[29].mxu0  ;;  %3872 = vmatprep.mubr.msk.f32.mxu0 %vm1699_vm9, %v1697_v52 }
 0x2c0   :  { %v4017_v13 = vpack.c.bf16 %v3811_v11, %v2426_v12 }
 0x2c1   :  { %v3804_v14 = vpop.f32.mrb[26].mxu1  ;;  %3852 = vmatmul.mubr.msk.f32.vlgmr.msra.gmra.mrb[34].mxu1 %vm1699_vm9, %v1698_v55 }
 0x2c2   :  { %4019 = vmatprep.subr.msk.bf16.mxu0 %vm4389_vm11, %v4017_v13  ;;  %v2345_v15 = vpop.f32.mrb[27].mxu1  ;;  %3865 = vmatprep.mubr.msk.f32.mxu1 %vm1699_vm9, %v1697_v52 }
 0x2c3   :  { %v4011_v16 = vpack.c.bf16 %v3804_v14, %v2345_v15  ;;  %4022 = vmatpush3.bf16.msk.msra.mxu0 %vm4389_vm11, %v4017_v13  ;;  %v3211_v13 = vld [vmem:[%s4598_s5 + $0x68] sm:$0x1] }
 0x2c5   :  { %4013 = vmatprep.subr.msk.bf16.mxu1 %vm4389_vm11, %v4011_v16 }
 0x2c6   :  { %4016 = vmatpush3.bf16.msk.msra.mxu1 %vm4389_vm11, %v4011_v16  ;;  %3873 = vmatmul.mubr.msk.f32.vlgmr.msra.gmra.mrb[36].mxu0 %vm1699_vm9, %v1698_v55  ;;  %vm3221_vm11 = vcmp.lt.f32.partialorder %v3203_v36, 0.5  ;;  %v3210_v16 = vld [vmem:[%s4598_s5 + $0x60] sm:$0xff] }
 0x2c9   :  { %3866 = vmatmul.mubr.msk.f32.vlgmr.msra.gmra.mrb[36].mxu1 %vm1699_vm9, %v1698_v55 }
 0x378   :  { %v3818_v17 = vpop.f32.mrb[28].mxu1 }
 0x379   :  { %v2511_v18 = vpop.f32.mrb[29].mxu1 }
 0x381   :  { %v3832_v19 = vpop.f32.mrb[30].mxu0 }
 0x382   :  { %v2667_v21 = vpop.f32.mrb[31].mxu0 }
 0x384   :  { %v3825_v23 = vpop.f32.mrb[30].mxu1 }
 0x385   :  { %v3147_v25 = vadd.f32 %v3825_v23, %v3818_v17  ;;  %v2589_v26 = vpop.f32.mrb[31].mxu1  ;;  %v3149_v27 = vadd.f32 %v3832_v19, %v3825_v23 }
 0x386   :  { %v3146_v29 = vadd.f32 %v2589_v26, %v2511_v18  ;;  %v3148_v30 = vadd.f32 %v2667_v21, %v2589_v26 }
 0x387   :  { %vm3181_vm14 = vcmp.gt.f32.partialorder %v3147_v25, 0.5  ;;  %v3165_v31 = vadd.f32 %v3832_v19, %v3147_v25 }
 0x388   :  { %vm3235_vm1 = vmand %vm3181_vm14, %vm3217_vm6  ;;  %vm3180_vm2 = vcmp.gt.f32.partialorder %v3146_v29, 0.5  ;;  %v3164_v32 = vadd.f32 %v3146_v29, %v2667_v21  ;;  %vm3220_vm6 = vcmp.lt.f32.partialorder %v3202_v39, 0.5  ;;  %vm3223_vm14 = vcmp.lt.f32.partialorder %v3205_v44, 0.5 }
 0x389   :  { %v3480_v33 = vsel %vm3235_vm1, 1.0, %v4029_v5  ;;  %vm3234_vm7 = vmand %vm3180_vm2, %vm3216_vm13  ;;  %vm3183_vm8 = vcmp.gt.f32.partialorder %v3165_v31, 0.5  ;;  %v3846_v34 = vpop.f32.mrb[32].mxu0  ;;  %vm3222_vm2 = vcmp.lt.f32.partialorder %v3204_v49, 0.5 }
 0x38a   :  { %3308 = vst.msk [vmem:[%s4599_s7 + $0x8] sm:$0x1] %vm4609_vm12, %v3480_v33  ;;  %v3479_v35 = vsel %vm3234_vm7, 1.0, %v4029_v5  ;;  %vm3237_vm4 = vmand %vm3183_vm8, %vm3219_vm15  ;;  %vm3182_vm5 = vcmp.gt.f32.partialorder %v3164_v32, 0.5  ;;  %v2823_v37 = vpop.f32.mrb[33].mxu0 }
 0x38b   :  { %3307 = vst.msk [vmem:[%s4599_s7] sm:$0xff] %vm1699_vm9, %v3479_v35  ;;  %v3482_v38 = vsel %vm3237_vm4, 1.0, %v4029_v5  ;;  %vm3236_vm10 = vmand %vm3182_vm5, %vm3218_vm3 }
 0x38c   :  { %3310 = vst.msk [vmem:[%s4599_s7 + $0x18] sm:$0x1] %vm4610_vm0, %v3482_v38  ;;  %v3481_v42 = vsel %vm3236_vm10, 1.0, %v4029_v5  ;;  %v3839_v43 = vpop.f32.mrb[32].mxu1  ;;  %vm4611_vm8 = vmmov %vm4610_vm0 }
 0x38d   :  { %3309 = vst.msk [vmem:[%s4599_s7 + $0x10] sm:$0xff] %vm1699_vm9, %v3481_v42  ;;  %v3151_v45 = vadd.f32 %v3839_v43, %v3832_v19  ;;  %v3167_v46 = vadd.f32 %v3839_v43, %v3149_v27  ;;  %v2745_v47 = vpop.f32.mrb[33].mxu1  ;;  %v3153_v48 = vadd.f32 %v3846_v34, %v3839_v43  ;;  %vm4612_vm10 = vmmov %vm4610_vm0  ;;  %vm3225_vm0 = vcmp.lt.f32.partialorder %v3207_v56, 0.5  ;;  %v3213_v19 = vld [vmem:[%s4598_s5 + $0x78] sm:$0x1] }
 0x38e   :  { %v3150_v50 = vadd.f32 %v2745_v47, %v2667_v21  ;;  %v3166_v51 = vadd.f32 %v3148_v30, %v2745_v47  ;;  %v3152_v52 = vadd.f32 %v2823_v37, %v2745_v47  ;;  %v3214_v30 = vld [vmem:[%s4598_s5 + $0x80] sm:$0xff] }
 0x38f   :  { %vm3185_vm13 = vcmp.gt.f32.partialorder %v3167_v46, 0.5  ;;  %v3169_v40 = vadd.f32 %v3846_v34, %v3151_v45 }
 0x390   :  { %vm3239_vm15 = vmand %vm3185_vm13, %vm3221_vm11  ;;  %vm3184_vm1 = vcmp.gt.f32.partialorder %v3166_v51, 0.5  ;;  %v3168_v41 = vadd.f32 %v3150_v50, %v2823_v37  ;;  %vm3224_vm11 = vcmp.lt.f32.partialorder %v3206_v59, 0.5  ;;  %vm3227_vm13 = vcmp.lt.f32.partialorder %v3209_v62, 0.5 }
 0x391   :  { %v3484_v53 = vsel %vm3239_vm15, 1.0, %v4029_v5  ;;  %vm3238_vm3 = vmand %vm3184_vm1, %vm3220_vm6  ;;  %vm3187_vm7 = vcmp.gt.f32.partialorder %v3169_v40, 0.5  ;;  %v3860_v54 = vpop.f32.mrb[34].mxu0  ;;  %vm3226_vm1 = vcmp.lt.f32.partialorder %v3208_v3, 0.5 }
 0x392   :  { %3312 = vst.msk [vmem:[%s4599_s7 + $0x28] sm:$0x1] %vm4611_vm8, %v3484_v53  ;;  %v3483_v55 = vsel %vm3238_vm3, 1.0, %v4029_v5  ;;  %vm3241_vm12 = vmand %vm3187_vm7, %vm3223_vm14  ;;  %vm3186_vm4 = vcmp.gt.f32.partialorder %v3168_v41, 0.5  ;;  %v2979_v57 = vpop.f32.mrb[35].mxu0 }
 0x393   :  { %3311 = vst.msk [vmem:[%s4599_s7 + $0x20] sm:$0xff] %vm1699_vm9, %v3483_v55  ;;  %v3486_v58 = vsel %vm3241_vm12, 1.0, %v4029_v5  ;;  %vm3240_vm5 = vmand %vm3186_vm4, %vm3222_vm2 }
 0x394   :  { %3314 = vst.msk [vmem:[%s4599_s7 + $0x38] sm:$0x1] %vm4612_vm10, %v3486_v58  ;;  %v3485_v60 = vsel %vm3240_vm5, 1.0, %v4029_v5  ;;  %v3853_v61 = vpop.f32.mrb[34].mxu1  ;;  %vm4613_vm7 = vmmov %vm4611_vm8  ;;  %vm3229_vm10 = vcmp.lt.f32.partialorder %v3211_v13, 0.5 }
 0x395   :  { %3313 = vst.msk [vmem:[%s4599_s7 + $0x30] sm:$0xff] %vm1699_vm9, %v3485_v60  ;;  %v3155_v63 = vadd.f32 %v3853_v61, %v3846_v34  ;;  %v3171_v0 = vadd.f32 %v3853_v61, %v3153_v48  ;;  %v2901_v1 = vpop.f32.mrb[35].mxu1  ;;  %v3157_v2 = vadd.f32 %v3860_v54, %v3853_v61  ;;  %vm4614_vm5 = vmmov %vm4613_vm7 }
 0x396   :  { %v3154_v4 = vadd.f32 %v2901_v1, %v2823_v37  ;;  %v3170_v6 = vadd.f32 %v3152_v52, %v2901_v1  ;;  %v3156_v7 = vadd.f32 %v2979_v57, %v2901_v1 }
 0x397   :  { %vm3189_vm6 = vcmp.gt.f32.partialorder %v3171_v0, 0.5  ;;  %v3173_v8 = vadd.f32 %v3860_v54, %v3155_v63 }
 0x398   :  { %vm3243_vm14 = vmand %vm3189_vm6, %vm3225_vm0  ;;  %vm3188_vm15 = vcmp.gt.f32.partialorder %v3170_v6, 0.5  ;;  %v3172_v9 = vadd.f32 %v3154_v4, %v2979_v57  ;;  %vm3228_vm0 = vcmp.lt.f32.partialorder %v3210_v16, 0.5  ;;  %vm3231_vm6 = vcmp.lt.f32.partialorder %v3213_v19, 0.5 }
 0x399   :  { %v3488_v10 = vsel %vm3243_vm14, 1.0, %v4029_v5  ;;  %vm3242_vm2 = vmand %vm3188_vm15, %vm3224_vm11  ;;  %vm3191_vm3 = vcmp.gt.f32.partialorder %v3173_v8, 0.5  ;;  %v3874_v11 = vpop.f32.mrb[36].mxu0 }
 0x39a   :  { %3316 = vst.msk [vmem:[%s4599_s7 + $0x48] sm:$0x1] %vm4613_vm7, %v3488_v10  ;;  %v3487_v12 = vsel %vm3242_vm2, 1.0, %v4029_v5  ;;  %vm3245_vm8 = vmand %vm3191_vm3, %vm3227_vm13  ;;  %vm3190_vm12 = vcmp.gt.f32.partialorder %v3172_v9, 0.5  ;;  %v3135_v14 = vpop.f32.mrb[37].mxu0  ;;  %vm3230_vm7 = vcmp.lt.f32.partialorder %v3212_v28, 0.5 }
 0x39b   :  { %3315 = vst.msk [vmem:[%s4599_s7 + $0x40] sm:$0xff] %vm1699_vm9, %v3487_v12  ;;  %v3490_v15 = vsel %vm3245_vm8, 1.0, %v4029_v5  ;;  %vm3244_vm4 = vmand %vm3190_vm12, %vm3226_vm1  ;;  %vm3233_vm1 = vcmp.lt.f32.partialorder %v3215_v24, 0.5 }
 0x39c   :  { %3318 = vst.msk [vmem:[%s4599_s7 + $0x58] sm:$0x1] %vm4614_vm5, %v3490_v15  ;;  %v3489_v17 = vsel %vm3244_vm4, 1.0, %v4029_v5  ;;  %v3867_v18 = vpop.f32.mrb[36].mxu1  ;;  %vm4615_vm8 = vmmov %vm4614_vm5 }
 0x39d   :  { %3317 = vst.msk [vmem:[%s4599_s7 + $0x50] sm:$0xff] %vm1699_vm9, %v3489_v17  ;;  %v3159_v20 = vadd.f32 %v3867_v18, %v3860_v54  ;;  %v3175_v21 = vadd.f32 %v3867_v18, %v3157_v2  ;;  %v3057_v22 = vpop.f32.mrb[37].mxu1  ;;  %v3161_v23 = vadd.f32 %v3874_v11, %v3867_v18 }
 0x39e   :  { %v3158_v25 = vadd.f32 %v3057_v22, %v2979_v57  ;;  %v3174_v26 = vadd.f32 %v3156_v7, %v3057_v22  ;;  %v3160_v27 = vadd.f32 %v3135_v14, %v3057_v22 }
 0x39f   :  { %vm3193_vm11 = vcmp.gt.f32.partialorder %v3175_v21, 0.5  ;;  %v3177_v29 = vadd.f32 %v3874_v11, %v3159_v20  ;;  %vm3197_vm15 = vcmp.gt.f32.partialorder %v3161_v23, 0.5 }
 0x3a0   :  { %vm3247_vm13 = vmand %vm3193_vm11, %vm3229_vm10  ;;  %vm3192_vm14 = vcmp.gt.f32.partialorder %v3174_v26, 0.5  ;;  %v3176_v31 = vadd.f32 %v3158_v25, %v3135_v14  ;;  %vm3196_vm5 = vcmp.gt.f32.partialorder %v3160_v27, 0.5  ;;  %vm3232_vm10 = vcmp.lt.f32.partialorder %v3214_v30, 0.5 }
 0x3a1   :  { %v3492_v32 = vsel %vm3247_vm13, 1.0, %v4029_v5  ;;  %vm3246_vm2 = vmand %vm3192_vm14, %vm3228_vm0  ;;  %vm3195_vm3 = vcmp.gt.f32.partialorder %v3177_v29, 0.5 }
 0x3a2   :  { %3320 = vst.msk [vmem:[%s4599_s7 + $0x68] sm:$0x1] %vm4615_vm8, %v3492_v32  ;;  %v3491_v33 = vsel %vm3246_vm2, 1.0, %v4029_v5  ;;  %vm3249_vm12 = vmand %vm3195_vm3, %vm3231_vm6  ;;  %vm3194_vm4 = vcmp.gt.f32.partialorder %v3176_v31, 0.5 }
 0x3a3   :  { %3319 = vst.msk [vmem:[%s4599_s7 + $0x60] sm:$0xff] %vm1699_vm9, %v3491_v33  ;;  %vm3251_vm11 = vmand %vm3197_vm15, %vm3233_vm1  ;;  %v3494_v34 = vsel %vm3249_vm12, 1.0, %v4029_v5 }
 0x3a4   :  { %v3496_v35 = vsel %vm3251_vm11, 1.0, %v4029_v5  ;;  %vm4616_vm0 = vmmov %vm4615_vm8 }
 0x3a5   :  { %3322 = vst.msk [vmem:[%s4599_s7 + $0x78] sm:$0x1] %vm4616_vm0, %v3494_v34  ;;  %vm3248_vm13 = vmand %vm3194_vm4, %vm3230_vm7 }
 0x3a6   :  { %vm4617_vm6 = vmmov %vm4616_vm0  ;;  %v3493_v36 = vsel %vm3248_vm13, 1.0, %v4029_v5 }
 0x3a7   :  { %3324 = vst.msk [vmem:[%s4599_s7 + $0x88] sm:$0x1] %vm4617_vm6, %v3496_v35  ;;  %vm3250_vm14 = vmand %vm3196_vm5, %vm3232_vm10 }
 0x3a8   :  { %v3495_v37 = vsel %vm3250_vm14, 1.0, %v4029_v5  ;;  %3321 = vst.msk [vmem:[%s4599_s7 + $0x70] sm:$0xff] %vm1699_vm9, %v3493_v36 }
 0x3a9   :  { %3323 = vst.msk [vmem:[%s4599_s7 + $0x80] sm:$0xff] %vm1699_vm9, %v3495_v37 }

// kernel: seg3d_lossless_forward.9
= control target key start
LH: loop header
LB: loop body
LE: loop exit
PB: predicated region body
PF: predicated region fallthrough
CT: control target
= control target key end

     0   :  { %10 = vsyncpa [#allocation3], 0  ;;  %s1023_s0 = inlined_call_operand.vmem [shape: s32[3], index: 0, kind: input, shape index: {}]   ;;  %s1024_s1 = inlined_call_operand.vmem [shape: f32[8,8], index: 1, kind: input, shape index: {}]   ;;  %s1025_s2 = inlined_call_operand.vmem [shape: f32[2,384], index: 2, kind: input, shape index: {}]   ;;  %s1026_s3 = inlined_call_operand.vmem [shape: f32[24,384], index: 3, kind: input, shape index: {}]   ;;  %s1027_s4 = inlined_call_operand.vmem [shape: f32[24,384], index: 4, kind: input, shape index: {}]   ;;  %s1028_s5 = inlined_call_operand.vmem [shape: f32[24,384], index: 5, kind: output, shape index: {}]  }
   0x1   :  { %11 = vsyncpa [#allocation5], 0  ;;  %s839_s18 = smov 0  }
   0x2 LB: > { %s845_s19 = sadd.s32 4294967295, %s805_s18   ;;  %p652_p0 = scmp.ge.s32.totalorder %s805_s18, 1  ;;  %s805_s18 = sphi %s839_s18, %s17_s18  }
   0x3   : > { %p163_p1 = scmp.lt.s32.totalorder %s805_s18, 4  ;;  %s176_s22 = sshll.u32 %s1023_s0, 4  ;;  %s177_s22 = int_to_ptr.vmem [resolvable:$true] %s176_s22 }
   0x4   : > { %p1029_p3 = scmp.eq.s32.totalorder %s845_s19, 0  ;;  %s187_s26 = sshll.u32 %s1024_s1, 4  ;;  %s188_s26 = int_to_ptr.vmem [resolvable:$true] %s187_s26 }
   0x5   : > { %p852_p2 = pnand %p652_p0, %p163_p1  ;;  %s761_s28 = scalar_lea.vmem %s177_s22, 16 }
   0x6   : > { %p762_p6 = scmp.ne.s32.totalorder %s177_s22, %s761_s28  ;;  %p769_p10 = scmp.lt.s32.totalorder %s177_s22, %s177_s22 }
   0x7   : > { %s1031_s23 = scalar_select %p852_p2, 1, 0 }
   0x8   : > { %p704_p4 = pneg %p852_p2  ;;  %p770_p11 = scmp.lt.s32.totalorder %s761_s28, %s761_s28 }
   0xa   : > { %p864_p5 = pnand %p1029_p3, %p704_p4  ;;  %p771_p12 = por %p770_p11, %p769_p10 }
   0xc   : > { %p763_p7 = pneg %p864_p5 }
   0xe   : > { %p764_p8 = pnand %p763_p7, %p762_p6 }
  0x10   : > { %p765_p9 = pneg %p764_p8 }
  0x12   : > { %p772_p13 = pnand %p771_p12, %p765_p9 }
  0x14   : > { %775 = shalt.err (!%p772_p13)
}
  0x15   : > { %s807_s29 = smov [#allocation2]   ;;  %s776_s30 = scalar_lea.vmem %s188_s26, 128 }
  0x16   : > { %707 = dma.vmem_to_smem (!%p864_p5), %s177_s22, 16, %s807_s29, [#allocation3]  }
  0x17   : > { %p777_p0 = scmp.ne.s32.totalorder %s188_s26, %s776_s30  ;;  %p784_p3 = scmp.lt.s32.totalorder %s188_s26, %s188_s26 }
  0x18   : > { %p785_p2 = scmp.lt.s32.totalorder %s776_s30, %s776_s30 }
  0x19   : > { %p779_p1 = pnand %p777_p0, %p763_p7 }
  0x1a   : > { %p786_p6 = por %p785_p2, %p784_p3 }
  0x1b   : > { %p780_p4 = pneg %p779_p1 }
  0x1d   : > { %p787_p8 = pnand %p786_p6, %p780_p4 }
  0x1f   : > { %790 = shalt.err (!%p787_p8)
}
  0x20   : > { %s808_s6 = smov [#allocation4]   ;;  %p1033_p9 = scmp.ne.s32.totalorder %s1031_s23, 0 }
  0x21   : > { %710 = dma.vmem_to_smem (!%p864_p5), %s188_s26, 128, %s808_s6, [#allocation5]  }
  0x22   : > { %219 = sbr.rel (%p1033_p9) target bundleno = 156 (0x9c), region = 40  ;;  %p1034_p10 = scmp.eq.s32.totalorder (!%p1033_p9), %s845_s19, 0 }
  0x29   : > { %796 = dma.done.wait (%p1034_p10), [#allocation3], 16   ;;  %p1035_p11 = pmov %p1034_p10 }
  0x2a   : > { %p1036_p7 = pmov %p1034_p10 }
  0x2b   : > { %798 = vsyncadd (%p1035_p11), [#allocation3], 4294967280 }
  0x2c   : > { %800 = dma.done.wait (%p1036_p7), [#allocation5], 128   ;;  %p1037_p2 = pmov %p1036_p7 }
  0x2e   : > { %802 = vsyncadd (%p1037_p2), [#allocation5], 4294967168 }
  0x2f   : > { %229 = sfence }
  0x30   : > { %p257_p3 = scmp.lt.s32.totalorder %s845_s19, 2  ;;  %s272_s7 = sld [smem:[#allocation2 + %s845_s19]] }
  0x32   : > { %s258_s8 = scalar_select %p257_p3, %s845_s19, 2 }
  0x34   : > { %s695_s9 = smul.u32 24, %s258_s8 }
  0x36   : > { %s890_s12 = scalar_lea.vmem %s1026_s3, %s695_s9  ;;  %s895_s15 = scalar_lea.vmem %s1027_s4, %s695_s9 }
  0x37   : > { %s900_s20 = scalar_lea.vmem %s1028_s5, %s695_s9  ;;  %p662_p5 = scmp.ne.s32.totalorder %s272_s7, 0 }
  0x38   : > { %v277_v0 = vld [vmem:[%s890_s12] sm:$0xff] (!%p662_p5)  ;;  %v278_v1 = vld [vmem:[%s890_s12 + $0x8] sm:$0xff] (!%p662_p5)  ;;  %v279_v2 = vld [vmem:[%s890_s12 + $0x10] sm:$0xff] (!%p662_p5) }
  0x39   : > { %276 = sbr.rel (%p662_p5) target bundleno = 64 (0x40), region = 52  ;;  %280 = vst [vmem:[%s900_s20] sm:$0xff] (!%p662_p5), %v277_v0  ;;  %281 = vst [vmem:[%s900_s20 + $0x8] sm:$0xff] (!%p662_p5), %v278_v1 }
  0x3a   : > { %282 = vst [vmem:[%s900_s20 + $0x10] sm:$0xff] (!%p662_p5), %v279_v2 }
  0x40 PF: > { %s283_s21 = sld [smem:[#allocation2 + %s845_s19]] }
  0x46   : > { %p663_p12 = scmp.le.s32.totalorder %s283_s21, 0 }
  0x47   : > { %v291_v3 = vlaneseq (!%p663_p12)  ;;  %s665_s22 = sshll.u32 (!%p663_p12), %s845_s19, 3  ;;  %s297_s23 = sld [smem:[#allocation4]] (!%p663_p12)  ;;  %v288_v7 = vld [vmem:[%s1025_s2] ss:$2 sm:$0x7] (!%p663_p12) }
  0x48   : > { %287 = sbr.rel (%p663_p12) target bundleno = 156 (0x9c), region = 56  ;;  %v294_v5 = vstv (!%p663_p12), %s665_s22  ;;  %s666_s24 = sld [smem:[#allocation4 + $0x3]] (!%p663_p12)  ;;  %v664_v8 = vld [vmem:[%s1025_s2 + $0x1] ss:$2 sm:$0x7] (!%p663_p12) }
  0x49   : > { %v292_v4 = vshrl.u32 (!%p663_p12), %v291_v3, 7  ;;  %s667_s25 = sld [smem:[#allocation4 + $0x1]] (!%p663_p12)  ;;  %s668_s26 = sld [smem:[#allocation4 + $0x4]] (!%p663_p12) }
  0x4a   : > { %s669_s27 = sld [smem:[#allocation4 + $0x2]] (!%p663_p12)  ;;  %s670_s28 = sld [smem:[#allocation4 + $0x5]] (!%p663_p12) }
  0x4b   : > { %v295_v6 = vadd.s32 (!%p663_p12), %v294_v5, %v292_v4  ;;  %s673_s8 = sld [smem:[#allocation4 + $0x80]] (!%p663_p12)  ;;  %s674_s19 = sld [smem:[#allocation4 + $0x81]] (!%p663_p12)  ;;  %v926_v24 = vsub.s32 (!%p663_p12), 0, %v292_v4  ;;  %v936_v30 = vsub.s32 (!%p663_p12), 1, %v292_v4  ;;  %v938_v31 = vsub.s32 (!%p663_p12), 2, %v292_v4 }
  0x4c   : > { %s675_s9 = sld [smem:[#allocation4 + $0x82]] (!%p663_p12)  ;;  %s916_s10 = sld [smem:[#allocation4 + $0x83]] (!%p663_p12) }
  0x4d   : > { %v296_v9 = vcvt.s32.f32 (!%p663_p12), %v295_v6  ;;  %v298_v10 = vstv (!%p663_p12), %s297_s23  ;;  %s678_s11 = sld [smem:[#allocation4 + $0x100]] (!%p663_p12)  ;;  %s679_s13 = sld [smem:[#allocation4 + $0x101]] (!%p663_p12) }
  0x4e   : > { %v299_v11 = vmul.f32 (!%p663_p12), %v298_v10, %v288_v7  ;;  %v301_v12 = vstv (!%p663_p12), %s666_s24  ;;  %s918_s14 = sld [smem:[#allocation4 + $0x102]] (!%p663_p12)  ;;  %s930_s16 = sld [smem:[#allocation4 + $0x103]] (!%p663_p12) }
  0x4f   : > { %v304_v13 = vstv %s667_s25  ;;  %v307_v15 = vstv %s668_s26  ;;  %s940_s17 = sld [smem:[#allocation4 + $0x281]]  ;;  %s948_s21 = sld [smem:[#allocation4 + $0x180]] }
  0x50   : > { %v305_v14 = vmul.f32 %v664_v8, %v304_v13  ;;  %v310_v16 = vstv %s669_s27  ;;  %v920_v17 = vadd.f32 %v301_v12, %v299_v11  ;;  %v313_v19 = vstv %s670_s28  ;;  %s950_s22 = sld [smem:[#allocation4 + $0x181]]  ;;  %s955_s23 = sld [smem:[#allocation4 + $0x182]] }
  0x51   : > { %v311_v18 = vmul.f32 %v310_v16, %v296_v9  ;;  %v349_v22 = vstv %s673_s8  ;;  %v352_v23 = vstv %s674_s19  ;;  %s959_s24 = sld [smem:[#allocation4 + $0x200]]  ;;  %s961_s25 = sld [smem:[#allocation4 + $0x201]] }
  0x52   : > { %v922_v20 = vadd.f32 %v307_v15, %v305_v14  ;;  %v350_v25 = vmul.f32 %v349_v22, %v920_v17  ;;  %v356_v27 = vstv %s675_s9  ;;  %v315_v28 = vmul.f32 %v920_v17, %v920_v17  ;;  %s965_s26 = sld [smem:[#allocation4 + $0x202]]  ;;  %s974_s27 = sld [smem:[#allocation4 + $0x183]] }
  0x53   : > { %v924_v21 = vadd.f32 %v313_v19, %v311_v18  ;;  %v394_v34 = vstv %s678_s11  ;;  %v397_v35 = vstv %s679_s13  ;;  %v378_v40 = vstv %s916_s10  ;;  %s979_s28 = sld [smem:[#allocation4 + $0x280]]  ;;  %s981_s29 = sld [smem:[#allocation4 + $0x84]] }
  0x54   : > { %v353_v26 = vmul.f32 %v352_v23, %v922_v20  ;;  %v316_v29 = vmul.f32 %v922_v20, %v922_v20  ;;  %v395_v36 = vmul.f32 %v394_v34, %v920_v17  ;;  %v398_v37 = vmul.f32 %v397_v35, %v922_v20  ;;  %s986_s30 = sld [smem:[#allocation4 + $0x203]]  ;;  %s994_s6 = sld [smem:[#allocation4 + $0x104]] }
  0x55   : > { %v357_v33 = vmul.f32 %v356_v27, %v924_v21  ;;  %v401_v38 = vstv %s918_s14  ;;  %v423_v52 = vstv %s930_s16  ;;  %v318_v57 = vmul.f32 %v924_v21, %v924_v21  ;;  %s687_s7 = sld [smem:[#allocation4 + $0x184]] }
  0x56   : > { %v354_v32 = vadd.f32 %v353_v26, %v350_v25  ;;  %v399_v43 = vadd.f32 %v398_v37, %v395_v36  ;;  %v402_v44 = vmul.f32 %v401_v38, %v924_v21  ;;  %v317_v45 = vadd.f32 %v316_v29, %v315_v28  ;;  %s692_s8 = sld [smem:[#allocation4 + $0x204]] }
  0x57   : > { %v972_v60 = vstv %s940_s17  ;;  %v439_v1 = vstv %s948_s21  ;;  %v442_v2 = vstv %s950_s22  ;;  %v446_v8 = vstv %s955_s23 }
  0x58   : > { %v362_v39 = vrot.slane %v354_v32, %v926_v24  ;;  %v366_v41 = vrot.slane %v354_v32, %v936_v30  ;;  %v370_v42 = vrot.slane %v354_v32, %v938_v31  ;;  %v407_v49 = vrot.slane %v399_v43, %v926_v24 }
  0x59   : > { %v411_v50 = vrot.slane %v399_v43, %v936_v30  ;;  %v415_v55 = vrot.slane %v399_v43, %v938_v31  ;;  %v323_v58 = vrot.slane %v317_v45, %v926_v24  ;;  %v327_v59 = vrot.slane %v317_v45, %v936_v30 }
  0x5a   : > { %v374_v46 = vadd.f32 %v362_v39, %v357_v33  ;;  %v375_v47 = vadd.f32 %v366_v41, %v357_v33  ;;  %v376_v48 = vadd.f32 %v370_v42, %v357_v33  ;;  %v419_v56 = vadd.f32 %v407_v49, %v402_v44 }
  0x5b   : > { %v420_v61 = vadd.f32 %v411_v50, %v402_v44  ;;  %v421_v62 = vadd.f32 %v415_v55, %v402_v44  ;;  %v331_v0 = vrot.slane %v317_v45, %v938_v31  ;;  %v440_v5 = vmul.f32 %v439_v1, %v920_v17 }
  0x5c   : > { %v379_v51 = vadd.f32 %v378_v40, %v374_v46  ;;  %v380_v53 = vadd.f32 %v378_v40, %v375_v47  ;;  %v381_v54 = vadd.f32 %v378_v40, %v376_v48  ;;  %v424_v63 = vadd.f32 %v423_v52, %v419_v56 }
  0x5d   : > { %v425_v3 = vadd.f32 %v423_v52, %v420_v61  ;;  %v426_v4 = vadd.f32 %v423_v52, %v421_v62  ;;  %v335_v6 = vadd.f32 %v323_v58, %v318_v57  ;;  %v443_v7 = vmul.f32 %v442_v2, %v922_v20 }
  0x5e   : > { %725 = vtanh.f32 %v379_v51  ;;  %v336_v9 = vadd.f32 %v327_v59, %v318_v57  ;;  %v484_v10 = vstv %s959_s24  ;;  %v487_v11 = vstv %s961_s25 }
  0x5f   : > { %727 = vtanh.f32 %v380_v53  ;;  %v444_v12 = vadd.f32 %v443_v7, %v440_v5  ;;  %v447_v13 = vmul.f32 %v446_v8, %v924_v21  ;;  %v485_v14 = vmul.f32 %v484_v10, %v920_v17 }
  0x60   : > { %729 = vtanh.f32 %v381_v54  ;;  %v488_v15 = vmul.f32 %v487_v11, %v922_v20  ;;  %v337_v16 = vadd.f32 %v331_v0, %v318_v57  ;;  %v491_v18 = vstv %s965_s26 }
  0x61   : > { %731 = vtanh.f32 %v424_v63  ;;  %v452_v19 = vrot.slane %v444_v12, %v926_v24  ;;  %v456_v22 = vrot.slane %v444_v12, %v936_v30  ;;  %v460_v23 = vrot.slane %v444_v12, %v938_v31 }
  0x62   : > { %733 = vtanh.f32 %v425_v3  ;;  %v489_v25 = vadd.f32 %v488_v15, %v485_v14  ;;  %v341_v26 = vsub.f32 %v972_v60, %v335_v6  ;;  %v342_v17 = vsub.f32 %v972_v60, %v336_v9 }
  0x63   : > { %735 = vtanh.f32 %v426_v4  ;;  %v468_v20 = vstv %s974_s27  ;;  %v492_v27 = vmul.f32 %v491_v18, %v924_v21  ;;  %v464_v28 = vadd.f32 %v452_v19, %v447_v13 }
  0x64   : > { %v465_v29 = vadd.f32 %v456_v22, %v447_v13  ;;  %v466_v32 = vadd.f32 %v460_v23, %v447_v13  ;;  %v497_v33 = vrot.slane %v489_v25, %v926_v24  ;;  %v344_v35 = vstv %s979_s28 }
  0x65   : > { %v386_v36 = vstv %s981_s29  ;;  %v501_v37 = vrot.slane %v489_v25, %v936_v30  ;;  %v505_v38 = vrot.slane %v489_v25, %v938_v31  ;;  %v469_v40 = vadd.f32 %v468_v20, %v464_v28 }
  0x66   : > { %v470_v41 = vadd.f32 %v468_v20, %v465_v29  ;;  %v471_v42 = vadd.f32 %v468_v20, %v466_v32  ;;  %v513_v43 = vstv %s986_s30  ;;  %v343_v21 = vsub.f32 %v972_v60, %v337_v16 }
  0x67   : > { %v509_v45 = vadd.f32 %v497_v33, %v492_v27  ;;  %v510_v46 = vadd.f32 %v501_v37, %v492_v27  ;;  %v345_v24 = vmul.f32 %v344_v35, %v341_v26  ;;  %v346_v48 = vmul.f32 %v344_v35, %v342_v17 }
  0x68   : > { %v726_v34 = vpop.eup %725  ;;  %737 = vtanh.f32 %v469_v40  ;;  %v511_v49 = vadd.f32 %v505_v38, %v492_v27  ;;  %v431_v53 = vstv %s994_s6  ;;  %v347_v56 = vmul.f32 %v344_v35, %v343_v21  ;;  %v552_v21 = vld [vmem:[%s890_s12] sm:$0xff] }
  0x69   : > { %v728_v39 = vpop.eup %727  ;;  %v387_v50 = vmul.f32 %v726_v34, %v386_v36  ;;  %739 = vtanh.f32 %v470_v41  ;;  %v514_v31 = vadd.f32 %v513_v43, %v509_v45  ;;  %v515_v51 = vadd.f32 %v513_v43, %v510_v46  ;;  %v553_v45 = vld [vmem:[%s890_s12 + $0x8] sm:$0xff] }
  0x6a   : > { %v730_v44 = vpop.eup %729  ;;  %v388_v52 = vmul.f32 %v728_v39, %v386_v36  ;;  %741 = vtanh.f32 %v471_v42  ;;  %v516_v54 = vadd.f32 %v513_v43, %v511_v49  ;;  %v476_v0 = vstv %s687_s7  ;;  %v546_v42 = vld [vmem:[%s895_s15] sm:$0xff]  ;;  %v547_v43 = vld [vmem:[%s895_s15 + $0x8] sm:$0xff] }
  0x6b   : > { %v732_v47 = vpop.eup %731  ;;  %v389_v57 = vmul.f32 %v730_v44, %v386_v36  ;;  %743 = vtanh.f32 %v514_v31  ;;  %v390_v58 = vadd.f32 %v387_v50, %v345_v24  ;;  %v521_v7 = vstv %s692_s8  ;;  %v548_v44 = vld [vmem:[%s895_s15 + $0x10] sm:$0xff] }
  0x6c   : > { %v734_v30 = vpop.eup %733  ;;  %745 = vtanh.f32 %v515_v51  ;;  %v432_v59 = vmul.f32 %v732_v47, %v431_v53  ;;  %v391_v60 = vadd.f32 %v388_v52, %v346_v48  ;;  %vm549_vm0 = vcmp.gt.f32.partialorder %v546_v42, 0.5  ;;  %v554_v47 = vld [vmem:[%s890_s12 + $0x10] sm:$0xff] }
  0x6d   : > { %v736_v55 = vpop.eup %735  ;;  %747 = vtanh.f32 %v516_v54  ;;  %v433_v61 = vmul.f32 %v734_v30, %v431_v53  ;;  %v392_v62 = vadd.f32 %v389_v57, %v347_v56  ;;  %vm550_vm1 = vcmp.gt.f32.partialorder %v547_v43, 0.5 }
  0x6e   : > { %v434_v63 = vmul.f32 %v736_v55, %v431_v53  ;;  %v435_v1 = vadd.f32 %v432_v59, %v390_v58  ;;  %vm551_vm2 = vcmp.gt.f32.partialorder %v548_v44, 0.5 }
  0x6f   : > { %v436_v3 = vadd.f32 %v433_v61, %v391_v60 }
  0x70   : > { %v437_v5 = vadd.f32 %v434_v63, %v392_v62 }
  0x72   : > { %v738_v2 = vpop.eup %737 }
  0x73   : > { %v740_v4 = vpop.eup %739  ;;  %v477_v6 = vmul.f32 %v738_v2, %v476_v0 }
  0x74   : > { %v742_v8 = vpop.eup %741  ;;  %v478_v9 = vmul.f32 %v740_v4, %v476_v0 }
  0x75   : > { %v744_v10 = vpop.eup %743  ;;  %v479_v11 = vmul.f32 %v742_v8, %v476_v0  ;;  %v480_v12 = vadd.f32 %v477_v6, %v435_v1 }
  0x76   : > { %v746_v13 = vpop.eup %745  ;;  %v481_v14 = vadd.f32 %v478_v9, %v436_v3  ;;  %v522_v15 = vmul.f32 %v744_v10, %v521_v7 }
  0x77   : > { %v748_v16 = vpop.eup %747  ;;  %v482_v18 = vadd.f32 %v479_v11, %v437_v5  ;;  %v523_v19 = vmul.f32 %v746_v13, %v521_v7 }
  0x78   : > { %v524_v22 = vmul.f32 %v748_v16, %v521_v7  ;;  %v525_v23 = vadd.f32 %v522_v15, %v480_v12 }
  0x79   : > { %v526_v25 = vadd.f32 %v523_v19, %v481_v14 }
  0x7a   : > { %v527_v26 = vadd.f32 %v524_v22, %v482_v18  ;;  %v528_v17 = vmax.f32 %v525_v23, -60.0 }
  0x7b   : > { %v529_v20 = vmax.f32 %v526_v25, -60.0 }
  0x7c   : > { %v530_v27 = vmax.f32 %v527_v26, -60.0  ;;  %v531_v28 = vsub.f32 0.0, %v528_v17 }
  0x7d   : > { %v532_v29 = vsub.f32 0.0, %v529_v20 }
  0x7e   : > { %v533_v32 = vsub.f32 0.0, %v530_v27  ;;  %v534_v33 = vmul.f32 1.442695, %v531_v28 }
  0x7f   : > { %v536_v34 = vmul.f32 1.442695, %v532_v29 }
  0x80   : > { %749 = vpow2.f32 %v534_v33  ;;  %v538_v35 = vmul.f32 1.442695, %v533_v32 }
  0x81   : > { %751 = vpow2.f32 %v536_v34 }
  0x82   : > { %753 = vpow2.f32 %v538_v35 }
  0x8a   : > { %v750_v36 = vpop.eup %749 }
  0x8b   : > { %v752_v37 = vpop.eup %751  ;;  %v540_v38 = vadd.f32 1.0, %v750_v36 }
  0x8c   : > { %v754_v39 = vpop.eup %753  ;;  %v541_v40 = vadd.f32 1.0, %v752_v37 }
  0x8d   : > { %v542_v41 = vadd.f32 1.0, %v754_v39  ;;  %755 = vrcp.f32 %v540_v38 }
  0x8e   : > { %757 = vrcp.f32 %v541_v40 }
  0x8f   : > { %759 = vrcp.f32 %v542_v41 }
  0x97   : > { %v756_v46 = vpop.eup %755 }
  0x98   : > { %v758_v24 = vpop.eup %757  ;;  %v555_v48 = vsel %vm549_vm0, %v756_v46, %v552_v21 }
  0x99   : > { %v760_v49 = vpop.eup %759  ;;  %v556_v30 = vsel %vm550_vm1, %v758_v24, %v553_v45  ;;  %558 = vst [vmem:[%s900_s20] sm:$0xff] %v555_v48 }
  0x9a   : > { %v557_v50 = vsel %vm551_vm2, %v760_v49, %v554_v47  ;;  %559 = vst [vmem:[%s900_s20 + $0x8] sm:$0xff] %v556_v30 }
  0x9b   : > { %560 = vst [vmem:[%s900_s20 + $0x10] sm:$0xff] %v557_v50 }
  0x9c PF: > { %s17_s18 = sadd.s32 1, %s805_s18  }
  0x9d   : > { %p14_p13 = scmp.ge.s32.totalorder %s17_s18, 5  }
  0x9f   :  { %16 = sbr.rel (!%p14_p13) target bundleno = 2 (0x2), region = 91 }
  0xa6   :  { %582 = vsyncpa [#allocation3], 1 }
  0xa7   :  { %584 = vsyncpa [#allocation3 + $0x1], 1 }
  0xa8   :  { %585 = vsyncpa [#allocation5], 1 }

// kernel: seg3d_lossless_forward.8
= control target key start
LH: loop header
LB: loop body
LE: loop exit
PB: predicated region body
PF: predicated region fallthrough
CT: control target
= control target key end

     0   :  { %vm103_vm0 = vcmask 72704   ;;  %v8940_v21 = vmov 0.0   ;;  %v8941_v41 = vmov 0.0|0.0   ;;  %s11276_s1 = inlined_call_operand.vmem [shape: f32[17,9], index: 1, kind: input, shape index: {}, may-alias: {1,2}]   ;;  %s11277_s0 = inlined_call_operand.vmem [shape: f32[9,9,9], index: 0, kind: input, shape index: {}]   ;;  %s11278_s2 = inlined_call_operand.vmem [shape: f32[17,9], index: 2, kind: input, shape index: {}, may-alias: {1,2}]   ;;  %s11279_s3 = inlined_call_operand.vmem [shape: f32[17,17], index: 3, kind: input, shape index: {}, may-alias: {3,4}]   ;;  %s11280_s6 = inlined_call_operand.vmem [shape: f32[17,17,17], index: 6, kind: output, shape index: {0}]   ;;  %s11281_s4 = inlined_call_operand.vmem [shape: f32[17,17], index: 4, kind: input, shape index: {}, may-alias: {3,4}]   ;;  %s11282_s5 = inlined_call_operand.vmem [shape: f32[17,17,17], index: 5, kind: input, shape index: {}]   ;;  %s11283_s7 = inlined_call_operand.vmem [shape: f32[17,17,17], index: 7, kind: output, shape index: {1}]  }
   0x1   :  { %v97_v0 = vld [vmem:[%s11276_s1] sm:$0xff]  ;;  %v98_v1 = vld [vmem:[%s11276_s1 + $0x8] sm:$0xff]  ;;  %vm8992_vm1 = vmpackc.low %vm103_vm0, %vm103_vm0 }
   0x2   :  { %v8996_v3 = vpack.c.bf16 %v98_v1, %v97_v0  ;;  %v9001_v4 = vld [vmem:[%s11277_s0] sm:$0xff]  ;;  %v9006_v5 = vld [vmem:[%s11277_s0 + $0x10] sm:$0xff]  ;;  %v9040_v7 = vld [vmem:[%s11277_s0 + $0x8] sm:$0x1] }
   0x3   :  { %v9011_v6 = vld [vmem:[%s11276_s1 + $0x10] sm:$0x1]  ;;  %7736 = vmatprep.mubr.msk.f32.mxu0 %vm103_vm0, %v9001_v4  ;;  %7745 = vmatprep.mubr.msk.f32.mxu1 %vm103_vm0, %v9006_v5  ;;  %v9045_v8 = vld [vmem:[%s11277_s0 + $0x18] sm:$0x1]  ;;  %v9060_v9 = vld [vmem:[%s11277_s0 + $0x20] sm:$0xff]  ;;  %vm43_vm2 = vcmp.gt.f32.partialorder %v9001_v4, 0.5 }
   0x4   :  { %8638 = vmatprep.subr.msk.bf16.mxu0 %vm8992_vm1, %v8996_v3  ;;  %8644 = vmatprep.subr.msk.bf16.mxu1 %vm8992_vm1, %v8996_v3  ;;  %v9065_v10 = vld [vmem:[%s11277_s0 + $0x30] sm:$0xff]  ;;  %v9088_v11 = vld [vmem:[%s11277_s0 + $0x28] sm:$0x1]  ;;  %v9093_v12 = vld [vmem:[%s11277_s0 + $0x38] sm:$0x1]  ;;  %v6894_v22 = vsel %vm43_vm2, 1.0, %v8940_v21 }
   0x5   :  { %8641 = vmatpush3.bf16.xpose.msk.msra.mxu0 %vm8992_vm1, %v8996_v3  ;;  %8647 = vmatpush3.bf16.xpose.msk.msra.mxu1 %vm8992_vm1, %v8996_v3  ;;  %v9108_v13 = vld [vmem:[%s11277_s0 + $0x40] sm:$0xff]  ;;  %v9113_v14 = vld [vmem:[%s11277_s0 + $0x50] sm:$0xff]  ;;  %v9136_v15 = vld [vmem:[%s11277_s0 + $0x48] sm:$0x1]  ;;  %vm44_vm3 = vcmp.gt.f32.partialorder %v9040_v7, 0.5  ;;  %vm45_vm4 = vcmp.gt.f32.partialorder %v9006_v5, 0.5 }
   0x6   :  { %7734 = vmatprep.subr.msk.mxu0 %vm103_vm0, %v9011_v6  ;;  %7743 = vmatprep.subr.msk.mxu1 %vm103_vm0, %v9011_v6  ;;  %v9141_v16 = vld [vmem:[%s11277_s0 + $0x58] sm:$0x1]  ;;  %v9156_v17 = vld [vmem:[%s11277_s0 + $0x60] sm:$0xff]  ;;  %v9161_v18 = vld [vmem:[%s11277_s0 + $0x70] sm:$0xff]  ;;  %v6895_v24 = vsel %vm44_vm3, 1.0, %v8940_v21  ;;  %vm47_vm5 = vcmp.gt.f32.partialorder %v9060_v9, 0.5 }
   0x7   :  { %v9185_v19 = vld [vmem:[%s11277_s0 + $0x68] sm:$0x1]  ;;  %v9190_v20 = vld [vmem:[%s11277_s0 + $0x78] sm:$0x1]  ;;  %v9206_v23 = vld [vmem:[%s11277_s0 + $0x80] sm:$0xff]  ;;  %v6896_v26 = vsel %vm45_vm4, 1.0, %v8940_v21 }
   0x8   :  { %v9231_v25 = vld [vmem:[%s11277_s0 + $0x88] sm:$0x1]  ;;  %v6898_v27 = vsel %vm47_vm5, 1.0, %v8940_v21  ;;  %vm46_vm6 = vcmp.gt.f32.partialorder %v9045_v8, 0.5  ;;  %vm48_vm7 = vcmp.gt.f32.partialorder %v9088_v11, 0.5  ;;  %vm49_vm8 = vcmp.gt.f32.partialorder %v9065_v10, 0.5 }
   0x9   :  { %v6897_v28 = vsel %vm46_vm6, 1.0, %v8940_v21  ;;  %v6899_v29 = vsel %vm48_vm7, 1.0, %v8940_v21  ;;  %vm51_vm9 = vcmp.gt.f32.partialorder %v9108_v13, 0.5  ;;  %v6900_v30 = vsel %vm49_vm8, 1.0, %v8940_v21  ;;  %v9381_v50 = vld [vmem:[%s11278_s2] sm:$0xff]  ;;  %v9396_v51 = vld [vmem:[%s11278_s2 + $0x8] sm:$0xff] }
   0xa   :  { %v6902_v31 = vsel %vm51_vm9, 1.0, %v8940_v21  ;;  %vm50_vm10 = vcmp.gt.f32.partialorder %v9093_v12, 0.5  ;;  %vm52_vm11 = vcmp.gt.f32.partialorder %v9136_v15, 0.5  ;;  %vm53_vm12 = vcmp.gt.f32.partialorder %v9113_v14, 0.5  ;;  %v9409_v54 = vld [vmem:[%s11278_s2 + $0x10] sm:$0x1] }
   0xb   :  { %v6901_v32 = vsel %vm50_vm10, 1.0, %v8940_v21  ;;  %vm55_vm13 = vcmp.gt.f32.partialorder %v9156_v17, 0.5  ;;  %v6903_v33 = vsel %vm52_vm11, 1.0, %v8940_v21  ;;  %v6904_v34 = vsel %vm53_vm12, 1.0, %v8940_v21 }
   0xc   :  { %v6906_v35 = vsel %vm55_vm13, 1.0, %v8940_v21  ;;  %vm54_vm14 = vcmp.gt.f32.partialorder %v9141_v16, 0.5  ;;  %vm57_vm15 = vcmp.gt.f32.partialorder %v9161_v18, 0.5  ;;  %vm56_vm2 = vcmp.gt.f32.partialorder %v9185_v19, 0.5 }
   0xd   :  { %7735 = vmatpush3.xpose.msk.msra.mxu0 %vm103_vm0, %v9011_v6  ;;  %7744 = vmatpush3.xpose.msk.msra.mxu1 %vm103_vm0, %v9011_v6  ;;  %v6905_v36 = vsel %vm54_vm14, 1.0, %v8940_v21  ;;  %vm59_vm3 = vcmp.gt.f32.partialorder %v9206_v23, 0.5  ;;  %v6908_v37 = vsel %vm57_vm15, 1.0, %v8940_v21  ;;  %v6907_v38 = vsel %vm56_vm2, 1.0, %v8940_v21 }
   0xe   :  { %8650 = vmatprep.subr.msk.bf16.mxu0 %vm8992_vm1, %v8996_v3  ;;  %8656 = vmatprep.subr.msk.bf16.mxu1 %vm8992_vm1, %v8996_v3  ;;  %v6910_v39 = vsel %vm59_vm3, 1.0, %v8940_v21  ;;  %vm58_vm4 = vcmp.gt.f32.partialorder %v9190_v20, 0.5  ;;  %vm60_vm5 = vcmp.gt.f32.partialorder %v9231_v25, 0.5  ;;  %vm1580_vm6 = vcmask 1040384  }
   0xf   :  { %v6909_v40 = vsel %vm58_vm4, 1.0, %v8940_v21  ;;  %v6911_v42 = vsel %vm60_vm5, 1.0, %v8940_v21  ;;  %vm8943_vm7 = vmmov 1   ;;  %vm3432_vm9 = vcmask 138240  }
  0x10   :  { %7737 = vmatmul.mubr.msk.f32.vlgmr.msra.gmra.mrb[0].mxu0 %vm103_vm0, %v9040_v7  ;;  %7746 = vmatmul.mubr.msk.f32.vlgmr.msra.gmra.mrb[0].mxu1 %vm103_vm0, %v9045_v8  ;;  %vm9370_vm8 = vmpackc.low %vm1580_vm6, %vm8943_vm7 }
  0x11   :  { %8653 = vmatpush3.bf16.xpose.msk.msra.mxu0 %vm8992_vm1, %v8996_v3  ;;  %8659 = vmatpush3.bf16.xpose.msk.msra.mxu1 %vm8992_vm1, %v8996_v3  ;;  %vm9669_vm10 = vmpackc.low %vm3432_vm9, %vm3432_vm9 }
  0x12   :  { %7752 = vmatprep.subr.msk.mxu0 %vm103_vm0, %v9011_v6  ;;  %7761 = vmatprep.subr.msk.mxu1 %vm103_vm0, %v9011_v6 }
  0x13   :  { %7754 = vmatprep.mubr.msk.f32.mxu0 %vm103_vm0, %v9060_v9  ;;  %7763 = vmatprep.mubr.msk.f32.mxu1 %vm103_vm0, %v9065_v10 }
  0x19   :  { %7753 = vmatpush3.xpose.msk.msra.mxu0 %vm103_vm0, %v9011_v6  ;;  %7762 = vmatpush3.xpose.msk.msra.mxu1 %vm103_vm0, %v9011_v6 }
  0x1a   :  { %8662 = vmatprep.subr.msk.bf16.mxu0 %vm8992_vm1, %v8996_v3  ;;  %8668 = vmatprep.subr.msk.bf16.mxu1 %vm8992_vm1, %v8996_v3 }
  0x1c   :  { %7755 = vmatmul.mubr.msk.f32.vlgmr.msra.gmra.mrb[2].mxu0 %vm103_vm0, %v9088_v11  ;;  %7764 = vmatmul.mubr.msk.f32.vlgmr.msra.gmra.mrb[2].mxu1 %vm103_vm0, %v9093_v12 }
  0x1d   :  { %8665 = vmatpush3.bf16.xpose.msk.msra.mxu0 %vm8992_vm1, %v8996_v3  ;;  %8671 = vmatpush3.bf16.xpose.msk.msra.mxu1 %vm8992_vm1, %v8996_v3 }
  0x1e   :  { %7770 = vmatprep.subr.msk.mxu0 %vm103_vm0, %v9011_v6  ;;  %7779 = vmatprep.subr.msk.mxu1 %vm103_vm0, %v9011_v6 }
  0x1f   :  { %7772 = vmatprep.mubr.msk.f32.mxu0 %vm103_vm0, %v9108_v13  ;;  %7781 = vmatprep.mubr.msk.f32.mxu1 %vm103_vm0, %v9113_v14 }
  0x25   :  { %7771 = vmatpush3.xpose.msk.msra.mxu0 %vm103_vm0, %v9011_v6  ;;  %7780 = vmatpush3.xpose.msk.msra.mxu1 %vm103_vm0, %v9011_v6 }
  0x26   :  { %8674 = vmatprep.subr.msk.bf16.mxu0 %vm8992_vm1, %v8996_v3  ;;  %8680 = vmatprep.subr.msk.bf16.mxu1 %vm8992_vm1, %v8996_v3 }
  0x28   :  { %7773 = vmatmul.mubr.msk.f32.vlgmr.msra.gmra.mrb[4].mxu0 %vm103_vm0, %v9136_v15  ;;  %7782 = vmatmul.mubr.msk.f32.vlgmr.msra.gmra.mrb[4].mxu1 %vm103_vm0, %v9141_v16 }
  0x29   :  { %8677 = vmatpush3.bf16.xpose.msk.msra.mxu0 %vm8992_vm1, %v8996_v3  ;;  %8683 = vmatpush3.bf16.xpose.msk.msra.mxu1 %vm8992_vm1, %v8996_v3 }
  0x2a   :  { %7788 = vmatprep.subr.msk.mxu0 %vm103_vm0, %v9011_v6  ;;  %7797 = vmatprep.subr.msk.mxu1 %vm103_vm0, %v9011_v6 }
  0x2b   :  { %7790 = vmatprep.mubr.msk.f32.mxu0 %vm103_vm0, %v9156_v17  ;;  %7799 = vmatprep.mubr.msk.f32.mxu1 %vm103_vm0, %v9161_v18 }
  0x31   :  { %7789 = vmatpush3.xpose.msk.msra.mxu0 %vm103_vm0, %v9011_v6  ;;  %7798 = vmatpush3.xpose.msk.msra.mxu1 %vm103_vm0, %v9011_v6 }
  0x32   :  { %8686 = vmatprep.subr.msk.bf16.mxu0 %vm8992_vm1, %v8996_v3  ;;  %8692 = vmatprep.subr.msk.bf16.mxu1 %vm8992_vm1, %v8996_v3 }
  0x34   :  { %7791 = vmatmul.mubr.msk.f32.vlgmr.msra.gmra.mrb[6].mxu0 %vm103_vm0, %v9185_v19  ;;  %7800 = vmatmul.mubr.msk.f32.vlgmr.msra.gmra.mrb[6].mxu1 %vm103_vm0, %v9190_v20 }
  0x35   :  { %8689 = vmatpush3.bf16.xpose.msk.msra.mxu0 %vm8992_vm1, %v8996_v3  ;;  %8695 = vmatpush3.bf16.xpose.msk.msra.mxu1 %vm8992_vm1, %v8996_v3 }
  0x36   :  { %7806 = vmatprep.subr.msk.mxu0 %vm103_vm0, %v9011_v6  ;;  %7815 = vmatprep.subr.msk.mxu1 %vm103_vm0, %v9011_v6 }
  0x37   :  { %7808 = vmatprep.mubr.msk.f32.mxu0 %vm103_vm0, %v9206_v23  ;;  %7817 = vmatprep.mubr.msk.f32.mxu1 %vm103_vm0, %v6894_v22 }
  0x3d   :  { %7807 = vmatpush3.xpose.msk.msra.mxu0 %vm103_vm0, %v9011_v6  ;;  %7816 = vmatpush3.xpose.msk.msra.mxu1 %vm103_vm0, %v9011_v6 }
  0x3e   :  { %8698 = vmatprep.subr.msk.bf16.mxu0 %vm8992_vm1, %v8996_v3  ;;  %8704 = vmatprep.subr.msk.bf16.mxu1 %vm8992_vm1, %v8996_v3 }
  0x40   :  { %7809 = vmatmul.mubr.msk.f32.vlgmr.msra.gmra.mrb[8].mxu0 %vm103_vm0, %v9231_v25  ;;  %7818 = vmatmul.mubr.msk.f32.vlgmr.msra.gmra.mrb[8].mxu1 %vm103_vm0, %v6895_v24 }
  0x41   :  { %8701 = vmatpush3.bf16.xpose.msk.msra.mxu0 %vm8992_vm1, %v8996_v3  ;;  %8707 = vmatpush3.bf16.xpose.msk.msra.mxu1 %vm8992_vm1, %v8996_v3 }
  0x42   :  { %7824 = vmatprep.subr.msk.mxu0 %vm103_vm0, %v9011_v6  ;;  %7833 = vmatprep.subr.msk.mxu1 %vm103_vm0, %v9011_v6 }
  0x43   :  { %7826 = vmatprep.mubr.msk.f32.mxu0 %vm103_vm0, %v6896_v26  ;;  %7835 = vmatprep.mubr.msk.f32.mxu1 %vm103_vm0, %v6898_v27 }
  0x49   :  { %7825 = vmatpush3.xpose.msk.msra.mxu0 %vm103_vm0, %v9011_v6  ;;  %7834 = vmatpush3.xpose.msk.msra.mxu1 %vm103_vm0, %v9011_v6 }
  0x4a   :  { %8710 = vmatprep.subr.msk.bf16.mxu0 %vm8992_vm1, %v8996_v3  ;;  %8716 = vmatprep.subr.msk.bf16.mxu1 %vm8992_vm1, %v8996_v3 }
  0x4c   :  { %7827 = vmatmul.mubr.msk.f32.vlgmr.msra.gmra.mrb[10].mxu0 %vm103_vm0, %v6897_v28  ;;  %7836 = vmatmul.mubr.msk.f32.vlgmr.msra.gmra.mrb[10].mxu1 %vm103_vm0, %v6899_v29 }
  0x4d   :  { %8713 = vmatpush3.bf16.xpose.msk.msra.mxu0 %vm8992_vm1, %v8996_v3  ;;  %7844 = vmatprep.mubr.msk.f32.mxu0 %vm103_vm0, %v6900_v30 }
  0x4e   :  { %7842 = vmatprep.subr.msk.mxu0 %vm103_vm0, %v9011_v6  ;;  %8719 = vmatpush3.bf16.xpose.msk.msra.mxu1 %vm8992_vm1, %v8996_v3 }
  0x4f   :  { %7851 = vmatprep.subr.msk.mxu1 %vm103_vm0, %v9011_v6  ;;  %7853 = vmatprep.mubr.msk.f32.mxu1 %vm103_vm0, %v6902_v31 }
  0x55   :  { %7843 = vmatpush3.xpose.msk.msra.mxu0 %vm103_vm0, %v9011_v6 }
  0x56   :  { %7852 = vmatpush3.xpose.msk.msra.mxu1 %vm103_vm0, %v9011_v6  ;;  %8722 = vmatprep.subr.msk.bf16.mxu0 %vm8992_vm1, %v8996_v3 }
  0x57   :  { %8728 = vmatprep.subr.msk.bf16.mxu1 %vm8992_vm1, %v8996_v3 }
  0x58   :  { %7845 = vmatmul.mubr.msk.f32.vlgmr.msra.gmra.mrb[12].mxu0 %vm103_vm0, %v6901_v32 }
  0x59   :  { %7854 = vmatmul.mubr.msk.f32.vlgmr.msra.gmra.mrb[12].mxu1 %vm103_vm0, %v6903_v33  ;;  %8725 = vmatpush3.bf16.xpose.msk.msra.mxu0 %vm8992_vm1, %v8996_v3 }
  0x5a   :  { %7860 = vmatprep.subr.msk.mxu0 %vm103_vm0, %v9011_v6  ;;  %7862 = vmatprep.mubr.msk.f32.mxu0 %vm103_vm0, %v6904_v34 }
  0x5b   :  { %8731 = vmatpush3.bf16.xpose.msk.msra.mxu1 %vm8992_vm1, %v8996_v3  ;;  %7871 = vmatprep.mubr.msk.f32.mxu1 %vm103_vm0, %v6906_v35 }
  0x5c   :  { %7869 = vmatprep.subr.msk.mxu1 %vm103_vm0, %v9011_v6 }
  0x61   :  { %7861 = vmatpush3.xpose.msk.msra.mxu0 %vm103_vm0, %v9011_v6 }
  0x62   :  { %8734 = vmatprep.subr.msk.bf16.mxu0 %vm8992_vm1, %v8996_v3 }
  0x63   :  { %7870 = vmatpush3.xpose.msk.msra.mxu1 %vm103_vm0, %v9011_v6 }
  0x64   :  { %7863 = vmatmul.mubr.msk.f32.vlgmr.msra.gmra.mrb[14].mxu0 %vm103_vm0, %v6905_v36  ;;  %8740 = vmatprep.subr.msk.bf16.mxu1 %vm8992_vm1, %v8996_v3 }
  0x65   :  { %8737 = vmatpush3.bf16.xpose.msk.msra.mxu0 %vm8992_vm1, %v8996_v3  ;;  %7880 = vmatprep.mubr.msk.f32.mxu0 %vm103_vm0, %v6908_v37 }
  0x66   :  { %7872 = vmatmul.mubr.msk.f32.vlgmr.msra.gmra.mrb[14].mxu1 %vm103_vm0, %v6907_v38  ;;  %7878 = vmatprep.subr.msk.mxu0 %vm103_vm0, %v9011_v6  ;;  %v3426_v38 = vld [vmem:[%s11279_s3] sm:$0xff] }
  0x67   :  { %8743 = vmatpush3.bf16.xpose.msk.msra.mxu1 %vm8992_vm1, %v8996_v3  ;;  %7889 = vmatprep.mubr.msk.f32.mxu1 %vm103_vm0, %v6910_v39  ;;  %vm8942_vm1 = vmmov 0   ;;  %v3427_v39 = vld [vmem:[%s11279_s3 + $0x8] sm:$0xff] }
  0x68   :  { %7887 = vmatprep.subr.msk.mxu1 %vm103_vm0, %v9011_v6 }
  0x6d   :  { %7879 = vmatpush3.xpose.msk.msra.mxu0 %vm103_vm0, %v9011_v6 }
  0x6e   :  { %8744 = vmatprep.subr.bf16.mxu0 %v8941_v41 }
  0x6f   :  { %7888 = vmatpush3.xpose.msk.msra.mxu1 %vm103_vm0, %v9011_v6 }
  0x70   :  { %7881 = vmatmul.mubr.msk.f32.vlgmr.msra.gmra.mrb[16].mxu0 %vm103_vm0, %v6909_v40  ;;  %8748 = vmatprep.subr.bf16.mxu1 %v8941_v41  ;;  %v9665_v40 = vpack.c.bf16 %v3427_v39, %v3426_v38 }
  0x71   :  { %7896 = vmatprep.mubr.msk.f32.mxu0 %vm8942_vm1, %v8940_v21 }
  0x72   :  { %7890 = vmatmul.mubr.msk.f32.vlgmr.msra.gmra.mrb[16].mxu1 %vm103_vm0, %v6911_v42 }
  0x73   :  { %7909 = vmatprep.mubr.msk.f32.mxu1 %vm8942_vm1, %v8940_v21 }
  0xe3   :  { %v7738_v43 = vpop.f32.mrb[0].mxu0  ;;  %v7747_v44 = vpop.f32.mrb[0].mxu1 }
  0xe4   :  { %v185_v45 = vpop.f32.mrb[1].mxu0  ;;  %v266_v46 = vpop.f32.mrb[1].mxu1 }
  0xe5   :  { %v8745_v48 = vpack.c.bf16 %v7738_v43, %v185_v45  ;;  %v8749_v49 = vpack.c.bf16 %v7747_v44, %v266_v46  ;;  %v9684_v43 = vld [vmem:[%s11279_s3 + $0x10] sm:$0x1] }
  0xe7   :  { %8747 = vmatpush3.bf16.msk.msra.mxu0 %vm9370_vm8, %v8745_v48  ;;  %8751 = vmatpush3.bf16.msk.msra.mxu1 %vm9370_vm8, %v8749_v49 }
  0xe8   :  { %8752 = vmatprep.subr.bf16.mxu0 %v8941_v41  ;;  %8756 = vmatprep.subr.bf16.mxu1 %v8941_v41 }
  0xea   :  { %7897 = vmatmul.mubr.msk.f32.vlgmr.msra.gmra.mrb[18].mxu0 %vm103_vm0, %v9381_v50  ;;  %7910 = vmatmul.mubr.msk.f32.vlgmr.msra.gmra.mrb[18].mxu1 %vm103_vm0, %v9381_v50 }
  0xeb   :  { %7899 = vmatprep.mubr.msk.f32.mxu0 %vm8942_vm1, %v8940_v21  ;;  %7912 = vmatprep.mubr.msk.f32.mxu1 %vm8942_vm1, %v8940_v21 }
  0xee   :  { %7900 = vmatmul.mubr.msk.f32.gmra.mrb[20].mxu0 %vm103_vm0, %v9396_v51  ;;  %7913 = vmatmul.mubr.msk.f32.gmra.mrb[20].mxu1 %vm103_vm0, %v9396_v51 }
  0xef   :  { %v7756_v52 = vpop.f32.mrb[2].mxu0  ;;  %v7765_v53 = vpop.f32.mrb[2].mxu1  ;;  %7902 = vmatprep.mubr.msk.f32.mxu0 %vm8942_vm1, %v8940_v21  ;;  %7915 = vmatprep.mubr.msk.f32.mxu1 %vm8942_vm1, %v8940_v21 }
  0xf0   :  { %v347_v55 = vpop.f32.mrb[3].mxu0  ;;  %v428_v56 = vpop.f32.mrb[3].mxu1 }
  0xf1   :  { %v8753_v57 = vpack.c.bf16 %v7756_v52, %v347_v55  ;;  %v8757_v58 = vpack.c.bf16 %v7765_v53, %v428_v56 }
  0xf2   :  { %7903 = vmatmul.mubr.msk.f32.gmra.mrb[22].mxu0 %vm103_vm0, %v9409_v54  ;;  %7916 = vmatmul.mubr.msk.f32.gmra.mrb[22].mxu1 %vm103_vm0, %v9409_v54 }
  0xf3   :  { %8755 = vmatpush3.bf16.msk.msra.mxu0 %vm9370_vm8, %v8753_v57  ;;  %8759 = vmatpush3.bf16.msk.msra.mxu1 %vm9370_vm8, %v8757_v58 }
  0xf4   :  { %7922 = vmatprep.mubr.msk.f32.mxu0 %vm8942_vm1, %v8940_v21  ;;  %7935 = vmatprep.mubr.msk.f32.mxu1 %vm8942_vm1, %v8940_v21 }
  0xf5   :  { %8760 = vmatprep.subr.bf16.mxu0 %v8941_v41  ;;  %8764 = vmatprep.subr.bf16.mxu1 %v8941_v41 }
  0xf6   :  { %7923 = vmatmul.mubr.msk.f32.vlgmr.msra.gmra.mrb[24].mxu0 %vm103_vm0, %v9381_v50  ;;  %7936 = vmatmul.mubr.msk.f32.vlgmr.msra.gmra.mrb[24].mxu1 %vm103_vm0, %v9381_v50 }
  0xf7   :  { %7925 = vmatprep.mubr.msk.f32.mxu0 %vm8942_vm1, %v8940_v21  ;;  %7938 = vmatprep.mubr.msk.f32.mxu1 %vm8942_vm1, %v8940_v21 }
  0xfa   :  { %7926 = vmatmul.mubr.msk.f32.gmra.mrb[26].mxu0 %vm103_vm0, %v9396_v51  ;;  %7939 = vmatmul.mubr.msk.f32.gmra.mrb[26].mxu1 %vm103_vm0, %v9396_v51 }
  0xfb   :  { %v7774_v59 = vpop.f32.mrb[4].mxu0  ;;  %v7783_v60 = vpop.f32.mrb[4].mxu1  ;;  %7928 = vmatprep.mubr.msk.f32.mxu0 %vm8942_vm1, %v8940_v21  ;;  %7941 = vmatprep.mubr.msk.f32.mxu1 %vm8942_vm1, %v8940_v21 }
  0xfc   :  { %v509_v61 = vpop.f32.mrb[5].mxu0  ;;  %v590_v62 = vpop.f32.mrb[5].mxu1 }
  0xfd   :  { %v8761_v63 = vpack.c.bf16 %v7774_v59, %v509_v61  ;;  %v8765_v0 = vpack.c.bf16 %v7783_v60, %v590_v62 }
  0xfe   :  { %7929 = vmatmul.mubr.msk.f32.gmra.mrb[28].mxu0 %vm103_vm0, %v9409_v54  ;;  %7942 = vmatmul.mubr.msk.f32.gmra.mrb[28].mxu1 %vm103_vm0, %v9409_v54 }
  0xff   :  { %8763 = vmatpush3.bf16.msk.msra.mxu0 %vm9370_vm8, %v8761_v63  ;;  %8767 = vmatpush3.bf16.msk.msra.mxu1 %vm9370_vm8, %v8765_v0 }
 0x100   :  { %7948 = vmatprep.mubr.msk.f32.mxu0 %vm8942_vm1, %v8940_v21  ;;  %7961 = vmatprep.mubr.msk.f32.mxu1 %vm8942_vm1, %v8940_v21 }
 0x101   :  { %8768 = vmatprep.subr.bf16.mxu0 %v8941_v41  ;;  %8772 = vmatprep.subr.bf16.mxu1 %v8941_v41 }
 0x102   :  { %7949 = vmatmul.mubr.msk.f32.vlgmr.msra.gmra.mrb[30].mxu0 %vm103_vm0, %v9381_v50  ;;  %7962 = vmatmul.mubr.msk.f32.vlgmr.msra.gmra.mrb[30].mxu1 %vm103_vm0, %v9381_v50 }
 0x103   :  { %7951 = vmatprep.mubr.msk.f32.mxu0 %vm8942_vm1, %v8940_v21  ;;  %7964 = vmatprep.mubr.msk.f32.mxu1 %vm8942_vm1, %v8940_v21 }
 0x106   :  { %7952 = vmatmul.mubr.msk.f32.gmra.mrb[32].mxu0 %vm103_vm0, %v9396_v51  ;;  %7965 = vmatmul.mubr.msk.f32.gmra.mrb[32].mxu1 %vm103_vm0, %v9396_v51 }
 0x107   :  { %v7792_v1 = vpop.f32.mrb[6].mxu0  ;;  %v7801_v2 = vpop.f32.mrb[6].mxu1  ;;  %7954 = vmatprep.mubr.msk.f32.mxu0 %vm8942_vm1, %v8940_v21  ;;  %7967 = vmatprep.mubr.msk.f32.mxu1 %vm8942_vm1, %v8940_v21 }
 0x108   :  { %v671_v3 = vpop.f32.mrb[7].mxu0  ;;  %v752_v4 = vpop.f32.mrb[7].mxu1 }
 0x109   :  { %v8769_v5 = vpack.c.bf16 %v7792_v1, %v671_v3  ;;  %v8773_v6 = vpack.c.bf16 %v7801_v2, %v752_v4 }
 0x10a   :  { %7955 = vmatmul.mubr.msk.f32.gmra.mrb[34].mxu0 %vm103_vm0, %v9409_v54  ;;  %7968 = vmatmul.mubr.msk.f32.gmra.mrb[34].mxu1 %vm103_vm0, %v9409_v54 }
 0x10b   :  { %8771 = vmatpush3.bf16.msk.msra.mxu0 %vm9370_vm8, %v8769_v5  ;;  %8775 = vmatpush3.bf16.msk.msra.mxu1 %vm9370_vm8, %v8773_v6 }
 0x10c   :  { %7974 = vmatprep.mubr.msk.f32.mxu0 %vm8942_vm1, %v8940_v21  ;;  %7987 = vmatprep.mubr.msk.f32.mxu1 %vm8942_vm1, %v8940_v21 }
 0x10d   :  { %8776 = vmatprep.subr.bf16.mxu0 %v8941_v41  ;;  %8780 = vmatprep.subr.bf16.mxu1 %v8941_v41 }
 0x10e   :  { %7975 = vmatmul.mubr.msk.f32.vlgmr.msra.gmra.mrb[36].mxu0 %vm103_vm0, %v9381_v50  ;;  %7988 = vmatmul.mubr.msk.f32.vlgmr.msra.gmra.mrb[36].mxu1 %vm103_vm0, %v9381_v50 }
 0x10f   :  { %7977 = vmatprep.mubr.msk.f32.mxu0 %vm8942_vm1, %v8940_v21  ;;  %7990 = vmatprep.mubr.msk.f32.mxu1 %vm8942_vm1, %v8940_v21 }
 0x112   :  { %7978 = vmatmul.mubr.msk.f32.gmra.mrb[38].mxu0 %vm103_vm0, %v9396_v51  ;;  %7991 = vmatmul.mubr.msk.f32.gmra.mrb[38].mxu1 %vm103_vm0, %v9396_v51 }
 0x113   :  { %v7810_v7 = vpop.f32.mrb[8].mxu0  ;;  %v7819_v8 = vpop.f32.mrb[8].mxu1  ;;  %7980 = vmatprep.mubr.msk.f32.mxu0 %vm8942_vm1, %v8940_v21  ;;  %7993 = vmatprep.mubr.msk.f32.mxu1 %vm8942_vm1, %v8940_v21 }
 0x114   :  { %v833_v9 = vpop.f32.mrb[9].mxu0  ;;  %v914_v10 = vpop.f32.mrb[9].mxu1 }
 0x115   :  { %v8777_v11 = vpack.c.bf16 %v7810_v7, %v833_v9  ;;  %v8781_v12 = vpack.c.bf16 %v7819_v8, %v914_v10 }
 0x116   :  { %7981 = vmatmul.mubr.msk.f32.gmra.mrb[40].mxu0 %vm103_vm0, %v9409_v54  ;;  %7994 = vmatmul.mubr.msk.f32.gmra.mrb[40].mxu1 %vm103_vm0, %v9409_v54 }
 0x117   :  { %8779 = vmatpush3.bf16.msk.msra.mxu0 %vm9370_vm8, %v8777_v11  ;;  %8783 = vmatpush3.bf16.msk.msra.mxu1 %vm9370_vm8, %v8781_v12 }
 0x118   :  { %8000 = vmatprep.mubr.msk.f32.mxu0 %vm8942_vm1, %v8940_v21  ;;  %8013 = vmatprep.mubr.msk.f32.mxu1 %vm8942_vm1, %v8940_v21 }
 0x119   :  { %8784 = vmatprep.subr.bf16.mxu0 %v8941_v41  ;;  %8788 = vmatprep.subr.bf16.mxu1 %v8941_v41 }
 0x11a   :  { %8001 = vmatmul.mubr.msk.f32.vlgmr.msra.gmra.mrb[42].mxu0 %vm103_vm0, %v9381_v50  ;;  %8014 = vmatmul.mubr.msk.f32.vlgmr.msra.gmra.mrb[42].mxu1 %vm103_vm0, %v9381_v50 }
 0x11b   :  { %8003 = vmatprep.mubr.msk.f32.mxu0 %vm8942_vm1, %v8940_v21  ;;  %8016 = vmatprep.mubr.msk.f32.mxu1 %vm8942_vm1, %v8940_v21 }
 0x11e   :  { %8004 = vmatmul.mubr.msk.f32.gmra.mrb[44].mxu0 %vm103_vm0, %v9396_v51  ;;  %8017 = vmatmul.mubr.msk.f32.gmra.mrb[44].mxu1 %vm103_vm0, %v9396_v51 }
 0x11f   :  { %v7828_v13 = vpop.f32.mrb[10].mxu0  ;;  %v7837_v14 = vpop.f32.mrb[10].mxu1  ;;  %8006 = vmatprep.mubr.msk.f32.mxu0 %vm8942_vm1, %v8940_v21  ;;  %8019 = vmatprep.mubr.msk.f32.mxu1 %vm8942_vm1, %v8940_v21 }
 0x120   :  { %v995_v15 = vpop.f32.mrb[11].mxu0  ;;  %v1076_v16 = vpop.f32.mrb[11].mxu1 }
 0x121   :  { %v8785_v17 = vpack.c.bf16 %v7828_v13, %v995_v15  ;;  %v8789_v18 = vpack.c.bf16 %v7837_v14, %v1076_v16 }
 0x122   :  { %8007 = vmatmul.mubr.msk.f32.gmra.mrb[46].mxu0 %vm103_vm0, %v9409_v54  ;;  %8020 = vmatmul.mubr.msk.f32.gmra.mrb[46].mxu1 %vm103_vm0, %v9409_v54 }
 0x123   :  { %8787 = vmatpush3.bf16.msk.msra.mxu0 %vm9370_vm8, %v8785_v17  ;;  %8026 = vmatprep.mubr.msk.f32.mxu0 %vm8942_vm1, %v8940_v21 }
 0x124   :  { %8791 = vmatpush3.bf16.msk.msra.mxu1 %vm9370_vm8, %v8789_v18  ;;  %8039 = vmatprep.mubr.msk.f32.mxu1 %vm8942_vm1, %v8940_v21 }
 0x125   :  { %8792 = vmatprep.subr.bf16.mxu0 %v8941_v41  ;;  %8796 = vmatprep.subr.bf16.mxu1 %v8941_v41 }
 0x126   :  { %8027 = vmatmul.mubr.msk.f32.vlgmr.msra.gmra.mrb[48].mxu0 %vm103_vm0, %v9381_v50 }
 0x127   :  { %8040 = vmatmul.mubr.msk.f32.vlgmr.msra.gmra.mrb[48].mxu1 %vm103_vm0, %v9381_v50  ;;  %8029 = vmatprep.mubr.msk.f32.mxu0 %vm8942_vm1, %v8940_v21 }
 0x128   :  { %8042 = vmatprep.mubr.msk.f32.mxu1 %vm8942_vm1, %v8940_v21 }
 0x12a   :  { %8030 = vmatmul.mubr.msk.f32.gmra.mrb[50].mxu0 %vm103_vm0, %v9396_v51 }
 0x12b   :  { %8043 = vmatmul.mubr.msk.f32.gmra.mrb[50].mxu1 %vm103_vm0, %v9396_v51  ;;  %v7846_v19 = vpop.f32.mrb[12].mxu0  ;;  %8032 = vmatprep.mubr.msk.f32.mxu0 %vm8942_vm1, %v8940_v21 }
 0x12c   :  { %v1157_v20 = vpop.f32.mrb[13].mxu0  ;;  %8045 = vmatprep.mubr.msk.f32.mxu1 %vm8942_vm1, %v8940_v21  ;;  %v7855_v22 = vpop.f32.mrb[12].mxu1 }
 0x12d   :  { %v8793_v23 = vpack.c.bf16 %v7846_v19, %v1157_v20  ;;  %v1238_v24 = vpop.f32.mrb[13].mxu1 }
 0x12e   :  { %8033 = vmatmul.mubr.msk.f32.gmra.mrb[52].mxu0 %vm103_vm0, %v9409_v54  ;;  %v8797_v25 = vpack.c.bf16 %v7855_v22, %v1238_v24 }
 0x12f   :  { %8046 = vmatmul.mubr.msk.f32.gmra.mrb[52].mxu1 %vm103_vm0, %v9409_v54  ;;  %8795 = vmatpush3.bf16.msk.msra.mxu0 %vm9370_vm8, %v8793_v23 }
 0x130   :  { %8052 = vmatprep.mubr.msk.f32.mxu0 %vm8942_vm1, %v8940_v21  ;;  %8799 = vmatpush3.bf16.msk.msra.mxu1 %vm9370_vm8, %v8797_v25 }
 0x131   :  { %8065 = vmatprep.mubr.msk.f32.mxu1 %vm8942_vm1, %v8940_v21  ;;  %8800 = vmatprep.subr.bf16.mxu0 %v8941_v41 }
 0x132   :  { %8053 = vmatmul.mubr.msk.f32.vlgmr.msra.gmra.mrb[54].mxu0 %vm103_vm0, %v9381_v50  ;;  %8804 = vmatprep.subr.bf16.mxu1 %v8941_v41 }
 0x133   :  { %8055 = vmatprep.mubr.msk.f32.mxu0 %vm8942_vm1, %v8940_v21  ;;  %8066 = vmatmul.mubr.msk.f32.vlgmr.msra.gmra.mrb[54].mxu1 %vm103_vm0, %v9381_v50 }
 0x134   :  { %8068 = vmatprep.mubr.msk.f32.mxu1 %vm8942_vm1, %v8940_v21 }
 0x136   :  { %8056 = vmatmul.mubr.msk.f32.gmra.mrb[56].mxu0 %vm103_vm0, %v9396_v51 }
 0x137   :  { %8058 = vmatprep.mubr.msk.f32.mxu0 %vm8942_vm1, %v8940_v21  ;;  %8069 = vmatmul.mubr.msk.f32.gmra.mrb[56].mxu1 %vm103_vm0, %v9396_v51  ;;  %v7864_v26 = vpop.f32.mrb[14].mxu0 }
 0x138   :  { %v1319_v27 = vpop.f32.mrb[15].mxu0  ;;  %8071 = vmatprep.mubr.msk.f32.mxu1 %vm8942_vm1, %v8940_v21 }
 0x139   :  { %v8801_v28 = vpack.c.bf16 %v7864_v26, %v1319_v27  ;;  %v7873_v29 = vpop.f32.mrb[14].mxu1 }
 0x13a   :  { %8059 = vmatmul.mubr.msk.f32.gmra.mrb[58].mxu0 %vm103_vm0, %v9409_v54  ;;  %v1400_v30 = vpop.f32.mrb[15].mxu1 }
 0x13b   :  { %8072 = vmatmul.mubr.msk.f32.gmra.mrb[58].mxu1 %vm103_vm0, %v9409_v54  ;;  %8803 = vmatpush3.bf16.msk.msra.mxu0 %vm9370_vm8, %v8801_v28  ;;  %v8805_v31 = vpack.c.bf16 %v7873_v29, %v1400_v30 }
 0x13c   :  { %8078 = vmatprep.mubr.msk.f32.mxu0 %vm8942_vm1, %v8940_v21  ;;  %8091 = vmatprep.mubr.msk.f32.mxu1 %vm8942_vm1, %v8940_v21 }
 0x13d   :  { %8807 = vmatpush3.bf16.msk.msra.mxu1 %vm9370_vm8, %v8805_v31  ;;  %8808 = vmatprep.subr.bf16.mxu0 %v8941_v41 }
 0x13e   :  { %8079 = vmatmul.mubr.msk.f32.vlgmr.msra.gmra.mrb[60].mxu0 %vm103_vm0, %v9381_v50  ;;  %8812 = vmatprep.subr.bf16.mxu1 %v8941_v41 }
 0x13f   :  { %8081 = vmatprep.mubr.msk.f32.mxu0 %vm8942_vm1, %v8940_v21 }
 0x140   :  { %8092 = vmatmul.mubr.msk.f32.vlgmr.msra.gmra.mrb[60].mxu1 %vm103_vm0, %v9381_v50 }
 0x141   :  { %8094 = vmatprep.mubr.msk.f32.mxu1 %vm8942_vm1, %v8940_v21 }
 0x142   :  { %8082 = vmatmul.mubr.msk.f32.gmra.mrb[62].mxu0 %vm103_vm0, %v9396_v51 }
 0x143   :  { %8084 = vmatprep.mubr.msk.f32.mxu0 %vm8942_vm1, %v8940_v21  ;;  %v7882_v32 = vpop.f32.mrb[16].mxu0 }
 0x144   :  { %8095 = vmatmul.mubr.msk.f32.gmra.mrb[62].mxu1 %vm103_vm0, %v9396_v51  ;;  %v1481_v33 = vpop.f32.mrb[17].mxu0 }
 0x145   :  { %v8809_v34 = vpack.c.bf16 %v7882_v32, %v1481_v33  ;;  %8097 = vmatprep.mubr.msk.f32.mxu1 %vm8942_vm1, %v8940_v21  ;;  %v7891_v35 = vpop.f32.mrb[16].mxu1 }
 0x146   :  { %8085 = vmatmul.mubr.msk.f32.gmra.mrb[64].mxu0 %vm103_vm0, %v9409_v54  ;;  %v1562_v36 = vpop.f32.mrb[17].mxu1 }
 0x147   :  { %8811 = vmatpush3.bf16.msk.msra.mxu0 %vm9370_vm8, %v8809_v34  ;;  %8104 = vmatprep.mubr.msk.f32.mxu0 %vm8942_vm1, %v8940_v21  ;;  %v8813_v37 = vpack.c.bf16 %v7891_v35, %v1562_v36 }
 0x148   :  { %8098 = vmatmul.mubr.msk.f32.gmra.mrb[64].mxu1 %vm103_vm0, %v9409_v54  ;;  %8816 = vmatprep.subr.bf16.mxu0 %v8941_v41 }
 0x149   :  { %8815 = vmatpush3.bf16.msk.msra.mxu1 %vm9370_vm8, %v8813_v37  ;;  %8117 = vmatprep.mubr.msk.f32.mxu1 %vm8942_vm1, %v8940_v21 }
 0x14a   :  { %8105 = vmatmul.mubr.msk.f32.vlgmr.msra.gmra.mrb[66].mxu0 %vm103_vm0, %v9381_v50  ;;  %8820 = vmatprep.subr.bf16.mxu1 %v8941_v41 }
 0x14b   :  { %8107 = vmatprep.mubr.msk.f32.mxu0 %vm8942_vm1, %v8940_v21 }
 0x14c   :  { %8118 = vmatmul.mubr.msk.f32.vlgmr.msra.gmra.mrb[66].mxu1 %vm103_vm0, %v9381_v50 }
 0x14d   :  { %8120 = vmatprep.mubr.msk.f32.mxu1 %vm8942_vm1, %v8940_v21 }
 0x14e   :  { %8108 = vmatmul.mubr.msk.f32.gmra.mrb[68].mxu0 %vm103_vm0, %v9396_v51 }
 0x14f   :  { %8110 = vmatprep.mubr.msk.f32.mxu0 %vm8942_vm1, %v8940_v21 }
 0x150   :  { %8121 = vmatmul.mubr.msk.f32.gmra.mrb[68].mxu1 %vm103_vm0, %v9396_v51  ;;  %8819 = vmatpush3.bf16.xpose.msk.msra.mxu0 %vm9669_vm10, %v9665_v40 }
 0x151   :  { %8123 = vmatprep.mubr.msk.f32.mxu1 %vm8942_vm1, %v8940_v21  ;;  %8130 = vmatprep.subr.mxu0 %v8940_v21 }
 0x152   :  { %8111 = vmatmul.mubr.msk.f32.gmra.mrb[70].mxu0 %vm103_vm0, %v9409_v54  ;;  %8823 = vmatpush3.bf16.xpose.msk.msra.mxu1 %vm9669_vm10, %v9665_v40 }
 0x153   :  { %8132 = vmatprep.mubr.msk.f32.mxu0 %vm8942_vm1, %v8940_v21  ;;  %8145 = vmatprep.subr.mxu1 %v8940_v21 }
 0x154   :  { %8124 = vmatmul.mubr.msk.f32.gmra.mrb[70].mxu1 %vm103_vm0, %v9409_v54  ;;  %vm11284_vm0 = vcmask 131072  }
 0x155   :  { %8147 = vmatprep.mubr.msk.f32.mxu1 %vm8942_vm1, %v8940_v21 }
 0x158   :  { %8131 = vmatpush3.xpose.msk.msra.mxu0 %vm3432_vm9, %v9684_v43 }
 0x159   :  { %8824 = vmatprep.subr.bf16.mxu0 %v8941_v41 }
 0x15a   :  { %8146 = vmatpush3.xpose.msk.msra.mxu1 %vm3432_vm9, %v9684_v43 }
 0x15b   :  { %8828 = vmatprep.subr.bf16.mxu1 %v8941_v41 }
 0x1bd   :  { %v1650_v44 = vpop.f32.mrb[18].mxu0  ;;  %v1733_v45 = vpop.f32.mrb[18].mxu1 }
 0x1be   :  { %6783 = vst.msk [vmem:[%s11280_s6] sm:$0xff] %vm3432_vm9, %v1650_v44  ;;  %v7898_v46 = vpop.f32.mrb[19].mxu0  ;;  %v3075_v47 = vadd.f32 %v1733_v45, %v1650_v44  ;;  %6790 = vst.msk [vmem:[%s11280_s6 + $0x30] sm:$0xff] %vm3432_vm9, %v1733_v45  ;;  %v7911_v48 = vpop.f32.mrb[19].mxu1 }
 0x1c0   :  { %v3099_v49 = vmul.f32 0.5, %v3075_v47 }
 0x1c1   :  { %v1655_v50 = vpop.f32.mrb[20].mxu0  ;;  %v1738_v51 = vpop.f32.mrb[20].mxu1 }
 0x1c2   :  { %6787 = vst.msk [vmem:[%s11280_s6 + $0x18] sm:$0xff] %vm3432_vm9, %v3099_v49  ;;  %6784 = vst.msk [vmem:[%s11280_s6 + $0x8] sm:$0xff] %vm3432_vm9, %v1655_v50  ;;  %v7901_v52 = vpop.f32.mrb[21].mxu0  ;;  %v3076_v53 = vadd.f32 %v1738_v51, %v1655_v50  ;;  %v7914_v54 = vpop.f32.mrb[21].mxu1 }
 0x1c3   :  { %6791 = vst.msk [vmem:[%s11280_s6 + $0x38] sm:$0xff] %vm3432_vm9, %v1738_v51 }
 0x1c4   :  { %v3100_v55 = vmul.f32 0.5, %v3076_v53 }
 0x1c5   :  { %v1660_v56 = vpop.f32.mrb[22].mxu0  ;;  %v1743_v57 = vpop.f32.mrb[22].mxu1 }
 0x1c6   :  { %6788 = vst.msk [vmem:[%s11280_s6 + $0x20] sm:$0xff] %vm3432_vm9, %v3100_v55  ;;  %v7904_v58 = vpop.f32.mrb[23].mxu0  ;;  %v3077_v59 = vadd.f32 %v1743_v57, %v1660_v56  ;;  %v7917_v60 = vpop.f32.mrb[23].mxu1 }
 0x1c7   :  { %6786 = vst.msk [vmem:[%s11280_s6 + $0x10] sm:$0x1] %vm11284_vm0, %v1660_v56  ;;  %6792 = vst.msk [vmem:[%s11280_s6 + $0x40] sm:$0x1] %vm11284_vm0, %v1743_v57 }
 0x1c8   :  { %v3101_v61 = vmul.f32 0.5, %v3077_v59 }
 0x1c9   :  { %v1816_v62 = vpop.f32.mrb[24].mxu0  ;;  %v1899_v63 = vpop.f32.mrb[24].mxu1 }
 0x1ca   :  { %6789 = vst.msk [vmem:[%s11280_s6 + $0x28] sm:$0x1] %vm11284_vm0, %v3101_v61  ;;  %v3078_v0 = vadd.f32 %v1816_v62, %v1733_v45  ;;  %v7924_v1 = vpop.f32.mrb[25].mxu0  ;;  %v3081_v2 = vadd.f32 %v1899_v63, %v1816_v62  ;;  %v7937_v3 = vpop.f32.mrb[25].mxu1 }
 0x1cb   :  { %6796 = vst.msk [vmem:[%s11280_s6 + $0x60] sm:$0xff] %vm3432_vm9, %v1816_v62  ;;  %6802 = vst.msk [vmem:[%s11280_s6 + $0x90] sm:$0xff] %vm3432_vm9, %v1899_v63 }
 0x1cc   :  { %v3102_v4 = vmul.f32 0.5, %v3078_v0  ;;  %v3105_v5 = vmul.f32 0.5, %v3081_v2 }
 0x1cd   :  { %v1821_v6 = vpop.f32.mrb[26].mxu0  ;;  %v1904_v7 = vpop.f32.mrb[26].mxu1 }
 0x1ce   :  { %6793 = vst.msk [vmem:[%s11280_s6 + $0x48] sm:$0xff] %vm3432_vm9, %v3102_v4  ;;  %6799 = vst.msk [vmem:[%s11280_s6 + $0x78] sm:$0xff] %vm3432_vm9, %v3105_v5  ;;  %v3079_v8 = vadd.f32 %v1821_v6, %v1738_v51  ;;  %v7927_v9 = vpop.f32.mrb[27].mxu0  ;;  %v3082_v10 = vadd.f32 %v1904_v7, %v1821_v6  ;;  %v7940_v11 = vpop.f32.mrb[27].mxu1 }
 0x1cf   :  { %6797 = vst.msk [vmem:[%s11280_s6 + $0x68] sm:$0xff] %vm3432_vm9, %v1821_v6  ;;  %6803 = vst.msk [vmem:[%s11280_s6 + $0x98] sm:$0xff] %vm3432_vm9, %v1904_v7 }
 0x1d0   :  { %v3103_v12 = vmul.f32 0.5, %v3079_v8  ;;  %v3106_v13 = vmul.f32 0.5, %v3082_v10 }
 0x1d1   :  { %v1826_v14 = vpop.f32.mrb[28].mxu0  ;;  %v1909_v15 = vpop.f32.mrb[28].mxu1 }
 0x1d2   :  { %6794 = vst.msk [vmem:[%s11280_s6 + $0x50] sm:$0xff] %vm3432_vm9, %v3103_v12  ;;  %6800 = vst.msk [vmem:[%s11280_s6 + $0x80] sm:$0xff] %vm3432_vm9, %v3106_v13  ;;  %v3080_v16 = vadd.f32 %v1826_v14, %v1743_v57  ;;  %v7930_v17 = vpop.f32.mrb[29].mxu0  ;;  %v3083_v18 = vadd.f32 %v1909_v15, %v1826_v14  ;;  %v7943_v19 = vpop.f32.mrb[29].mxu1 }
 0x1d3   :  { %6798 = vst.msk [vmem:[%s11280_s6 + $0x70] sm:$0x1] %vm11284_vm0, %v1826_v14  ;;  %6804 = vst.msk [vmem:[%s11280_s6 + $0xa0] sm:$0x1] %vm11284_vm0, %v1909_v15 }
 0x1d4   :  { %v3104_v20 = vmul.f32 0.5, %v3080_v16  ;;  %v3107_v22 = vmul.f32 0.5, %v3083_v18 }
 0x1d5   :  { %v1982_v23 = vpop.f32.mrb[30].mxu0  ;;  %v2065_v24 = vpop.f32.mrb[30].mxu1 }
 0x1d6   :  { %6795 = vst.msk [vmem:[%s11280_s6 + $0x58] sm:$0x1] %vm11284_vm0, %v3104_v20  ;;  %6801 = vst.msk [vmem:[%s11280_s6 + $0x88] sm:$0x1] %vm11284_vm0, %v3107_v22  ;;  %v3084_v25 = vadd.f32 %v1982_v23, %v1899_v63  ;;  %v7950_v26 = vpop.f32.mrb[31].mxu0  ;;  %v3087_v27 = vadd.f32 %v2065_v24, %v1982_v23  ;;  %v7963_v28 = vpop.f32.mrb[31].mxu1 }
 0x1d7   :  { %6808 = vst.msk [vmem:[%s11280_s6 + $0xc0] sm:$0xff] %vm3432_vm9, %v1982_v23  ;;  %6814 = vst.msk [vmem:[%s11280_s6 + $0xf0] sm:$0xff] %vm3432_vm9, %v2065_v24 }
 0x1d8   :  { %v3108_v29 = vmul.f32 0.5, %v3084_v25  ;;  %v3111_v30 = vmul.f32 0.5, %v3087_v27 }
 0x1d9   :  { %v1987_v31 = vpop.f32.mrb[32].mxu0  ;;  %v2070_v32 = vpop.f32.mrb[32].mxu1 }
 0x1da   :  { %6805 = vst.msk [vmem:[%s11280_s6 + $0xa8] sm:$0xff] %vm3432_vm9, %v3108_v29  ;;  %6811 = vst.msk [vmem:[%s11280_s6 + $0xd8] sm:$0xff] %vm3432_vm9, %v3111_v30  ;;  %v3085_v33 = vadd.f32 %v1987_v31, %v1904_v7  ;;  %v7953_v34 = vpop.f32.mrb[33].mxu0  ;;  %v3088_v35 = vadd.f32 %v2070_v32, %v1987_v31  ;;  %v7966_v36 = vpop.f32.mrb[33].mxu1 }
 0x1db   :  { %6809 = vst.msk [vmem:[%s11280_s6 + $0xc8] sm:$0xff] %vm3432_vm9, %v1987_v31  ;;  %6815 = vst.msk [vmem:[%s11280_s6 + $0xf8] sm:$0xff] %vm3432_vm9, %v2070_v32 }
 0x1dc   :  { %v3109_v37 = vmul.f32 0.5, %v3085_v33  ;;  %v3112_v38 = vmul.f32 0.5, %v3088_v35 }
 0x1dd   :  { %v1992_v39 = vpop.f32.mrb[34].mxu0  ;;  %v2075_v44 = vpop.f32.mrb[34].mxu1 }
 0x1de   :  { %6806 = vst.msk [vmem:[%s11280_s6 + $0xb0] sm:$0xff] %vm3432_vm9, %v3109_v37  ;;  %6812 = vst.msk [vmem:[%s11280_s6 + $0xe0] sm:$0xff] %vm3432_vm9, %v3112_v38  ;;  %v3086_v45 = vadd.f32 %v1992_v39, %v1909_v15  ;;  %v7956_v46 = vpop.f32.mrb[35].mxu0  ;;  %v3089_v47 = vadd.f32 %v2075_v44, %v1992_v39  ;;  %v7969_v48 = vpop.f32.mrb[35].mxu1 }
 0x1df   :  { %6810 = vst.msk [vmem:[%s11280_s6 + $0xd0] sm:$0x1] %vm11284_vm0, %v1992_v39  ;;  %6816 = vst.msk [vmem:[%s11280_s6 + $0x100] sm:$0x1] %vm11284_vm0, %v2075_v44 }
 0x1e0   :  { %v3110_v49 = vmul.f32 0.5, %v3086_v45  ;;  %v3113_v50 = vmul.f32 0.5, %v3089_v47 }
 0x1e1   :  { %v2148_v51 = vpop.f32.mrb[36].mxu0  ;;  %v2231_v52 = vpop.f32.mrb[36].mxu1 }
 0x1e2   :  { %6807 = vst.msk [vmem:[%s11280_s6 + $0xb8] sm:$0x1] %vm11284_vm0, %v3110_v49  ;;  %6813 = vst.msk [vmem:[%s11280_s6 + $0xe8] sm:$0x1] %vm11284_vm0, %v3113_v50  ;;  %v3090_v53 = vadd.f32 %v2148_v51, %v2065_v24  ;;  %v7976_v54 = vpop.f32.mrb[37].mxu0  ;;  %v3093_v55 = vadd.f32 %v2231_v52, %v2148_v51  ;;  %v7989_v56 = vpop.f32.mrb[37].mxu1 }
 0x1e3   :  { %6820 = vst.msk [vmem:[%s11280_s6 + $0x120] sm:$0xff] %vm3432_vm9, %v2148_v51  ;;  %6826 = vst.msk [vmem:[%s11280_s6 + $0x150] sm:$0xff] %vm3432_vm9, %v2231_v52 }
 0x1e4   :  { %v3114_v57 = vmul.f32 0.5, %v3090_v53  ;;  %v3117_v58 = vmul.f32 0.5, %v3093_v55 }
 0x1e5   :  { %v2153_v59 = vpop.f32.mrb[38].mxu0  ;;  %v2236_v60 = vpop.f32.mrb[38].mxu1 }
 0x1e6   :  { %6817 = vst.msk [vmem:[%s11280_s6 + $0x108] sm:$0xff] %vm3432_vm9, %v3114_v57  ;;  %6823 = vst.msk [vmem:[%s11280_s6 + $0x138] sm:$0xff] %vm3432_vm9, %v3117_v58  ;;  %v3091_v61 = vadd.f32 %v2153_v59, %v2070_v32  ;;  %v7979_v62 = vpop.f32.mrb[39].mxu0  ;;  %v3094_v63 = vadd.f32 %v2236_v60, %v2153_v59  ;;  %v7992_v0 = vpop.f32.mrb[39].mxu1 }
 0x1e7   :  { %6821 = vst.msk [vmem:[%s11280_s6 + $0x128] sm:$0xff] %vm3432_vm9, %v2153_v59  ;;  %6827 = vst.msk [vmem:[%s11280_s6 + $0x158] sm:$0xff] %vm3432_vm9, %v2236_v60 }
 0x1e8   :  { %v3115_v1 = vmul.f32 0.5, %v3091_v61  ;;  %v3118_v2 = vmul.f32 0.5, %v3094_v63 }
 0x1e9   :  { %v2158_v3 = vpop.f32.mrb[40].mxu0  ;;  %v2241_v4 = vpop.f32.mrb[40].mxu1 }
 0x1ea   :  { %6818 = vst.msk [vmem:[%s11280_s6 + $0x110] sm:$0xff] %vm3432_vm9, %v3115_v1  ;;  %6824 = vst.msk [vmem:[%s11280_s6 + $0x140] sm:$0xff] %vm3432_vm9, %v3118_v2  ;;  %v3092_v5 = vadd.f32 %v2158_v3, %v2075_v44  ;;  %v7982_v6 = vpop.f32.mrb[41].mxu0  ;;  %v3095_v7 = vadd.f32 %v2241_v4, %v2158_v3  ;;  %v7995_v8 = vpop.f32.mrb[41].mxu1 }
 0x1eb   :  { %6822 = vst.msk [vmem:[%s11280_s6 + $0x130] sm:$0x1] %vm11284_vm0, %v2158_v3  ;;  %6828 = vst.msk [vmem:[%s11280_s6 + $0x160] sm:$0x1] %vm11284_vm0, %v2241_v4 }
 0x1ec   :  { %v3116_v9 = vmul.f32 0.5, %v3092_v5  ;;  %v3119_v10 = vmul.f32 0.5, %v3095_v7 }
 0x1ed   :  { %v2314_v11 = vpop.f32.mrb[42].mxu0  ;;  %v2397_v12 = vpop.f32.mrb[42].mxu1 }
 0x1ee   :  { %6819 = vst.msk [vmem:[%s11280_s6 + $0x118] sm:$0x1] %vm11284_vm0, %v3116_v9  ;;  %6825 = vst.msk [vmem:[%s11280_s6 + $0x148] sm:$0x1] %vm11284_vm0, %v3119_v10  ;;  %v3096_v13 = vadd.f32 %v2314_v11, %v2231_v52  ;;  %vm3171_vm11 = vcmp.gt.f32.partialorder %v2397_v12, 0.0001 }
 0x1ef   :  { %6832 = vst.msk [vmem:[%s11280_s6 + $0x180] sm:$0xff] %vm3432_vm9, %v2314_v11  ;;  %vm3222_vm12 = vcmp.lt.f32.partialorder %v2397_v12, 0.9999  ;;  %v8002_v14 = vpop.f32.mrb[43].mxu0  ;;  %v8015_v15 = vpop.f32.mrb[43].mxu1 }
 0x1f0   :  { %vm3273_vm13 = vmand %vm3171_vm11, %vm3222_vm12  ;;  %v3120_v16 = vmul.f32 0.5, %v3096_v13 }
 0x1f1   :  { %v7074_v17 = vsel %vm3273_vm13, 1.0, %v8940_v21  ;;  %v2319_v18 = vpop.f32.mrb[44].mxu0  ;;  %v2402_v19 = vpop.f32.mrb[44].mxu1 }
 0x1f2   :  { %8133 = vmatmul.mubr.msk.f32.vlgmr.msra.gmra.mrb[72].mxu0 %vm3432_vm9, %v7074_v17  ;;  %6829 = vst.msk [vmem:[%s11280_s6 + $0x168] sm:$0xff] %vm3432_vm9, %v3120_v16  ;;  %v3097_v20 = vadd.f32 %v2319_v18, %v2236_v60  ;;  %6833 = vst.msk [vmem:[%s11280_s6 + $0x188] sm:$0xff] %vm3432_vm9, %v2319_v18  ;;  %vm3172_vm14 = vcmp.gt.f32.partialorder %v2402_v19, 0.0001  ;;  %vm3223_vm15 = vcmp.lt.f32.partialorder %v2402_v19, 0.9999 }
 0x1f3   :  { %8827 = vmatpush3.bf16.xpose.msk.msra.mxu0 %vm9669_vm10, %v9665_v40  ;;  %v8005_v22 = vpop.f32.mrb[45].mxu0  ;;  %v8018_v23 = vpop.f32.mrb[45].mxu1  ;;  %8135 = vmatprep.mubr.msk.f32.mxu0 %vm8942_vm1, %v8940_v21  ;;  %vm3274_vm2 = vmand %vm3172_vm14, %vm3223_vm15 }
 0x1f4   :  { %8160 = vmatprep.subr.mxu0 %v8940_v21  ;;  %v3121_v24 = vmul.f32 0.5, %v3097_v20  ;;  %v7075_v25 = vsel %vm3274_vm2, 1.0, %v8940_v21 }
 0x1f5   :  { %v2324_v26 = vpop.f32.mrb[46].mxu0  ;;  %v2407_v27 = vpop.f32.mrb[46].mxu1 }
 0x1f6   :  { %8136 = vmatmul.mubr.msk.f32.gmra.mrb[74].mxu0 %vm3432_vm9, %v7075_v25  ;;  %6830 = vst.msk [vmem:[%s11280_s6 + $0x170] sm:$0xff] %vm3432_vm9, %v3121_v24  ;;  %v3098_v28 = vadd.f32 %v2324_v26, %v2241_v4  ;;  %vm3173_vm3 = vcmp.gt.f32.partialorder %v2407_v27, 0.0001  ;;  %vm3224_vm4 = vcmp.lt.f32.partialorder %v2407_v27, 0.9999 }
 0x1f7   :  { %6834 = vst.msk [vmem:[%s11280_s6 + $0x190] sm:$0x1] %vm11284_vm0, %v2324_v26  ;;  %v8008_v29 = vpop.f32.mrb[47].mxu0  ;;  %8138 = vmatprep.mubr.msk.f32.mxu0 %vm8942_vm1, %v8940_v21  ;;  %v8021_v30 = vpop.f32.mrb[47].mxu1  ;;  %vm3275_vm5 = vmand %vm3173_vm3, %vm3224_vm4 }
 0x1f8   :  { %v3122_v31 = vmul.f32 0.5, %v3098_v28  ;;  %v7076_v32 = vsel %vm3275_vm5, 1.0, %v8940_v21 }
 0x1f9   :  { %v2480_v33 = vpop.f32.mrb[48].mxu0 }
 0x1fa   :  { %8139 = vmatmul.mubr.msk.f32.gmra.mrb[76].mxu0 %vm3432_vm9, %v7076_v32  ;;  %6831 = vst.msk [vmem:[%s11280_s6 + $0x178] sm:$0x1] %vm11284_vm0, %v3122_v31  ;;  %v3123_v34 = vadd.f32 %v2480_v33, %v2397_v12  ;;  %vm3177_vm7 = vcmp.gt.f32.partialorder %v2480_v33, 0.0001  ;;  %vm3228_vm8 = vcmp.lt.f32.partialorder %v2480_v33, 0.9999 }
 0x1fb   :  { %8161 = vmatpush3.xpose.msk.msra.mxu0 %vm3432_vm9, %v9684_v43  ;;  %v8028_v35 = vpop.f32.mrb[49].mxu0  ;;  %v2563_v36 = vpop.f32.mrb[48].mxu1  ;;  %8162 = vmatprep.mubr.msk.f32.mxu0 %vm8942_vm1, %v8940_v21  ;;  %vm3279_vm11 = vmand %vm3177_vm7, %vm3228_vm8 }
 0x1fc   :  { %v3126_v37 = vadd.f32 %v2563_v36, %v2480_v33  ;;  %8832 = vmatprep.subr.bf16.mxu0 %v8941_v41  ;;  %v8041_v38 = vpop.f32.mrb[49].mxu1  ;;  %v3147_v39 = vmul.f32 0.5, %v3123_v34  ;;  %v7080_v44 = vsel %vm3279_vm11, 1.0, %v8940_v21  ;;  %vm3183_vm15 = vcmp.gt.f32.partialorder %v2563_v36, 0.0001 }
 0x1fd   :  { %v2485_v45 = vpop.f32.mrb[50].mxu0  ;;  %vm3234_vm2 = vcmp.lt.f32.partialorder %v2563_v36, 0.9999 }
 0x1fe   :  { %8163 = vmatmul.mubr.msk.f32.vlgmr.msra.gmra.mrb[78].mxu0 %vm3432_vm9, %v7080_v44  ;;  %vm3174_vm12 = vcmp.gt.f32.partialorder %v3147_v39, 0.0001  ;;  %vm3225_vm13 = vcmp.lt.f32.partialorder %v3147_v39, 0.9999  ;;  %v3124_v46 = vadd.f32 %v2485_v45, %v2402_v19  ;;  %v8031_v47 = vpop.f32.mrb[51].mxu0  ;;  %v2568_v48 = vpop.f32.mrb[50].mxu1  ;;  %vm9935_vm8 = vmand %vm3183_vm15, %vm3234_vm2 }
 0x1ff   :  { %8835 = vmatpush3.bf16.xpose.msk.msra.mxu0 %vm9669_vm10, %v9665_v40  ;;  %8165 = vmatprep.mubr.msk.f32.mxu0 %vm8942_vm1, %v8940_v21  ;;  %vm3276_vm14 = vmand %vm3174_vm12, %vm3225_vm13  ;;  %v3127_v49 = vadd.f32 %v2568_v48, %v2485_v45  ;;  %vm3178_vm3 = vcmp.gt.f32.partialorder %v2485_v45, 0.0001  ;;  %vm3229_vm4 = vcmp.lt.f32.partialorder %v2485_v45, 0.9999  ;;  %v8044_v52 = vpop.f32.mrb[51].mxu1  ;;  %v3150_v53 = vmul.f32 0.5, %v3126_v37 }
 0x200   :  { %8190 = vmatprep.subr.mxu0 %v8940_v21  ;;  %v3148_v50 = vmul.f32 0.5, %v3124_v46  ;;  %v7077_v51 = vsel %vm3276_vm14, 1.0, %v8940_v21  ;;  %vm3280_vm5 = vmand %vm3178_vm3, %vm3229_vm4  ;;  %vm3184_vm4 = vcmp.gt.f32.partialorder %v2568_v48, 0.0001  ;;  %v7086_v6 = vsel %vm9935_vm8, 1.0, %v8940_v21 }
 0x201   :  { %v2490_v54 = vpop.f32.mrb[52].mxu0  ;;  %8148 = vmatmul.mubr.msk.f32.vlgmr.msra.gmra.mrb[72].mxu1 %vm3432_vm9, %v7077_v51  ;;  %v7081_v56 = vsel %vm3280_vm5, 1.0, %v8940_v21  ;;  %vm3180_vm3 = vcmp.gt.f32.partialorder %v3150_v53, 0.0001  ;;  %vm3231_vm15 = vcmp.lt.f32.partialorder %v3150_v53, 0.9999 }
 0x202   :  { %v3125_v55 = vadd.f32 %v2490_v54, %v2407_v27  ;;  %8831 = vmatpush3.bf16.xpose.msk.msra.mxu1 %vm9669_vm10, %v9665_v40  ;;  %v8034_v57 = vpop.f32.mrb[53].mxu0  ;;  %v9929_v58 = vpop.f32.mrb[52].mxu1  ;;  %8150 = vmatprep.mubr.msk.f32.mxu1 %vm8942_vm1, %v8940_v21  ;;  %vm3175_vm7 = vcmp.gt.f32.partialorder %v3148_v50, 0.0001  ;;  %vm3226_vm11 = vcmp.lt.f32.partialorder %v3148_v50, 0.9999 }
 0x203   :  { %8166 = vmatmul.mubr.msk.f32.gmra.mrb[80].mxu0 %vm3432_vm9, %v7081_v56  ;;  %v3128_v60 = vadd.f32 %v9929_v58, %v2490_v54  ;;  %vm3179_vm12 = vcmp.gt.f32.partialorder %v2490_v54, 0.0001  ;;  %vm3230_vm13 = vcmp.lt.f32.partialorder %v2490_v54, 0.9999  ;;  %8175 = vmatprep.subr.mxu1 %v8940_v21  ;;  %vm3277_vm14 = vmand %vm3175_vm7, %vm3226_vm11  ;;  %v8047_v62 = vpop.f32.mrb[53].mxu1  ;;  %v3151_v4 = vmul.f32 0.5, %v3127_v49 }
 0x204   :  { %v3149_v61 = vmul.f32 0.5, %v3125_v55  ;;  %8168 = vmatprep.mubr.msk.f32.mxu0 %vm8942_vm1, %v8940_v21  ;;  %v7078_v63 = vsel %vm3277_vm14, 1.0, %v8940_v21  ;;  %vm3281_vm2 = vmand %vm3179_vm12, %vm3230_vm13  ;;  %vm3235_vm5 = vcmp.lt.f32.partialorder %v2568_v48, 0.9999  ;;  %vm3185_vm8 = vcmp.gt.f32.partialorder %v9929_v58, 0.0001 }
 0x205   :  { %v2646_v0 = vpop.f32.mrb[54].mxu0  ;;  %8151 = vmatmul.mubr.msk.f32.gmra.mrb[74].mxu1 %vm3432_vm9, %v7078_v63  ;;  %v7082_v1 = vsel %vm3281_vm2, 1.0, %v8940_v21  ;;  %vm3286_vm13 = vmand %vm3184_vm4, %vm3235_vm5  ;;  %vm3236_vm2 = vcmp.lt.f32.partialorder %v9929_v58, 0.9999  ;;  %v3152_v13 = vmul.f32 0.5, %v3128_v60 }
 0x206   :  { %v3129_v2 = vadd.f32 %v2646_v0, %v2563_v36  ;;  %v8054_v3 = vpop.f32.mrb[55].mxu0  ;;  %8153 = vmatprep.mubr.msk.f32.mxu1 %vm8942_vm1, %v8940_v21  ;;  %vm3176_vm7 = vcmp.gt.f32.partialorder %v3149_v61, 0.0001  ;;  %vm3227_vm11 = vcmp.lt.f32.partialorder %v3149_v61, 0.9999  ;;  %v9952_v5 = vpop.f32.mrb[54].mxu1  ;;  %vm9968_vm14 = vmand %vm3180_vm3, %vm3231_vm15 }
 0x207   :  { %8191 = vmatpush3.xpose.msk.msra.mxu0 %vm3432_vm9, %v9684_v43  ;;  %vm3278_vm12 = vmand %vm3176_vm7, %vm3227_vm11  ;;  %v9964_v9 = vadd.f32 %v9952_v5, %v2646_v0  ;;  %vm3181_vm4 = vcmp.gt.f32.partialorder %v3151_v4, 0.0001  ;;  %vm3232_vm3 = vcmp.lt.f32.partialorder %v3151_v4, 0.9999  ;;  %v7087_v14 = vsel %vm3286_vm13, 1.0, %v8940_v21  ;;  %v8067_v15 = vpop.f32.mrb[55].mxu1 }
 0x208   :  { %8169 = vmatmul.mubr.msk.f32.gmra.mrb[82].mxu0 %vm3432_vm9, %v7082_v1  ;;  %8840 = vmatprep.subr.bf16.mxu0 %v8941_v41  ;;  %v7079_v7 = vsel %vm3278_vm12, 1.0, %v8940_v21  ;;  %vm3189_vm15 = vcmp.gt.f32.partialorder %v2646_v0, 0.0001  ;;  %v7083_v16 = vsel %vm9968_vm14, 1.0, %v8940_v21  ;;  %vm9997_vm5 = vmand %vm3185_vm8, %vm3236_vm2  ;;  %v3153_v19 = vmul.f32 0.5, %v3129_v2 }
 0x209   :  { %8192 = vmatprep.mubr.msk.f32.mxu0 %vm8942_vm1, %v8940_v21  ;;  %v9961_v8 = vpop.f32.mrb[56].mxu0  ;;  %8154 = vmatmul.mubr.msk.f32.gmra.mrb[76].mxu1 %vm3432_vm9, %v7079_v7  ;;  %vm3240_vm7 = vcmp.lt.f32.partialorder %v2646_v0, 0.9999  ;;  %vm10006_vm11 = vmand %vm3181_vm4, %vm3232_vm3  ;;  %vm3182_vm12 = vcmp.gt.f32.partialorder %v3152_v13, 0.0001  ;;  %v7088_v27 = vsel %vm9997_vm5, 1.0, %v8940_v21 }
 0x20a   :  { %v3130_v11 = vadd.f32 %v9961_v8, %v2568_v48  ;;  %v8057_v12 = vpop.f32.mrb[57].mxu0  ;;  %8176 = vmatpush3.xpose.msk.msra.mxu1 %vm3432_vm9, %v9684_v43  ;;  %8177 = vmatprep.mubr.msk.f32.mxu1 %vm8942_vm1, %v8940_v21  ;;  %v10011_v23 = vpop.f32.mrb[56].mxu1  ;;  %vm3233_vm13 = vcmp.lt.f32.partialorder %v3152_v13, 0.9999  ;;  %vm10032_vm14 = vmand %vm3189_vm15, %vm3240_vm7  ;;  %v7084_v30 = vsel %vm10006_vm11, 1.0, %v8940_v21  ;;  %v3156_v59 = vmul.f32 0.5, %v9964_v9 }
 0x20b   :  { %8836 = vmatprep.subr.bf16.mxu1 %v8941_v41  ;;  %v10019_v25 = vadd.f32 %v10011_v23, %v9961_v8  ;;  %v8070_v26 = vpop.f32.mrb[57].mxu1  ;;  %vm3186_vm8 = vcmp.gt.f32.partialorder %v3153_v19, 0.0001  ;;  %vm3284_vm2 = vmand %vm3182_vm12, %vm3233_vm13  ;;  %vm3190_vm4 = vcmp.gt.f32.partialorder %v9961_v8, 0.0001  ;;  %v7092_v38 = vsel %vm10032_vm14, 1.0, %v8940_v21 }
 0x20c   :  { %8193 = vmatmul.mubr.msk.f32.vlgmr.msra.gmra.mrb[84].mxu0 %vm3432_vm9, %v7086_v6  ;;  %vm3241_vm3 = vcmp.lt.f32.partialorder %v9961_v8, 0.9999  ;;  %vm3237_vm15 = vcmp.lt.f32.partialorder %v3153_v19, 0.9999  ;;  %v3154_v35 = vmul.f32 0.5, %v3130_v11  ;;  %v7085_v39 = vsel %vm3284_vm2, 1.0, %v8940_v21 }
 0x20d   :  { %8843 = vmatpush3.bf16.xpose.msk.msra.mxu0 %vm9669_vm10, %v9665_v40  ;;  %8195 = vmatprep.mubr.msk.f32.mxu0 %vm8942_vm1, %v8940_v21  ;;  %v9991_v17 = vpop.f32.mrb[58].mxu0  ;;  %vm10069_vm5 = vmand %vm3190_vm4, %vm3241_vm3  ;;  %vm3195_vm2 = vcmp.gt.f32.partialorder %v9952_v5, 0.0001  ;;  %vm3246_vm4 = vcmp.lt.f32.partialorder %v9952_v5, 0.9999  ;;  %v3157_v7 = vmul.f32 0.5, %v10019_v25 }
 0x20e   :  { %8178 = vmatmul.mubr.msk.f32.vlgmr.msra.gmra.mrb[78].mxu1 %vm3432_vm9, %v7083_v16  ;;  %v3131_v20 = vadd.f32 %v9991_v17, %v9929_v58  ;;  %8220 = vmatprep.subr.mxu0 %v8940_v21  ;;  %v8060_v24 = vpop.f32.mrb[59].mxu0  ;;  %v10028_v28 = vpop.f32.mrb[58].mxu1  ;;  %vm10080_vm7 = vmand %vm3186_vm8, %vm3237_vm15  ;;  %vm3191_vm11 = vcmp.gt.f32.partialorder %v9991_v17, 0.0001  ;;  %vm3242_vm12 = vcmp.lt.f32.partialorder %v9991_v17, 0.9999 }
 0x20f   :  { %8839 = vmatpush3.bf16.xpose.msk.msra.mxu1 %vm9669_vm10, %v9665_v40  ;;  %8180 = vmatprep.mubr.msk.f32.mxu1 %vm8942_vm1, %v8940_v21  ;;  %v10042_v31 = vadd.f32 %v10028_v28, %v9991_v17  ;;  %v8073_v33 = vpop.f32.mrb[59].mxu1  ;;  %vm3187_vm13 = vcmp.gt.f32.partialorder %v3154_v35, 0.0001  ;;  %vm3238_vm14 = vcmp.lt.f32.partialorder %v3154_v35, 0.9999  ;;  %v7093_v51 = vsel %vm10069_vm5, 1.0, %v8940_v21  ;;  %vm10112_vm8 = vmand %vm3191_vm11, %vm3242_vm12 }
 0x210   :  { %8196 = vmatmul.mubr.msk.f32.gmra.mrb[86].mxu0 %vm3432_vm9, %v7087_v14  ;;  %8205 = vmatprep.subr.mxu1 %v8940_v21  ;;  %v3155_v50 = vmul.f32 0.5, %v3131_v20  ;;  %v7089_v53 = vsel %vm10080_vm7, 1.0, %v8940_v21  ;;  %vm10121_vm3 = vmand %vm3187_vm13, %vm3238_vm14  ;;  %v7094_v62 = vsel %vm10112_vm8, 1.0, %v8940_v21  ;;  %vm3196_vm12 = vcmp.gt.f32.partialorder %v10011_v23, 0.0001 }
 0x211   :  { %8198 = vmatprep.mubr.msk.f32.mxu0 %vm8942_vm1, %v8940_v21  ;;  %v10044_v32 = vpop.f32.mrb[60].mxu0  ;;  %vm10154_vm7 = vmand %vm3195_vm2, %vm3246_vm4  ;;  %v7090_v2 = vsel %vm10121_vm3, 1.0, %v8940_v21  ;;  %vm3247_vm13 = vcmp.lt.f32.partialorder %v10011_v23, 0.9999  ;;  %vm3192_vm14 = vcmp.gt.f32.partialorder %v3156_v59, 0.0001 }
 0x212   :  { %8181 = vmatmul.mubr.msk.f32.gmra.mrb[80].mxu1 %vm3432_vm9, %v7084_v30  ;;  %v10053_v34 = vadd.f32 %v10044_v32, %v9952_v5  ;;  %v8080_v36 = vpop.f32.mrb[61].mxu0  ;;  %vm3188_vm15 = vcmp.gt.f32.partialorder %v3155_v50, 0.0001  ;;  %vm3239_vm5 = vcmp.lt.f32.partialorder %v3155_v50, 0.9999  ;;  %v7098_v8 = vsel %vm10154_vm7, 1.0, %v8940_v21  ;;  %vm10190_vm2 = vmand %vm3196_vm12, %vm3247_vm13 }
 0x213   :  { %8183 = vmatprep.mubr.msk.f32.mxu1 %vm8942_vm1, %v8940_v21  ;;  %v10058_v37 = vpop.f32.mrb[60].mxu1  ;;  %vm3290_vm11 = vmand %vm3188_vm15, %vm3239_vm5  ;;  %vm3243_vm8 = vcmp.lt.f32.partialorder %v3156_v59, 0.9999  ;;  %vm3197_vm3 = vcmp.gt.f32.partialorder %v10028_v28, 0.0001  ;;  %v3158_v16 = vmul.f32 0.5, %v10042_v31 }
 0x214   :  { %8199 = vmatmul.mubr.msk.f32.gmra.mrb[88].mxu0 %vm3432_vm9, %v7088_v27  ;;  %v10077_v46 = vadd.f32 %v10058_v37, %v10044_v32  ;;  %v8093_v52 = vpop.f32.mrb[61].mxu1  ;;  %v7091_v10 = vsel %vm3290_vm11, 1.0, %v8940_v21  ;;  %vm10196_vm4 = vmand %vm3192_vm14, %vm3243_vm8  ;;  %vm3248_vm15 = vcmp.lt.f32.partialorder %v10028_v28, 0.9999  ;;  %vm3193_vm5 = vcmp.gt.f32.partialorder %v3157_v7, 0.0001 }
 0x215   :  { %8221 = vmatpush3.xpose.msk.msra.mxu0 %vm3432_vm9, %v9684_v43  ;;  %8222 = vmatprep.mubr.msk.f32.mxu0 %vm8942_vm1, %v8940_v21  ;;  %v10073_v45 = vpop.f32.mrb[62].mxu0  ;;  %vm3244_vm7 = vcmp.lt.f32.partialorder %v3157_v7, 0.9999  ;;  %v7099_v18 = vsel %vm10190_vm2, 1.0, %v8940_v21  ;;  %v7095_v22 = vsel %vm10196_vm4, 1.0, %v8940_v21  ;;  %vm10235_vm11 = vmand %vm3197_vm3, %vm3248_vm15  ;;  %v3159_v29 = vmul.f32 0.5, %v10053_v34 }
 0x216   :  { %8848 = vmatprep.subr.bf16.mxu0 %v8941_v41  ;;  %8184 = vmatmul.mubr.msk.f32.gmra.mrb[82].mxu1 %vm3432_vm9, %v7085_v39  ;;  %v10089_v48 = vadd.f32 %v10073_v45, %v10011_v23  ;;  %v8083_v49 = vpop.f32.mrb[63].mxu0  ;;  %vm3201_vm12 = vcmp.gt.f32.partialorder %v10044_v32, 0.0001  ;;  %vm3252_vm13 = vcmp.lt.f32.partialorder %v10044_v32, 0.9999  ;;  %vm10246_vm14 = vmand %vm3193_vm5, %vm3244_vm7  ;;  %v7100_v33 = vsel %vm10235_vm11, 1.0, %v8940_v21 }
 0x217   :  { %8206 = vmatpush3.xpose.msk.msra.mxu1 %vm3432_vm9, %v9684_v43  ;;  %8207 = vmatprep.mubr.msk.f32.mxu1 %vm8942_vm1, %v8940_v21  ;;  %v10130_v58 = vpop.f32.mrb[62].mxu1  ;;  %vm3194_vm8 = vcmp.gt.f32.partialorder %v3158_v16, 0.0001  ;;  %vm3245_vm2 = vcmp.lt.f32.partialorder %v3158_v16, 0.9999  ;;  %vm3303_vm4 = vmand %vm3201_vm12, %vm3252_vm13  ;;  %v7096_v34 = vsel %vm10246_vm14, 1.0, %v8940_v21 }
 0x218   :  { %8223 = vmatmul.mubr.msk.f32.vlgmr.msra.gmra.mrb[90].mxu0 %vm3432_vm9, %v7092_v38  ;;  %8844 = vmatprep.subr.bf16.mxu1 %v8941_v41  ;;  %v10139_v60 = vadd.f32 %v10130_v58, %v10073_v45  ;;  %v8096_v61 = vpop.f32.mrb[63].mxu1  ;;  %vm3296_vm3 = vmand %vm3194_vm8, %vm3245_vm2  ;;  %vm3202_vm15 = vcmp.gt.f32.partialorder %v10073_v45, 0.0001  ;;  %vm3253_vm5 = vcmp.lt.f32.partialorder %v10073_v45, 0.9999  ;;  %v3160_v32 = vmul.f32 0.5, %v10089_v48 }
 0x219   :  { %8851 = vmatpush3.bf16.xpose.msk.msra.mxu0 %vm9669_vm10, %v9665_v40  ;;  %8225 = vmatprep.mubr.msk.f32.mxu0 %vm8942_vm1, %v8940_v21  ;;  %v10116_v55 = vpop.f32.mrb[64].mxu0  ;;  %vm3198_vm7 = vcmp.gt.f32.partialorder %v3159_v29, 0.0001  ;;  %vm3249_vm11 = vcmp.lt.f32.partialorder %v3159_v29, 0.9999  ;;  %v7104_v38 = vsel %vm3303_vm4, 1.0, %v8940_v21  ;;  %vm3304_vm12 = vmand %vm3202_vm15, %vm3253_vm5 }
 0x21a   :  { %8208 = vmatmul.mubr.msk.f32.vlgmr.msra.gmra.mrb[84].mxu1 %vm3432_vm9, %v7089_v53  ;;  %8250 = vmatprep.subr.mxu0 %v8940_v21  ;;  %v10128_v57 = vadd.f32 %v10116_v55, %v10028_v28  ;;  %v8086_v63 = vpop.f32.mrb[65].mxu0  ;;  %v7097_v39 = vsel %vm3296_vm3, 1.0, %v8940_v21  ;;  %vm3300_vm13 = vmand %vm3198_vm7, %vm3249_vm11  ;;  %vm3203_vm14 = vcmp.gt.f32.partialorder %v10116_v55, 0.0001  ;;  %vm3254_vm8 = vcmp.lt.f32.partialorder %v10116_v55, 0.9999 }
 0x21b   :  { %8847 = vmatpush3.bf16.xpose.msk.msra.mxu1 %vm9669_vm10, %v9665_v40  ;;  %8210 = vmatprep.mubr.msk.f32.mxu1 %vm8942_vm1, %v8940_v21  ;;  %v10148_v0 = vpop.f32.mrb[64].mxu1  ;;  %vm3199_vm2 = vcmp.gt.f32.partialorder %v3160_v32, 0.0001  ;;  %vm3250_vm4 = vcmp.lt.f32.partialorder %v3160_v32, 0.9999  ;;  %v7105_v47 = vsel %vm3304_vm12, 1.0, %v8940_v21  ;;  %vm3305_vm3 = vmand %vm3203_vm14, %vm3254_vm8 }
 0x21c   :  { %8226 = vmatmul.mubr.msk.f32.gmra.mrb[92].mxu0 %vm3432_vm9, %v7093_v51  ;;  %8235 = vmatprep.subr.mxu1 %v8940_v21  ;;  %v10164_v3 = vadd.f32 %v10148_v0, %v10116_v55  ;;  %v8099_v6 = vpop.f32.mrb[65].mxu1  ;;  %v3161_v45 = vmul.f32 0.5, %v10128_v57  ;;  %v7101_v48 = vsel %vm3300_vm13, 1.0, %v8940_v21  ;;  %vm3207_vm15 = vcmp.gt.f32.partialorder %v10058_v37, 0.0001  ;;  %vm3301_vm7 = vmand %vm3199_vm2, %vm3250_vm4 }
 0x21d   :  { %8228 = vmatprep.mubr.msk.f32.mxu0 %vm8942_vm1, %v8940_v21  ;;  %v10166_v4 = vpop.f32.mrb[66].mxu0  ;;  %vm3258_vm5 = vcmp.lt.f32.partialorder %v10058_v37, 0.9999  ;;  %v3162_v49 = vmul.f32 0.5, %v10077_v46  ;;  %v7102_v50 = vsel %vm3301_vm7, 1.0, %v8940_v21  ;;  %v3163_v46 = vmul.f32 0.5, %v10139_v60 }
 0x21e   :  { %8211 = vmatmul.mubr.msk.f32.gmra.mrb[86].mxu1 %vm3432_vm9, %v7090_v2  ;;  %v10175_v5 = vadd.f32 %v10166_v4, %v10058_v37  ;;  %v8106_v9 = vpop.f32.mrb[67].mxu0  ;;  %vm3200_vm11 = vcmp.gt.f32.partialorder %v3161_v45, 0.0001  ;;  %vm3251_vm12 = vcmp.lt.f32.partialorder %v3161_v45, 0.9999  ;;  %v7106_v37 = vsel %vm3305_vm3, 1.0, %v8940_v21  ;;  %vm3309_vm13 = vmand %vm3207_vm15, %vm3258_vm5 }
 0x21f   :  { %8213 = vmatprep.mubr.msk.f32.mxu1 %vm8942_vm1, %v8940_v21  ;;  %v10211_v17 = vpop.f32.mrb[66].mxu1  ;;  %vm3302_vm14 = vmand %vm3200_vm11, %vm3251_vm12  ;;  %vm3208_vm8 = vcmp.gt.f32.partialorder %v10130_v58, 0.0001  ;;  %vm3259_vm2 = vcmp.lt.f32.partialorder %v10130_v58, 0.9999  ;;  %v7110_v51 = vsel %vm3309_vm13, 1.0, %v8940_v21 }
 0x220   :  { %8229 = vmatmul.mubr.msk.f32.gmra.mrb[94].mxu0 %vm3432_vm9, %v7094_v62  ;;  %v10223_v19 = vadd.f32 %v10211_v17, %v10166_v4  ;;  %v8119_v20 = vpop.f32.mrb[67].mxu1  ;;  %vm3204_vm4 = vcmp.gt.f32.partialorder %v3162_v49, 0.0001  ;;  %vm3255_vm0 = vcmp.lt.f32.partialorder %v3162_v49, 0.9999  ;;  %v7103_v52 = vsel %vm3302_vm14, 1.0, %v8940_v21  ;;  %vm3310_vm3 = vmand %vm3208_vm8, %vm3259_vm2 }
 0x221   :  { %8251 = vmatpush3.xpose.msk.msra.mxu0 %vm3432_vm9, %v9684_v43  ;;  %8252 = vmatprep.mubr.msk.f32.mxu0 %vm8942_vm1, %v8940_v21  ;;  %v10194_v12 = vpop.f32.mrb[68].mxu0  ;;  %vm3306_vm15 = vmand %vm3204_vm4, %vm3255_vm0  ;;  %vm3209_vm5 = vcmp.gt.f32.partialorder %v10148_v0, 0.0001  ;;  %vm3260_vm7 = vcmp.lt.f32.partialorder %v10148_v0, 0.9999  ;;  %v3164_v53 = vmul.f32 0.5, %v10164_v3 }
 0x222   :  { %8856 = vmatprep.subr.bf16.mxu0 %v8941_v41  ;;  %8214 = vmatmul.mubr.msk.f32.gmra.mrb[88].mxu1 %vm3432_vm9, %v7091_v10  ;;  %v10205_v14 = vadd.f32 %v10194_v12, %v10130_v58  ;;  %v8109_v15 = vpop.f32.mrb[69].mxu0  ;;  %vm3205_vm11 = vcmp.gt.f32.partialorder %v3163_v46, 0.0001  ;;  %vm3256_vm12 = vcmp.lt.f32.partialorder %v3163_v46, 0.9999  ;;  %v7111_v54 = vsel %vm3310_vm3, 1.0, %v8940_v21  ;;  %vm3311_vm0 = vmand %vm3209_vm5, %vm3260_vm7 }
 0x223   :  { %8236 = vmatpush3.xpose.msk.msra.mxu1 %vm3432_vm9, %v9684_v43  ;;  %8237 = vmatprep.mubr.msk.f32.mxu1 %vm8942_vm1, %v8940_v21  ;;  %v10255_v27 = vpop.f32.mrb[68].mxu1  ;;  %v7107_v55 = vsel %vm3306_vm15, 1.0, %v8940_v21  ;;  %vm3213_vm13 = vcmp.gt.f32.partialorder %v10166_v4, 0.0001  ;;  %vm3264_vm14 = vcmp.lt.f32.partialorder %v10166_v4, 0.9999  ;;  %vm3307_vm8 = vmand %vm3205_vm11, %vm3256_vm12 }
 0x224   :  { %8253 = vmatmul.mubr.msk.f32.vlgmr.msra.gmra.mrb[96].mxu0 %vm3432_vm9, %v7098_v8  ;;  %8852 = vmatprep.subr.bf16.mxu1 %v8941_v41  ;;  %v10264_v30 = vadd.f32 %v10255_v27, %v10194_v12  ;;  %v8122_v31 = vpop.f32.mrb[69].mxu1  ;;  %vm3206_vm2 = vcmp.gt.f32.partialorder %v3164_v53, 0.0001  ;;  %vm3257_vm4 = vcmp.lt.f32.partialorder %v3164_v53, 0.9999  ;;  %v7112_v56 = vsel %vm3311_vm0, 1.0, %v8940_v21  ;;  %vm3315_vm3 = vmand %vm3213_vm13, %vm3264_vm14 }
 0x225   :  { %8859 = vmatpush3.bf16.xpose.msk.msra.mxu0 %vm9669_vm10, %v9665_v40  ;;  %8255 = vmatprep.mubr.msk.f32.mxu0 %vm8942_vm1, %v8940_v21  ;;  %v10239_v24 = vpop.f32.mrb[70].mxu0  ;;  %v7108_v57 = vsel %vm3307_vm8, 1.0, %v8940_v21  ;;  %vm3308_vm15 = vmand %vm3206_vm2, %vm3257_vm4  ;;  %vm3214_vm5 = vcmp.gt.f32.partialorder %v10194_v12, 0.0001  ;;  %vm3265_vm7 = vcmp.lt.f32.partialorder %v10194_v12, 0.9999 }
 0x226   :  { %8238 = vmatmul.mubr.msk.f32.vlgmr.msra.gmra.mrb[90].mxu1 %vm3432_vm9, %v7095_v22  ;;  %8280 = vmatprep.subr.mxu0 %v8940_v21  ;;  %v10253_v26 = vadd.f32 %v10239_v24, %v10148_v0  ;;  %v8112_v28 = vpop.f32.mrb[71].mxu0  ;;  %v3166_v58 = vmul.f32 0.5, %v10205_v14  ;;  %v7116_v59 = vsel %vm3315_vm3, 1.0, %v8940_v21  ;;  %v8939_v60 = vld [vmem:[%s11279_s3 + $0x10] sm:$0x1]  ;;  %v7109_v61 = vsel %vm3308_vm15, 1.0, %v8940_v21  ;;  %vm3316_vm0 = vmand %vm3214_vm5, %vm3265_vm7 }
 0x227   :  { %8855 = vmatpush3.bf16.xpose.msk.msra.mxu1 %vm9669_vm10, %v9665_v40  ;;  %8240 = vmatprep.mubr.msk.f32.mxu1 %vm8942_vm1, %v8940_v21  ;;  %v10284_v35 = vpop.f32.mrb[70].mxu1  ;;  %vm3215_vm14 = vcmp.gt.f32.partialorder %v10239_v24, 0.0001  ;;  %vm3266_vm8 = vcmp.lt.f32.partialorder %v10239_v24, 0.9999  ;;  %v7117_v63 = vsel %vm3316_vm0, 1.0, %v8940_v21 }
 0x228   :  { %8256 = vmatmul.mubr.msk.f32.gmra.mrb[98].mxu0 %vm3432_vm9, %v7099_v18  ;;  %8265 = vmatprep.subr.mxu1 %v8940_v21  ;;  %v10292_v36 = vadd.f32 %v10284_v35, %v10239_v24  ;;  %v8125_v44 = vpop.f32.mrb[71].mxu1  ;;  %v3167_v62 = vmul.f32 0.5, %v10253_v26  ;;  %vm3211_vm2 = vcmp.gt.f32.partialorder %v3166_v58, 0.0001  ;;  %vm3262_vm4 = vcmp.lt.f32.partialorder %v3166_v58, 0.9999  ;;  %vm3317_vm3 = vmand %vm3215_vm14, %vm3266_vm8 }
 0x229   :  { %8258 = vmatprep.mubr.msk.f32.mxu0 %vm8942_vm1, %v8940_v21  ;;  %vm3219_vm15 = vcmp.gt.f32.partialorder %v10211_v17, 0.0001  ;;  %vm3270_vm5 = vcmp.lt.f32.partialorder %v10211_v17, 0.9999  ;;  %vm3313_vm7 = vmand %vm3211_vm2, %vm3262_vm4  ;;  %v3168_v1 = vmul.f32 0.5, %v10223_v19  ;;  %v7118_v2 = vsel %vm3317_vm3, 1.0, %v8940_v21 }
 0x22a   :  { %8241 = vmatmul.mubr.msk.f32.gmra.mrb[92].mxu1 %vm3432_vm9, %v7096_v34  ;;  %vm3321_vm0 = vmand %vm3219_vm15, %vm3270_vm5  ;;  %v7114_v3 = vsel %vm3313_vm7, 1.0, %v8940_v21  ;;  %vm3271_vm14 = vcmp.lt.f32.partialorder %v10255_v27, 0.9999  ;;  %vm3221_vm15 = vcmp.gt.f32.partialorder %v10284_v35, 0.0001  ;;  %v3170_v6 = vmul.f32 0.5, %v10292_v36 }
 0x22b   :  { %8243 = vmatprep.mubr.msk.f32.mxu1 %vm8942_vm1, %v8940_v21  ;;  %vm3216_vm8 = vcmp.gt.f32.partialorder %v3168_v1, 0.0001  ;;  %vm3267_vm2 = vcmp.lt.f32.partialorder %v3168_v1, 0.9999  ;;  %v7122_v42 = vsel %vm3321_vm0, 1.0, %v8940_v21  ;;  %v10477_v18 = vld [vmem:[%s11281_s4] sm:$0xff] }
 0x22c   :  { %8259 = vmatmul.mubr.msk.f32.gmra.mrb[100].mxu0 %vm3432_vm9, %v7100_v33  ;;  %vm3318_vm3 = vmand %vm3216_vm8, %vm3267_vm2  ;;  %vm3272_vm5 = vcmp.lt.f32.partialorder %v10284_v35, 0.9999  ;;  %v10488_v22 = vld [vmem:[%s11281_s4 + $0x8] sm:$0xff]  ;;  %v10497_v25 = vld [vmem:[%s11281_s4 + $0x10] sm:$0x1] }
 0x22d   :  { %8281 = vmatpush3.xpose.msk.msra.mxu0 %vm3432_vm9, %v9684_v43  ;;  %8282 = vmatprep.mubr.msk.f32.mxu0 %vm8942_vm1, %v8940_v21  ;;  %v7119_v7 = vsel %vm3318_vm3, 1.0, %v8940_v21 }
 0x22e   :  { %8864 = vmatprep.subr.bf16.mxu0 %v8941_v41  ;;  %8244 = vmatmul.mubr.msk.f32.gmra.mrb[94].mxu1 %vm3432_vm9, %v7097_v39 }
 0x22f   :  { %8266 = vmatpush3.xpose.msk.msra.mxu1 %vm3432_vm9, %v9684_v43  ;;  %8267 = vmatprep.mubr.msk.f32.mxu1 %vm8942_vm1, %v8940_v21 }
 0x230   :  { %8283 = vmatmul.mubr.msk.f32.vlgmr.msra.gmra.mrb[102].mxu0 %vm3432_vm9, %v7104_v38  ;;  %8860 = vmatprep.subr.bf16.mxu1 %v8941_v41 }
 0x231   :  { %8867 = vmatpush3.bf16.xpose.msk.msra.mxu0 %vm9669_vm10, %v9665_v40  ;;  %8285 = vmatprep.mubr.msk.f32.mxu0 %vm8942_vm1, %v8940_v21 }
 0x232   :  { %8268 = vmatmul.mubr.msk.f32.vlgmr.msra.gmra.mrb[96].mxu1 %vm3432_vm9, %v7101_v48  ;;  %8310 = vmatprep.subr.mxu0 %v8940_v21 }
 0x233   :  { %8863 = vmatpush3.bf16.xpose.msk.msra.mxu1 %vm9669_vm10, %v9665_v40  ;;  %8270 = vmatprep.mubr.msk.f32.mxu1 %vm8942_vm1, %v8940_v21 }
 0x234   :  { %8286 = vmatmul.mubr.msk.f32.gmra.mrb[104].mxu0 %vm3432_vm9, %v7105_v47  ;;  %8295 = vmatprep.subr.mxu1 %v8940_v21 }
 0x235   :  { %8288 = vmatprep.mubr.msk.f32.mxu0 %vm8942_vm1, %v8940_v21 }
 0x236   :  { %8271 = vmatmul.mubr.msk.f32.gmra.mrb[98].mxu1 %vm3432_vm9, %v7102_v50 }
 0x237   :  { %8273 = vmatprep.mubr.msk.f32.mxu1 %vm8942_vm1, %v8940_v21 }
 0x238   :  { %8289 = vmatmul.mubr.msk.f32.gmra.mrb[106].mxu0 %vm3432_vm9, %v7106_v37 }
 0x239   :  { %8311 = vmatpush3.xpose.msk.msra.mxu0 %vm3432_vm9, %v9684_v43  ;;  %8312 = vmatprep.mubr.msk.f32.mxu0 %vm8942_vm1, %v8940_v21 }
 0x23a   :  { %8872 = vmatprep.subr.bf16.mxu0 %v8941_v41  ;;  %8274 = vmatmul.mubr.msk.f32.gmra.mrb[100].mxu1 %vm3432_vm9, %v7103_v52 }
 0x23b   :  { %8296 = vmatpush3.xpose.msk.msra.mxu1 %vm3432_vm9, %v9684_v43  ;;  %8297 = vmatprep.mubr.msk.f32.mxu1 %vm8942_vm1, %v8940_v21  ;;  %v3165_v43 = vmul.f32 0.5, %v10175_v5 }
 0x23c   :  { %8313 = vmatmul.mubr.msk.f32.vlgmr.msra.gmra.mrb[108].mxu0 %vm3432_vm9, %v7110_v51  ;;  %8868 = vmatprep.subr.bf16.mxu1 %v8941_v41 }
 0x23d   :  { %8875 = vmatpush3.bf16.xpose.msk.msra.mxu0 %vm9669_vm10, %v9665_v40  ;;  %8315 = vmatprep.mubr.msk.f32.mxu0 %vm8942_vm1, %v8940_v21  ;;  %vm3210_vm11 = vcmp.gt.f32.partialorder %v3165_v43, 0.0001  ;;  %vm3261_vm12 = vcmp.lt.f32.partialorder %v3165_v43, 0.9999 }
 0x23e   :  { %8298 = vmatmul.mubr.msk.f32.vlgmr.msra.gmra.mrb[102].mxu1 %vm3432_vm9, %v7107_v55  ;;  %8340 = vmatprep.subr.mxu0 %v8940_v21  ;;  %vm3312_vm13 = vmand %vm3210_vm11, %vm3261_vm12  ;;  %vm3212_vm11 = vcmp.gt.f32.partialorder %v3167_v62, 0.0001  ;;  %vm3263_vm12 = vcmp.lt.f32.partialorder %v3167_v62, 0.9999 }
 0x23f   :  { %8871 = vmatpush3.bf16.xpose.msk.msra.mxu1 %vm9669_vm10, %v9665_v40  ;;  %8300 = vmatprep.mubr.msk.f32.mxu1 %vm8942_vm1, %v8940_v21  ;;  %v7113_v0 = vsel %vm3312_vm13, 1.0, %v8940_v21  ;;  %vm3220_vm13 = vcmp.gt.f32.partialorder %v10255_v27, 0.0001 }
 0x240   :  { %8316 = vmatmul.mubr.msk.f32.gmra.mrb[110].mxu0 %vm3432_vm9, %v7111_v54  ;;  %8325 = vmatprep.subr.mxu1 %v8940_v21  ;;  %vm3322_vm4 = vmand %vm3220_vm13, %vm3271_vm14  ;;  %vm3218_vm13 = vcmp.gt.f32.partialorder %v3170_v6, 0.0001  ;;  %vm3269_vm14 = vcmp.lt.f32.partialorder %v3170_v6, 0.9999 }
 0x241   :  { %8318 = vmatprep.mubr.msk.f32.mxu0 %vm8942_vm1, %v8940_v21  ;;  %v7123_v5 = vsel %vm3322_vm4, 1.0, %v8940_v21 }
 0x242   :  { %8301 = vmatmul.mubr.msk.f32.gmra.mrb[104].mxu1 %vm3432_vm9, %v7108_v57 }
 0x243   :  { %8303 = vmatprep.mubr.msk.f32.mxu1 %vm8942_vm1, %v8940_v21 }
 0x244   :  { %8319 = vmatmul.mubr.msk.f32.gmra.mrb[112].mxu0 %vm3432_vm9, %v7112_v56 }
 0x245   :  { %8341 = vmatpush3.xpose.msk.msra.mxu0 %vm3432_vm9, %v8939_v60  ;;  %8342 = vmatprep.mubr.msk.f32.mxu0 %vm8942_vm1, %v8940_v21 }
 0x246   :  { %8880 = vmatprep.subr.bf16.mxu0 %v8941_v41  ;;  %8304 = vmatmul.mubr.msk.f32.gmra.mrb[106].mxu1 %vm3432_vm9, %v7109_v61 }
 0x247   :  { %8326 = vmatpush3.xpose.msk.msra.mxu1 %vm3432_vm9, %v8939_v60  ;;  %8327 = vmatprep.mubr.msk.f32.mxu1 %vm8942_vm1, %v8940_v21 }
 0x248   :  { %8343 = vmatmul.mubr.msk.f32.vlgmr.msra.gmra.mrb[114].mxu0 %vm3432_vm9, %v7116_v59  ;;  %8876 = vmatprep.subr.bf16.mxu1 %v8941_v41 }
 0x249   :  { %8883 = vmatpush3.bf16.xpose.msk.msra.mxu0 %vm9669_vm10, %v9665_v40  ;;  %8345 = vmatprep.mubr.msk.f32.mxu0 %vm8942_vm1, %v8940_v21 }
 0x24a   :  { %8328 = vmatmul.mubr.msk.f32.vlgmr.msra.gmra.mrb[108].mxu1 %vm3432_vm9, %v7113_v0  ;;  %8370 = vmatprep.subr.mxu0 %v8940_v21 }
 0x24b   :  { %8879 = vmatpush3.bf16.xpose.msk.msra.mxu1 %vm9669_vm10, %v9665_v40  ;;  %8330 = vmatprep.mubr.msk.f32.mxu1 %vm8942_vm1, %v8940_v21  ;;  %vm3314_vm10 = vmand %vm3212_vm11, %vm3263_vm12  ;;  %v3169_v40 = vmul.f32 0.5, %v10264_v30 }
 0x24c   :  { %8346 = vmatmul.mubr.msk.f32.gmra.mrb[116].mxu0 %vm3432_vm9, %v7117_v63  ;;  %8355 = vmatprep.subr.mxu1 %v8940_v21  ;;  %v7115_v4 = vsel %vm3314_vm10, 1.0, %v8940_v21  ;;  %vm3323_vm12 = vmand %vm3221_vm15, %vm3272_vm5 }
 0x24d   :  { %8348 = vmatprep.mubr.msk.f32.mxu0 %vm8942_vm1, %v8940_v21  ;;  %vm3217_vm7 = vcmp.gt.f32.partialorder %v3169_v40, 0.0001  ;;  %vm3268_vm11 = vcmp.lt.f32.partialorder %v3169_v40, 0.9999  ;;  %v7124_v8 = vsel %vm3323_vm12, 1.0, %v8940_v21  ;;  %vm3320_vm10 = vmand %vm3218_vm13, %vm3269_vm14 }
 0x24e   :  { %8331 = vmatmul.mubr.msk.f32.gmra.mrb[110].mxu1 %vm3432_vm9, %v7114_v3  ;;  %vm3319_vm0 = vmand %vm3217_vm7, %vm3268_vm11  ;;  %v7121_v10 = vsel %vm3320_vm10, 1.0, %v8940_v21 }
 0x24f   :  { %8333 = vmatprep.mubr.msk.f32.mxu1 %vm8942_vm1, %v8940_v21  ;;  %v7120_v9 = vsel %vm3319_vm0, 1.0, %v8940_v21 }
 0x250   :  { %8349 = vmatmul.mubr.msk.f32.gmra.mrb[118].mxu0 %vm3432_vm9, %v7118_v2 }
 0x251   :  { %8371 = vmatpush3.xpose.msk.msra.mxu0 %vm3432_vm9, %v8939_v60  ;;  %8372 = vmatprep.mubr.msk.f32.mxu0 %vm8942_vm1, %v8940_v21 }
 0x252   :  { %8887 = vmatprep.subr.bf16.mxu0 %v8941_v41  ;;  %8334 = vmatmul.mubr.msk.f32.gmra.mrb[112].mxu1 %vm3432_vm9, %v7115_v4 }
 0x253   :  { %8356 = vmatpush3.xpose.msk.msra.mxu1 %vm3432_vm9, %v8939_v60  ;;  %8357 = vmatprep.mubr.msk.f32.mxu1 %vm8942_vm1, %v8940_v21 }
 0x254   :  { %8373 = vmatmul.mubr.msk.f32.vlgmr.msra.gmra.mrb[120].mxu0 %vm3432_vm9, %v7122_v42  ;;  %8884 = vmatprep.subr.bf16.mxu1 %v8941_v41 }
 0x255   :  { %8375 = vmatprep.mubr.msk.f32.mxu0 %vm8942_vm1, %v8940_v21 }
 0x256   :  { %8358 = vmatmul.mubr.msk.f32.vlgmr.msra.gmra.mrb[114].mxu1 %vm3432_vm9, %v7119_v7 }
 0x257   :  { %8360 = vmatprep.mubr.msk.f32.mxu1 %vm8942_vm1, %v8940_v21 }
 0x258   :  { %8376 = vmatmul.mubr.msk.f32.gmra.mrb[122].mxu0 %vm3432_vm9, %v7123_v5 }
 0x259   :  { %8378 = vmatprep.mubr.msk.f32.mxu0 %vm8942_vm1, %v8940_v21 }
 0x25a   :  { %8361 = vmatmul.mubr.msk.f32.gmra.mrb[116].mxu1 %vm3432_vm9, %v7120_v9 }
 0x25b   :  { %8363 = vmatprep.mubr.msk.f32.mxu1 %vm8942_vm1, %v8940_v21 }
 0x25c   :  { %8379 = vmatmul.mubr.msk.f32.gmra.mrb[124].mxu0 %vm3432_vm9, %v7124_v8 }
 0x25d   :  { %8402 = vmatprep.mubr.msk.f32.mxu0 %vm8942_vm1, %v8940_v21 }
 0x25e   :  { %8364 = vmatmul.mubr.msk.f32.gmra.mrb[118].mxu1 %vm3432_vm9, %v7121_v10 }
 0x25f   :  { %8387 = vmatprep.mubr.msk.f32.mxu1 %vm8942_vm1, %v8940_v21 }
 0x2c5   :  { %v3517_v11 = vpop.f32.mrb[72].mxu0 }
 0x2c6   :  { %v8134_v12 = vpop.f32.mrb[73].mxu0 }
 0x2c9   :  { %v3522_v13 = vpop.f32.mrb[74].mxu0 }
 0x2ca   :  { %v8885_v14 = vpack.c.bf16 %v3522_v13, %v3517_v11  ;;  %v8137_v15 = vpop.f32.mrb[75].mxu0 }
 0x2cc   :  { %8886 = vmatpush3.bf16.msra.mxu1 %v8885_v14 }
 0x2cd   :  { %v3527_v16 = vpop.f32.mrb[76].mxu0  ;;  %8385 = vmatprep.subr.mxu1 %v8940_v21 }
 0x2ce   :  { %v8140_v17 = vpop.f32.mrb[77].mxu0 }
 0x2d0   :  { %8386 = vmatpush3.msk.msra.mxu1 %vm1580_vm6, %v3527_v16 }
 0x2d1   :  { %v3695_v19 = vpop.f32.mrb[78].mxu0  ;;  %8388 = vmatmul.mubr.msk.f32.vlgmr.msra.gmra.mrb[120].mxu1 %vm3432_vm9, %v10477_v18  ;;  %8890 = vmatprep.subr.bf16.mxu1 %v8941_v41 }
 0x2d2   :  { %v8164_v20 = vpop.f32.mrb[79].mxu0  ;;  %8390 = vmatprep.mubr.msk.f32.mxu1 %vm8942_vm1, %v8940_v21 }
 0x2d4   :  { %v3606_v23 = vpop.f32.mrb[72].mxu1 }
 0x2d5   :  { %8391 = vmatmul.mubr.msk.f32.gmra.mrb[122].mxu1 %vm3432_vm9, %v10488_v22  ;;  %v8149_v24 = vpop.f32.mrb[73].mxu1 }
 0x2d6   :  { %8393 = vmatprep.mubr.msk.f32.mxu1 %vm8942_vm1, %v8940_v21  ;;  %v3700_v26 = vpop.f32.mrb[80].mxu0 }
 0x2d7   :  { %v8891_v27 = vpack.c.bf16 %v3700_v26, %v3695_v19  ;;  %v8167_v28 = vpop.f32.mrb[81].mxu0 }
 0x2d8   :  { %v3611_v29 = vpop.f32.mrb[74].mxu1 }
 0x2d9   :  { %8394 = vmatmul.mubr.msk.f32.gmra.mrb[124].mxu1 %vm3432_vm9, %v10497_v25  ;;  %v8888_v30 = vpack.c.bf16 %v3611_v29, %v3606_v23  ;;  %v8152_v31 = vpop.f32.mrb[75].mxu1 }
 0x2da   :  { %8892 = vmatpush3.bf16.msra.mxu1 %v8891_v27  ;;  %8417 = vmatprep.mubr.msk.f32.mxu1 %vm8942_vm1, %v8940_v21 }
 0x2db   :  { %v3705_v33 = vpop.f32.mrb[82].mxu0  ;;  %8415 = vmatprep.subr.mxu1 %v8940_v21  ;;  %8889 = vmatpush3.bf16.msra.mxu0 %v8888_v30 }
 0x2dc   :  { %v8170_v34 = vpop.f32.mrb[83].mxu0  ;;  %v3616_v35 = vpop.f32.mrb[76].mxu1  ;;  %8400 = vmatprep.subr.mxu0 %v8940_v21 }
 0x2dd   :  { %v8155_v32 = vpop.f32.mrb[77].mxu1 }
 0x2de   :  { %8416 = vmatpush3.msk.msra.mxu1 %vm1580_vm6, %v3705_v33 }
 0x2df   :  { %v3873_v36 = vpop.f32.mrb[84].mxu0  ;;  %8418 = vmatmul.mubr.msk.f32.vlgmr.msra.gmra.mrb[126].mxu1 %vm3432_vm9, %v10477_v18  ;;  %8896 = vmatprep.subr.bf16.mxu1 %v8941_v41 }
 0x2e0   :  { %v8194_v38 = vpop.f32.mrb[85].mxu0  ;;  %8420 = vmatprep.mubr.msk.f32.mxu1 %vm8942_vm1, %v8940_v21  ;;  %8401 = vmatpush3.msk.msra.mxu0 %vm1580_vm6, %v3616_v35 }
 0x2e1   :  { %v3784_v39 = vpop.f32.mrb[78].mxu1  ;;  %8403 = vmatmul.mubr.msk.f32.vlgmr.msra.gmra.mrb[126].mxu0 %vm3432_vm9, %v10477_v18  ;;  %8893 = vmatprep.subr.bf16.mxu0 %v8941_v41 }
 0x2e2   :  { %v8179_v45 = vpop.f32.mrb[79].mxu1  ;;  %8405 = vmatprep.mubr.msk.f32.mxu0 %vm8942_vm1, %v8940_v21 }
 0x2e3   :  { %v3878_v44 = vpop.f32.mrb[86].mxu0  ;;  %8421 = vmatmul.mubr.msk.f32.gmra.mrb[128].mxu1 %vm3432_vm9, %v10488_v22 }
 0x2e4   :  { %v8897_v47 = vpack.c.bf16 %v3878_v44, %v3873_v36  ;;  %v8197_v48 = vpop.f32.mrb[87].mxu0  ;;  %8423 = vmatprep.mubr.msk.f32.mxu1 %vm8942_vm1, %v8940_v21 }
 0x2e5   :  { %v3789_v49 = vpop.f32.mrb[80].mxu1  ;;  %8406 = vmatmul.mubr.msk.f32.gmra.mrb[128].mxu0 %vm3432_vm9, %v10488_v22 }
 0x2e6   :  { %8898 = vmatpush3.bf16.msra.mxu1 %v8897_v47  ;;  %v8894_v37 = vpack.c.bf16 %v3789_v49, %v3784_v39  ;;  %v8182_v50 = vpop.f32.mrb[81].mxu1  ;;  %8408 = vmatprep.mubr.msk.f32.mxu0 %vm8942_vm1, %v8940_v21 }
 0x2e7   :  { %v3883_v46 = vpop.f32.mrb[88].mxu0  ;;  %8445 = vmatprep.subr.mxu1 %v8940_v21  ;;  %8424 = vmatmul.mubr.msk.f32.gmra.mrb[130].mxu1 %vm3432_vm9, %v10497_v25 }
 0x2e8   :  { %v8200_v51 = vpop.f32.mrb[89].mxu0  ;;  %8895 = vmatpush3.bf16.msra.mxu0 %v8894_v37  ;;  %8447 = vmatprep.mubr.msk.f32.mxu1 %vm8942_vm1, %v8940_v21 }
 0x2e9   :  { %v3794_v52 = vpop.f32.mrb[82].mxu1  ;;  %8409 = vmatmul.mubr.msk.f32.gmra.mrb[130].mxu0 %vm3432_vm9, %v10497_v25  ;;  %8430 = vmatprep.subr.mxu0 %v8940_v21 }
 0x2ea   :  { %8446 = vmatpush3.msk.msra.mxu1 %vm1580_vm6, %v3883_v46  ;;  %v8185_v53 = vpop.f32.mrb[83].mxu1  ;;  %8432 = vmatprep.mubr.msk.f32.mxu0 %vm8942_vm1, %v8940_v21 }
 0x2eb   :  { %v4051_v54 = vpop.f32.mrb[90].mxu0  ;;  %8448 = vmatmul.mubr.msk.f32.vlgmr.msra.gmra.mrb[132].mxu1 %vm3432_vm9, %v10477_v18  ;;  %8902 = vmatprep.subr.bf16.mxu1 %v8941_v41 }
 0x2ec   :  { %v8224_v55 = vpop.f32.mrb[91].mxu0  ;;  %8431 = vmatpush3.msk.msra.mxu0 %vm1580_vm6, %v3794_v52  ;;  %8450 = vmatprep.mubr.msk.f32.mxu1 %vm8942_vm1, %v8940_v21 }
 0x2ed   :  { %v3962_v43 = vpop.f32.mrb[84].mxu1  ;;  %8433 = vmatmul.mubr.msk.f32.vlgmr.msra.gmra.mrb[132].mxu0 %vm3432_vm9, %v10477_v18  ;;  %8899 = vmatprep.subr.bf16.mxu0 %v8941_v41 }
 0x2ee   :  { %v8209_v57 = vpop.f32.mrb[85].mxu1  ;;  %8435 = vmatprep.mubr.msk.f32.mxu0 %vm8942_vm1, %v8940_v21 }
 0x2ef   :  { %v4056_v56 = vpop.f32.mrb[92].mxu0  ;;  %8451 = vmatmul.mubr.msk.f32.gmra.mrb[134].mxu1 %vm3432_vm9, %v10488_v22 }
 0x2f0   :  { %v8903_v58 = vpack.c.bf16 %v4056_v56, %v4051_v54  ;;  %v8227_v59 = vpop.f32.mrb[93].mxu0  ;;  %8453 = vmatprep.mubr.msk.f32.mxu1 %vm8942_vm1, %v8940_v21 }
 0x2f1   :  { %v3967_v60 = vpop.f32.mrb[86].mxu1  ;;  %8436 = vmatmul.mubr.msk.f32.gmra.mrb[134].mxu0 %vm3432_vm9, %v10488_v22 }
 0x2f2   :  { %8904 = vmatpush3.bf16.msra.mxu1 %v8903_v58  ;;  %v8900_v61 = vpack.c.bf16 %v3967_v60, %v3962_v43  ;;  %v8212_v62 = vpop.f32.mrb[87].mxu1  ;;  %8438 = vmatprep.mubr.msk.f32.mxu0 %vm8942_vm1, %v8940_v21 }
 0x2f3   :  { %v4061_v63 = vpop.f32.mrb[94].mxu0  ;;  %8475 = vmatprep.subr.mxu1 %v8940_v21  ;;  %8454 = vmatmul.mubr.msk.f32.gmra.mrb[136].mxu1 %vm3432_vm9, %v10497_v25 }
 0x2f4   :  { %v8230_v0 = vpop.f32.mrb[95].mxu0  ;;  %8901 = vmatpush3.bf16.msra.mxu0 %v8900_v61  ;;  %8477 = vmatprep.mubr.msk.f32.mxu1 %vm8942_vm1, %v8940_v21 }
 0x2f5   :  { %v3972_v1 = vpop.f32.mrb[88].mxu1  ;;  %8439 = vmatmul.mubr.msk.f32.gmra.mrb[136].mxu0 %vm3432_vm9, %v10497_v25  ;;  %8460 = vmatprep.subr.mxu0 %v8940_v21 }
 0x2f6   :  { %8476 = vmatpush3.msk.msra.mxu1 %vm1580_vm6, %v4061_v63  ;;  %v8215_v2 = vpop.f32.mrb[89].mxu1  ;;  %8462 = vmatprep.mubr.msk.f32.mxu0 %vm8942_vm1, %v8940_v21 }
 0x2f7   :  { %v4229_v3 = vpop.f32.mrb[96].mxu0  ;;  %8478 = vmatmul.mubr.msk.f32.vlgmr.msra.gmra.mrb[138].mxu1 %vm3432_vm9, %v10477_v18  ;;  %8908 = vmatprep.subr.bf16.mxu1 %v8941_v41 }
 0x2f8   :  { %v8254_v40 = vpop.f32.mrb[97].mxu0  ;;  %8461 = vmatpush3.msk.msra.mxu0 %vm1580_vm6, %v3972_v1  ;;  %8480 = vmatprep.mubr.msk.f32.mxu1 %vm8942_vm1, %v8940_v21 }
 0x2f9   :  { %v4140_v42 = vpop.f32.mrb[90].mxu1  ;;  %8463 = vmatmul.mubr.msk.f32.vlgmr.msra.gmra.mrb[138].mxu0 %vm3432_vm9, %v10477_v18  ;;  %8905 = vmatprep.subr.bf16.mxu0 %v8941_v41 }
 0x2fa   :  { %v8239_v6 = vpop.f32.mrb[91].mxu1  ;;  %8465 = vmatprep.mubr.msk.f32.mxu0 %vm8942_vm1, %v8940_v21 }
 0x2fb   :  { %v4234_v4 = vpop.f32.mrb[98].mxu0  ;;  %8481 = vmatmul.mubr.msk.f32.gmra.mrb[140].mxu1 %vm3432_vm9, %v10488_v22 }
 0x2fc   :  { %v8909_v5 = vpack.c.bf16 %v4234_v4, %v4229_v3  ;;  %v8257_v7 = vpop.f32.mrb[99].mxu0  ;;  %8483 = vmatprep.mubr.msk.f32.mxu1 %vm8942_vm1, %v8940_v21 }
 0x2fd   :  { %v4145_v8 = vpop.f32.mrb[92].mxu1  ;;  %8466 = vmatmul.mubr.msk.f32.gmra.mrb[140].mxu0 %vm3432_vm9, %v10488_v22 }
 0x2fe   :  { %8910 = vmatpush3.bf16.msra.mxu1 %v8909_v5  ;;  %v8906_v9 = vpack.c.bf16 %v4145_v8, %v4140_v42  ;;  %v8242_v10 = vpop.f32.mrb[93].mxu1  ;;  %8468 = vmatprep.mubr.msk.f32.mxu0 %vm8942_vm1, %v8940_v21 }
 0x2ff   :  { %v4239_v11 = vpop.f32.mrb[100].mxu0  ;;  %8505 = vmatprep.subr.mxu1 %v8940_v21  ;;  %8484 = vmatmul.mubr.msk.f32.gmra.mrb[142].mxu1 %vm3432_vm9, %v10497_v25 }
 0x300   :  { %v8260_v12 = vpop.f32.mrb[101].mxu0  ;;  %8907 = vmatpush3.bf16.msra.mxu0 %v8906_v9  ;;  %8507 = vmatprep.mubr.msk.f32.mxu1 %vm8942_vm1, %v8940_v21 }
 0x301   :  { %v4150_v13 = vpop.f32.mrb[94].mxu1  ;;  %8469 = vmatmul.mubr.msk.f32.gmra.mrb[142].mxu0 %vm3432_vm9, %v10497_v25  ;;  %8490 = vmatprep.subr.mxu0 %v8940_v21 }
 0x302   :  { %8506 = vmatpush3.msk.msra.mxu1 %vm1580_vm6, %v4239_v11  ;;  %v8245_v14 = vpop.f32.mrb[95].mxu1  ;;  %8492 = vmatprep.mubr.msk.f32.mxu0 %vm8942_vm1, %v8940_v21 }
 0x303   :  { %v4407_v15 = vpop.f32.mrb[102].mxu0  ;;  %8508 = vmatmul.mubr.msk.f32.vlgmr.msra.gmra.mrb[144].mxu1 %vm3432_vm9, %v10477_v18  ;;  %8914 = vmatprep.subr.bf16.mxu1 %v8941_v41 }
 0x304   :  { %v8284_v16 = vpop.f32.mrb[103].mxu0  ;;  %8491 = vmatpush3.msk.msra.mxu0 %vm1580_vm6, %v4150_v13  ;;  %8510 = vmatprep.mubr.msk.f32.mxu1 %vm8942_vm1, %v8940_v21 }
 0x305   :  { %v4318_v17 = vpop.f32.mrb[96].mxu1  ;;  %8493 = vmatmul.mubr.msk.f32.vlgmr.msra.gmra.mrb[144].mxu0 %vm3432_vm9, %v10477_v18  ;;  %8911 = vmatprep.subr.bf16.mxu0 %v8941_v41 }
 0x306   :  { %v8269_v20 = vpop.f32.mrb[97].mxu1  ;;  %8495 = vmatprep.mubr.msk.f32.mxu0 %vm8942_vm1, %v8940_v21 }
 0x307   :  { %v4412_v19 = vpop.f32.mrb[104].mxu0  ;;  %8511 = vmatmul.mubr.msk.f32.gmra.mrb[146].mxu1 %vm3432_vm9, %v10488_v22  ;;  %v6531_v20 = vld [vmem:[%s11282_s5 + $0x18] sm:$0xff] }
 0x308   :  { %v8915_v23 = vpack.c.bf16 %v4412_v19, %v4407_v15  ;;  %v8287_v24 = vpop.f32.mrb[105].mxu0  ;;  %8513 = vmatprep.mubr.msk.f32.mxu1 %vm8942_vm1, %v8940_v21  ;;  %vm6582_vm8 = vcmp.lt.f32.partialorder %v6531_v20, 0.5 }
 0x309   :  { %v4323_v26 = vpop.f32.mrb[98].mxu1  ;;  %8496 = vmatmul.mubr.msk.f32.gmra.mrb[146].mxu0 %vm3432_vm9, %v10488_v22 }
 0x30a   :  { %8916 = vmatpush3.bf16.msra.mxu1 %v8915_v23  ;;  %v8912_v27 = vpack.c.bf16 %v4323_v26, %v4318_v17  ;;  %v8272_v28 = vpop.f32.mrb[99].mxu1  ;;  %8498 = vmatprep.mubr.msk.f32.mxu0 %vm8942_vm1, %v8940_v21  ;;  %v6529_v26 = vld [vmem:[%s11282_s5 + $0x8] sm:$0xff] }
 0x30b   :  { %v4417_v29 = vpop.f32.mrb[106].mxu0  ;;  %8535 = vmatprep.subr.mxu1 %v8940_v21  ;;  %8514 = vmatmul.mubr.msk.f32.gmra.mrb[148].mxu1 %vm3432_vm9, %v10497_v25  ;;  %vm6580_vm4 = vcmp.lt.f32.partialorder %v6529_v26, 0.5  ;;  %v6543_v26 = vld [vmem:[%s11282_s5 + $0x78] sm:$0xff] }
 0x30c   :  { %v8290_v30 = vpop.f32.mrb[107].mxu0  ;;  %8913 = vmatpush3.bf16.msra.mxu0 %v8912_v27  ;;  %8537 = vmatprep.mubr.msk.f32.mxu1 %vm8942_vm1, %v8940_v21 }
 0x30d   :  { %v4328_v31 = vpop.f32.mrb[100].mxu1  ;;  %8499 = vmatmul.mubr.msk.f32.gmra.mrb[148].mxu0 %vm3432_vm9, %v10497_v25  ;;  %8520 = vmatprep.subr.mxu0 %v8940_v21 }
 0x30e   :  { %8536 = vmatpush3.msk.msra.mxu1 %vm1580_vm6, %v4417_v29  ;;  %v8275_v33 = vpop.f32.mrb[101].mxu1  ;;  %8522 = vmatprep.mubr.msk.f32.mxu0 %vm8942_vm1, %v8940_v21 }
 0x30f   :  { %v4585_v34 = vpop.f32.mrb[108].mxu0  ;;  %8538 = vmatmul.mubr.msk.f32.vlgmr.msra.gmra.mrb[150].mxu1 %vm3432_vm9, %v10477_v18  ;;  %8920 = vmatprep.subr.bf16.mxu1 %v8941_v41 }
 0x310   :  { %v8314_v35 = vpop.f32.mrb[109].mxu0  ;;  %8521 = vmatpush3.msk.msra.mxu0 %vm1580_vm6, %v4328_v31  ;;  %8540 = vmatprep.mubr.msk.f32.mxu1 %vm8942_vm1, %v8940_v21  ;;  %v6532_v31 = vld [vmem:[%s11282_s5 + $0x20] sm:$0xff] }
 0x311   :  { %v4496_v32 = vpop.f32.mrb[102].mxu1  ;;  %8523 = vmatmul.mubr.msk.f32.vlgmr.msra.gmra.mrb[150].mxu0 %vm3432_vm9, %v10477_v18  ;;  %8917 = vmatprep.subr.bf16.mxu0 %v8941_v41  ;;  %vm6583_vm7 = vcmp.lt.f32.partialorder %v6532_v31, 0.5  ;;  %v6541_v31 = vld [vmem:[%s11282_s5 + $0x68] sm:$0xff] }
 0x312   :  { %v8299_v38 = vpop.f32.mrb[103].mxu1  ;;  %8525 = vmatprep.mubr.msk.f32.mxu0 %vm8942_vm1, %v8940_v21 }
 0x313   :  { %v4590_v36 = vpop.f32.mrb[110].mxu0  ;;  %8541 = vmatmul.mubr.msk.f32.gmra.mrb[152].mxu1 %vm3432_vm9, %v10488_v22 }
 0x314   :  { %v8921_v39 = vpack.c.bf16 %v4590_v36, %v4585_v34  ;;  %v8317_v44 = vpop.f32.mrb[111].mxu0  ;;  %8543 = vmatprep.mubr.msk.f32.mxu1 %vm8942_vm1, %v8940_v21  ;;  %v6530_v36 = vld [vmem:[%s11282_s5 + $0x10] sm:$0x1] }
 0x315   :  { %v4501_v45 = vpop.f32.mrb[104].mxu1  ;;  %8526 = vmatmul.mubr.msk.f32.gmra.mrb[152].mxu0 %vm3432_vm9, %v10488_v22  ;;  %vm6581_vm12 = vcmp.lt.f32.partialorder %v6530_v36, 0.5 }
 0x316   :  { %8922 = vmatpush3.bf16.msra.mxu1 %v8921_v39  ;;  %v8918_v47 = vpack.c.bf16 %v4501_v45, %v4496_v32  ;;  %v8302_v48 = vpop.f32.mrb[105].mxu1  ;;  %8528 = vmatprep.mubr.msk.f32.mxu0 %vm8942_vm1, %v8940_v21 }
 0x317   :  { %v4595_v49 = vpop.f32.mrb[112].mxu0  ;;  %8565 = vmatprep.subr.mxu1 %v8940_v21  ;;  %8544 = vmatmul.mubr.msk.f32.gmra.mrb[154].mxu1 %vm3432_vm9, %v10497_v25  ;;  %v6533_v48 = vld [vmem:[%s11282_s5 + $0x28] sm:$0x1] }
 0x318   :  { %v8320_v37 = vpop.f32.mrb[113].mxu0  ;;  %8919 = vmatpush3.bf16.msra.mxu0 %v8918_v47  ;;  %8567 = vmatprep.mubr.msk.f32.mxu1 %vm8942_vm1, %v8940_v21  ;;  %vm6584_vm10 = vcmp.lt.f32.partialorder %v6533_v48, 0.5 }
 0x319   :  { %v4506_v50 = vpop.f32.mrb[106].mxu1  ;;  %8529 = vmatmul.mubr.msk.f32.gmra.mrb[154].mxu0 %vm3432_vm9, %v10497_v25  ;;  %8550 = vmatprep.subr.mxu0 %v8940_v21 }
 0x31a   :  { %8566 = vmatpush3.msk.msra.mxu1 %vm1580_vm6, %v4595_v49  ;;  %v8305_v46 = vpop.f32.mrb[107].mxu1  ;;  %8552 = vmatprep.mubr.msk.f32.mxu0 %vm8942_vm1, %v8940_v21 }
 0x31b   :  { %v4763_v51 = vpop.f32.mrb[114].mxu0  ;;  %8568 = vmatmul.mubr.msk.f32.vlgmr.msra.gmra.mrb[156].mxu1 %vm3432_vm9, %v10477_v18  ;;  %8926 = vmatprep.subr.bf16.mxu1 %v8941_v41 }
 0x31c   :  { %v8344_v52 = vpop.f32.mrb[115].mxu0  ;;  %8551 = vmatpush3.msk.msra.mxu0 %vm1580_vm6, %v4506_v50  ;;  %8570 = vmatprep.mubr.msk.f32.mxu1 %vm8942_vm1, %v8940_v21 }
 0x31d   :  { %v4674_v53 = vpop.f32.mrb[108].mxu1  ;;  %8553 = vmatmul.mubr.msk.f32.vlgmr.msra.gmra.mrb[156].mxu0 %vm3432_vm9, %v10477_v18  ;;  %8923 = vmatprep.subr.bf16.mxu0 %v8941_v41 }
 0x31e   :  { %v8329_v55 = vpop.f32.mrb[109].mxu1  ;;  %8555 = vmatprep.mubr.msk.f32.mxu0 %vm8942_vm1, %v8940_v21 }
 0x31f   :  { %v4768_v54 = vpop.f32.mrb[116].mxu0  ;;  %8571 = vmatmul.mubr.msk.f32.gmra.mrb[158].mxu1 %vm3432_vm9, %v10488_v22 }
 0x320   :  { %v8927_v43 = vpack.c.bf16 %v4768_v54, %v4763_v51  ;;  %v8347_v56 = vpop.f32.mrb[117].mxu0  ;;  %8573 = vmatprep.mubr.msk.f32.mxu1 %vm8942_vm1, %v8940_v21  ;;  %v6534_v51 = vld [vmem:[%s11282_s5 + $0x30] sm:$0xff] }
 0x321   :  { %v4679_v57 = vpop.f32.mrb[110].mxu1  ;;  %8556 = vmatmul.mubr.msk.f32.gmra.mrb[158].mxu0 %vm3432_vm9, %v10488_v22  ;;  %v6537_v56 = vld [vmem:[%s11282_s5 + $0x48] sm:$0xff] }
 0x322   :  { %8928 = vmatpush3.bf16.msra.mxu1 %v8927_v43  ;;  %v8924_v58 = vpack.c.bf16 %v4679_v57, %v4674_v53  ;;  %v8332_v59 = vpop.f32.mrb[111].mxu1  ;;  %8558 = vmatprep.mubr.msk.f32.mxu0 %vm8942_vm1, %v8940_v21 }
 0x323   :  { %v4773_v60 = vpop.f32.mrb[118].mxu0  ;;  %8595 = vmatprep.subr.mxu1 %v8940_v21  ;;  %8574 = vmatmul.mubr.msk.f32.gmra.mrb[160].mxu1 %vm3432_vm9, %v10497_v25 }
 0x324   :  { %v8350_v61 = vpop.f32.mrb[119].mxu0  ;;  %8925 = vmatpush3.bf16.msra.mxu0 %v8924_v58  ;;  %8597 = vmatprep.mubr.msk.f32.mxu1 %vm8942_vm1, %v8940_v21 }
 0x325   :  { %v4684_v62 = vpop.f32.mrb[112].mxu1  ;;  %8559 = vmatmul.mubr.msk.f32.gmra.mrb[160].mxu0 %vm3432_vm9, %v10497_v25  ;;  %8580 = vmatprep.subr.mxu0 %v8940_v21  ;;  %v6535_v61 = vld [vmem:[%s11282_s5 + $0x38] sm:$0xff] }
 0x326   :  { %8596 = vmatpush3.msk.msra.mxu1 %vm1580_vm6, %v4773_v60  ;;  %v8335_v63 = vpop.f32.mrb[113].mxu1  ;;  %8582 = vmatprep.mubr.msk.f32.mxu0 %vm8942_vm1, %v8940_v21 }
 0x327   :  { %v4941_v0 = vpop.f32.mrb[120].mxu0  ;;  %8598 = vmatmul.mubr.msk.f32.vlgmr.msra.gmra.mrb[162].mxu1 %vm3432_vm9, %v10477_v18  ;;  %8932 = vmatprep.subr.bf16.mxu1 %v8941_v41 }
 0x328   :  { %v8374_v1 = vpop.f32.mrb[121].mxu0  ;;  %8581 = vmatpush3.msk.msra.mxu0 %vm1580_vm6, %v4684_v62  ;;  %8600 = vmatprep.mubr.msk.f32.mxu1 %vm8942_vm1, %v8940_v21 }
 0x329   :  { %v4852_v2 = vpop.f32.mrb[114].mxu1  ;;  %8583 = vmatmul.mubr.msk.f32.vlgmr.msra.gmra.mrb[162].mxu0 %vm3432_vm9, %v10477_v18  ;;  %8929 = vmatprep.subr.bf16.mxu0 %v8941_v41 }
 0x32a   :  { %v8359_v40 = vpop.f32.mrb[115].mxu1  ;;  %8585 = vmatprep.mubr.msk.f32.mxu0 %vm8942_vm1, %v8940_v21 }
 0x32b   :  { %v4946_v3 = vpop.f32.mrb[122].mxu0  ;;  %8601 = vmatmul.mubr.msk.f32.gmra.mrb[164].mxu1 %vm3432_vm9, %v10488_v22  ;;  %v6538_v40 = vld [vmem:[%s11282_s5 + $0x50] sm:$0xff] }
 0x32c   :  { %v8933_v42 = vpack.c.bf16 %v4946_v3, %v4941_v0  ;;  %v8377_v4 = vpop.f32.mrb[123].mxu0  ;;  %8603 = vmatprep.mubr.msk.f32.mxu1 %vm8942_vm1, %v8940_v21 }
 0x32d   :  { %v4857_v6 = vpop.f32.mrb[116].mxu1  ;;  %8586 = vmatmul.mubr.msk.f32.gmra.mrb[164].mxu0 %vm3432_vm9, %v10488_v22 }
 0x32e   :  { %8934 = vmatpush3.bf16.msra.mxu1 %v8933_v42  ;;  %v8930_v5 = vpack.c.bf16 %v4857_v6, %v4852_v2  ;;  %v8362_v41 = vpop.f32.mrb[117].mxu1  ;;  %8588 = vmatprep.mubr.msk.f32.mxu0 %vm8942_vm1, %v8940_v21 }
 0x32f   :  { %v4951_v7 = vpop.f32.mrb[124].mxu0  ;;  %8625 = vmatprep.subr.mxu1 %v8940_v21  ;;  %8604 = vmatmul.mubr.msk.f32.gmra.mrb[166].mxu1 %vm3432_vm9, %v10497_v25  ;;  %v6536_v41 = vld [vmem:[%s11282_s5 + $0x40] sm:$0x1] }
 0x330   :  { %v8380_v8 = vpop.f32.mrb[125].mxu0  ;;  %8931 = vmatpush3.bf16.msra.mxu0 %v8930_v5  ;;  %8627 = vmatprep.mubr.msk.f32.mxu1 %vm8942_vm1, %v8940_v21 }
 0x331   :  { %v4862_v9 = vpop.f32.mrb[118].mxu1  ;;  %8589 = vmatmul.mubr.msk.f32.gmra.mrb[166].mxu0 %vm3432_vm9, %v10497_v25  ;;  %8610 = vmatprep.subr.mxu0 %v8940_v21 }
 0x332   :  { %v8365_v10 = vpop.f32.mrb[119].mxu1  ;;  %8612 = vmatprep.mubr.msk.f32.mxu0 %vm8942_vm1, %v8940_v21  ;;  %8626 = vmatpush3.msk.msra.mxu1 %vm1580_vm6, %v4951_v7 }
 0x333   :  { %8628 = vmatmul.mubr.msk.f32.vlgmr.msra.gmra.mrb[168].mxu1 %vm3432_vm9, %v10477_v18 }
 0x334   :  { %8611 = vmatpush3.msk.msra.mxu0 %vm1580_vm6, %v4862_v9  ;;  %8630 = vmatprep.mubr.msk.f32.mxu1 %vm8942_vm1, %v8940_v21 }
 0x335   :  { %8613 = vmatmul.mubr.msk.f32.vlgmr.msra.gmra.mrb[168].mxu0 %vm3432_vm9, %v10477_v18 }
 0x336   :  { %8615 = vmatprep.mubr.msk.f32.mxu0 %vm8942_vm1, %v8940_v21 }
 0x337   :  { %8631 = vmatmul.mubr.msk.f32.gmra.mrb[170].mxu1 %vm3432_vm9, %v10488_v22 }
 0x338   :  { %8633 = vmatprep.mubr.msk.f32.mxu1 %vm8942_vm1, %v8940_v21 }
 0x339   :  { %8616 = vmatmul.mubr.msk.f32.gmra.mrb[170].mxu0 %vm3432_vm9, %v10488_v22  ;;  %v6528_v22 = vld [vmem:[%s11282_s5] sm:$0xff] }
 0x33a   :  { %8618 = vmatprep.mubr.msk.f32.mxu0 %vm8942_vm1, %v8940_v21  ;;  %vm6579_vm1 = vcmp.lt.f32.partialorder %v6528_v22, 0.5  ;;  %v6540_v22 = vld [vmem:[%s11282_s5 + $0x60] sm:$0xff] }
 0x33b   :  { %8634 = vmatmul.mubr.msk.f32.gmra.mrb[172].mxu1 %vm3432_vm9, %v10497_v25 }
 0x33d   :  { %8619 = vmatmul.mubr.msk.f32.gmra.mrb[172].mxu0 %vm3432_vm9, %v10497_v25 }
 0x3a4   :  { %v5033_v18 = vpop.f32.mrb[120].mxu1 }
 0x3a5   :  { %v8389_v11 = vpop.f32.mrb[121].mxu1 }
 0x3a8   :  { %v5038_v12 = vpop.f32.mrb[122].mxu1 }
 0x3a9   :  { %v8392_v13 = vpop.f32.mrb[123].mxu1 }
 0x3ac   :  { %v5043_v14 = vpop.f32.mrb[124].mxu1 }
 0x3ad   :  { %v8395_v15 = vpop.f32.mrb[125].mxu1 }
 0x3b2   :  { %v5199_v16 = vpop.f32.mrb[126].mxu1 }
 0x3b3   :  { %v8419_v17 = vpop.f32.mrb[127].mxu1 }
 0x3b4   :  { %v5116_v19 = vpop.f32.mrb[126].mxu0 }
 0x3b5   :  { %v6378_v23 = vadd.f32 %v5116_v19, %v5033_v18  ;;  %v6381_v25 = vadd.f32 %v5199_v16, %v5116_v19  ;;  %v8404_v24 = vpop.f32.mrb[127].mxu0 }
 0x3b6   :  { %v10746_v27 = vpop.f32.mrb[128].mxu1 }
 0x3b7   :  { %v8422_v28 = vpop.f32.mrb[129].mxu1  ;;  %vm6477_vm6 = vcmp.gt.f32.partialorder %v6378_v23, 0.5  ;;  %v6429_v29 = vadd.f32 %v6378_v23, %v5199_v16 }
 0x3b8   :  { %vm6630_vm2 = vmand %vm6477_vm6, %vm6579_vm1  ;;  %v5121_v30 = vpop.f32.mrb[128].mxu0  ;;  %vm6585_vm6 = vcmp.lt.f32.partialorder %v6534_v51, 0.5 }
 0x3b9   :  { %v7295_v33 = vsel %vm6630_vm2, 1.0, %v8940_v21  ;;  %vm6480_vm3 = vcmp.gt.f32.partialorder %v6429_v29, 0.5  ;;  %v6379_v34 = vadd.f32 %v5121_v30, %v5038_v12  ;;  %v6382_v35 = vadd.f32 %v10746_v27, %v5121_v30  ;;  %v8407_v32 = vpop.f32.mrb[129].mxu0  ;;  %v6539_v12 = vld [vmem:[%s11282_s5 + $0x58] sm:$0x1] }
 0x3ba   :  { %6835 = vst.msk [vmem:[%s11283_s7] sm:$0xff] %vm3432_vm9, %v7295_v33  ;;  %vm6633_vm15 = vmand %vm6480_vm3, %vm6582_vm8  ;;  %v10760_v38 = vpop.f32.mrb[130].mxu1  ;;  %vm11319_vm2 = vcmask 131072  }
 0x3bb   :  { %v7298_v39 = vsel %vm6633_vm15, 1.0, %v8940_v21  ;;  %vm6478_vm5 = vcmp.gt.f32.partialorder %v6379_v34, 0.5  ;;  %v6430_v44 = vadd.f32 %v6379_v34, %v10746_v27  ;;  %v8425_v45 = vpop.f32.mrb[131].mxu1  ;;  %vm6588_vm15 = vcmp.lt.f32.partialorder %v6537_v56, 0.5 }
 0x3bc   :  { %6838 = vst.msk [vmem:[%s11283_s7 + $0x18] sm:$0xff] %vm3432_vm9, %v7298_v39  ;;  %vm6631_vm11 = vmand %vm6478_vm5, %vm6580_vm4  ;;  %v5126_v47 = vpop.f32.mrb[130].mxu0  ;;  %v6544_v39 = vld [vmem:[%s11282_s5 + $0x80] sm:$0xff] }
 0x3bd   :  { %v7296_v49 = vsel %vm6631_vm11, 1.0, %v8940_v21  ;;  %vm6481_vm0 = vcmp.gt.f32.partialorder %v6430_v44, 0.5  ;;  %v6380_v37 = vadd.f32 %v5126_v47, %v5043_v14  ;;  %v6383_v50 = vadd.f32 %v10760_v38, %v5126_v47  ;;  %v8410_v46 = vpop.f32.mrb[131].mxu0  ;;  %vm11320_vm5 = vmmov %vm11319_vm2 }
 0x3be   :  { %6836 = vst.msk [vmem:[%s11283_s7 + $0x8] sm:$0xff] %vm3432_vm9, %v7296_v49  ;;  %vm6634_vm13 = vmand %vm6481_vm0, %vm6583_vm7  ;;  %v10781_v52 = vpop.f32.mrb[132].mxu1  ;;  %vm6586_vm11 = vcmp.lt.f32.partialorder %v6535_v61, 0.5  ;;  %v6542_v49 = vld [vmem:[%s11282_s5 + $0x70] sm:$0x1] }
 0x3bf   :  { %v7299_v53 = vsel %vm6634_vm13, 1.0, %v8940_v21  ;;  %vm6479_vm14 = vcmp.gt.f32.partialorder %v6380_v37, 0.5  ;;  %v6431_v54 = vadd.f32 %v6380_v37, %v10760_v38  ;;  %v8449_v55 = vpop.f32.mrb[133].mxu1 }
 0x3c0   :  { %6839 = vst.msk [vmem:[%s11283_s7 + $0x20] sm:$0xff] %vm3432_vm9, %v7299_v53  ;;  %vm6632_vm1 = vmand %vm6479_vm14, %vm6581_vm12  ;;  %v5282_v43 = vpop.f32.mrb[132].mxu0  ;;  %vm6589_vm14 = vcmp.lt.f32.partialorder %v6538_v40, 0.5 }
 0x3c1   :  { %v7297_v57 = vsel %vm6632_vm1, 1.0, %v8940_v21  ;;  %vm6482_vm8 = vcmp.gt.f32.partialorder %v6431_v54, 0.5  ;;  %v6384_v58 = vadd.f32 %v5282_v43, %v5199_v16  ;;  %v6432_v59 = vadd.f32 %v6381_v25, %v5282_v43  ;;  %v8434_v60 = vpop.f32.mrb[133].mxu0  ;;  %v6545_v54 = vld [vmem:[%s11282_s5 + $0x88] sm:$0x1] }
 0x3c2   :  { %6837 = vst.msk [vmem:[%s11283_s7 + $0x10] sm:$0x1] %vm11319_vm2, %v7297_v57  ;;  %vm6635_vm4 = vmand %vm6482_vm8, %vm6584_vm10  ;;  %v6387_v62 = vadd.f32 %v10781_v52, %v5282_v43  ;;  %v10802_v63 = vpop.f32.mrb[134].mxu1  ;;  %vm6587_vm1 = vcmp.lt.f32.partialorder %v6536_v41, 0.5 }
 0x3c3   :  { %v7300_v0 = vsel %vm6635_vm4, 1.0, %v8940_v21  ;;  %vm6483_vm3 = vcmp.gt.f32.partialorder %v6432_v59, 0.5  ;;  %v6435_v1 = vadd.f32 %v6384_v58, %v10781_v52  ;;  %v8452_v2 = vpop.f32.mrb[135].mxu1  ;;  %vm6590_vm4 = vcmp.lt.f32.partialorder %v6539_v12, 0.5  ;;  %v6546_v58 = vld [vmem:[%s11282_s5 + $0x90] sm:$0xff] }
 0x3c4   :  { %6840 = vst.msk [vmem:[%s11283_s7 + $0x28] sm:$0x1] %vm11320_vm5, %v7300_v0  ;;  %vm6636_vm7 = vmand %vm6483_vm3, %vm6585_vm6  ;;  %v5287_v3 = vpop.f32.mrb[134].mxu0 }
 0x3c5   :  { %v7301_v42 = vsel %vm6636_vm7, 1.0, %v8940_v21  ;;  %vm6486_vm12 = vcmp.gt.f32.partialorder %v6435_v1, 0.5  ;;  %v6385_v4 = vadd.f32 %v5287_v3, %v10746_v27  ;;  %v6433_v6 = vadd.f32 %v6382_v35, %v5287_v3  ;;  %v8437_v5 = vpop.f32.mrb[135].mxu0  ;;  %v6549_v1 = vld [vmem:[%s11282_s5 + $0xa8] sm:$0xff] }
 0x3c6   :  { %6841 = vst.msk [vmem:[%s11283_s7 + $0x30] sm:$0xff] %vm3432_vm9, %v7301_v42  ;;  %vm6639_vm0 = vmand %vm6486_vm12, %vm6588_vm15  ;;  %v6388_v7 = vadd.f32 %v10802_v63, %v5287_v3  ;;  %v10824_v8 = vpop.f32.mrb[136].mxu1  ;;  %vm6591_vm15 = vcmp.lt.f32.partialorder %v6540_v22, 0.5  ;;  %vm11321_vm7 = vcmask 131072  }
 0x3c7   :  { %v7304_v9 = vsel %vm6639_vm0, 1.0, %v8940_v21  ;;  %vm6484_vm13 = vcmp.gt.f32.partialorder %v6433_v6, 0.5  ;;  %v6436_v10 = vadd.f32 %v6385_v4, %v10802_v63  ;;  %v8455_v18 = vpop.f32.mrb[137].mxu1  ;;  %vm6594_vm0 = vcmp.lt.f32.partialorder %v6543_v26, 0.5  ;;  %v6547_v4 = vld [vmem:[%s11282_s5 + $0x98] sm:$0xff] }
 0x3c8   :  { %6844 = vst.msk [vmem:[%s11283_s7 + $0x48] sm:$0xff] %vm3432_vm9, %v7304_v9  ;;  %vm6637_vm10 = vmand %vm6484_vm13, %vm6586_vm11  ;;  %v5292_v11 = vpop.f32.mrb[136].mxu0 }
 0x3c9   :  { %v7302_v13 = vsel %vm6637_vm10, 1.0, %v8940_v21  ;;  %vm6487_vm6 = vcmp.gt.f32.partialorder %v6436_v10, 0.5  ;;  %v6386_v14 = vadd.f32 %v5292_v11, %v10760_v38  ;;  %v6434_v15 = vadd.f32 %v6383_v50, %v5292_v11  ;;  %v8440_v16 = vpop.f32.mrb[137].mxu0  ;;  %vm11322_vm13 = vmmov %vm11321_vm7  ;;  %v6550_v10 = vld [vmem:[%s11282_s5 + $0xb0] sm:$0xff] }
 0x3ca   :  { %6842 = vst.msk [vmem:[%s11283_s7 + $0x38] sm:$0xff] %vm3432_vm9, %v7302_v13  ;;  %vm6640_vm8 = vmand %vm6487_vm6, %vm6589_vm14  ;;  %v6389_v17 = vadd.f32 %v10824_v8, %v5292_v11  ;;  %v10846_v19 = vpop.f32.mrb[138].mxu1  ;;  %vm6592_vm10 = vcmp.lt.f32.partialorder %v6541_v31, 0.5 }
 0x3cb   :  { %v7305_v20 = vsel %vm6640_vm8, 1.0, %v8940_v21  ;;  %vm6485_vm2 = vcmp.gt.f32.partialorder %v6434_v15, 0.5  ;;  %v6437_v23 = vadd.f32 %v6386_v14, %v10824_v8  ;;  %v8479_v25 = vpop.f32.mrb[139].mxu1  ;;  %v6548_v14 = vld [vmem:[%s11282_s5 + $0xa0] sm:$0x1] }
 0x3cc   :  { %6845 = vst.msk [vmem:[%s11283_s7 + $0x50] sm:$0xff] %vm3432_vm9, %v7305_v20  ;;  %vm6638_vm3 = vmand %vm6485_vm2, %vm6587_vm1  ;;  %v5448_v24 = vpop.f32.mrb[138].mxu0  ;;  %vm6595_vm2 = vcmp.lt.f32.partialorder %v6544_v39, 0.5 }
 0x3cd   :  { %v7303_v27 = vsel %vm6638_vm3, 1.0, %v8940_v21  ;;  %vm6488_vm5 = vcmp.gt.f32.partialorder %v6437_v23, 0.5  ;;  %v6390_v28 = vadd.f32 %v5448_v24, %v10781_v52  ;;  %v6438_v29 = vadd.f32 %v6387_v62, %v5448_v24  ;;  %v8464_v30 = vpop.f32.mrb[139].mxu0  ;;  %v6551_v23 = vld [vmem:[%s11282_s5 + $0xb8] sm:$0x1] }
 0x3ce   :  { %6843 = vst.msk [vmem:[%s11283_s7 + $0x40] sm:$0x1] %vm11321_vm7, %v7303_v27  ;;  %vm6641_vm11 = vmand %vm6488_vm5, %vm6590_vm4  ;;  %v6393_v33 = vadd.f32 %v10846_v19, %v5448_v24  ;;  %v10868_v34 = vpop.f32.mrb[140].mxu1  ;;  %vm6593_vm3 = vcmp.lt.f32.partialorder %v6542_v49, 0.5 }
 0x3cf   :  { %v7306_v35 = vsel %vm6641_vm11, 1.0, %v8940_v21  ;;  %vm6489_vm12 = vcmp.gt.f32.partialorder %v6438_v29, 0.5  ;;  %v6441_v32 = vadd.f32 %v6390_v28, %v10846_v19  ;;  %v8482_v36 = vpop.f32.mrb[141].mxu1  ;;  %vm6596_vm11 = vcmp.lt.f32.partialorder %v6545_v54, 0.5  ;;  %v6552_v28 = vld [vmem:[%s11282_s5 + $0xc0] sm:$0xff] }
 0x3d0   :  { %6846 = vst.msk [vmem:[%s11283_s7 + $0x58] sm:$0x1] %vm11322_vm13, %v7306_v35  ;;  %vm6642_vm14 = vmand %vm6489_vm12, %vm6591_vm15  ;;  %v5453_v38 = vpop.f32.mrb[140].mxu0 }
 0x3d1   :  { %v7307_v44 = vsel %vm6642_vm14, 1.0, %v8940_v21  ;;  %vm6492_vm1 = vcmp.gt.f32.partialorder %v6441_v32, 0.5  ;;  %v6391_v45 = vadd.f32 %v5453_v38, %v10802_v63  ;;  %v6439_v47 = vadd.f32 %v6388_v7, %v5453_v38  ;;  %v8467_v48 = vpop.f32.mrb[141].mxu0  ;;  %v6555_v32 = vld [vmem:[%s11282_s5 + $0xd8] sm:$0xff] }
 0x3d2   :  { %6847 = vst.msk [vmem:[%s11283_s7 + $0x60] sm:$0xff] %vm3432_vm9, %v7307_v44  ;;  %vm6645_vm6 = vmand %vm6492_vm1, %vm6594_vm0  ;;  %v6394_v37 = vadd.f32 %v10868_v34, %v5453_v38  ;;  %v10890_v50 = vpop.f32.mrb[142].mxu1  ;;  %vm6597_vm0 = vcmp.lt.f32.partialorder %v6546_v58, 0.5  ;;  %vm11323_vm14 = vcmask 131072  }
 0x3d3   :  { %v7310_v46 = vsel %vm6645_vm6, 1.0, %v8940_v21  ;;  %vm6490_vm8 = vcmp.gt.f32.partialorder %v6439_v47, 0.5  ;;  %v6442_v51 = vadd.f32 %v6391_v45, %v10868_v34  ;;  %v8485_v52 = vpop.f32.mrb[143].mxu1  ;;  %vm6600_vm6 = vcmp.lt.f32.partialorder %v6549_v1, 0.5  ;;  %v6553_v45 = vld [vmem:[%s11282_s5 + $0xc8] sm:$0xff] }
 0x3d4   :  { %6850 = vst.msk [vmem:[%s11283_s7 + $0x78] sm:$0xff] %vm3432_vm9, %v7310_v46  ;;  %vm6643_vm4 = vmand %vm6490_vm8, %vm6592_vm10  ;;  %v5458_v53 = vpop.f32.mrb[142].mxu0 }
 0x3d5   :  { %v7308_v55 = vsel %vm6643_vm4, 1.0, %v8940_v21  ;;  %vm6493_vm15 = vcmp.gt.f32.partialorder %v6442_v51, 0.5  ;;  %v6392_v43 = vadd.f32 %v5458_v53, %v10824_v8  ;;  %v6440_v56 = vadd.f32 %v6389_v17, %v5458_v53  ;;  %v8470_v57 = vpop.f32.mrb[143].mxu0  ;;  %vm11324_vm8 = vmmov %vm11323_vm14  ;;  %v6556_v51 = vld [vmem:[%s11282_s5 + $0xe0] sm:$0xff] }
 0x3d6   :  { %6848 = vst.msk [vmem:[%s11283_s7 + $0x68] sm:$0xff] %vm3432_vm9, %v7308_v55  ;;  %vm6646_vm5 = vmand %vm6493_vm15, %vm6595_vm2  ;;  %v6395_v59 = vadd.f32 %v10890_v50, %v5458_v53  ;;  %v10912_v60 = vpop.f32.mrb[144].mxu1  ;;  %vm6598_vm4 = vcmp.lt.f32.partialorder %v6547_v4, 0.5 }
 0x3d7   :  { %v7311_v61 = vsel %vm6646_vm5, 1.0, %v8940_v21  ;;  %vm6491_vm7 = vcmp.gt.f32.partialorder %v6440_v56, 0.5  ;;  %v6443_v62 = vadd.f32 %v6392_v43, %v10890_v50  ;;  %v8509_v63 = vpop.f32.mrb[145].mxu1  ;;  %v6554_v43 = vld [vmem:[%s11282_s5 + $0xd0] sm:$0x1] }
 0x3d8   :  { %6851 = vst.msk [vmem:[%s11283_s7 + $0x80] sm:$0xff] %vm3432_vm9, %v7311_v61  ;;  %vm6644_vm12 = vmand %vm6491_vm7, %vm6593_vm3  ;;  %v5614_v0 = vpop.f32.mrb[144].mxu0  ;;  %vm6601_vm7 = vcmp.lt.f32.partialorder %v6550_v10, 0.5 }
 0x3d9   :  { %v7309_v2 = vsel %vm6644_vm12, 1.0, %v8940_v21  ;;  %vm6494_vm13 = vcmp.gt.f32.partialorder %v6443_v62, 0.5  ;;  %v6396_v3 = vadd.f32 %v5614_v0, %v10846_v19  ;;  %v6444_v40 = vadd.f32 %v6393_v33, %v5614_v0  ;;  %v8494_v42 = vpop.f32.mrb[145].mxu0  ;;  %v6557_v62 = vld [vmem:[%s11282_s5 + $0xe8] sm:$0x1] }
 0x3da   :  { %6849 = vst.msk [vmem:[%s11283_s7 + $0x70] sm:$0x1] %vm11323_vm14, %v7309_v2  ;;  %vm6647_vm10 = vmand %vm6494_vm13, %vm6596_vm11  ;;  %v6399_v6 = vadd.f32 %v10912_v60, %v5614_v0  ;;  %v10934_v5 = vpop.f32.mrb[146].mxu1  ;;  %vm6599_vm12 = vcmp.lt.f32.partialorder %v6548_v14, 0.5 }
 0x3db   :  { %v7312_v41 = vsel %vm6647_vm10, 1.0, %v8940_v21  ;;  %vm6495_vm1 = vcmp.gt.f32.partialorder %v6444_v40, 0.5  ;;  %v6447_v7 = vadd.f32 %v6396_v3, %v10912_v60  ;;  %v8512_v8 = vpop.f32.mrb[147].mxu1  ;;  %vm6602_vm10 = vcmp.lt.f32.partialorder %v6551_v23, 0.5  ;;  %v6558_v3 = vld [vmem:[%s11282_s5 + $0xf0] sm:$0xff] }
 0x3dc   :  { %6852 = vst.msk [vmem:[%s11283_s7 + $0x88] sm:$0x1] %vm11324_vm8, %v7312_v41  ;;  %vm6648_vm2 = vmand %vm6495_vm1, %vm6597_vm0  ;;  %v5619_v9 = vpop.f32.mrb[146].mxu0 }
 0x3dd   :  { %v7313_v18 = vsel %vm6648_vm2, 1.0, %v8940_v21  ;;  %vm6498_vm3 = vcmp.gt.f32.partialorder %v6447_v7, 0.5  ;;  %v6397_v11 = vadd.f32 %v5619_v9, %v10868_v34  ;;  %v6445_v12 = vadd.f32 %v6394_v37, %v5619_v9  ;;  %v8497_v13 = vpop.f32.mrb[147].mxu0  ;;  %v6561_v7 = vld [vmem:[%s11282_s5 + $0x108] sm:$0xff] }
 0x3de   :  { %6853 = vst.msk [vmem:[%s11283_s7 + $0x90] sm:$0xff] %vm3432_vm9, %v7313_v18  ;;  %vm6651_vm15 = vmand %vm6498_vm3, %vm6600_vm6  ;;  %v6400_v15 = vadd.f32 %v10934_v5, %v5619_v9  ;;  %v10956_v16 = vpop.f32.mrb[148].mxu1  ;;  %vm6603_vm6 = vcmp.lt.f32.partialorder %v6552_v28, 0.5  ;;  %vm11325_vm2 = vcmask 131072  }
 0x3df   :  { %v7316_v22 = vsel %vm6651_vm15, 1.0, %v8940_v21  ;;  %vm6496_vm5 = vcmp.gt.f32.partialorder %v6445_v12, 0.5  ;;  %v6448_v17 = vadd.f32 %v6397_v11, %v10934_v5  ;;  %v8515_v19 = vpop.f32.mrb[149].mxu1  ;;  %vm6606_vm15 = vcmp.lt.f32.partialorder %v6555_v32, 0.5  ;;  %v6559_v11 = vld [vmem:[%s11282_s5 + $0xf8] sm:$0xff] }
 0x3e0   :  { %6856 = vst.msk [vmem:[%s11283_s7 + $0xa8] sm:$0xff] %vm3432_vm9, %v7316_v22  ;;  %vm6649_vm11 = vmand %vm6496_vm5, %vm6598_vm4  ;;  %v5624_v20 = vpop.f32.mrb[148].mxu0 }
 0x3e1   :  { %v7314_v25 = vsel %vm6649_vm11, 1.0, %v8940_v21  ;;  %vm6499_vm0 = vcmp.gt.f32.partialorder %v6448_v17, 0.5  ;;  %v6398_v24 = vadd.f32 %v5624_v20, %v10890_v50  ;;  %v6446_v26 = vadd.f32 %v6395_v59, %v5624_v20  ;;  %v8500_v27 = vpop.f32.mrb[149].mxu0  ;;  %vm11326_vm5 = vmmov %vm11325_vm2  ;;  %v6562_v17 = vld [vmem:[%s11282_s5 + $0x110] sm:$0xff] }
 0x3e2   :  { %6854 = vst.msk [vmem:[%s11283_s7 + $0x98] sm:$0xff] %vm3432_vm9, %v7314_v25  ;;  %vm6652_vm13 = vmand %vm6499_vm0, %vm6601_vm7  ;;  %v6401_v29 = vadd.f32 %v10956_v16, %v5624_v20  ;;  %v10978_v30 = vpop.f32.mrb[150].mxu1  ;;  %vm6604_vm11 = vcmp.lt.f32.partialorder %v6553_v45, 0.5 }
 0x3e3   :  { %v7317_v31 = vsel %vm6652_vm13, 1.0, %v8940_v21  ;;  %vm6497_vm14 = vcmp.gt.f32.partialorder %v6446_v26, 0.5  ;;  %v6449_v33 = vadd.f32 %v6398_v24, %v10956_v16  ;;  %v8539_v34 = vpop.f32.mrb[151].mxu1  ;;  %v6560_v24 = vld [vmem:[%s11282_s5 + $0x100] sm:$0x1] }
 0x3e4   :  { %6857 = vst.msk [vmem:[%s11283_s7 + $0xb0] sm:$0xff] %vm3432_vm9, %v7317_v31  ;;  %vm6650_vm1 = vmand %vm6497_vm14, %vm6599_vm12  ;;  %v5780_v35 = vpop.f32.mrb[150].mxu0  ;;  %vm6607_vm14 = vcmp.lt.f32.partialorder %v6556_v51, 0.5 }
 0x3e5   :  { %v7315_v36 = vsel %vm6650_vm1, 1.0, %v8940_v21  ;;  %vm6500_vm8 = vcmp.gt.f32.partialorder %v6449_v33, 0.5  ;;  %v6402_v38 = vadd.f32 %v5780_v35, %v10912_v60  ;;  %v6450_v39 = vadd.f32 %v6399_v6, %v5780_v35  ;;  %v8524_v44 = vpop.f32.mrb[151].mxu0  ;;  %v6563_v33 = vld [vmem:[%s11282_s5 + $0x118] sm:$0x1] }
 0x3e6   :  { %6855 = vst.msk [vmem:[%s11283_s7 + $0xa0] sm:$0x1] %vm11325_vm2, %v7315_v36  ;;  %vm6653_vm4 = vmand %vm6500_vm8, %vm6602_vm10  ;;  %v6405_v47 = vadd.f32 %v10978_v30, %v5780_v35  ;;  %v11000_v48 = vpop.f32.mrb[152].mxu1  ;;  %vm6605_vm1 = vcmp.lt.f32.partialorder %v6554_v43, 0.5 }
 0x3e7   :  { %v7318_v49 = vsel %vm6653_vm4, 1.0, %v8940_v21  ;;  %vm6501_vm3 = vcmp.gt.f32.partialorder %v6450_v39, 0.5  ;;  %v6453_v37 = vadd.f32 %v6402_v38, %v10978_v30  ;;  %v8542_v50 = vpop.f32.mrb[153].mxu1  ;;  %vm6608_vm4 = vcmp.lt.f32.partialorder %v6557_v62, 0.5  ;;  %v6564_v38 = vld [vmem:[%s11282_s5 + $0x120] sm:$0xff] }
 0x3e8   :  { %6858 = vst.msk [vmem:[%s11283_s7 + $0xb8] sm:$0x1] %vm11326_vm5, %v7318_v49  ;;  %vm6654_vm7 = vmand %vm6501_vm3, %vm6603_vm6  ;;  %v5785_v46 = vpop.f32.mrb[152].mxu0 }
 0x3e9   :  { %v7319_v52 = vsel %vm6654_vm7, 1.0, %v8940_v21  ;;  %vm6504_vm12 = vcmp.gt.f32.partialorder %v6453_v37, 0.5  ;;  %v6403_v53 = vadd.f32 %v5785_v46, %v10934_v5  ;;  %v6451_v54 = vadd.f32 %v6400_v15, %v5785_v46  ;;  %v8527_v55 = vpop.f32.mrb[153].mxu0  ;;  %v6567_v37 = vld [vmem:[%s11282_s5 + $0x138] sm:$0xff] }
 0x3ea   :  { %6859 = vst.msk [vmem:[%s11283_s7 + $0xc0] sm:$0xff] %vm3432_vm9, %v7319_v52  ;;  %vm6657_vm0 = vmand %vm6504_vm12, %vm6606_vm15  ;;  %v6406_v56 = vadd.f32 %v11000_v48, %v5785_v46  ;;  %v11022_v57 = vpop.f32.mrb[154].mxu1  ;;  %vm6609_vm15 = vcmp.lt.f32.partialorder %v6558_v3, 0.5  ;;  %vm11327_vm7 = vcmask 131072  }
 0x3eb   :  { %v7322_v58 = vsel %vm6657_vm0, 1.0, %v8940_v21  ;;  %vm6502_vm13 = vcmp.gt.f32.partialorder %v6451_v54, 0.5  ;;  %v6454_v59 = vadd.f32 %v6403_v53, %v11000_v48  ;;  %v8545_v60 = vpop.f32.mrb[155].mxu1  ;;  %vm6612_vm0 = vcmp.lt.f32.partialorder %v6561_v7, 0.5  ;;  %v6565_v53 = vld [vmem:[%s11282_s5 + $0x128] sm:$0xff] }
 0x3ec   :  { %6862 = vst.msk [vmem:[%s11283_s7 + $0xd8] sm:$0xff] %vm3432_vm9, %v7322_v58  ;;  %vm6655_vm10 = vmand %vm6502_vm13, %vm6604_vm11  ;;  %v5790_v61 = vpop.f32.mrb[154].mxu0 }
 0x3ed   :  { %v7320_v63 = vsel %vm6655_vm10, 1.0, %v8940_v21  ;;  %vm6505_vm6 = vcmp.gt.f32.partialorder %v6454_v59, 0.5  ;;  %v6404_v0 = vadd.f32 %v5790_v61, %v10956_v16  ;;  %v6452_v1 = vadd.f32 %v6401_v29, %v5790_v61  ;;  %v8530_v2 = vpop.f32.mrb[155].mxu0  ;;  %vm11328_vm13 = vmmov %vm11327_vm7  ;;  %v6568_v59 = vld [vmem:[%s11282_s5 + $0x140] sm:$0xff] }
 0x3ee   :  { %6860 = vst.msk [vmem:[%s11283_s7 + $0xc8] sm:$0xff] %vm3432_vm9, %v7320_v63  ;;  %vm6658_vm8 = vmand %vm6505_vm6, %vm6607_vm14  ;;  %v6407_v40 = vadd.f32 %v11022_v57, %v5790_v61  ;;  %v11044_v42 = vpop.f32.mrb[156].mxu1  ;;  %vm6610_vm10 = vcmp.lt.f32.partialorder %v6559_v11, 0.5 }
 0x3ef   :  { %v7323_v4 = vsel %vm6658_vm8, 1.0, %v8940_v21  ;;  %vm6503_vm2 = vcmp.gt.f32.partialorder %v6452_v1, 0.5  ;;  %v6455_v6 = vadd.f32 %v6404_v0, %v11022_v57  ;;  %v8569_v5 = vpop.f32.mrb[157].mxu1  ;;  %v6566_v0 = vld [vmem:[%s11282_s5 + $0x130] sm:$0x1] }
 0x3f0   :  { %6863 = vst.msk [vmem:[%s11283_s7 + $0xe0] sm:$0xff] %vm3432_vm9, %v7323_v4  ;;  %vm6656_vm3 = vmand %vm6503_vm2, %vm6605_vm1  ;;  %v5946_v41 = vpop.f32.mrb[156].mxu0  ;;  %vm6613_vm2 = vcmp.lt.f32.partialorder %v6562_v17, 0.5 }
 0x3f1   :  { %v7321_v8 = vsel %vm6656_vm3, 1.0, %v8940_v21  ;;  %vm6506_vm5 = vcmp.gt.f32.partialorder %v6455_v6, 0.5  ;;  %v6408_v9 = vadd.f32 %v5946_v41, %v10978_v30  ;;  %v6456_v10 = vadd.f32 %v6405_v47, %v5946_v41  ;;  %v8554_v18 = vpop.f32.mrb[157].mxu0  ;;  %v6569_v6 = vld [vmem:[%s11282_s5 + $0x148] sm:$0x1] }
 0x3f2   :  { %6861 = vst.msk [vmem:[%s11283_s7 + $0xd0] sm:$0x1] %vm11327_vm7, %v7321_v8  ;;  %vm6659_vm11 = vmand %vm6506_vm5, %vm6608_vm4  ;;  %v6411_v12 = vadd.f32 %v11044_v42, %v5946_v41  ;;  %v11066_v13 = vpop.f32.mrb[158].mxu1  ;;  %vm6611_vm3 = vcmp.lt.f32.partialorder %v6560_v24, 0.5 }
 0x3f3   :  { %v7324_v14 = vsel %vm6659_vm11, 1.0, %v8940_v21  ;;  %vm6507_vm12 = vcmp.gt.f32.partialorder %v6456_v10, 0.5  ;;  %v6459_v15 = vadd.f32 %v6408_v9, %v11044_v42  ;;  %v8572_v16 = vpop.f32.mrb[159].mxu1  ;;  %vm6614_vm11 = vcmp.lt.f32.partialorder %v6563_v33, 0.5  ;;  %v6570_v9 = vld [vmem:[%s11282_s5 + $0x150] sm:$0xff] }
 0x3f4   :  { %6864 = vst.msk [vmem:[%s11283_s7 + $0xe8] sm:$0x1] %vm11328_vm13, %v7324_v14  ;;  %vm6660_vm14 = vmand %vm6507_vm12, %vm6609_vm15  ;;  %v5951_v22 = vpop.f32.mrb[158].mxu0  ;;  %v6573_v16 = vld [vmem:[%s11282_s5 + $0x168] sm:$0xff] }
 0x3f5   :  { %v7325_v19 = vsel %vm6660_vm14, 1.0, %v8940_v21  ;;  %vm6510_vm1 = vcmp.gt.f32.partialorder %v6459_v15, 0.5  ;;  %v6409_v20 = vadd.f32 %v5951_v22, %v11000_v48  ;;  %v6457_v23 = vadd.f32 %v6406_v56, %v5951_v22  ;;  %v8557_v25 = vpop.f32.mrb[159].mxu0 }
 0x3f6   :  { %6865 = vst.msk [vmem:[%s11283_s7 + $0xf0] sm:$0xff] %vm3432_vm9, %v7325_v19  ;;  %vm6663_vm6 = vmand %vm6510_vm1, %vm6612_vm0  ;;  %v6412_v26 = vadd.f32 %v11066_v13, %v5951_v22  ;;  %v11088_v27 = vpop.f32.mrb[160].mxu1  ;;  %vm6615_vm0 = vcmp.lt.f32.partialorder %v6564_v38, 0.5  ;;  %vm11329_vm14 = vcmask 131072  }
 0x3f7   :  { %v7328_v28 = vsel %vm6663_vm6, 1.0, %v8940_v21  ;;  %vm6508_vm8 = vcmp.gt.f32.partialorder %v6457_v23, 0.5  ;;  %v6460_v29 = vadd.f32 %v6409_v20, %v11066_v13  ;;  %v8575_v30 = vpop.f32.mrb[161].mxu1  ;;  %vm6618_vm6 = vcmp.lt.f32.partialorder %v6567_v37, 0.5  ;;  %v6571_v23 = vld [vmem:[%s11282_s5 + $0x158] sm:$0xff] }
 0x3f8   :  { %6868 = vst.msk [vmem:[%s11283_s7 + $0x108] sm:$0xff] %vm3432_vm9, %v7328_v28  ;;  %vm6661_vm4 = vmand %vm6508_vm8, %vm6610_vm10  ;;  %v5956_v31 = vpop.f32.mrb[160].mxu0  ;;  %v6577_v28 = vld [vmem:[%s11282_s5 + $0x188] sm:$0xff] }
 0x3f9   :  { %v7326_v34 = vsel %vm6661_vm4, 1.0, %v8940_v21  ;;  %vm6511_vm15 = vcmp.gt.f32.partialorder %v6460_v29, 0.5  ;;  %v6410_v35 = vadd.f32 %v5956_v31, %v11022_v57  ;;  %v6458_v32 = vadd.f32 %v6407_v40, %v5956_v31  ;;  %v8560_v36 = vpop.f32.mrb[161].mxu0  ;;  %vm11330_vm8 = vmmov %vm11329_vm14 }
 0x3fa   :  { %6866 = vst.msk [vmem:[%s11283_s7 + $0xf8] sm:$0xff] %vm3432_vm9, %v7326_v34  ;;  %vm6664_vm5 = vmand %vm6511_vm15, %vm6613_vm2  ;;  %v6413_v39 = vadd.f32 %v11088_v27, %v5956_v31  ;;  %v11110_v44 = vpop.f32.mrb[162].mxu1  ;;  %vm6616_vm4 = vcmp.lt.f32.partialorder %v6565_v53, 0.5  ;;  %v6574_v31 = vld [vmem:[%s11282_s5 + $0x170] sm:$0xff]  ;;  %v6572_v36 = vld [vmem:[%s11282_s5 + $0x160] sm:$0x1] }
 0x3fb   :  { %v7329_v45 = vsel %vm6664_vm5, 1.0, %v8940_v21  ;;  %vm6509_vm7 = vcmp.gt.f32.partialorder %v6458_v32, 0.5  ;;  %v6461_v47 = vadd.f32 %v6410_v35, %v11088_v27  ;;  %v8599_v48 = vpop.f32.mrb[163].mxu1 }
 0x3fc   :  { %6869 = vst.msk [vmem:[%s11283_s7 + $0x110] sm:$0xff] %vm3432_vm9, %v7329_v45  ;;  %vm6662_vm12 = vmand %vm6509_vm7, %vm6611_vm3  ;;  %v6112_v49 = vpop.f32.mrb[162].mxu0  ;;  %vm6619_vm7 = vcmp.lt.f32.partialorder %v6568_v59, 0.5  ;;  %v6578_v48 = vld [vmem:[%s11282_s5 + $0x190] sm:$0x1] }
 0x3fd   :  { %v7327_v50 = vsel %vm6662_vm12, 1.0, %v8940_v21  ;;  %vm6512_vm13 = vcmp.gt.f32.partialorder %v6461_v47, 0.5  ;;  %v6414_v46 = vadd.f32 %v6112_v49, %v11044_v42  ;;  %v6462_v51 = vadd.f32 %v6411_v12, %v6112_v49  ;;  %v8584_v52 = vpop.f32.mrb[163].mxu0 }
 0x3fe   :  { %6867 = vst.msk [vmem:[%s11283_s7 + $0x100] sm:$0x1] %vm11329_vm14, %v7327_v50  ;;  %vm6665_vm10 = vmand %vm6512_vm13, %vm6614_vm11  ;;  %v6417_v54 = vadd.f32 %v11110_v44, %v6112_v49  ;;  %v11132_v55 = vpop.f32.mrb[164].mxu1  ;;  %vm6617_vm12 = vcmp.lt.f32.partialorder %v6566_v0, 0.5  ;;  %v6575_v50 = vld [vmem:[%s11282_s5 + $0x178] sm:$0x1] }
 0x3ff   :  { %v7330_v43 = vsel %vm6665_vm10, 1.0, %v8940_v21  ;;  %vm6513_vm1 = vcmp.gt.f32.partialorder %v6462_v51, 0.5  ;;  %v6465_v56 = vadd.f32 %v6414_v46, %v11110_v44  ;;  %v8602_v57 = vpop.f32.mrb[165].mxu1  ;;  %vm6620_vm10 = vcmp.lt.f32.partialorder %v6569_v6, 0.5 }
 0x400   :  { %6870 = vst.msk [vmem:[%s11283_s7 + $0x118] sm:$0x1] %vm11330_vm8, %v7330_v43  ;;  %vm6666_vm2 = vmand %vm6513_vm1, %vm6615_vm0  ;;  %v6117_v58 = vpop.f32.mrb[164].mxu0 }
 0x401   :  { %v7331_v60 = vsel %vm6666_vm2, 1.0, %v8940_v21  ;;  %vm6516_vm3 = vcmp.gt.f32.partialorder %v6465_v56, 0.5  ;;  %v6415_v61 = vadd.f32 %v6117_v58, %v11066_v13  ;;  %v6463_v62 = vadd.f32 %v6412_v26, %v6117_v58  ;;  %v8587_v63 = vpop.f32.mrb[165].mxu0  ;;  %v6576_v13 = vld [vmem:[%s11282_s5 + $0x180] sm:$0xff] }
 0x402   :  { %6871 = vst.msk [vmem:[%s11283_s7 + $0x120] sm:$0xff] %vm3432_vm9, %v7331_v60  ;;  %vm6669_vm15 = vmand %vm6516_vm3, %vm6618_vm6  ;;  %v6418_v1 = vadd.f32 %v11132_v55, %v6117_v58  ;;  %v11154_v2 = vpop.f32.mrb[166].mxu1  ;;  %vm6621_vm6 = vcmp.lt.f32.partialorder %v6570_v9, 0.5  ;;  %vm11331_vm2 = vcmask 131072   ;;  %vm6627_vm3 = vcmp.lt.f32.partialorder %v6576_v13, 0.5 }
 0x403   :  { %v7334_v3 = vsel %vm6669_vm15, 1.0, %v8940_v21  ;;  %vm6514_vm5 = vcmp.gt.f32.partialorder %v6463_v62, 0.5  ;;  %v6466_v40 = vadd.f32 %v6415_v61, %v11132_v55  ;;  %v8605_v42 = vpop.f32.mrb[167].mxu1 }
 0x404   :  { %6874 = vst.msk [vmem:[%s11283_s7 + $0x138] sm:$0xff] %vm3432_vm9, %v7334_v3  ;;  %vm6667_vm11 = vmand %vm6514_vm5, %vm6616_vm4  ;;  %v6122_v4 = vpop.f32.mrb[166].mxu0  ;;  %vm6624_vm5 = vcmp.lt.f32.partialorder %v6573_v16, 0.5 }
 0x405   :  { %v7332_v5 = vsel %vm6667_vm11, 1.0, %v8940_v21  ;;  %vm6517_vm0 = vcmp.gt.f32.partialorder %v6466_v40, 0.5  ;;  %v6416_v41 = vadd.f32 %v6122_v4, %v11088_v27  ;;  %v6464_v7 = vadd.f32 %v6413_v39, %v6122_v4  ;;  %v8590_v8 = vpop.f32.mrb[167].mxu0 }
 0x406   :  { %6872 = vst.msk [vmem:[%s11283_s7 + $0x128] sm:$0xff] %vm3432_vm9, %v7332_v5  ;;  %vm6670_vm13 = vmand %vm6517_vm0, %vm6619_vm7  ;;  %v11176_v10 = vadd.f32 %v11154_v2, %v6122_v4  ;;  %v6361_v18 = vpop.f32.mrb[168].mxu1  ;;  %vm6622_vm0 = vcmp.lt.f32.partialorder %v6571_v23, 0.5 }
 0x407   :  { %v7335_v11 = vsel %vm6670_vm13, 1.0, %v8940_v21  ;;  %vm6515_vm14 = vcmp.gt.f32.partialorder %v6464_v7, 0.5  ;;  %v6467_v12 = vadd.f32 %v6416_v41, %v11154_v2  ;;  %v8629_v14 = vpop.f32.mrb[169].mxu1  ;;  %vm11332_vm7 = vmmov %vm11331_vm2 }
 0x408   :  { %6875 = vst.msk [vmem:[%s11283_s7 + $0x140] sm:$0xff] %vm3432_vm9, %v7335_v11  ;;  %vm6668_vm1 = vmand %vm6515_vm14, %vm6617_vm12  ;;  %v6278_v15 = vpop.f32.mrb[168].mxu0 }
 0x409   :  { %v7333_v22 = vsel %vm6668_vm1, 1.0, %v8940_v21  ;;  %vm6518_vm8 = vcmp.gt.f32.partialorder %v6467_v12, 0.5  ;;  %v6420_v17 = vadd.f32 %v6278_v15, %v11110_v44  ;;  %v6468_v19 = vadd.f32 %v6417_v54, %v6278_v15  ;;  %v8614_v20 = vpop.f32.mrb[169].mxu0 }
 0x40a   :  { %6873 = vst.msk [vmem:[%s11283_s7 + $0x130] sm:$0x1] %vm11331_vm2, %v7333_v22  ;;  %vm6671_vm4 = vmand %vm6518_vm8, %vm6620_vm10  ;;  %v6423_v25 = vadd.f32 %v6361_v18, %v6278_v15  ;;  %v6366_v24 = vpop.f32.mrb[170].mxu1  ;;  %vm6628_vm1 = vcmp.lt.f32.partialorder %v6577_v28, 0.5  ;;  %vm6625_vm8 = vcmp.lt.f32.partialorder %v6574_v31, 0.5 }
 0x40b   :  { %v7336_v26 = vsel %vm6671_vm4, 1.0, %v8940_v21  ;;  %vm6519_vm15 = vcmp.gt.f32.partialorder %v6468_v19, 0.5  ;;  %v6471_v27 = vadd.f32 %v6420_v17, %v6361_v18  ;;  %v8632_v29 = vpop.f32.mrb[171].mxu1 }
 0x40c   :  { %6876 = vst.msk [vmem:[%s11283_s7 + $0x148] sm:$0x1] %vm11332_vm7, %v7336_v26  ;;  %vm6672_vm11 = vmand %vm6519_vm15, %vm6621_vm6  ;;  %vm6525_vm12 = vcmp.gt.f32.partialorder %v6423_v25, 0.5  ;;  %v6283_v30 = vpop.f32.mrb[170].mxu0 }
 0x40d   :  { %v7337_v33 = vsel %vm6672_vm11, 1.0, %v8940_v21  ;;  %vm6522_vm13 = vcmp.gt.f32.partialorder %v6471_v27, 0.5  ;;  %vm6678_vm14 = vmand %vm6525_vm12, %vm6627_vm3  ;;  %v6421_v34 = vadd.f32 %v6283_v30, %v11132_v55  ;;  %v6469_v35 = vadd.f32 %v6418_v1, %v6283_v30  ;;  %v8617_v32 = vpop.f32.mrb[171].mxu0 }
 0x40e   :  { %6877 = vst.msk [vmem:[%s11283_s7 + $0x150] sm:$0xff] %vm3432_vm9, %v7337_v33  ;;  %vm6675_vm10 = vmand %vm6522_vm13, %vm6624_vm5  ;;  %v7343_v38 = vsel %vm6678_vm14, 1.0, %v8940_v21  ;;  %v6424_v39 = vadd.f32 %v6366_v24, %v6283_v30  ;;  %v6371_v44 = vpop.f32.mrb[172].mxu1  ;;  %vm6623_vm3 = vcmp.lt.f32.partialorder %v6572_v36, 0.5  ;;  %vm6629_vm11 = vcmp.lt.f32.partialorder %v6578_v48, 0.5 }
 0x40f   :  { %v7340_v45 = vsel %vm6675_vm10, 1.0, %v8940_v21  ;;  %6883 = vst.msk [vmem:[%s11283_s7 + $0x180] sm:$0xff] %vm3432_vm9, %v7343_v38  ;;  %vm6520_vm6 = vcmp.gt.f32.partialorder %v6469_v35, 0.5  ;;  %v6472_v47 = vadd.f32 %v6421_v34, %v6366_v24  ;;  %v8635_v49 = vpop.f32.mrb[173].mxu1 }
 0x410   :  { %6880 = vst.msk [vmem:[%s11283_s7 + $0x168] sm:$0xff] %vm3432_vm9, %v7340_v45  ;;  %vm6673_vm2 = vmand %vm6520_vm6, %vm6622_vm0  ;;  %vm6526_vm4 = vcmp.gt.f32.partialorder %v6424_v39, 0.5  ;;  %v6288_v37 = vpop.f32.mrb[172].mxu0  ;;  %vm6626_vm0 = vcmp.lt.f32.partialorder %v6575_v50, 0.5  ;;  %vm11333_vm6 = vcmask 131072  }
 0x411   :  { %v7338_v46 = vsel %vm6673_vm2, 1.0, %v8940_v21  ;;  %vm6523_vm15 = vcmp.gt.f32.partialorder %v6472_v47, 0.5  ;;  %vm6679_vm5 = vmand %vm6526_vm4, %vm6628_vm1  ;;  %v6422_v51 = vadd.f32 %v6288_v37, %v11154_v2  ;;  %v6470_v52 = vadd.f32 %v11176_v10, %v6288_v37  ;;  %v8620_v53 = vpop.f32.mrb[173].mxu0 }
 0x412   :  { %6878 = vst.msk [vmem:[%s11283_s7 + $0x158] sm:$0xff] %vm3432_vm9, %v7338_v46  ;;  %vm6676_vm7 = vmand %vm6523_vm15, %vm6625_vm8  ;;  %v7344_v54 = vsel %vm6679_vm5, 1.0, %v8940_v21  ;;  %v6425_v55 = vadd.f32 %v6371_v44, %v6288_v37 }
 0x413   :  { %v7341_v43 = vsel %vm6676_vm7, 1.0, %v8940_v21  ;;  %6884 = vst.msk [vmem:[%s11283_s7 + $0x188] sm:$0xff] %vm3432_vm9, %v7344_v54  ;;  %vm6521_vm12 = vcmp.gt.f32.partialorder %v6470_v52, 0.5  ;;  %v6473_v56 = vadd.f32 %v6422_v51, %v6371_v44  ;;  %vm11334_vm2 = vmmov %vm11333_vm6 }
 0x414   :  { %6881 = vst.msk [vmem:[%s11283_s7 + $0x170] sm:$0xff] %vm3432_vm9, %v7341_v43  ;;  %vm6674_vm13 = vmand %vm6521_vm12, %vm6623_vm3  ;;  %vm6527_vm14 = vcmp.gt.f32.partialorder %v6425_v55, 0.5 }
 0x415   :  { %v7339_v57 = vsel %vm6674_vm13, 1.0, %v8940_v21  ;;  %vm6524_vm10 = vcmp.gt.f32.partialorder %v6473_v56, 0.5  ;;  %vm6680_vm1 = vmand %vm6527_vm14, %vm6629_vm11 }
 0x416   :  { %6879 = vst.msk [vmem:[%s11283_s7 + $0x160] sm:$0x1] %vm11333_vm6, %v7339_v57  ;;  %vm6677_vm8 = vmand %vm6524_vm10, %vm6626_vm0  ;;  %v7345_v58 = vsel %vm6680_vm1, 1.0, %v8940_v21 }
 0x417   :  { %v7342_v59 = vsel %vm6677_vm8, 1.0, %v8940_v21  ;;  %6885 = vst.msk [vmem:[%s11283_s7 + $0x190] sm:$0x1] %vm11334_vm2, %v7345_v58  ;;  %vm11335_vm9 = vmmov %vm11334_vm2 }
 0x418   :  { %6882 = vst.msk [vmem:[%s11283_s7 + $0x178] sm:$0x1] %vm11335_vm9, %v7342_v59 }

</bundles_post_ra>
